<compile_context>
chip_gen: v6e
topology: v6e:2x2x1
jax: 0.10.0
libtpu: 0.0.40
codegen_flags: <defaults>
</compile_context>

<pallas_src>
import functools

import numpy as np
import jax
import jax.numpy as jnp
from jax.experimental import pallas as pl
from jax.experimental.pallas import tpu as pltpu


def _round_up(x, m):
    return -(-x // m) * m


# ----------------------------------------------------------------------------
# Fused kernel: num_convs x (3x3 dilated conv + ReLU)  ->  2x2 upconv + ReLU
# ----------------------------------------------------------------------------
def _fused_mask_head_kernel(x_ref, wconv_ref, bconv_ref, wup_ref, bup_ref,
                            o_ref, pact_ref, px_ref, *, B, H, W, C, d, L):
    f32 = jnp.float32
    Hp, Wp = H + 2 * d, W + 2 * d
    adt = pact_ref.dtype                      # activation / MXU operand dtype

    # "Same" padding in-kernel: zero only the d-wide borders (the interior is
    # fully overwritten below).  Correct under megacore grid sharding since it
    # runs every grid step and touches only a few KB.
    pact_ref[:, :d, :, :] = jnp.zeros((B, d, Wp, C), adt)
    pact_ref[:, d + H:, :, :] = jnp.zeros((B, d, Wp, C), adt)
    pact_ref[:, :, :d, :] = jnp.zeros((B, Hp, d, C), adt)
    pact_ref[:, :, d + W:, :] = jnp.zeros((B, Hp, d, C), adt)
    pact_ref[:, d:d + H, d:d + W, :] = x_ref[...].astype(adt)

    Mp = B * Hp * W
    y_last = None

    # ---- num_convs x (3x3 conv + ReLU), single padded VMEM buffer ----------
    for l in range(L):                        # static unroll over conv layers
        # kx-expanded im2col over the FULL padded row range: 3 shifted copies.
        # Lane offsets kx*C are 128-aligned (C % 128 == 0) -> unmasked stores.
        for kx in range(3):
            px_ref[:, :, :, kx * C:(kx + 1) * C] = (
                pact_ref[:, :, kx * d:kx * d + W, :])
        lhs = px_ref[...].reshape(Mp, 3 * C)  # loaded once, reused for 3 ky

        acc = None
        for ky in range(3):                   # one MXU matmul per ky, K = 3*C
            full = jnp.dot(lhs, wconv_ref[l, ky],
                           preferred_element_type=f32).reshape(B, Hp, W, C)
            part = full[:, ky * d:ky * d + H, :, :]   # slice the OUTPUT rows
            acc = part if acc is None else acc + part

        y = jnp.maximum(acc + bconv_ref[l], 0.0)      # bias + ReLU in f32
        if l + 1 < L:
            # Safe to overwrite in place: px already holds this layer's input.
            pact_ref[:, d:d + H, d:d + W, :] = y.astype(adt)
        else:
            y_last = y                         # feed the upconv directly

    # ---- ConvTranspose2d(k=2, s=2) + ReLU, written in final layout ---------
    xin = y_last.reshape(B * H * W, C).astype(wup_ref.dtype)
    for ky in range(2):            # one (M, C) x (C, 2C) matmul per row parity
        yk = jnp.dot(xin, wup_ref[ky], preferred_element_type=f32) + bup_ref[...]
        yk = jnp.maximum(yk, 0.0)                     # (M, 2C), cols = (kx, co)
        # (w, kx) flattens to output column 2w+kx; rows 2h+ky live at o[:, h, ky].
        o_ref[:, :, ky, :, :] = yk.reshape(B, H, 2 * W, C).astype(o_ref.dtype)


# ----------------------------------------------------------------------------
# Wrapper
# ----------------------------------------------------------------------------
def _pad_to(a, shape):
    return jnp.pad(a, [(0, s - a.shape[i]) for i, s in enumerate(shape)])


def _is_single_tensorcore_chip():
    try:
        kind = jax.devices()[0].device_kind.lower()
    except Exception:
        return False
    # v5e / v6e ("lite") parts have one TensorCore per chip; v4/v5p/v7x expose
    # two TensorCores to a "parallel" grid axis.
    return ("lite" in kind) or ("v5e" in kind) or ("v6e" in kind)


def _vmem_capacity_bytes():
    try:
        cap = int(getattr(pltpu.get_tpu_info(), "vmem_capacity_bytes", 0))
        if cap > 0:
            return cap
    except Exception:
        pass
    return 64 * 1024 * 1024      # conservative (v7x); v5e/v6e have 128 MiB


def mask_head_forward(x_nchw, params, dilation=1, block_rois=8,
                      compute_dtype=jnp.bfloat16):
    """Head forward on already-ROI-pooled features. NCHW in / NCHW out."""
    N, dim_in, H, W = x_nchw.shape
    d = int(dilation)
    assert d >= 1
    convs = params["convs"]
    L = len(convs)
    assert L >= 1
    dim_inner = int(params["upconv_w"].shape[1])
    # Channels padded to the 128-lane width: unmasked stores, full MXU tiles.
    C = _round_up(max(dim_in, dim_inner), 128)

    # ---- weights: pad channels to C, rearrange, cast to compute_dtype ------
    wconv, bconv = [], []
    for (w, b) in convs:                                 # w: (co, ci, 3, 3)
        wt = jnp.transpose(_pad_to(w, (C, C, 3, 3)), (2, 3, 1, 0))  # ky,kx,ci,co
        wconv.append(wt.reshape(3, 3 * C, C))            # row index = kx*C + ci
        bconv.append(_pad_to(b, (C,)).reshape(1, C))
    wconv = jnp.stack(wconv).astype(compute_dtype)       # (L, 3, 3C, C)
    bconv = jnp.stack(bconv).astype(jnp.float32)         # (L, 1, C)

    wu = _pad_to(params["upconv_w"], (C, C, 2, 2))       # (ci, co, ky, kx)
    wup = jnp.transpose(wu, (2, 0, 3, 1)).reshape(2, C, 2 * C).astype(compute_dtype)
    bup = jnp.tile(_pad_to(params["upconv_b"], (C,)).reshape(1, C),
                   (1, 2)).astype(jnp.float32)           # (1, 2C), col = kx*C+co

    # ---- input: NCHW -> NHWC, pad channels to C, cast to compute_dtype -----
    x = _pad_to(jnp.transpose(x_nchw, (0, 2, 3, 1)),
                (N, H, W, C)).astype(compute_dtype)

    # ---- ROI-block choice: 1 TC -> one big block; 2 TCs -> >= 2 grid steps --
    if _is_single_tensorcore_chip():
        B = max(1, min(block_rois, N))
    else:
        B = max(1, min(block_rois, -(-N // 2)))

    # ---- VMEM budgeting (shrink B first if over the chip's budget) ---------
    cdb = jnp.dtype(compute_dtype).itemsize
    Hp, Wp = H + 2 * d, W + 2 * d

    def vmem_estimate(b):
        x_blk = 2 * b * H * W * C * cdb                       # double-buffered in
        o_blk = 2 * b * H * 2 * 2 * W * C * 4                 # double-buffered out
        wts = (L * 3 * 3 * C * C + 4 * C * C) * cdb + (L + 2) * C * 4
        scr = b * Hp * Wp * C * cdb + b * Hp * W * 3 * C * cdb
        tmp = (b * Hp * W * 3 * C * cdb + 2 * b * Hp * W * C * 4
               + 2 * b * H * W * C * 4 + 2 * b * H * W * 2 * C * 4)
        return x_blk + o_blk + wts + scr + tmp

    budget = int(0.75 * _vmem_capacity_bytes())
    while B > 1 and vmem_estimate(B) > budget:
        B = max(1, B // 2)
    vmem_limit = min(budget, max(vmem_estimate(B) + (16 << 20), 32 << 20))

    Np = -(-N // B) * B
    if Np != N:
        x = jnp.pad(x, ((0, Np - N), (0, 0), (0, 0), (0, 0)))

    kernel = functools.partial(_fused_mask_head_kernel,
                               B=B, H=H, W=W, C=C, d=d, L=L)

    def build(resident_weights):
        if resident_weights:
            # Constant operands: whole-array VMEM residents (no double buffer).
            w_specs = [pl.BlockSpec(memory_space=pltpu.MemorySpace.VMEM)] * 4
        else:
            w_specs = [
                pl.BlockSpec((L, 3, 3 * C, C), lambda n: (0, 0, 0, 0)),
                pl.BlockSpec((L, 1, C), lambda n: (0, 0, 0)),
                pl.BlockSpec((2, C, 2 * C), lambda n: (0, 0, 0)),
                pl.BlockSpec((1, 2 * C), lambda n: (0, 0)),
            ]
        return pl.pallas_call(
            kernel,
            out_shape=jax.ShapeDtypeStruct((Np, H, 2, 2 * W, C), jnp.float32),
            grid=(Np // B,),
            in_specs=[pl.BlockSpec((B, H, W, C), lambda n: (n, 0, 0, 0))] + w_specs,
            out_specs=pl.BlockSpec((B, H, 2, 2 * W, C),
                                   lambda n: (n, 0, 0, 0, 0)),
            scratch_shapes=[
                pltpu.VMEM((B, Hp, Wp, C), compute_dtype),     # padded activations
                pltpu.VMEM((B, Hp, W, 3 * C), compute_dtype),  # kx-expanded patch
            ],
            compiler_params=pltpu.CompilerParams(
                dimension_semantics=("parallel",),
                vmem_limit_bytes=int(vmem_limit)),
        )

    try:
        out5 = build(True)(x, wconv, bconv, wup, bup)
    except Exception:
        # Fallback: pipelined full-array weight blocks (double-buffered).
        out5 = build(False)(x, wconv, bconv, wup, bup)

    # Free row-major reshape (h, ky) -> 2h+ky, crop ROI/channel padding, NCHW.
    out = out5.reshape(Np, 2 * H, 2 * W, C)[:N, :, :, :dim_inner]
    return jnp.transpose(out, (0, 3, 1, 2))


# ----------------------------------------------------------------------------
# Pure-JAX reference and module-style parameter init
# ----------------------------------------------------------------------------
def ref_forward(x_nchw, params, dilation=1):
    d = dilation
    x = jnp.transpose(x_nchw, (0, 2, 3, 1))
    for (w, b) in params["convs"]:
        w_hwio = jnp.transpose(w, (2, 3, 1, 0))
        x = jax.lax.conv_general_dilated(
            x, w_hwio, window_strides=(1, 1), padding=((d, d), (d, d)),
            rhs_dilation=(d, d), dimension_numbers=("NHWC", "HWIO", "NHWC"),
            precision=jax.lax.Precision.HIGHEST)
        x = jax.nn.relu(x + b)
    wu, bu = params["upconv_w"], params["upconv_b"]
    y = jnp.einsum("nhwi,iokl->nhkwlo", x, wu,
                   precision=jax.lax.Precision.HIGHEST)
    Nn, Hh, _, Ww, _, Co = y.shape
    y = jax.nn.relu(y.reshape(Nn, 2 * Hh, 2 * Ww, Co) + bu)
    return jnp.transpose(y, (0, 3, 1, 2))


def make_params(key, dim_in, dim_inner, num_convs, std=0.001):
    """Module init: GaussianFill(std) weights, zero bias."""
    params = {"convs": []}
    c_in = dim_in
    for _ in range(num_convs):
        key, kw = jax.random.split(key)
        w = std * jax.random.normal(kw, (dim_inner, c_in, 3, 3), jnp.float32)
        params["convs"].append((w, jnp.zeros((dim_inner,), jnp.float32)))
        c_in = dim_inner
    key, kw = jax.random.split(key)
    params["upconv_w"] = std * jax.random.normal(
        kw, (dim_inner, dim_inner, 2, 2), jnp.float32)
    params["upconv_b"] = jnp.zeros((dim_inner,), jnp.float32)
    return params


if __name__ == "__main__":
    # Small synthetic config: num_rois=4, dim_in=8, DIM_REDUCED=16,
    # ROI_XFORM_RESOLUTION=8, num_convs=2, DILATION=1.
    N, DIM_IN, DIM_INNER, RES, NUM_CONVS, DILATION = 4, 8, 16, 8, 2, 1

    key = jax.random.PRNGKey(0)
    key, kx = jax.random.split(key)
    x = jax.random.normal(kx, (N, DIM_IN, RES, RES), jnp.float32)  # post-ROI, NCHW
    # std=0.1 (instead of the module's 0.001) so activations are O(1) and the
    # numerical check is meaningful after two ReLU layers.
    params = make_params(key, DIM_IN, DIM_INNER, NUM_CONVS, std=0.1)

    ref = jax.block_until_ready(ref_forward(x, params, dilation=DILATION))

    # f32 path: tight check against the XLA reference.
    out_f32 = jax.block_until_ready(
        mask_head_forward(x, params, dilation=DILATION, compute_dtype=jnp.float32))
    assert out_f32.shape == (N, DIM_INNER, 2 * RES, 2 * RES), out_f32.shape
    np.testing.assert_allclose(np.asarray(out_f32), np.asarray(ref),
                               rtol=2e-2, atol=1e-4)

    # Default bf16 path (bf16 activations/weights on the MXU, f32 accumulation).
    out_bf = jax.block_until_ready(mask_head_forward(x, params, dilation=DILATION))
    np.testing.assert_allclose(np.asarray(out_bf), np.asarray(ref),
                               rtol=1.5e-1, atol=3e-2)

    # dilation=2 path (padding == dilation, as in the module), f32 for tightness.
    out_d2 = jax.block_until_ready(
        mask_head_forward(x, params, dilation=2, compute_dtype=jnp.float32))
    ref_d2 = jax.block_until_ready(ref_forward(x, params, dilation=2))
    np.testing.assert_allclose(np.asarray(out_d2), np.asarray(ref_d2),
                               rtol=2e-2, atol=1e-4)

    print("KERNEL_OK")
</pallas_src>

<mosaic_0001>
module attributes {stable_mosaic.version = 11 : i64} {
  func.func @_fused_mask_head_kernel(%arg0: i32, %arg1: memref<2x8x8x128xf32, #tpu.memory_space<vmem>>, %arg2: memref<2x3x384x128xf32, #tpu.memory_space<vmem>>, %arg3: memref<2x1x128xf32, #tpu.memory_space<vmem>>, %arg4: memref<2x128x256xf32, #tpu.memory_space<vmem>>, %arg5: memref<1x256xf32, #tpu.memory_space<vmem>>, %arg6: memref<2x8x2x16x128xf32, #tpu.memory_space<vmem>>, %arg7: memref<2x10x10x128xf32, #tpu.memory_space<vmem>>, %arg8: memref<2x10x8x384xf32, #tpu.memory_space<vmem>>) attributes {dimension_semantics = [#tpu.dimension_semantics<parallel>], iteration_bounds = array<i64: 2>, scalar_prefetch = 0 : i64, scratch_operands = 2 : i64, tpu.core_type = #tpu.core_type<tc>, window_params = [{transform_indices = @transform_0, window_bounds = array<i64: 2, 8, 8, 128>}, {pipeline_mode = #tpu.pipeline_mode<synchronous>, transform_indices = @transform_1, window_bounds = array<i64: 2, 3, 384, 128>}, {pipeline_mode = #tpu.pipeline_mode<synchronous>, transform_indices = @transform_2, window_bounds = array<i64: 2, 1, 128>}, {pipeline_mode = #tpu.pipeline_mode<synchronous>, transform_indices = @transform_3, window_bounds = array<i64: 2, 128, 256>}, {pipeline_mode = #tpu.pipeline_mode<synchronous>, transform_indices = @transform_4, window_bounds = array<i64: 1, 256>}, {transform_indices = @transform_5, window_bounds = array<i64: 2, 8, 2, 16, 128>}]} {
    %cst = arith.constant 0.000000e+00 : f32
    %0 = vector.broadcast %cst : f32 to vector<2x1x10x128xf32>
    %c0 = arith.constant 0 : index
    %c0_0 = arith.constant 0 : index
    %c0_1 = arith.constant 0 : index
    %c0_2 = arith.constant 0 : index
    %1 = vector.load %arg7[%c0, %c0_0, %c0_1, %c0_2] : memref<2x10x10x128xf32, #tpu.memory_space<vmem>>, vector<2x1x10x128xf32>
    tpu.vector_store %arg7[%c0, %c0_0, %c0_1, %c0_2], %0 {strides = array<i32>} : memref<2x10x10x128xf32, #tpu.memory_space<vmem>>, vector<2x1x10x128xf32>,
    %cst_3 = arith.constant 0.000000e+00 : f32
    %2 = vector.broadcast %cst_3 : f32 to vector<2x1x10x128xf32>
    %c0_4 = arith.constant 0 : index
    %c9 = arith.constant 9 : index
    %c0_5 = arith.constant 0 : index
    %c0_6 = arith.constant 0 : index
    %3 = vector.load %arg7[%c0_4, %c9, %c0_5, %c0_6] : memref<2x10x10x128xf32, #tpu.memory_space<vmem>>, vector<2x1x10x128xf32>
    tpu.vector_store %arg7[%c0_4, %c9, %c0_5, %c0_6], %2 {strides = array<i32>} : memref<2x10x10x128xf32, #tpu.memory_space<vmem>>, vector<2x1x10x128xf32>,
    %cst_7 = arith.constant 0.000000e+00 : f32
    %4 = vector.broadcast %cst_7 : f32 to vector<2x10x1x128xf32>
    %c0_8 = arith.constant 0 : index
    %c0_9 = arith.constant 0 : index
    %c0_10 = arith.constant 0 : index
    %c0_11 = arith.constant 0 : index
    %5 = vector.load %arg7[%c0_8, %c0_9, %c0_10, %c0_11] : memref<2x10x10x128xf32, #tpu.memory_space<vmem>>, vector<2x10x1x128xf32>
    tpu.vector_store %arg7[%c0_8, %c0_9, %c0_10, %c0_11], %4 {strides = array<i32>} : memref<2x10x10x128xf32, #tpu.memory_space<vmem>>, vector<2x10x1x128xf32>,
    %cst_12 = arith.constant 0.000000e+00 : f32
    %6 = vector.broadcast %cst_12 : f32 to vector<2x10x1x128xf32>
    %c0_13 = arith.constant 0 : index
    %c0_14 = arith.constant 0 : index
    %c9_15 = arith.constant 9 : index
    %c0_16 = arith.constant 0 : index
    %7 = vector.load %arg7[%c0_13, %c0_14, %c9_15, %c0_16] : memref<2x10x10x128xf32, #tpu.memory_space<vmem>>, vector<2x10x1x128xf32>
    tpu.vector_store %arg7[%c0_13, %c0_14, %c9_15, %c0_16], %6 {strides = array<i32>} : memref<2x10x10x128xf32, #tpu.memory_space<vmem>>, vector<2x10x1x128xf32>,
    %c0_17 = arith.constant 0 : index
    %c0_18 = arith.constant 0 : index
    %c0_19 = arith.constant 0 : index
    %c0_20 = arith.constant 0 : index
    %8 = vector.load %arg1[%c0_17, %c0_18, %c0_19, %c0_20] : memref<2x8x8x128xf32, #tpu.memory_space<vmem>>, vector<2x8x8x128xf32>
    %c0_21 = arith.constant 0 : index
    %c1 = arith.constant 1 : index
    %c1_22 = arith.constant 1 : index
    %c0_23 = arith.constant 0 : index
    %9 = vector.load %arg7[%c0_21, %c1, %c1_22, %c0_23] : memref<2x10x10x128xf32, #tpu.memory_space<vmem>>, vector<2x8x8x128xf32>
    tpu.vector_store %arg7[%c0_21, %c1, %c1_22, %c0_23], %8 {strides = array<i32>} : memref<2x10x10x128xf32, #tpu.memory_space<vmem>>, vector<2x8x8x128xf32>,
    %c0_24 = arith.constant 0 : index
    %c0_25 = arith.constant 0 : index
    %c0_26 = arith.constant 0 : index
    %c0_27 = arith.constant 0 : index
    %10 = vector.load %arg7[%c0_24, %c0_25, %c0_26, %c0_27] : memref<2x10x10x128xf32, #tpu.memory_space<vmem>>, vector<2x10x8x128xf32>
    %c0_28 = arith.constant 0 : index
    %c0_29 = arith.constant 0 : index
    %c0_30 = arith.constant 0 : index
    %c0_31 = arith.constant 0 : index
    %11 = vector.load %arg8[%c0_28, %c0_29, %c0_30, %c0_31] : memref<2x10x8x384xf32, #tpu.memory_space<vmem>>, vector<2x10x8x128xf32>
    tpu.vector_store %arg8[%c0_28, %c0_29, %c0_30, %c0_31], %10 {strides = array<i32>} : memref<2x10x8x384xf32, #tpu.memory_space<vmem>>, vector<2x10x8x128xf32>,
    %c0_32 = arith.constant 0 : index
    %c0_33 = arith.constant 0 : index
    %c1_34 = arith.constant 1 : index
    %c0_35 = arith.constant 0 : index
    %12 = vector.load %arg7[%c0_32, %c0_33, %c1_34, %c0_35] : memref<2x10x10x128xf32, #tpu.memory_space<vmem>>, vector<2x10x8x128xf32>
    %c0_36 = arith.constant 0 : index
    %c0_37 = arith.constant 0 : index
    %c0_38 = arith.constant 0 : index
    %c128 = arith.constant 128 : index
    %13 = vector.load %arg8[%c0_36, %c0_37, %c0_38, %c128] : memref<2x10x8x384xf32, #tpu.memory_space<vmem>>, vector<2x10x8x128xf32>
    tpu.vector_store %arg8[%c0_36, %c0_37, %c0_38, %c128], %12 {strides = array<i32>} : memref<2x10x8x384xf32, #tpu.memory_space<vmem>>, vector<2x10x8x128xf32>,
    %c0_39 = arith.constant 0 : index
    %c0_40 = arith.constant 0 : index
    %c2 = arith.constant 2 : index
    %c0_41 = arith.constant 0 : index
    %14 = vector.load %arg7[%c0_39, %c0_40, %c2, %c0_41] : memref<2x10x10x128xf32, #tpu.memory_space<vmem>>, vector<2x10x8x128xf32>
    %c0_42 = arith.constant 0 : index
    %c0_43 = arith.constant 0 : index
    %c0_44 = arith.constant 0 : index
    %c256 = arith.constant 256 : index
    %15 = vector.load %arg8[%c0_42, %c0_43, %c0_44, %c256] : memref<2x10x8x384xf32, #tpu.memory_space<vmem>>, vector<2x10x8x128xf32>
    tpu.vector_store %arg8[%c0_42, %c0_43, %c0_44, %c256], %14 {strides = array<i32>} : memref<2x10x8x384xf32, #tpu.memory_space<vmem>>, vector<2x10x8x128xf32>,
    %c0_45 = arith.constant 0 : index
    %c0_46 = arith.constant 0 : index
    %c0_47 = arith.constant 0 : index
    %c0_48 = arith.constant 0 : index
    %16 = vector.load %arg8[%c0_45, %c0_46, %c0_47, %c0_48] : memref<2x10x8x384xf32, #tpu.memory_space<vmem>>, vector<2x10x8x384xf32>
    %17 = vector.shape_cast %16 : vector<2x10x8x384xf32> to vector<160x384xf32>
    %c0_49 = arith.constant 0 : index
    %c0_50 = arith.constant 0 : index
    %c0_51 = arith.constant 0 : index
    %c0_52 = arith.constant 0 : index
    %18 = vector.load %arg2[%c0_49, %c0_50, %c0_51, %c0_52] : memref<2x3x384x128xf32, #tpu.memory_space<vmem>>, vector<1x1x384x128xf32>
    %19 = vector.shape_cast %18 : vector<1x1x384x128xf32> to vector<384x128xf32>
    %cst_53 = arith.constant dense<0.000000e+00> : vector<160x128xf32>
    %20 = tpu.matmul %17, %19, %cst_53 {dimension_numbers = #tpu.dot_dimension_numbers<[1], [0], [0], [1], [0, 0, 1, 1], [], []>} : vector<160x384xf32>, vector<384x128xf32>, vector<160x128xf32> -> vector<160x128xf32>
    %21 = vector.shape_cast %20 : vector<160x128xf32> to vector<2x10x8x128xf32>
    %22 = vector.extract_strided_slice %21 {offsets = [0, 0, 0, 0], sizes = [2, 8, 8, 128], strides = [1, 1, 1, 1]} : vector<2x10x8x128xf32> to vector<2x8x8x128xf32>
    %c0_54 = arith.constant 0 : index
    %c1_55 = arith.constant 1 : index
    %c0_56 = arith.constant 0 : index
    %c0_57 = arith.constant 0 : index
    %23 = vector.load %arg2[%c0_54, %c1_55, %c0_56, %c0_57] : memref<2x3x384x128xf32, #tpu.memory_space<vmem>>, vector<1x1x384x128xf32>
    %24 = vector.shape_cast %23 : vector<1x1x384x128xf32> to vector<384x128xf32>
    %cst_58 = arith.constant dense<0.000000e+00> : vector<160x128xf32>
    %25 = tpu.matmul %17, %24, %cst_58 {dimension_numbers = #tpu.dot_dimension_numbers<[1], [0], [0], [1], [0, 0, 1, 1], [], []>} : vector<160x384xf32>, vector<384x128xf32>, vector<160x128xf32> -> vector<160x128xf32>
    %26 = vector.shape_cast %25 : vector<160x128xf32> to vector<2x10x8x128xf32>
    %27 = vector.extract_strided_slice %26 {offsets = [0, 1, 0, 0], sizes = [2, 8, 8, 128], strides = [1, 1, 1, 1]} : vector<2x10x8x128xf32> to vector<2x8x8x128xf32>
    %28 = arith.addf %22, %27 : vector<2x8x8x128xf32>
    %c0_59 = arith.constant 0 : index
    %c2_60 = arith.constant 2 : index
    %c0_61 = arith.constant 0 : index
    %c0_62 = arith.constant 0 : index
    %29 = vector.load %arg2[%c0_59, %c2_60, %c0_61, %c0_62] : memref<2x3x384x128xf32, #tpu.memory_space<vmem>>, vector<1x1x384x128xf32>
    %30 = vector.shape_cast %29 : vector<1x1x384x128xf32> to vector<384x128xf32>
    %cst_63 = arith.constant dense<0.000000e+00> : vector<160x128xf32>
    %31 = tpu.matmul %17, %30, %cst_63 {dimension_numbers = #tpu.dot_dimension_numbers<[1], [0], [0], [1], [0, 0, 1, 1], [], []>} : vector<160x384xf32>, vector<384x128xf32>, vector<160x128xf32> -> vector<160x128xf32>
    %32 = vector.shape_cast %31 : vector<160x128xf32> to vector<2x10x8x128xf32>
    %33 = vector.extract_strided_slice %32 {offsets = [0, 2, 0, 0], sizes = [2, 8, 8, 128], strides = [1, 1, 1, 1]} : vector<2x10x8x128xf32> to vector<2x8x8x128xf32>
    %34 = arith.addf %28, %33 : vector<2x8x8x128xf32>
    %c0_64 = arith.constant 0 : index
    %c0_65 = arith.constant 0 : index
    %c0_66 = arith.constant 0 : index
    %35 = vector.load %arg3[%c0_64, %c0_65, %c0_66] : memref<2x1x128xf32, #tpu.memory_space<vmem>>, vector<1x1x128xf32>
    %36 = vector.shape_cast %35 : vector<1x1x128xf32> to vector<1x128xf32>
    %37 = vector.shape_cast %36 : vector<1x128xf32> to vector<1x1x1x128xf32>
    %38 = vector.broadcast %37 : vector<1x1x1x128xf32> to vector<2x8x8x128xf32>
    %39 = arith.addf %34, %38 : vector<2x8x8x128xf32>
    %cst_67 = arith.constant 0.000000e+00 : f32
    %40 = vector.broadcast %cst_67 : f32 to vector<2x8x8x128xf32>
    %41 = arith.maximumf %39, %40 : vector<2x8x8x128xf32>
    %c0_68 = arith.constant 0 : index
    %c1_69 = arith.constant 1 : index
    %c1_70 = arith.constant 1 : index
    %c0_71 = arith.constant 0 : index
    %42 = vector.load %arg7[%c0_68, %c1_69, %c1_70, %c0_71] : memref<2x10x10x128xf32, #tpu.memory_space<vmem>>, vector<2x8x8x128xf32>
    tpu.vector_store %arg7[%c0_68, %c1_69, %c1_70, %c0_71], %41 {strides = array<i32>} : memref<2x10x10x128xf32, #tpu.memory_space<vmem>>, vector<2x8x8x128xf32>,
    %c0_72 = arith.constant 0 : index
    %c0_73 = arith.constant 0 : index
    %c0_74 = arith.constant 0 : index
    %c0_75 = arith.constant 0 : index
    %43 = vector.load %arg7[%c0_72, %c0_73, %c0_74, %c0_75] : memref<2x10x10x128xf32, #tpu.memory_space<vmem>>, vector<2x10x8x128xf32>
    %c0_76 = arith.constant 0 : index
    %c0_77 = arith.constant 0 : index
    %c0_78 = arith.constant 0 : index
    %c0_79 = arith.constant 0 : index
    %44 = vector.load %arg8[%c0_76, %c0_77, %c0_78, %c0_79] : memref<2x10x8x384xf32, #tpu.memory_space<vmem>>, vector<2x10x8x128xf32>
    tpu.vector_store %arg8[%c0_76, %c0_77, %c0_78, %c0_79], %43 {strides = array<i32>} : memref<2x10x8x384xf32, #tpu.memory_space<vmem>>, vector<2x10x8x128xf32>,
    %c0_80 = arith.constant 0 : index
    %c0_81 = arith.constant 0 : index
    %c1_82 = arith.constant 1 : index
    %c0_83 = arith.constant 0 : index
    %45 = vector.load %arg7[%c0_80, %c0_81, %c1_82, %c0_83] : memref<2x10x10x128xf32, #tpu.memory_space<vmem>>, vector<2x10x8x128xf32>
    %c0_84 = arith.constant 0 : index
    %c0_85 = arith.constant 0 : index
    %c0_86 = arith.constant 0 : index
    %c128_87 = arith.constant 128 : index
    %46 = vector.load %arg8[%c0_84, %c0_85, %c0_86, %c128_87] : memref<2x10x8x384xf32, #tpu.memory_space<vmem>>, vector<2x10x8x128xf32>
    tpu.vector_store %arg8[%c0_84, %c0_85, %c0_86, %c128_87], %45 {strides = array<i32>} : memref<2x10x8x384xf32, #tpu.memory_space<vmem>>, vector<2x10x8x128xf32>,
    %c0_88 = arith.constant 0 : index
    %c0_89 = arith.constant 0 : index
    %c2_90 = arith.constant 2 : index
    %c0_91 = arith.constant 0 : index
    %47 = vector.load %arg7[%c0_88, %c0_89, %c2_90, %c0_91] : memref<2x10x10x128xf32, #tpu.memory_space<vmem>>, vector<2x10x8x128xf32>
    %c0_92 = arith.constant 0 : index
    %c0_93 = arith.constant 0 : index
    %c0_94 = arith.constant 0 : index
    %c256_95 = arith.constant 256 : index
    %48 = vector.load %arg8[%c0_92, %c0_93, %c0_94, %c256_95] : memref<2x10x8x384xf32, #tpu.memory_space<vmem>>, vector<2x10x8x128xf32>
    tpu.vector_store %arg8[%c0_92, %c0_93, %c0_94, %c256_95], %47 {strides = array<i32>} : memref<2x10x8x384xf32, #tpu.memory_space<vmem>>, vector<2x10x8x128xf32>,
    %c0_96 = arith.constant 0 : index
    %c0_97 = arith.constant 0 : index
    %c0_98 = arith.constant 0 : index
    %c0_99 = arith.constant 0 : index
    %49 = vector.load %arg8[%c0_96, %c0_97, %c0_98, %c0_99] : memref<2x10x8x384xf32, #tpu.memory_space<vmem>>, vector<2x10x8x384xf32>
    %50 = vector.shape_cast %49 : vector<2x10x8x384xf32> to vector<160x384xf32>
    %c1_100 = arith.constant 1 : index
    %c0_101 = arith.constant 0 : index
    %c0_102 = arith.constant 0 : index
    %c0_103 = arith.constant 0 : index
    %51 = vector.load %arg2[%c1_100, %c0_101, %c0_102, %c0_103] : memref<2x3x384x128xf32, #tpu.memory_space<vmem>>, vector<1x1x384x128xf32>
    %52 = vector.shape_cast %51 : vector<1x1x384x128xf32> to vector<384x128xf32>
    %cst_104 = arith.constant dense<0.000000e+00> : vector<160x128xf32>
    %53 = tpu.matmul %50, %52, %cst_104 {dimension_numbers = #tpu.dot_dimension_numbers<[1], [0], [0], [1], [0, 0, 1, 1], [], []>} : vector<160x384xf32>, vector<384x128xf32>, vector<160x128xf32> -> vector<160x128xf32>
    %54 = vector.shape_cast %53 : vector<160x128xf32> to vector<2x10x8x128xf32>
    %55 = vector.extract_strided_slice %54 {offsets = [0, 0, 0, 0], sizes = [2, 8, 8, 128], strides = [1, 1, 1, 1]} : vector<2x10x8x128xf32> to vector<2x8x8x128xf32>
    %c1_105 = arith.constant 1 : index
    %c1_106 = arith.constant 1 : index
    %c0_107 = arith.constant 0 : index
    %c0_108 = arith.constant 0 : index
    %56 = vector.load %arg2[%c1_105, %c1_106, %c0_107, %c0_108] : memref<2x3x384x128xf32, #tpu.memory_space<vmem>>, vector<1x1x384x128xf32>
    %57 = vector.shape_cast %56 : vector<1x1x384x128xf32> to vector<384x128xf32>
    %cst_109 = arith.constant dense<0.000000e+00> : vector<160x128xf32>
    %58 = tpu.matmul %50, %57, %cst_109 {dimension_numbers = #tpu.dot_dimension_numbers<[1], [0], [0], [1], [0, 0, 1, 1], [], []>} : vector<160x384xf32>, vector<384x128xf32>, vector<160x128xf32> -> vector<160x128xf32>
    %59 = vector.shape_cast %58 : vector<160x128xf32> to vector<2x10x8x128xf32>
    %60 = vector.extract_strided_slice %59 {offsets = [0, 1, 0, 0], sizes = [2, 8, 8, 128], strides = [1, 1, 1, 1]} : vector<2x10x8x128xf32> to vector<2x8x8x128xf32>
    %61 = arith.addf %55, %60 : vector<2x8x8x128xf32>
    %c1_110 = arith.constant 1 : index
    %c2_111 = arith.constant 2 : index
    %c0_112 = arith.constant 0 : index
    %c0_113 = arith.constant 0 : index
    %62 = vector.load %arg2[%c1_110, %c2_111, %c0_112, %c0_113] : memref<2x3x384x128xf32, #tpu.memory_space<vmem>>, vector<1x1x384x128xf32>
    %63 = vector.shape_cast %62 : vector<1x1x384x128xf32> to vector<384x128xf32>
    %cst_114 = arith.constant dense<0.000000e+00> : vector<160x128xf32>
    %64 = tpu.matmul %50, %63, %cst_114 {dimension_numbers = #tpu.dot_dimension_numbers<[1], [0], [0], [1], [0, 0, 1, 1], [], []>} : vector<160x384xf32>, vector<384x128xf32>, vector<160x128xf32> -> vector<160x128xf32>
    %65 = vector.shape_cast %64 : vector<160x128xf32> to vector<2x10x8x128xf32>
    %66 = vector.extract_strided_slice %65 {offsets = [0, 2, 0, 0], sizes = [2, 8, 8, 128], strides = [1, 1, 1, 1]} : vector<2x10x8x128xf32> to vector<2x8x8x128xf32>
    %67 = arith.addf %61, %66 : vector<2x8x8x128xf32>
    %c1_115 = arith.constant 1 : index
    %c0_116 = arith.constant 0 : index
    %c0_117 = arith.constant 0 : index
    %68 = vector.load %arg3[%c1_115, %c0_116, %c0_117] : memref<2x1x128xf32, #tpu.memory_space<vmem>>, vector<1x1x128xf32>
    %69 = vector.shape_cast %68 : vector<1x1x128xf32> to vector<1x128xf32>
    %70 = vector.shape_cast %69 : vector<1x128xf32> to vector<1x1x1x128xf32>
    %71 = vector.broadcast %70 : vector<1x1x1x128xf32> to vector<2x8x8x128xf32>
    %72 = arith.addf %67, %71 : vector<2x8x8x128xf32>
    %cst_118 = arith.constant 0.000000e+00 : f32
    %73 = vector.broadcast %cst_118 : f32 to vector<2x8x8x128xf32>
    %74 = arith.maximumf %72, %73 : vector<2x8x8x128xf32>
    %75 = vector.shape_cast %74 : vector<2x8x8x128xf32> to vector<128x128xf32>
    %c0_119 = arith.constant 0 : index
    %c0_120 = arith.constant 0 : index
    %c0_121 = arith.constant 0 : index
    %76 = vector.load %arg4[%c0_119, %c0_120, %c0_121] : memref<2x128x256xf32, #tpu.memory_space<vmem>>, vector<1x128x256xf32>
    %77 = vector.shape_cast %76 : vector<1x128x256xf32> to vector<128x256xf32>
    %cst_122 = arith.constant dense<0.000000e+00> : vector<128x256xf32>
    %78 = tpu.matmul %75, %77, %cst_122 {dimension_numbers = #tpu.dot_dimension_numbers<[1], [0], [0], [1], [0, 0, 1, 1], [], []>} : vector<128x128xf32>, vector<128x256xf32>, vector<128x256xf32> -> vector<128x256xf32>
    %c0_123 = arith.constant 0 : index
    %c0_124 = arith.constant 0 : index
    %79 = vector.load %arg5[%c0_123, %c0_124] : memref<1x256xf32, #tpu.memory_space<vmem>>, vector<1x256xf32>
    %80 = vector.broadcast %79 : vector<1x256xf32> to vector<128x256xf32>
    %81 = arith.addf %78, %80 : vector<128x256xf32>
    %cst_125 = arith.constant 0.000000e+00 : f32
    %82 = vector.broadcast %cst_125 : f32 to vector<128x256xf32>
    %83 = arith.maximumf %81, %82 : vector<128x256xf32>
    %84 = vector.shape_cast %83 : vector<128x256xf32> to vector<2x8x16x128xf32>
    %c0_126 = arith.constant 0 : index
    %c0_127 = arith.constant 0 : index
    %c0_128 = arith.constant 0 : index
    %c0_129 = arith.constant 0 : index
    %c0_130 = arith.constant 0 : index
    %85 = vector.load %arg6[%c0_126, %c0_127, %c0_128, %c0_129, %c0_130] : memref<2x8x2x16x128xf32, #tpu.memory_space<vmem>>, vector<2x8x1x16x128xf32>
    %86 = vector.shape_cast %85 : vector<2x8x1x16x128xf32> to vector<2x8x16x128xf32>
    %87 = vector.shape_cast %84 : vector<2x8x16x128xf32> to vector<2x8x1x16x128xf32>
    tpu.vector_store %arg6[%c0_126, %c0_127, %c0_128, %c0_129, %c0_130], %87 {strides = array<i32>} : memref<2x8x2x16x128xf32, #tpu.memory_space<vmem>>, vector<2x8x1x16x128xf32>,
    %c1_131 = arith.constant 1 : index
    %c0_132 = arith.constant 0 : index
    %c0_133 = arith.constant 0 : index
    %88 = vector.load %arg4[%c1_131, %c0_132, %c0_133] : memref<2x128x256xf32, #tpu.memory_space<vmem>>, vector<1x128x256xf32>
    %89 = vector.shape_cast %88 : vector<1x128x256xf32> to vector<128x256xf32>
    %cst_134 = arith.constant dense<0.000000e+00> : vector<128x256xf32>
    %90 = tpu.matmul %75, %89, %cst_134 {dimension_numbers = #tpu.dot_dimension_numbers<[1], [0], [0], [1], [0, 0, 1, 1], [], []>} : vector<128x128xf32>, vector<128x256xf32>, vector<128x256xf32> -> vector<128x256xf32>
    %c0_135 = arith.constant 0 : index
    %c0_136 = arith.constant 0 : index
    %91 = vector.load %arg5[%c0_135, %c0_136] : memref<1x256xf32, #tpu.memory_space<vmem>>, vector<1x256xf32>
    %92 = vector.broadcast %91 : vector<1x256xf32> to vector<128x256xf32>
    %93 = arith.addf %90, %92 : vector<128x256xf32>
    %cst_137 = arith.constant 0.000000e+00 : f32
    %94 = vector.broadcast %cst_137 : f32 to vector<128x256xf32>
    %95 = arith.maximumf %93, %94 : vector<128x256xf32>
    %96 = vector.shape_cast %95 : vector<128x256xf32> to vector<2x8x16x128xf32>
    %c0_138 = arith.constant 0 : index
    %c0_139 = arith.constant 0 : index
    %c1_140 = arith.constant 1 : index
    %c0_141 = arith.constant 0 : index
    %c0_142 = arith.constant 0 : index
    %97 = vector.load %arg6[%c0_138, %c0_139, %c1_140, %c0_141, %c0_142] : memref<2x8x2x16x128xf32, #tpu.memory_space<vmem>>, vector<2x8x1x16x128xf32>
    %98 = vector.shape_cast %97 : vector<2x8x1x16x128xf32> to vector<2x8x16x128xf32>
    %99 = vector.shape_cast %96 : vector<2x8x16x128xf32> to vector<2x8x1x16x128xf32>
    tpu.vector_store %arg6[%c0_138, %c0_139, %c1_140, %c0_141, %c0_142], %99 {strides = array<i32>} : memref<2x8x2x16x128xf32, #tpu.memory_space<vmem>>, vector<2x8x1x16x128xf32>,
    return
  }
  func.func @transform_0(%arg0: i32) -> (i32, i32, i32, i32) {
    %c0_i32 = arith.constant 0 : i32
    %c0_i32_0 = arith.constant 0 : i32
    %c0_i32_1 = arith.constant 0 : i32
    %c0_i32_2 = arith.constant 0 : i32
    return %arg0, %c0_i32, %c0_i32_0, %c0_i32_1 : i32, i32, i32, i32
  }
  func.func @transform_1(%arg0: i32) -> (i32, i32, i32, i32) {
    %c0_i32 = arith.constant 0 : i32
    %c0_i32_0 = arith.constant 0 : i32
    %c0_i32_1 = arith.constant 0 : i32
    %c0_i32_2 = arith.constant 0 : i32
    %c0_i32_3 = arith.constant 0 : i32
    return %c0_i32, %c0_i32_0, %c0_i32_1, %c0_i32_2 : i32, i32, i32, i32
  }
  func.func @transform_2(%arg0: i32) -> (i32, i32, i32) {
    %c0_i32 = arith.constant 0 : i32
    %c0_i32_0 = arith.constant 0 : i32
    %c0_i32_1 = arith.constant 0 : i32
    %c0_i32_2 = arith.constant 0 : i32
    return %c0_i32, %c0_i32_0, %c0_i32_1 : i32, i32, i32
  }
  func.func @transform_3(%arg0: i32) -> (i32, i32, i32) {
    %c0_i32 = arith.constant 0 : i32
    %c0_i32_0 = arith.constant 0 : i32
    %c0_i32_1 = arith.constant 0 : i32
    %c0_i32_2 = arith.constant 0 : i32
    return %c0_i32, %c0_i32_0, %c0_i32_1 : i32, i32, i32
  }
  func.func @transform_4(%arg0: i32) -> (i32, i32) {
    %c0_i32 = arith.constant 0 : i32
    %c0_i32_0 = arith.constant 0 : i32
    %c0_i32_1 = arith.constant 0 : i32
    return %c0_i32, %c0_i32_0 : i32, i32
  }
  func.func @transform_5(%arg0: i32) -> (i32, i32, i32, i32, i32) {
    %c0_i32 = arith.constant 0 : i32
    %c0_i32_0 = arith.constant 0 : i32
    %c0_i32_1 = arith.constant 0 : i32
    %c0_i32_2 = arith.constant 0 : i32
    %c0_i32_3 = arith.constant 0 : i32
    return %arg0, %c0_i32, %c0_i32_0, %c0_i32_1, %c0_i32_2 : i32, i32, i32, i32, i32
  }
}

module attributes {stable_mosaic.version = 11 : i64} {
  func.func @_fused_mask_head_kernel(%arg0: i32, %arg1: memref<2x8x8x128xf32, #tpu.memory_space<vmem>>, %arg2: memref<2x3x384x128xf32, #tpu.memory_space<vmem>>, %arg3: memref<2x1x128xf32, #tpu.memory_space<vmem>>, %arg4: memref<2x128x256xf32, #tpu.memory_space<vmem>>, %arg5: memref<1x256xf32, #tpu.memory_space<vmem>>, %arg6: memref<2x8x2x16x128xf32, #tpu.memory_space<vmem>>, %arg7: memref<2x10x10x128xf32, #tpu.memory_space<vmem>>, %arg8: memref<2x10x8x384xf32, #tpu.memory_space<vmem>>) attributes {dimension_semantics = [#tpu.dimension_semantics<parallel>], iteration_bounds = array<i64: 2>, scalar_prefetch = 0 : i64, scratch_operands = 2 : i64, tpu.core_type = #tpu.core_type<tc>, window_params = [{transform_indices = @transform_0, window_bounds = array<i64: 2, 8, 8, 128>}, {pipeline_mode = #tpu.pipeline_mode<synchronous>, transform_indices = @transform_1, window_bounds = array<i64: 2, 3, 384, 128>}, {pipeline_mode = #tpu.pipeline_mode<synchronous>, transform_indices = @transform_2, window_bounds = array<i64: 2, 1, 128>}, {pipeline_mode = #tpu.pipeline_mode<synchronous>, transform_indices = @transform_3, window_bounds = array<i64: 2, 128, 256>}, {pipeline_mode = #tpu.pipeline_mode<synchronous>, transform_indices = @transform_4, window_bounds = array<i64: 1, 256>}, {transform_indices = @transform_5, window_bounds = array<i64: 2, 8, 2, 16, 128>}]} {
    %cst = arith.constant 0.000000e+00 : f32
    %0 = vector.broadcast %cst : f32 to vector<2x1x10x128xf32>
    %c0 = arith.constant 0 : index
    %c0_0 = arith.constant 0 : index
    %c0_1 = arith.constant 0 : index
    %c0_2 = arith.constant 0 : index
    %1 = vector.load %arg7[%c0, %c0_0, %c0_1, %c0_2] : memref<2x10x10x128xf32, #tpu.memory_space<vmem>>, vector<2x1x10x128xf32>
    tpu.vector_store %arg7[%c0, %c0_0, %c0_1, %c0_2], %0 {strides = array<i32>} : memref<2x10x10x128xf32, #tpu.memory_space<vmem>>, vector<2x1x10x128xf32>,
    %cst_3 = arith.constant 0.000000e+00 : f32
    %2 = vector.broadcast %cst_3 : f32 to vector<2x1x10x128xf32>
    %c0_4 = arith.constant 0 : index
    %c9 = arith.constant 9 : index
    %c0_5 = arith.constant 0 : index
    %c0_6 = arith.constant 0 : index
    %3 = vector.load %arg7[%c0_4, %c9, %c0_5, %c0_6] : memref<2x10x10x128xf32, #tpu.memory_space<vmem>>, vector<2x1x10x128xf32>
    tpu.vector_store %arg7[%c0_4, %c9, %c0_5, %c0_6], %2 {strides = array<i32>} : memref<2x10x10x128xf32, #tpu.memory_space<vmem>>, vector<2x1x10x128xf32>,
    %cst_7 = arith.constant 0.000000e+00 : f32
    %4 = vector.broadcast %cst_7 : f32 to vector<2x10x1x128xf32>
    %c0_8 = arith.constant 0 : index
    %c0_9 = arith.constant 0 : index
    %c0_10 = arith.constant 0 : index
    %c0_11 = arith.constant 0 : index
    %5 = vector.load %arg7[%c0_8, %c0_9, %c0_10, %c0_11] : memref<2x10x10x128xf32, #tpu.memory_space<vmem>>, vector<2x10x1x128xf32>
    tpu.vector_store %arg7[%c0_8, %c0_9, %c0_10, %c0_11], %4 {strides = array<i32>} : memref<2x10x10x128xf32, #tpu.memory_space<vmem>>, vector<2x10x1x128xf32>,
    %cst_12 = arith.constant 0.000000e+00 : f32
    %6 = vector.broadcast %cst_12 : f32 to vector<2x10x1x128xf32>
    %c0_13 = arith.constant 0 : index
    %c0_14 = arith.constant 0 : index
    %c9_15 = arith.constant 9 : index
    %c0_16 = arith.constant 0 : index
    %7 = vector.load %arg7[%c0_13, %c0_14, %c9_15, %c0_16] : memref<2x10x10x128xf32, #tpu.memory_space<vmem>>, vector<2x10x1x128xf32>
    tpu.vector_store %arg7[%c0_13, %c0_14, %c9_15, %c0_16], %6 {strides = array<i32>} : memref<2x10x10x128xf32, #tpu.memory_space<vmem>>, vector<2x10x1x128xf32>,
    %c0_17 = arith.constant 0 : index
    %c0_18 = arith.constant 0 : index
    %c0_19 = arith.constant 0 : index
    %c0_20 = arith.constant 0 : index
    %8 = vector.load %arg1[%c0_17, %c0_18, %c0_19, %c0_20] : memref<2x8x8x128xf32, #tpu.memory_space<vmem>>, vector<2x8x8x128xf32>
    %c0_21 = arith.constant 0 : index
    %c1 = arith.constant 1 : index
    %c1_22 = arith.constant 1 : index
    %c0_23 = arith.constant 0 : index
    %9 = vector.load %arg7[%c0_21, %c1, %c1_22, %c0_23] : memref<2x10x10x128xf32, #tpu.memory_space<vmem>>, vector<2x8x8x128xf32>
    tpu.vector_store %arg7[%c0_21, %c1, %c1_22, %c0_23], %8 {strides = array<i32>} : memref<2x10x10x128xf32, #tpu.memory_space<vmem>>, vector<2x8x8x128xf32>,
    %c0_24 = arith.constant 0 : index
    %c0_25 = arith.constant 0 : index
    %c0_26 = arith.constant 0 : index
    %c0_27 = arith.constant 0 : index
    %10 = vector.load %arg7[%c0_24, %c0_25, %c0_26, %c0_27] : memref<2x10x10x128xf32, #tpu.memory_space<vmem>>, vector<2x10x8x128xf32>
    %c0_28 = arith.constant 0 : index
    %c0_29 = arith.constant 0 : index
    %c0_30 = arith.constant 0 : index
    %c0_31 = arith.constant 0 : index
    %11 = vector.load %arg8[%c0_28, %c0_29, %c0_30, %c0_31] : memref<2x10x8x384xf32, #tpu.memory_space<vmem>>, vector<2x10x8x128xf32>
    tpu.vector_store %arg8[%c0_28, %c0_29, %c0_30, %c0_31], %10 {strides = array<i32>} : memref<2x10x8x384xf32, #tpu.memory_space<vmem>>, vector<2x10x8x128xf32>,
    %c0_32 = arith.constant 0 : index
    %c0_33 = arith.constant 0 : index
    %c1_34 = arith.constant 1 : index
    %c0_35 = arith.constant 0 : index
    %12 = vector.load %arg7[%c0_32, %c0_33, %c1_34, %c0_35] : memref<2x10x10x128xf32, #tpu.memory_space<vmem>>, vector<2x10x8x128xf32>
    %c0_36 = arith.constant 0 : index
    %c0_37 = arith.constant 0 : index
    %c0_38 = arith.constant 0 : index
    %c128 = arith.constant 128 : index
    %13 = vector.load %arg8[%c0_36, %c0_37, %c0_38, %c128] : memref<2x10x8x384xf32, #tpu.memory_space<vmem>>, vector<2x10x8x128xf32>
    tpu.vector_store %arg8[%c0_36, %c0_37, %c0_38, %c128], %12 {strides = array<i32>} : memref<2x10x8x384xf32, #tpu.memory_space<vmem>>, vector<2x10x8x128xf32>,
    %c0_39 = arith.constant 0 : index
    %c0_40 = arith.constant 0 : index
    %c2 = arith.constant 2 : index
    %c0_41 = arith.constant 0 : index
    %14 = vector.load %arg7[%c0_39, %c0_40, %c2, %c0_41] : memref<2x10x10x128xf32, #tpu.memory_space<vmem>>, vector<2x10x8x128xf32>
    %c0_42 = arith.constant 0 : index
    %c0_43 = arith.constant 0 : index
    %c0_44 = arith.constant 0 : index
    %c256 = arith.constant 256 : index
    %15 = vector.load %arg8[%c0_42, %c0_43, %c0_44, %c256] : memref<2x10x8x384xf32, #tpu.memory_space<vmem>>, vector<2x10x8x128xf32>
    tpu.vector_store %arg8[%c0_42, %c0_43, %c0_44, %c256], %14 {strides = array<i32>} : memref<2x10x8x384xf32, #tpu.memory_space<vmem>>, vector<2x10x8x128xf32>,
    %c0_45 = arith.constant 0 : index
    %c0_46 = arith.constant 0 : index
    %c0_47 = arith.constant 0 : index
    %c0_48 = arith.constant 0 : index
    %16 = vector.load %arg8[%c0_45, %c0_46, %c0_47, %c0_48] : memref<2x10x8x384xf32, #tpu.memory_space<vmem>>, vector<2x10x8x384xf32>
    %17 = vector.shape_cast %16 : vector<2x10x8x384xf32> to vector<160x384xf32>
    %c0_49 = arith.constant 0 : index
    %c0_50 = arith.constant 0 : index
    %c0_51 = arith.constant 0 : index
    %c0_52 = arith.constant 0 : index
    %18 = vector.load %arg2[%c0_49, %c0_50, %c0_51, %c0_52] : memref<2x3x384x128xf32, #tpu.memory_space<vmem>>, vector<1x1x384x128xf32>
    %19 = vector.shape_cast %18 : vector<1x1x384x128xf32> to vector<384x128xf32>
    %cst_53 = arith.constant dense<0.000000e+00> : vector<160x128xf32>
    %20 = tpu.matmul %17, %19, %cst_53 {dimension_numbers = #tpu.dot_dimension_numbers<[1], [0], [0], [1], [0, 0, 1, 1], [], []>} : vector<160x384xf32>, vector<384x128xf32>, vector<160x128xf32> -> vector<160x128xf32>
    %21 = vector.shape_cast %20 : vector<160x128xf32> to vector<2x10x8x128xf32>
    %22 = vector.extract_strided_slice %21 {offsets = [0, 0, 0, 0], sizes = [2, 8, 8, 128], strides = [1, 1, 1, 1]} : vector<2x10x8x128xf32> to vector<2x8x8x128xf32>
    %c0_54 = arith.constant 0 : index
    %c1_55 = arith.constant 1 : index
    %c0_56 = arith.constant 0 : index
    %c0_57 = arith.constant 0 : index
    %23 = vector.load %arg2[%c0_54, %c1_55, %c0_56, %c0_57] : memref<2x3x384x128xf32, #tpu.memory_space<vmem>>, vector<1x1x384x128xf32>
    %24 = vector.shape_cast %23 : vector<1x1x384x128xf32> to vector<384x128xf32>
    %cst_58 = arith.constant dense<0.000000e+00> : vector<160x128xf32>
    %25 = tpu.matmul %17, %24, %cst_58 {dimension_numbers = #tpu.dot_dimension_numbers<[1], [0], [0], [1], [0, 0, 1, 1], [], []>} : vector<160x384xf32>, vector<384x128xf32>, vector<160x128xf32> -> vector<160x128xf32>
    %26 = vector.shape_cast %25 : vector<160x128xf32> to vector<2x10x8x128xf32>
    %27 = vector.extract_strided_slice %26 {offsets = [0, 1, 0, 0], sizes = [2, 8, 8, 128], strides = [1, 1, 1, 1]} : vector<2x10x8x128xf32> to vector<2x8x8x128xf32>
    %28 = arith.addf %22, %27 : vector<2x8x8x128xf32>
    %c0_59 = arith.constant 0 : index
    %c2_60 = arith.constant 2 : index
    %c0_61 = arith.constant 0 : index
    %c0_62 = arith.constant 0 : index
    %29 = vector.load %arg2[%c0_59, %c2_60, %c0_61, %c0_62] : memref<2x3x384x128xf32, #tpu.memory_space<vmem>>, vector<1x1x384x128xf32>
    %30 = vector.shape_cast %29 : vector<1x1x384x128xf32> to vector<384x128xf32>
    %cst_63 = arith.constant dense<0.000000e+00> : vector<160x128xf32>
    %31 = tpu.matmul %17, %30, %cst_63 {dimension_numbers = #tpu.dot_dimension_numbers<[1], [0], [0], [1], [0, 0, 1, 1], [], []>} : vector<160x384xf32>, vector<384x128xf32>, vector<160x128xf32> -> vector<160x128xf32>
    %32 = vector.shape_cast %31 : vector<160x128xf32> to vector<2x10x8x128xf32>
    %33 = vector.extract_strided_slice %32 {offsets = [0, 2, 0, 0], sizes = [2, 8, 8, 128], strides = [1, 1, 1, 1]} : vector<2x10x8x128xf32> to vector<2x8x8x128xf32>
    %34 = arith.addf %28, %33 : vector<2x8x8x128xf32>
    %c0_64 = arith.constant 0 : index
    %c0_65 = arith.constant 0 : index
    %c0_66 = arith.constant 0 : index
    %35 = vector.load %arg3[%c0_64, %c0_65, %c0_66] : memref<2x1x128xf32, #tpu.memory_space<vmem>>, vector<1x1x128xf32>
    %36 = vector.shape_cast %35 : vector<1x1x128xf32> to vector<1x128xf32>
    %37 = vector.shape_cast %36 : vector<1x128xf32> to vector<1x1x1x128xf32>
    %38 = vector.broadcast %37 : vector<1x1x1x128xf32> to vector<2x8x8x128xf32>
    %39 = arith.addf %34, %38 : vector<2x8x8x128xf32>
    %cst_67 = arith.constant 0.000000e+00 : f32
    %40 = vector.broadcast %cst_67 : f32 to vector<2x8x8x128xf32>
    %41 = arith.maximumf %39, %40 : vector<2x8x8x128xf32>
    %c0_68 = arith.constant 0 : index
    %c1_69 = arith.constant 1 : index
    %c1_70 = arith.constant 1 : index
    %c0_71 = arith.constant 0 : index
    %42 = vector.load %arg7[%c0_68, %c1_69, %c1_70, %c0_71] : memref<2x10x10x128xf32, #tpu.memory_space<vmem>>, vector<2x8x8x128xf32>
    tpu.vector_store %arg7[%c0_68, %c1_69, %c1_70, %c0_71], %41 {strides = array<i32>} : memref<2x10x10x128xf32, #tpu.memory_space<vmem>>, vector<2x8x8x128xf32>,
    %c0_72 = arith.constant 0 : index
    %c0_73 = arith.constant 0 : index
    %c0_74 = arith.constant 0 : index
    %c0_75 = arith.constant 0 : index
    %43 = vector.load %arg7[%c0_72, %c0_73, %c0_74, %c0_75] : memref<2x10x10x128xf32, #tpu.memory_space<vmem>>, vector<2x10x8x128xf32>
    %c0_76 = arith.constant 0 : index
    %c0_77 = arith.constant 0 : index
    %c0_78 = arith.constant 0 : index
    %c0_79 = arith.constant 0 : index
    %44 = vector.load %arg8[%c0_76, %c0_77, %c0_78, %c0_79] : memref<2x10x8x384xf32, #tpu.memory_space<vmem>>, vector<2x10x8x128xf32>
    tpu.vector_store %arg8[%c0_76, %c0_77, %c0_78, %c0_79], %43 {strides = array<i32>} : memref<2x10x8x384xf32, #tpu.memory_space<vmem>>, vector<2x10x8x128xf32>,
    %c0_80 = arith.constant 0 : index
    %c0_81 = arith.constant 0 : index
    %c1_82 = arith.constant 1 : index
    %c0_83 = arith.constant 0 : index
    %45 = vector.load %arg7[%c0_80, %c0_81, %c1_82, %c0_83] : memref<2x10x10x128xf32, #tpu.memory_space<vmem>>, vector<2x10x8x128xf32>
    %c0_84 = arith.constant 0 : index
    %c0_85 = arith.constant 0 : index
    %c0_86 = arith.constant 0 : index
    %c128_87 = arith.constant 128 : index
    %46 = vector.load %arg8[%c0_84, %c0_85, %c0_86, %c128_87] : memref<2x10x8x384xf32, #tpu.memory_space<vmem>>, vector<2x10x8x128xf32>
    tpu.vector_store %arg8[%c0_84, %c0_85, %c0_86, %c128_87], %45 {strides = array<i32>} : memref<2x10x8x384xf32, #tpu.memory_space<vmem>>, vector<2x10x8x128xf32>,
    %c0_88 = arith.constant 0 : index
    %c0_89 = arith.constant 0 : index
    %c2_90 = arith.constant 2 : index
    %c0_91 = arith.constant 0 : index
    %47 = vector.load %arg7[%c0_88, %c0_89, %c2_90, %c0_91] : memref<2x10x10x128xf32, #tpu.memory_space<vmem>>, vector<2x10x8x128xf32>
    %c0_92 = arith.constant 0 : index
    %c0_93 = arith.constant 0 : index
    %c0_94 = arith.constant 0 : index
    %c256_95 = arith.constant 256 : index
    %48 = vector.load %arg8[%c0_92, %c0_93, %c0_94, %c256_95] : memref<2x10x8x384xf32, #tpu.memory_space<vmem>>, vector<2x10x8x128xf32>
    tpu.vector_store %arg8[%c0_92, %c0_93, %c0_94, %c256_95], %47 {strides = array<i32>} : memref<2x10x8x384xf32, #tpu.memory_space<vmem>>, vector<2x10x8x128xf32>,
    %c0_96 = arith.constant 0 : index
    %c0_97 = arith.constant 0 : index
    %c0_98 = arith.constant 0 : index
    %c0_99 = arith.constant 0 : index
    %49 = vector.load %arg8[%c0_96, %c0_97, %c0_98, %c0_99] : memref<2x10x8x384xf32, #tpu.memory_space<vmem>>, vector<2x10x8x384xf32>
    %50 = vector.shape_cast %49 : vector<2x10x8x384xf32> to vector<160x384xf32>
    %c1_100 = arith.constant 1 : index
    %c0_101 = arith.constant 0 : index
    %c0_102 = arith.constant 0 : index
    %c0_103 = arith.constant 0 : index
    %51 = vector.load %arg2[%c1_100, %c0_101, %c0_102, %c0_103] : memref<2x3x384x128xf32, #tpu.memory_space<vmem>>, vector<1x1x384x128xf32>
    %52 = vector.shape_cast %51 : vector<1x1x384x128xf32> to vector<384x128xf32>
    %cst_104 = arith.constant dense<0.000000e+00> : vector<160x128xf32>
    %53 = tpu.matmul %50, %52, %cst_104 {dimension_numbers = #tpu.dot_dimension_numbers<[1], [0], [0], [1], [0, 0, 1, 1], [], []>} : vector<160x384xf32>, vector<384x128xf32>, vector<160x128xf32> -> vector<160x128xf32>
    %54 = vector.shape_cast %53 : vector<160x128xf32> to vector<2x10x8x128xf32>
    %55 = vector.extract_strided_slice %54 {offsets = [0, 0, 0, 0], sizes = [2, 8, 8, 128], strides = [1, 1, 1, 1]} : vector<2x10x8x128xf32> to vector<2x8x8x128xf32>
    %c1_105 = arith.constant 1 : index
    %c1_106 = arith.constant 1 : index
    %c0_107 = arith.constant 0 : index
    %c0_108 = arith.constant 0 : index
    %56 = vector.load %arg2[%c1_105, %c1_106, %c0_107, %c0_108] : memref<2x3x384x128xf32, #tpu.memory_space<vmem>>, vector<1x1x384x128xf32>
    %57 = vector.shape_cast %56 : vector<1x1x384x128xf32> to vector<384x128xf32>
    %cst_109 = arith.constant dense<0.000000e+00> : vector<160x128xf32>
    %58 = tpu.matmul %50, %57, %cst_109 {dimension_numbers = #tpu.dot_dimension_numbers<[1], [0], [0], [1], [0, 0, 1, 1], [], []>} : vector<160x384xf32>, vector<384x128xf32>, vector<160x128xf32> -> vector<160x128xf32>
    %59 = vector.shape_cast %58 : vector<160x128xf32> to vector<2x10x8x128xf32>
    %60 = vector.extract_strided_slice %59 {offsets = [0, 1, 0, 0], sizes = [2, 8, 8, 128], strides = [1, 1, 1, 1]} : vector<2x10x8x128xf32> to vector<2x8x8x128xf32>
    %61 = arith.addf %55, %60 : vector<2x8x8x128xf32>
    %c1_110 = arith.constant 1 : index
    %c2_111 = arith.constant 2 : index
    %c0_112 = arith.constant 0 : index
    %c0_113 = arith.constant 0 : index
    %62 = vector.load %arg2[%c1_110, %c2_111, %c0_112, %c0_113] : memref<2x3x384x128xf32, #tpu.memory_space<vmem>>, vector<1x1x384x128xf32>
    %63 = vector.shape_cast %62 : vector<1x1x384x128xf32> to vector<384x128xf32>
    %cst_114 = arith.constant dense<0.000000e+00> : vector<160x128xf32>
    %64 = tpu.matmul %50, %63, %cst_114 {dimension_numbers = #tpu.dot_dimension_numbers<[1], [0], [0], [1], [0, 0, 1, 1], [], []>} : vector<160x384xf32>, vector<384x128xf32>, vector<160x128xf32> -> vector<160x128xf32>
    %65 = vector.shape_cast %64 : vector<160x128xf32> to vector<2x10x8x128xf32>
    %66 = vector.extract_strided_slice %65 {offsets = [0, 2, 0, 0], sizes = [2, 8, 8, 128], strides = [1, 1, 1, 1]} : vector<2x10x8x128xf32> to vector<2x8x8x128xf32>
    %67 = arith.addf %61, %66 : vector<2x8x8x128xf32>
    %c1_115 = arith.constant 1 : index
    %c0_116 = arith.constant 0 : index
    %c0_117 = arith.constant 0 : index
    %68 = vector.load %arg3[%c1_115, %c0_116, %c0_117] : memref<2x1x128xf32, #tpu.memory_space<vmem>>, vector<1x1x128xf32>
    %69 = vector.shape_cast %68 : vector<1x1x128xf32> to vector<1x128xf32>
    %70 = vector.shape_cast %69 : vector<1x128xf32> to vector<1x1x1x128xf32>
    %71 = vector.broadcast %70 : vector<1x1x1x128xf32> to vector<2x8x8x128xf32>
    %72 = arith.addf %67, %71 : vector<2x8x8x128xf32>
    %cst_118 = arith.constant 0.000000e+00 : f32
    %73 = vector.broadcast %cst_118 : f32 to vector<2x8x8x128xf32>
    %74 = arith.maximumf %72, %73 : vector<2x8x8x128xf32>
    %75 = vector.shape_cast %74 : vector<2x8x8x128xf32> to vector<128x128xf32>
    %c0_119 = arith.constant 0 : index
    %c0_120 = arith.constant 0 : index
    %c0_121 = arith.constant 0 : index
    %76 = vector.load %arg4[%c0_119, %c0_120, %c0_121] : memref<2x128x256xf32, #tpu.memory_space<vmem>>, vector<1x128x256xf32>
    %77 = vector.shape_cast %76 : vector<1x128x256xf32> to vector<128x256xf32>
    %cst_122 = arith.constant dense<0.000000e+00> : vector<128x256xf32>
    %78 = tpu.matmul %75, %77, %cst_122 {dimension_numbers = #tpu.dot_dimension_numbers<[1], [0], [0], [1], [0, 0, 1, 1], [], []>} : vector<128x128xf32>, vector<128x256xf32>, vector<128x256xf32> -> vector<128x256xf32>
    %c0_123 = arith.constant 0 : index
    %c0_124 = arith.constant 0 : index
    %79 = vector.load %arg5[%c0_123, %c0_124] : memref<1x256xf32, #tpu.memory_space<vmem>>, vector<1x256xf32>
    %80 = vector.broadcast %79 : vector<1x256xf32> to vector<128x256xf32>
    %81 = arith.addf %78, %80 : vector<128x256xf32>
    %cst_125 = arith.constant 0.000000e+00 : f32
    %82 = vector.broadcast %cst_125 : f32 to vector<128x256xf32>
    %83 = arith.maximumf %81, %82 : vector<128x256xf32>
    %84 = vector.shape_cast %83 : vector<128x256xf32> to vector<2x8x16x128xf32>
    %c0_126 = arith.constant 0 : index
    %c0_127 = arith.constant 0 : index
    %c0_128 = arith.constant 0 : index
    %c0_129 = arith.constant 0 : index
    %c0_130 = arith.constant 0 : index
    %85 = vector.load %arg6[%c0_126, %c0_127, %c0_128, %c0_129, %c0_130] : memref<2x8x2x16x128xf32, #tpu.memory_space<vmem>>, vector<2x8x1x16x128xf32>
    %86 = vector.shape_cast %85 : vector<2x8x1x16x128xf32> to vector<2x8x16x128xf32>
    %87 = vector.shape_cast %84 : vector<2x8x16x128xf32> to vector<2x8x1x16x128xf32>
    tpu.vector_store %arg6[%c0_126, %c0_127, %c0_128, %c0_129, %c0_130], %87 {strides = array<i32>} : memref<2x8x2x16x128xf32, #tpu.memory_space<vmem>>, vector<2x8x1x16x128xf32>,
    %c1_131 = arith.constant 1 : index
    %c0_132 = arith.constant 0 : index
    %c0_133 = arith.constant 0 : index
    %88 = vector.load %arg4[%c1_131, %c0_132, %c0_133] : memref<2x128x256xf32, #tpu.memory_space<vmem>>, vector<1x128x256xf32>
    %89 = vector.shape_cast %88 : vector<1x128x256xf32> to vector<128x256xf32>
    %cst_134 = arith.constant dense<0.000000e+00> : vector<128x256xf32>
    %90 = tpu.matmul %75, %89, %cst_134 {dimension_numbers = #tpu.dot_dimension_numbers<[1], [0], [0], [1], [0, 0, 1, 1], [], []>} : vector<128x128xf32>, vector<128x256xf32>, vector<128x256xf32> -> vector<128x256xf32>
    %c0_135 = arith.constant 0 : index
    %c0_136 = arith.constant 0 : index
    %91 = vector.load %arg5[%c0_135, %c0_136] : memref<1x256xf32, #tpu.memory_space<vmem>>, vector<1x256xf32>
    %92 = vector.broadcast %91 : vector<1x256xf32> to vector<128x256xf32>
    %93 = arith.addf %90, %92 : vector<128x256xf32>
    %cst_137 = arith.constant 0.000000e+00 : f32
    %94 = vector.broadcast %cst_137 : f32 to vector<128x256xf32>
    %95 = arith.maximumf %93, %94 : vector<128x256xf32>
    %96 = vector.shape_cast %95 : vector<128x256xf32> to vector<2x8x16x128xf32>
    %c0_138 = arith.constant 0 : index
    %c0_139 = arith.constant 0 : index
    %c1_140 = arith.constant 1 : index
    %c0_141 = arith.constant 0 : index
    %c0_142 = arith.constant 0 : index
    %97 = vector.load %arg6[%c0_138, %c0_139, %c1_140, %c0_141, %c0_142] : memref<2x8x2x16x128xf32, #tpu.memory_space<vmem>>, vector<2x8x1x16x128xf32>
    %98 = vector.shape_cast %97 : vector<2x8x1x16x128xf32> to vector<2x8x16x128xf32>
    %99 = vector.shape_cast %96 : vector<2x8x16x128xf32> to vector<2x8x1x16x128xf32>
    tpu.vector_store %arg6[%c0_138, %c0_139, %c1_140, %c0_141, %c0_142], %99 {strides = array<i32>} : memref<2x8x2x16x128xf32, #tpu.memory_space<vmem>>, vector<2x8x1x16x128xf32>,
    return
  }
  func.func @transform_0(%arg0: i32) -> (i32, i32, i32, i32) {
    %c0_i32 = arith.constant 0 : i32
    %c0_i32_0 = arith.constant 0 : i32
    %c0_i32_1 = arith.constant 0 : i32
    %c0_i32_2 = arith.constant 0 : i32
    return %arg0, %c0_i32, %c0_i32_0, %c0_i32_1 : i32, i32, i32, i32
  }
  func.func @transform_1(%arg0: i32) -> (i32, i32, i32, i32) {
    %c0_i32 = arith.constant 0 : i32
    %c0_i32_0 = arith.constant 0 : i32
    %c0_i32_1 = arith.constant 0 : i32
    %c0_i32_2 = arith.constant 0 : i32
    %c0_i32_3 = arith.constant 0 : i32
    return %c0_i32, %c0_i32_0, %c0_i32_1, %c0_i32_2 : i32, i32, i32, i32
  }
  func.func @transform_2(%arg0: i32) -> (i32, i32, i32) {
    %c0_i32 = arith.constant 0 : i32
    %c0_i32_0 = arith.constant 0 : i32
    %c0_i32_1 = arith.constant 0 : i32
    %c0_i32_2 = arith.constant 0 : i32
    return %c0_i32, %c0_i32_0, %c0_i32_1 : i32, i32, i32
  }
  func.func @transform_3(%arg0: i32) -> (i32, i32, i32) {
    %c0_i32 = arith.constant 0 : i32
    %c0_i32_0 = arith.constant 0 : i32
    %c0_i32_1 = arith.constant 0 : i32
    %c0_i32_2 = arith.constant 0 : i32
    return %c0_i32, %c0_i32_0, %c0_i32_1 : i32, i32, i32
  }
  func.func @transform_4(%arg0: i32) -> (i32, i32) {
    %c0_i32 = arith.constant 0 : i32
    %c0_i32_0 = arith.constant 0 : i32
    %c0_i32_1 = arith.constant 0 : i32
    return %c0_i32, %c0_i32_0 : i32, i32
  }
  func.func @transform_5(%arg0: i32) -> (i32, i32, i32, i32, i32) {
    %c0_i32 = arith.constant 0 : i32
    %c0_i32_0 = arith.constant 0 : i32
    %c0_i32_1 = arith.constant 0 : i32
    %c0_i32_2 = arith.constant 0 : i32
    %c0_i32_3 = arith.constant 0 : i32
    return %arg0, %c0_i32, %c0_i32_0, %c0_i32_1, %c0_i32_2 : i32, i32, i32, i32, i32
  }
}

</mosaic_0001>

<bundles_post_ra>
// kernel: tpu_custom_call.1
= control target key start
LH: loop header
LB: loop body
LE: loop exit
PB: predicated region body
PF: predicated region fallthrough
CT: control target
= control target key end

     0   :  { %10 = vsyncpa [#allocation5], 0  ;;  %s7244_s0 = inlined_call_operand.hbm [shape: f32[4,8,8,128], index: 0, kind: input, shape index: {}]   ;;  %s7245_s1 = inlined_call_operand.hbm [shape: f32[2,3,384,128], index: 1, kind: input, shape index: {}]   ;;  %s7246_s2 = inlined_call_operand.hbm [shape: f32[2,1,128], index: 2, kind: input, shape index: {}]   ;;  %s7247_s3 = inlined_call_operand.hbm [shape: f32[2,128,256], index: 3, kind: input, shape index: {}]   ;;  %s7248_s4 = inlined_call_operand.hbm [shape: f32[1,256], index: 4, kind: input, shape index: {}]   ;;  %s7249_s5 = inlined_call_operand.hbm [shape: f32[4,8,2,16,128], index: 5, kind: output, shape index: {}]  }
   0x1   :  { %12 = vsyncpa [#allocation5 + $0x1], 0 }
   0x2   :  { %13 = vsyncpa [#allocation8], 0 }
   0x3   :  { %14 = vsyncpa [#allocation11], 0 }
   0x4   :  { %15 = vsyncpa [#allocation6], 0 }
   0x5   :  { %17 = vsyncpa [#allocation6 + $0x1], 0  ;;  %s5547_s18 = smov 0   ;;  %s5549_s19 = smov 0  }
   0x6   :  { %s5551_s20 = smov 0   ;;  %s5553_s21 = smov 0  }
   0x7 LB: > { %s5568_s22 = sadd.s32 4294967295, %s5501_s21   ;;  %s4434_s23 = sadd.s32 4294967294, %s5501_s21   ;;  %s5501_s21 = sphi %s5553_s21, %s7307_s21   ;;  %s5497_s20 = sphi %s5551_s20, %s7306_s20   ;;  %s5493_s19 = sphi %s5549_s19, %s7305_s19   ;;  %s5489_s18 = sphi %s5547_s18, %s7304_s18  }
   0x8   : > { %p43_p0 = scmp.ne.s32.totalorder %s5493_s19, %s5489_s18  ;;  %p7250_p1 = scmp.eq.s32.totalorder %s5568_s22, 0 }
   0x9   : > { %p157_p3 = scmp.eq.s32.totalorder %s4434_s23, 1  ;;  %p4435_p5 = scmp.ge.s32.totalorder %s5501_s21, 1 }
   0xa   : > { %p5577_p4 = por %p7250_p1, %p43_p0  ;;  %p164_p7 = scmp.lt.s32.totalorder %s5501_s21, 3 }
   0xb   : > { %p5582_p6 = por %p157_p3, %p43_p0  ;;  %s5503_s27 = smov [#allocation7]  }
   0xc   : > { %s7266_s24 = scalar_select %p5577_p4, 1, 0 }
   0xd   : > { %s7267_s25 = scalar_select %p5582_p6, 1, 0 }
   0xe   : > { %p5587_p8 = pnand %p4435_p5, %p164_p7  ;;  %s176_s28 = sshll.u32 %s5503_s27, 4  ;;  %s177_s28 = int_to_ptr.vmem [resolvable:$true] %s176_s28 }
   0xf   : > { %s5504_s30 = smov [#allocation10]   ;;  %s5308_s7 = scalar_lea.vmem %s177_s28, 36864 }
  0x10   : > { %s7268_s26 = scalar_select %p5587_p8, 1, 0 }
  0x11   : > { %p5200_p9 = pneg %p5587_p8  ;;  %s202_s6 = sshll.u32 %s5504_s30, 4  ;;  %s203_s6 = int_to_ptr.vmem [resolvable:$true] %s202_s6 }
  0x12   : > { %p5309_p13 = scmp.ne.s32.totalorder %s177_s28, %s5308_s7  ;;  %p5316_p5 = scmp.lt.s32.totalorder %s177_s28, %s177_s28 }
  0x13   : > { %p5596_p11 = pnand %p5200_p9, %p7250_p1  ;;  %p5317_p7 = scmp.lt.s32.totalorder %s5308_s7, %s5308_s7 }
  0x15   : > { %p5299_p12 = pneg %p5596_p11  ;;  %p5318_p10 = por %p5317_p7, %p5316_p5 }
  0x17   : > { %p5311_p0 = pnand %p5309_p13, %p5299_p12 }
  0x19   : > { %p5312_p3 = pneg %p5311_p0 }
  0x1b   : > { %p5319_p9 = pnand %p5318_p10, %p5312_p3 }
  0x1d   : > { %5322 = shalt.err (!%p5319_p9)
}
  0x1e   : > { %s7251_s8 = smov 128   ;;  %s5506_s9 = smov 8  }
  0x1f   : > { %5203 = dma.hbm_to_vmem [thread:$0]  (!%p5596_p11), %s7245_s1, 36864, %s177_s28, [#allocation8], %s7251_s8, %s7251_s8, %s5506_s9  }
  0x20   : > { %s5334_s12 = scalar_lea.vmem %s203_s6, 8192  ;;  %p5342_p10 = scmp.lt.s32.totalorder %s203_s6, %s203_s6 }
  0x21   : > { %p5335_p13 = scmp.ne.s32.totalorder %s203_s6, %s5334_s12  ;;  %p5343_p3 = scmp.lt.s32.totalorder %s5334_s12, %s5334_s12 }
  0x23   : > { %p5337_p0 = pnand %p5335_p13, %p5299_p12  ;;  %p5344_p7 = por %p5343_p3, %p5342_p10 }
  0x25   : > { %p5338_p5 = pneg %p5337_p0 }
  0x27   : > { %p5345_p9 = pnand %p5344_p7, %p5338_p5 }
  0x29   : > { %5348 = shalt.err (!%p5345_p9)
}
  0x2a   : > { %s5507_s13 = smov 256   ;;  %s5508_s14 = smov 16  }
  0x2b   : > { %5209 = dma.hbm_to_vmem [thread:$0]  (!%p5596_p11), %s7247_s3, 8192, %s203_s6, [#allocation11], %s5507_s13, %s5507_s13, %s5508_s14  }
  0x2c   : > { %s5509_s17 = smov [#allocation9]   ;;  %s5510_s27 = smov [#allocation12]  }
  0x2d   : > { %s189_s23 = sshll.u32 %s5509_s17, 4  ;;  %s216_s28 = sshll.u32 %s5510_s27, 4  ;;  %s190_s23 = int_to_ptr.vmem [resolvable:$true] %s189_s23  ;;  %s217_s28 = int_to_ptr.vmem [resolvable:$true] %s216_s28 }
  0x2e   : > { %s5360_s30 = scalar_lea.vmem %s190_s23, 32  ;;  %p5368_p10 = scmp.lt.s32.totalorder %s190_s23, %s190_s23 }
  0x2f   : > { %p5361_p13 = scmp.ne.s32.totalorder %s190_s23, %s5360_s30  ;;  %p5369_p3 = scmp.lt.s32.totalorder %s5360_s30, %s5360_s30 }
  0x31   : > { %p5363_p0 = pnand %p5361_p13, %p5299_p12  ;;  %p5370_p7 = por %p5369_p3, %p5368_p10 }
  0x33   : > { %p5364_p5 = pneg %p5363_p0 }
  0x35   : > { %p5371_p9 = pnand %p5370_p7, %p5364_p5 }
  0x37   : > { %5374 = shalt.err (!%p5371_p9)
}
  0x38   : > { %s5511_s7 = smov 1   ;;  %s5386_s11 = scalar_lea.vmem %s217_s28, 32 }
  0x39   : > { %5206 = dma.hbm_to_vmem [thread:$0]  (!%p5596_p11), %s7246_s2, 32, %s190_s23, [#allocation8], %s5508_s14, %s5508_s14, %s5511_s7  }
  0x3a   : > { %p5387_p1 = scmp.ne.s32.totalorder %s217_s28, %s5386_s11  ;;  %p5394_p2 = scmp.lt.s32.totalorder %s217_s28, %s217_s28 }
  0x3b   : > { %p5395_p6 = scmp.lt.s32.totalorder %s5386_s11, %s5386_s11 }
  0x3c   : > { %p5389_p13 = pnand %p5387_p1, %p5299_p12 }
  0x3d   : > { %p5396_p10 = por %p5395_p6, %p5394_p2 }
  0x3e   : > { %p5390_p0 = pneg %p5389_p13 }
  0x40   : > { %p5397_p5 = pnand %p5396_p10, %p5390_p0 }
  0x42   : > { %5400 = shalt.err (!%p5397_p5)
}
  0x43   : > { %5212 = dma.hbm_to_vmem [thread:$0]  (!%p5596_p11), %s7248_s4, 32, %s217_s28, [#allocation11]  }
  0x44   : > { %s5638_s14 = sadd.s32 1, %s5501_s21   ;;  %s30_s29 = sadd.s32 1, %s5497_s20 }
  0x45   : > { %s27_s15 = ssub.s32 %s5501_s21, %s5638_s14  ;;  %p37_p2 = scmp.ne.s32.totalorder %s5497_s20, %s5493_s19 }
  0x46   : > { %p28_p1 = scmp.eq.s32.totalorder %s27_s15, 0  ;;  %p38_p6 = scmp.eq.s32.totalorder %s5501_s21, 0 }
  0x47   : > { %p5225_p12 = scmp.lt.s32.totalorder %s5501_s21, 2  ;;  %p7270_p7 = scmp.eq.s32.totalorder %s5568_s22, 1 }
  0x48   : > { %s5648_s16 = scalar_select %p28_p1, %s5497_s20, %s30_s29  }
  0x49   : > { %p39_p3 = por %p38_p6, %p37_p2  ;;  %p5652_p9 = por %p7270_p7, %p37_p2 }
  0x4a   : > { %s227_s23 = sand.u32 1, %s5497_s20   ;;  %s4525_s27 = sshll.u32 %s5501_s21, 11 }
  0x4b   : > { %s7271_s17 = scalar_select %p5652_p9, 1, 0 }
  0x4c   : > { %s4441_s28 = sshll.u32 %s227_s23, 7  ;;  %s5661_s6 = scalar_lea.hbm %s7244_s0, %s4525_s27 }
  0x4d   : > { %s231_s10 = scalar_lea.vmem [#allocation4], %s4441_s28  ;;  %p5663_p11 = pnand %p5225_p12, %p39_p3 }
  0x4e   : > { %s239_s11 = sshll.u32 %s231_s10, 4  ;;  %s5669_s13 = scalar_lea.sflag [#allocation5], %s227_s23  ;;  %s5667_s11 = int_to_ptr.vmem [resolvable:$true] %s239_s11 }
  0x4f   : > { %s5401_s15 = scalar_lea.hbm %s5661_s6, 2048  ;;  %p5403_p0 = pneg %p5663_p11 }
  0x50   : > { %p5402_p13 = scmp.ne.s32.totalorder %s5661_s6, %s5401_s15  ;;  %s5406_s28 = scalar_lea.hbm %s7244_s0, 4096 }
  0x51   : > { %p5407_p1 = scmp.lt.s32.totalorder %s5661_s6, %s7244_s0  ;;  %p5408_p2 = scmp.lt.s32.totalorder %s5406_s28, %s5401_s15 }
  0x52   : > { %p5404_p10 = pnand %p5403_p0, %p5402_p13 }
  0x53   : > { %p5409_p6 = por %p5408_p2, %p5407_p1 }
  0x54   : > { %p5405_p5 = pneg %p5404_p10 }
  0x56   : > { %p5410_p12 = pnand %p5409_p6, %p5405_p5 }
  0x58   : > { %5413 = shalt.err (!%p5410_p12)
}
  0x59   : > { %s5414_s23 = scalar_lea.vmem %s5667_s11, 2048  ;;  %s5512_s10 = smov [#allocation4]  }
  0x5a   : > { %p5415_p3 = scmp.ne.s32.totalorder %s5667_s11, %s5414_s23  ;;  %s5419_s8 = sshll.u32 %s5512_s10, 4  ;;  %s5420_s8 = int_to_ptr.vmem [resolvable:$false] %s5419_s8 }
  0x5b   : > { %s5421_s29 = scalar_lea.vmem %s5420_s8, 4096  ;;  %p5422_p10 = scmp.lt.s32.totalorder %s5667_s11, %s5420_s8 }
  0x5c   : > { %p5417_p7 = pnand %p5415_p3, %p5403_p0  ;;  %p5423_p9 = scmp.lt.s32.totalorder %s5421_s29, %s5414_s23 }
  0x5e   : > { %p5418_p13 = pneg %p5417_p7  ;;  %p5424_p4 = por %p5423_p9, %p5422_p10 }
  0x60   : > { %p5425_p8 = pnand %p5424_p4, %p5418_p13 }
  0x62   : > { %5428 = shalt.err (!%p5425_p8)
}
  0x63   : > { %s7273_s15 = smov 128   ;;  %p7274_p0 = scmp.ne.s32.totalorder %s7268_s26, 0 }
  0x64   : > { %5216 = dma.hbm_to_vmem [thread:$0]  (!%p5663_p11), %s5661_s6, 2048, %s5667_s11, %s5669_s13, %s7273_s15, %s7273_s15, %s5506_s9  }
  0x65   : > { %251 = sbr.rel (%p7274_p0) target bundleno = 1195 (0x4ab), region = 40 }
  0x6a   : > { %s5696_s27 = sand.u32 1, %s5493_s19   ;;  %p7275_p4 = scmp.ne.s32.totalorder %s7266_s24, 0 }
  0x6b   : > { %s4446_s8 = sshll.u32 %s5696_s27, 7  ;;  %s254_s28 = scalar_lea.sflag [#allocation5], %s5696_s27 }
  0x6c   : > { %s5700_s30 = scalar_lea.vmem [#allocation4], %s4446_s8 }
  0x6d   : > { %5472 = dma.done.wait (%p7275_p4), %s254_s28, 2048  }
  0x6e   : > { %5474 = vsyncadd (%p7275_p4), %s254_s28, 4294965248  ;;  %p7276_p8 = scmp.eq.s32.totalorder %s5568_s22, 0 }
  0x70   : > { %5476 = dma.done.wait (%p7276_p8), [#allocation8], 36896   ;;  %p7277_p9 = pmov %p7276_p8 }
  0x71   : > { %p7278_p11 = pmov %p7276_p8 }
  0x72   : > { %5478 = vsyncadd (%p7277_p9), [#allocation8], 4294930400 }
  0x73   : > { %5480 = dma.done.wait (%p7278_p11), [#allocation11], 8224   ;;  %p7279_p5 = pmov %p7276_p8 }
  0x74   : > { %v7255_v0 = vmov 0.0   ;;  %v579_v1 = vld [vmem:[#allocation7 + $0x78] sm:$0xff]  ;;  %v578_v3 = vld [vmem:[#allocation7 + $0x70] sm:$0xff]  ;;  %v577_v5 = vld [vmem:[#allocation7 + $0x68] sm:$0xff]  ;;  %s4451_s24 = sshll.u32 %s5696_s27, 9  ;;  %s4559_s9 = sshll.u32 %s5568_s22, 13 }
  0x75   : > { %5482 = vsyncadd (%p7279_p5), [#allocation11], 4294959072  ;;  %612 = vmatprep.subr.mxu0 %v7255_v0  ;;  %302 = vst [vmem:[#allocation2] sm:$0xff] %v7255_v0  ;;  %v611_v2 = vld [vmem:[#allocation7 + $0x178] sm:$0xff]  ;;  %v610_v4 = vld [vmem:[#allocation7 + $0x170] sm:$0xff]  ;;  %s7072_s26 = scalar_lea.vmem [#allocation13], %s4451_s24  ;;  %s7197_s13 = scalar_lea.hbm %s7249_s5, %s4559_s9 }
  0x76   : > { %303 = vst [vmem:[#allocation2 + $0x8] sm:$0x3] %v7255_v0  ;;  %304 = vst [vmem:[#allocation2 + $0xa0] sm:$0xff] %v7255_v0  ;;  %613 = vmatpush1.msra.mxu0 %v579_v1  ;;  %4776 = vmatprep.subr.mxu1 %v611_v2  ;;  %v609_v6 = vld [vmem:[#allocation7 + $0x168] sm:$0xff]  ;;  %v576_v7 = vld [vmem:[#allocation7 + $0x60] sm:$0xff]  ;;  %s4323_s6 = sshll.u32 %s7072_s26, 4  ;;  %s7199_s6 = int_to_ptr.vmem [resolvable:$true] %s4323_s6 }
  0x77   : > { %305 = vst [vmem:[#allocation2 + $0xa8] sm:$0x3] %v7255_v0  ;;  %307 = vst [vmem:[#allocation2 + $0x90] sm:$0xff] %v7255_v0  ;;  %614 = vmatprep.subr.mxu0 %v7255_v0  ;;  %4777 = vmatpush3.msra.mxu1 %v611_v2  ;;  %v608_v8 = vld [vmem:[#allocation7 + $0x160] sm:$0xff]  ;;  %v575_v9 = vld [vmem:[#allocation7 + $0x58] sm:$0xff]  ;;  %s4309_s22 = scalar_lea.sflag [#allocation6], %s5696_s27 }
  0x78   : > { %308 = vst [vmem:[#allocation2 + $0x98] sm:$0x3] %v7255_v0  ;;  %309 = vst [vmem:[#allocation2 + $0x130] sm:$0xff] %v7255_v0  ;;  %615 = vmatpush1.msra.mxu0 %v578_v3  ;;  %4778 = vmatprep.subr.mxu1 %v610_v4  ;;  %v607_v10 = vld [vmem:[#allocation7 + $0x158] sm:$0xff]  ;;  %v574_v11 = vld [vmem:[#allocation7 + $0x50] sm:$0xff]  ;;  %s5429_s7 = scalar_lea.vmem %s7199_s6, 8192 }
  0x79   : > { %310 = vst [vmem:[#allocation2 + $0x138] sm:$0x3] %v7255_v0  ;;  %312 = vst [vmem:[#allocation2 + $0x10] sm:$0x1] %v7255_v0  ;;  %616 = vmatprep.subr.mxu0 %v7255_v0  ;;  %4779 = vmatpush3.msra.mxu1 %v610_v4  ;;  %v606_v12 = vld [vmem:[#allocation7 + $0x150] sm:$0xff]  ;;  %v573_v13 = vld [vmem:[#allocation7 + $0x48] sm:$0xff]  ;;  %p5430_p1 = scmp.ne.s32.totalorder %s7199_s6, %s5429_s7 }
  0x7a   : > { %313 = vst [vmem:[#allocation2 + $0x20] sm:$0x1] %v7255_v0  ;;  %314 = vst [vmem:[#allocation2 + $0x30] sm:$0x1] %v7255_v0  ;;  %617 = vmatpush1.msra.mxu0 %v577_v5  ;;  %4780 = vmatprep.subr.mxu1 %v609_v6  ;;  %v605_v14 = vld [vmem:[#allocation7 + $0x148] sm:$0xff]  ;;  %v5769_v15 = vld [vmem:[%s5700_s30] sm:$0xff] }
  0x7b   : > { %315 = vst [vmem:[#allocation2 + $0x40] sm:$0x1] %v7255_v0  ;;  %316 = vst [vmem:[#allocation2 + $0x50] sm:$0x1] %v7255_v0  ;;  %618 = vmatprep.subr.mxu0 %v7255_v0  ;;  %4781 = vmatpush3.msra.mxu1 %v609_v6  ;;  %v572_v16 = vld [vmem:[#allocation7 + $0x40] sm:$0xff]  ;;  %v571_v18 = vld [vmem:[#allocation7 + $0x38] sm:$0xff] }
  0x7c   : > { %317 = vst [vmem:[#allocation2 + $0x60] sm:$0x1] %v7255_v0  ;;  %318 = vst [vmem:[#allocation2 + $0x70] sm:$0x1] %v7255_v0  ;;  %619 = vmatpush1.msra.mxu0 %v576_v7  ;;  %4782 = vmatprep.subr.mxu1 %v608_v8  ;;  %v604_v17 = vld [vmem:[#allocation7 + $0x140] sm:$0xff]  ;;  %v603_v19 = vld [vmem:[#allocation7 + $0x138] sm:$0xff] }
  0x7d   : > { %319 = vst [vmem:[#allocation2 + $0x80] sm:$0x1] %v7255_v0  ;;  %322 = vst [vmem:[#allocation2 + $0xb0] sm:$0x1] %v7255_v0  ;;  %620 = vmatprep.subr.mxu0 %v7255_v0  ;;  %4783 = vmatpush3.msra.mxu1 %v608_v8  ;;  %v570_v20 = vld [vmem:[#allocation7 + $0x30] sm:$0xff]  ;;  %v569_v22 = vld [vmem:[#allocation7 + $0x28] sm:$0xff] }
  0x7e   : > { %323 = vst [vmem:[#allocation2 + $0xc0] sm:$0x1] %v7255_v0  ;;  %324 = vst [vmem:[#allocation2 + $0xd0] sm:$0x1] %v7255_v0  ;;  %621 = vmatpush1.msra.mxu0 %v575_v9  ;;  %4784 = vmatprep.subr.mxu1 %v607_v10  ;;  %v602_v21 = vld [vmem:[#allocation7 + $0x130] sm:$0xff]  ;;  %v601_v23 = vld [vmem:[#allocation7 + $0x128] sm:$0xff] }
  0x7f   : > { %325 = vst [vmem:[#allocation2 + $0xe0] sm:$0x1] %v7255_v0  ;;  %326 = vst [vmem:[#allocation2 + $0xf0] sm:$0x1] %v7255_v0  ;;  %622 = vmatprep.subr.mxu0 %v7255_v0  ;;  %4785 = vmatpush3.msra.mxu1 %v607_v10  ;;  %v568_v24 = vld [vmem:[#allocation7 + $0x20] sm:$0xff]  ;;  %v5778_v26 = vld [vmem:[%s5700_s30 + $0x8] sm:$0xff] }
  0x80   : > { %327 = vst [vmem:[#allocation2 + $0x100] sm:$0x1] %v7255_v0  ;;  %328 = vst [vmem:[#allocation2 + $0x110] sm:$0x1] %v7255_v0  ;;  %623 = vmatpush1.msra.mxu0 %v574_v11  ;;  %4786 = vmatprep.subr.mxu1 %v606_v12  ;;  %v600_v25 = vld [vmem:[#allocation7 + $0x120] sm:$0xff]  ;;  %v5782_v27 = vld [vmem:[%s5700_s30 + $0x10] sm:$0xff] }
  0x81   : > { %329 = vst [vmem:[#allocation2 + $0x120] sm:$0x1] %v7255_v0  ;;  %332 = vst [vmem:[#allocation2 + $0x19] sm:$0x1] %v7255_v0  ;;  %624 = vmatprep.subr.mxu0 %v7255_v0  ;;  %4787 = vmatpush3.msra.mxu1 %v606_v12  ;;  %v567_v28 = vld [vmem:[#allocation7 + $0x18] sm:$0xff]  ;;  %v566_v31 = vld [vmem:[#allocation7 + $0x10] sm:$0xff] }
  0x82   : > { %333 = vst [vmem:[#allocation2 + $0x29] sm:$0x1] %v7255_v0  ;;  %334 = vst [vmem:[#allocation2 + $0x39] sm:$0x1] %v7255_v0  ;;  %625 = vmatpush1.msra.mxu0 %v573_v13  ;;  %4788 = vmatprep.subr.mxu1 %v605_v14  ;;  %v599_v29 = vld [vmem:[#allocation7 + $0x118] sm:$0xff]  ;;  %v598_v32 = vld [vmem:[#allocation7 + $0x110] sm:$0xff] }
  0x83   : > { %335 = vst [vmem:[#allocation2 + $0x49] sm:$0x1] %v7255_v0  ;;  %336 = vst [vmem:[#allocation2 + $0x59] sm:$0x1] %v7255_v0  ;;  %626 = vmatprep.subr.mxu0 %v7255_v0  ;;  %4789 = vmatpush3.msra.mxu1 %v605_v14  ;;  %v5787_v30 = vld [vmem:[%s5700_s30 + $0x18] sm:$0xff]  ;;  %v5792_v33 = vld [vmem:[%s5700_s30 + $0x20] sm:$0xff] }
  0x84   : > { %337 = vst [vmem:[#allocation2 + $0x69] sm:$0x1] %v7255_v0  ;;  %338 = vst [vmem:[#allocation2 + $0x79] sm:$0x1] %v7255_v0  ;;  %627 = vmatpush1.msra.mxu0 %v572_v16  ;;  %4790 = vmatprep.subr.mxu1 %v604_v17  ;;  %v5796_v34 = vld [vmem:[%s5700_s30 + $0x28] sm:$0xff]  ;;  %v5801_v37 = vld [vmem:[%s5700_s30 + $0x30] sm:$0xff] }
  0x85   : > { %339 = vst [vmem:[#allocation2 + $0x89] sm:$0x1] %v7255_v0  ;;  %342 = vst [vmem:[#allocation2 + $0xb9] sm:$0x1] %v7255_v0  ;;  %628 = vmatprep.subr.mxu0 %v7255_v0  ;;  %4791 = vmatpush3.msra.mxu1 %v604_v17  ;;  %v565_v35 = vld [vmem:[#allocation7 + $0x8] sm:$0xff]  ;;  %v5805_v38 = vld [vmem:[%s5700_s30 + $0x38] sm:$0xff] }
  0x86   : > { %343 = vst [vmem:[#allocation2 + $0xc9] sm:$0x1] %v7255_v0  ;;  %344 = vst [vmem:[#allocation2 + $0xd9] sm:$0x1] %v7255_v0  ;;  %629 = vmatpush1.msra.mxu0 %v571_v18  ;;  %4792 = vmatprep.subr.mxu1 %v603_v19  ;;  %v597_v36 = vld [vmem:[#allocation7 + $0x108] sm:$0xff]  ;;  %v564_v39 = vld [vmem:[#allocation7] sm:$0xff] }
  0x87   : > { %345 = vst [vmem:[#allocation2 + $0xe9] sm:$0x1] %v7255_v0  ;;  %346 = vst [vmem:[#allocation2 + $0xf9] sm:$0x1] %v7255_v0  ;;  %630 = vmatprep.subr.mxu0 %v7255_v0  ;;  %4793 = vmatpush3.msra.mxu1 %v603_v19  ;;  %v596_v40 = vld [vmem:[#allocation7 + $0x100] sm:$0xff]  ;;  %v595_v41 = vld [vmem:[#allocation7 + $0xf8] sm:$0xff] }
  0x88   : > { %347 = vst [vmem:[#allocation2 + $0x109] sm:$0x1] %v7255_v0  ;;  %348 = vst [vmem:[#allocation2 + $0x119] sm:$0x1] %v7255_v0  ;;  %631 = vmatpush1.msra.mxu0 %v570_v20  ;;  %4794 = vmatprep.subr.mxu1 %v602_v21  ;;  %v5813_v43 = vld [vmem:[%s5700_s30 + $0x40] sm:$0xff]  ;;  %v594_v45 = vld [vmem:[#allocation7 + $0xf0] sm:$0xff] }
  0x89   : > { %349 = vst [vmem:[#allocation2 + $0x129] sm:$0x1] %v7255_v0  ;;  %311 = vst [vmem:[#allocation2] sm:$0x1] %v7255_v0  ;;  %632 = vmatprep.subr.mxu0 %v7255_v0  ;;  %4795 = vmatpush3.msra.mxu1 %v602_v21  ;;  %v5820_v46 = vld [vmem:[%s5700_s30 + $0x48] sm:$0xff]  ;;  %v950_v47 = vld [vmem:[#allocation7 + $0x1f8] sm:$0xff] }
  0x8a   : > { %320 = vst [vmem:[#allocation2 + $0x90] sm:$0x1] %v7255_v0  ;;  %321 = vst [vmem:[#allocation2 + $0xa0] sm:$0x1] %v7255_v0  ;;  %633 = vmatpush1.msra.mxu0 %v569_v22  ;;  %4796 = vmatprep.subr.mxu1 %v601_v23  ;;  %v5825_v48 = vld [vmem:[%s5700_s30 + $0x50] sm:$0xff]  ;;  %v593_v49 = vld [vmem:[#allocation7 + $0xe8] sm:$0xff] }
  0x8b   : > { %330 = vst [vmem:[#allocation2 + $0x130] sm:$0x1] %v7255_v0  ;;  %331 = vst [vmem:[#allocation2 + $0x9] sm:$0x1] %v7255_v0  ;;  %634 = vmatprep.subr.mxu0 %v7255_v0  ;;  %4797 = vmatpush3.msra.mxu1 %v601_v23  ;;  %v949_v50 = vld [vmem:[#allocation7 + $0x1f0] sm:$0xff]  ;;  %v5832_v51 = vld [vmem:[%s5700_s30 + $0x58] sm:$0xff] }
  0x8c   : > { %340 = vst [vmem:[#allocation2 + $0x99] sm:$0x1] %v7255_v0  ;;  %341 = vst [vmem:[#allocation2 + $0xa9] sm:$0x1] %v7255_v0  ;;  %635 = vmatpush1.msra.mxu0 %v568_v24  ;;  %4798 = vmatprep.subr.mxu1 %v600_v25  ;;  %v592_v52 = vld [vmem:[#allocation7 + $0xe0] sm:$0xff]  ;;  %v948_v54 = vld [vmem:[#allocation7 + $0x1e8] sm:$0xff] }
  0x8d   : > { %350 = vst [vmem:[#allocation2 + $0x139] sm:$0x1] %v7255_v0  ;;  %368 = vst [vmem:[#allocation2 + $0x11] sm:$0xff] %v5769_v15  ;;  %636 = vmatprep.subr.mxu0 %v7255_v0  ;;  %4799 = vmatpush3.msra.mxu1 %v600_v25  ;;  %v5837_v53 = vld [vmem:[%s5700_s30 + $0x60] sm:$0xff]  ;;  %v5842_v55 = vld [vmem:[%s5700_s30 + $0x68] sm:$0xff]  ;;  %p7301_p2 = scmp.ne.s32.totalorder %s7271_s17, 0 }
  0x8e   : > { %369 = vst [vmem:[#allocation2 + $0x21] sm:$0xff] %v5778_v26  ;;  %370 = vst [vmem:[#allocation2 + $0x31] sm:$0xff] %v5782_v27  ;;  %637 = vmatpush1.msra.mxu0 %v567_v28  ;;  %4800 = vmatprep.subr.mxu1 %v599_v29  ;;  %v591_v56 = vld [vmem:[#allocation7 + $0xd8] sm:$0xff]  ;;  %v5847_v57 = vld [vmem:[%s5700_s30 + $0x70] sm:$0xff]  ;;  %s5514_s23 = smov [#allocation13]  }
  0x8f   : > { %371 = vst [vmem:[#allocation2 + $0x41] sm:$0xff] %v5787_v30  ;;  %372 = vst [vmem:[#allocation2 + $0x51] sm:$0xff] %v5792_v33  ;;  %638 = vmatprep.subr.mxu0 %v7255_v0  ;;  %4801 = vmatpush3.msra.mxu1 %v599_v29  ;;  %v947_v58 = vld [vmem:[#allocation7 + $0x1e0] sm:$0xff]  ;;  %v5852_v59 = vld [vmem:[%s5700_s30 + $0x78] sm:$0xff]  ;;  %p5431_p6 = pnand %p5430_p1, %p7301_p2  ;;  %s5433_s10 = sshll.u32 %s5514_s23, 4  ;;  %s5434_s10 = int_to_ptr.vmem [resolvable:$false] %s5433_s10 }
  0x90   : > { %373 = vst [vmem:[#allocation2 + $0x61] sm:$0xff] %v5796_v34  ;;  %639 = vmatpush1.msra.mxu0 %v566_v31  ;;  %4802 = vmatprep.subr.mxu1 %v598_v32  ;;  %374 = vst [vmem:[#allocation2 + $0x71] sm:$0xff] %v5801_v37  ;;  %v590_v60 = vld [vmem:[#allocation7 + $0xd0] sm:$0xff]  ;;  %v946_v61 = vld [vmem:[#allocation7 + $0x1d8] sm:$0xff]  ;;  %s5435_s29 = scalar_lea.vmem %s5434_s10, 16384  ;;  %p5436_p3 = scmp.lt.s32.totalorder %s7199_s6, %s5434_s10 }
  0x91   : > { %640 = vmatprep.subr.mxu0 %v7255_v0  ;;  %4803 = vmatpush3.msra.mxu1 %v598_v32  ;;  %375 = vst [vmem:[#allocation2 + $0x81] sm:$0xff] %v5805_v38  ;;  %376 = vst [vmem:[#allocation2 + $0xb1] sm:$0xff] %v5813_v43  ;;  %v589_v62 = vld [vmem:[#allocation7 + $0xc8] sm:$0xff]  ;;  %v945_v63 = vld [vmem:[#allocation7 + $0x1d0] sm:$0xff]  ;;  %p5432_p12 = pneg %p5431_p6  ;;  %p5437_p7 = scmp.lt.s32.totalorder %s5435_s29, %s5429_s7 }
  0x92   : > { %641 = vmatpush1.msra.mxu0 %v565_v35  ;;  %4804 = vmatprep.subr.mxu1 %v597_v36  ;;  %v5810_v42 = vld [vmem:[#allocation2 + $0x2] sm:$0xff]  ;;  %377 = vst [vmem:[#allocation2 + $0xc1] sm:$0xff] %v5820_v46  ;;  %378 = vst [vmem:[#allocation2 + $0xd1] sm:$0xff] %v5825_v48  ;;  %v587_v3 = vld [vmem:[#allocation7 + $0xb8] sm:$0xff] }
  0x93   : > { %642 = vmatprep.subr.mxu0 %v7255_v0  ;;  %4805 = vmatpush3.msra.mxu1 %v597_v36  ;;  %379 = vst [vmem:[#allocation2 + $0xe1] sm:$0xff] %v5832_v51  ;;  %380 = vst [vmem:[#allocation2 + $0xf1] sm:$0xff] %v5837_v53  ;;  %v588_v1 = vld [vmem:[#allocation7 + $0xc0] sm:$0xff]  ;;  %v944_v2 = vld [vmem:[#allocation7 + $0x1c8] sm:$0xff]  ;;  %p5438_p13 = por %p5437_p7, %p5436_p3 }
  0x94   : > { %643 = vmatpush1.msra.mxu0 %v564_v39  ;;  %4806 = vmatprep.subr.mxu1 %v596_v40  ;;  %v5817_v44 = vld [vmem:[#allocation2 + $0x12] sm:$0xff]  ;;  %381 = vst [vmem:[#allocation2 + $0x101] sm:$0xff] %v5842_v55  ;;  %382 = vst [vmem:[#allocation2 + $0x111] sm:$0xff] %v5847_v57  ;;  %v943_v4 = vld [vmem:[#allocation7 + $0x1c0] sm:$0xff] }
  0x95   : > { %644 = vmatprep.subr.mxu0 %v7255_v0  ;;  %4807 = vmatpush3.msra.mxu1 %v596_v40  ;;  %383 = vst [vmem:[#allocation2 + $0x121] sm:$0xff] %v5852_v59  ;;  %v586_v5 = vld [vmem:[#allocation7 + $0xb0] sm:$0xff]  ;;  %v942_v6 = vld [vmem:[#allocation7 + $0x1b8] sm:$0xff]  ;;  %v585_v7 = vld [vmem:[#allocation7 + $0xa8] sm:$0xff]  ;;  %p5439_p10 = pnand %p5438_p13, %p5432_p12 }
  0x96   : > { %645 = vmatpush2.msra.mxu0 %v595_v41  ;;  %4808 = vmatprep.mubr.f32.mxu1 %v5810_v42  ;;  %v941_v8 = vld [vmem:[#allocation7 + $0x1b0] sm:$0xff]  ;;  %v584_v9 = vld [vmem:[#allocation7 + $0xa0] sm:$0xff]  ;;  %v940_v10 = vld [vmem:[#allocation7 + $0x1a8] sm:$0xff] }
  0x97   : > { %983 = vmatprep.subr.mxu1 %v7255_v0  ;;  %646 = vmatprep.subr.mxu0 %v7255_v0  ;;  %v583_v11 = vld [vmem:[#allocation7 + $0x98] sm:$0xff]  ;;  %v939_v12 = vld [vmem:[#allocation7 + $0x1a0] sm:$0xff]  ;;  %v582_v13 = vld [vmem:[#allocation7 + $0x90] sm:$0xff] }
  0x98   : > { %4809 = vmatmul.mubr.f32.vlgmr.msra.gmra.mxu1 %v5817_v44  ;;  %647 = vmatpush2.msra.mxu0 %v594_v45  ;;  %v938_v14 = vld [vmem:[#allocation7 + $0x198] sm:$0xff]  ;;  %v5874_v16 = vld [vmem:[#allocation2 + $0x22] sm:$0xff]  ;;  %v937_v17 = vld [vmem:[#allocation7 + $0x190] sm:$0xff] }
  0x99   : > { %984 = vmatpush1.msra.mxu1 %v950_v47  ;;  %648 = vmatprep.subr.mxu0 %v7255_v0  ;;  %v581_v18 = vld [vmem:[#allocation7 + $0x88] sm:$0xff]  ;;  %v5878_v19 = vld [vmem:[#allocation2 + $0x32] sm:$0xff]  ;;  %v580_v21 = vld [vmem:[#allocation7 + $0x80] sm:$0xff] }
  0x9a   : > { %985 = vmatprep.subr.mxu1 %v7255_v0  ;;  %649 = vmatpush2.msra.mxu0 %v593_v49  ;;  %v936_v20 = vld [vmem:[#allocation7 + $0x188] sm:$0xff]  ;;  %v5886_v23 = vld [vmem:[#allocation2] sm:$0xff]  ;;  %v982_v28 = vld [vmem:[#allocation7 + $0x2f8] sm:$0xff] }
  0x9b   : > { %986 = vmatpush1.msra.mxu1 %v949_v50  ;;  %650 = vmatprep.subr.mxu0 %v7255_v0  ;;  %v5882_v22 = vld [vmem:[#allocation2 + $0x1] sm:$0xff]  ;;  %v5892_v29 = vld [vmem:[#allocation2 + $0x52] sm:$0xff] }
  0x9c   : > { %987 = vmatprep.subr.mxu1 %v7255_v0  ;;  %651 = vmatpush2.msra.mxu0 %v592_v52  ;;  %v5889_v24 = vld [vmem:[#allocation2 + $0x42] sm:$0xff]  ;;  %v966_v31 = vld [vmem:[#allocation7 + $0x278] sm:$0xff]  ;;  %v5898_v32 = vld [vmem:[#allocation2 + $0x10] sm:$0xff] }
  0x9d   : > { %988 = vmatpush1.msra.mxu1 %v948_v54  ;;  %652 = vmatprep.subr.mxu0 %v7255_v0  ;;  %v935_v25 = vld [vmem:[#allocation7 + $0x180] sm:$0xff]  ;;  %v965_v36 = vld [vmem:[#allocation7 + $0x270] sm:$0xff]  ;;  %v964_v41 = vld [vmem:[#allocation7 + $0x268] sm:$0xff] }
  0x9e   : > { %989 = vmatprep.subr.mxu1 %v7255_v0  ;;  %653 = vmatpush2.msra.mxu0 %v591_v56  ;;  %v5901_v35 = vld [vmem:[#allocation2 + $0x62] sm:$0xff]  ;;  %v5904_v39 = vld [vmem:[#allocation2 + $0x72] sm:$0xff] }
  0x9f   : > { %990 = vmatpush1.msra.mxu1 %v947_v58  ;;  %654 = vmatprep.subr.mxu0 %v7255_v0  ;;  %v981_v40 = vld [vmem:[#allocation7 + $0x2f0] sm:$0xff]  ;;  %v5911_v45 = vld [vmem:[#allocation2 + $0x20] sm:$0xff]  ;;  %v962_v52 = vld [vmem:[#allocation7 + $0x258] sm:$0xff] }
  0xa0   : > { %991 = vmatprep.subr.mxu1 %v7255_v0  ;;  %655 = vmatpush2.msra.mxu0 %v590_v60  ;;  %v5913_v47 = vld [vmem:[#allocation2 + $0x82] sm:$0xff]  ;;  %v5916_v50 = vld [vmem:[#allocation2 + $0x92] sm:$0xff] }
  0xa1   : > { %992 = vmatpush1.msra.mxu1 %v946_v61  ;;  %656 = vmatprep.subr.mxu0 %v7255_v0  ;;  %v963_v49 = vld [vmem:[#allocation7 + $0x260] sm:$0xff]  ;;  %v980_v54 = vld [vmem:[#allocation7 + $0x2e8] sm:$0xff]  ;;  %v5925_v58 = vld [vmem:[#allocation2 + $0x30] sm:$0xff] }
  0xa2   : > { %993 = vmatprep.subr.mxu1 %v7255_v0  ;;  %657 = vmatpush2.msra.mxu0 %v589_v62  ;;  %v5923_v56 = vld [vmem:[#allocation2 + $0xa2] sm:$0xff]  ;;  %v961_v60 = vld [vmem:[#allocation7 + $0x250] sm:$0xff] }
  0xa3   : > { %994 = vmatpush1.msra.mxu1 %v945_v63  ;;  %658 = vmatprep.subr.mxu0 %v7255_v0  ;;  %v5929_v61 = vld [vmem:[#allocation2 + $0xb2] sm:$0xff]  ;;  %v960_v62 = vld [vmem:[#allocation7 + $0x248] sm:$0xff]  ;;  %v979_v63 = vld [vmem:[#allocation7 + $0x2e0] sm:$0xff] }
  0xa4   : > { %995 = vmatprep.subr.mxu1 %v7255_v0  ;;  %659 = vmatpush2.msra.mxu0 %v588_v1  ;;  %v5935_v1 = vld [vmem:[#allocation2 + $0x40] sm:$0xff] }
  0xa5   : > { %996 = vmatpush1.msra.mxu1 %v944_v2  ;;  %660 = vmatprep.subr.mxu0 %v7255_v0  ;;  %v5937_v2 = vld [vmem:[#allocation2 + $0xc2] sm:$0xff] }
  0xa6   : > { %997 = vmatprep.subr.mxu1 %v7255_v0  ;;  %661 = vmatpush2.msra.mxu0 %v587_v3  ;;  %v959_v3 = vld [vmem:[#allocation7 + $0x240] sm:$0xff] }
  0xa7   : > { %998 = vmatpush1.msra.mxu1 %v943_v4  ;;  %662 = vmatprep.subr.mxu0 %v7255_v0  ;;  %v5941_v4 = vld [vmem:[#allocation2 + $0xd2] sm:$0xff] }
  0xa8   : > { %999 = vmatprep.subr.mxu1 %v7255_v0  ;;  %663 = vmatpush2.msra.mxu0 %v586_v5  ;;  %v958_v5 = vld [vmem:[#allocation7 + $0x238] sm:$0xff] }
  0xa9   : > { %1000 = vmatpush1.msra.mxu1 %v942_v6  ;;  %664 = vmatprep.subr.mxu0 %v7255_v0  ;;  %v5945_v6 = vld [vmem:[#allocation2 + $0x50] sm:$0xff] }
  0xaa   : > { %1001 = vmatprep.subr.mxu1 %v7255_v0  ;;  %665 = vmatpush2.msra.mxu0 %v585_v7  ;;  %v5949_v7 = vld [vmem:[#allocation2 + $0xe2] sm:$0xff] }
  0xab   : > { %1002 = vmatpush1.msra.mxu1 %v941_v8  ;;  %666 = vmatprep.subr.mxu0 %v7255_v0  ;;  %v957_v8 = vld [vmem:[#allocation7 + $0x230] sm:$0xff] }
  0xac   : > { %1003 = vmatprep.subr.mxu1 %v7255_v0  ;;  %667 = vmatpush2.msra.mxu0 %v584_v9  ;;  %v978_v9 = vld [vmem:[#allocation7 + $0x2d8] sm:$0xff] }
  0xad   : > { %1004 = vmatpush1.msra.mxu1 %v940_v10  ;;  %668 = vmatprep.subr.mxu0 %v7255_v0  ;;  %v5952_v10 = vld [vmem:[#allocation2 + $0xf2] sm:$0xff] }
  0xae   : > { %1005 = vmatprep.subr.mxu1 %v7255_v0  ;;  %669 = vmatpush2.msra.mxu0 %v583_v11  ;;  %v956_v11 = vld [vmem:[#allocation7 + $0x228] sm:$0xff] }
  0xaf   : > { %1006 = vmatpush1.msra.mxu1 %v939_v12  ;;  %670 = vmatprep.subr.mxu0 %v7255_v0  ;;  %v5958_v12 = vld [vmem:[#allocation2 + $0x60] sm:$0xff] }
  0xb0   : > { %1007 = vmatprep.subr.mxu1 %v7255_v0  ;;  %671 = vmatpush2.msra.mxu0 %v582_v13  ;;  %v5961_v13 = vld [vmem:[#allocation2 + $0x102] sm:$0xff] }
  0xb1   : > { %1008 = vmatpush1.msra.mxu1 %v938_v14  ;;  %672 = vmatprep.subr.mxu0 %v7255_v0  ;;  %v955_v14 = vld [vmem:[#allocation7 + $0x220] sm:$0xff] }
  0xb2   : > { %1009 = vmatprep.subr.mxu1 %v7255_v0  ;;  %4811 = vmatprep.mubr.f32.mxu1 %v5874_v16 }
  0xb3   : > { %1010 = vmatpush1.msra.mxu1 %v937_v17  ;;  %673 = vmatpush2.msra.mxu0 %v581_v18  ;;  %v5964_v17 = vld [vmem:[#allocation2 + $0x112] sm:$0xff] }
  0xb4   : > { %4812 = vmatmul.mubr.f32.gmra.mxu1 %v5878_v19  ;;  %1011 = vmatprep.subr.mxu1 %v7255_v0  ;;  %v977_v18 = vld [vmem:[#allocation7 + $0x2d0] sm:$0xff] }
  0xb5   : > { %674 = vmatprep.subr.mxu0 %v7255_v0  ;;  %1012 = vmatpush1.msra.mxu1 %v936_v20  ;;  %v954_v20 = vld [vmem:[#allocation7 + $0x218] sm:$0xff] }
  0xb6   : > { %675 = vmatpush2.msra.mxu0 %v580_v21  ;;  %676 = vmatprep.mubr.f32.mxu0 %v5882_v22  ;;  %v5971_v21 = vld [vmem:[#allocation2 + $0x70] sm:$0xff] }
  0xb7   : > { %1013 = vmatprep.subr.mxu1 %v7255_v0  ;;  %677 = vmatmul.mubr.f32.vlgmr.msra.gmra.mxu0 %v5886_v23 }
  0xb8   : > { %4814 = vmatprep.mubr.f32.mxu1 %v5889_v24  ;;  %1014 = vmatpush1.msra.mxu1 %v935_v25  ;;  %v5973_v25 = vld [vmem:[#allocation2 + $0x122] sm:$0xff] }
  0xb9   : > { %4838 = vmatprep.subr.mxu0 %v982_v28  ;;  %4815 = vmatmul.mubr.f32.gmra.mxu1 %v5892_v29 }
  0xba   : > { %1015 = vmatprep.subr.mxu1 %v7255_v0  ;;  %4839 = vmatpush3.msra.mxu0 %v982_v28  ;;  %v953_v28 = vld [vmem:[#allocation7 + $0x210] sm:$0xff] }
  0xbb   : > { %1016 = vmatpush2.msra.mxu1 %v966_v31  ;;  %681 = vmatprep.mubr.f32.mxu0 %v5769_v15  ;;  %v5976_v31 = vld [vmem:[#allocation2 + $0x132] sm:$0xff] }
  0xbc   : > { %1017 = vmatprep.subr.mxu1 %v7255_v0  ;;  %682 = vmatmul.mubr.f32.gmra.mxu0 %v5898_v32 }
  0xbd   : > { %4817 = vmatprep.mubr.f32.mxu1 %v5901_v35  ;;  %1018 = vmatpush2.msra.mxu1 %v965_v36  ;;  %v952_v36 = vld [vmem:[#allocation7 + $0x208] sm:$0xff] }
  0xbe   : > { %4818 = vmatmul.mubr.f32.gmra.mxu1 %v5904_v39  ;;  %1019 = vmatprep.subr.mxu1 %v7255_v0 }
  0xbf   : > { %4840 = vmatprep.subr.mxu0 %v981_v40  ;;  %1020 = vmatpush2.msra.mxu1 %v964_v41  ;;  %v951_v41 = vld [vmem:[#allocation7 + $0x200] sm:$0xff] }
  0xc0   : > { %4841 = vmatpush3.msra.mxu0 %v981_v40  ;;  %686 = vmatprep.mubr.f32.mxu0 %v5778_v26  ;;  %v976_v40 = vld [vmem:[#allocation7 + $0x2c8] sm:$0xff] }
  0xc1   : > { %1021 = vmatprep.subr.mxu1 %v7255_v0  ;;  %687 = vmatmul.mubr.f32.gmra.mxu0 %v5911_v45 }
  0xc2   : > { %4820 = vmatprep.mubr.f32.mxu1 %v5913_v47  ;;  %1022 = vmatpush2.msra.mxu1 %v963_v49  ;;  %v5983_v49 = vld [vmem:[#allocation2 + $0x80] sm:$0xff] }
  0xc3   : > { %4821 = vmatmul.mubr.f32.gmra.mxu1 %v5916_v50  ;;  %1023 = vmatprep.subr.mxu1 %v7255_v0 }
  0xc4   : > { %1024 = vmatpush2.msra.mxu1 %v962_v52  ;;  %4842 = vmatprep.subr.mxu0 %v980_v54  ;;  %v5987_v52 = vld [vmem:[#allocation2 + $0x91] sm:$0xff] }
  0xc5   : > { %691 = vmatprep.mubr.f32.mxu0 %v5782_v27  ;;  %1025 = vmatprep.subr.mxu1 %v7255_v0 }
  0xc6   : > { %4843 = vmatpush3.msra.mxu0 %v980_v54  ;;  %4823 = vmatprep.mubr.f32.mxu1 %v5923_v56  ;;  %v975_v54 = vld [vmem:[#allocation7 + $0x2c0] sm:$0xff] }
  0xc7   : > { %692 = vmatmul.mubr.f32.gmra.mxu0 %v5925_v58  ;;  %1026 = vmatpush2.msra.mxu1 %v961_v60  ;;  %v5993_v60 = vld [vmem:[#allocation2 + $0x90] sm:$0xff] }
  0xc8   : > { %4824 = vmatmul.mubr.f32.gmra.mxu1 %v5929_v61  ;;  %1027 = vmatprep.subr.mxu1 %v7255_v0 }
  0xc9   : > { %1028 = vmatpush2.msra.mxu1 %v960_v62  ;;  %696 = vmatprep.mubr.f32.mxu0 %v5787_v30  ;;  %v1337_v62 = vld [vmem:[#allocation7 + $0x378] sm:$0xff] }
  0xca   : > { %1029 = vmatprep.subr.mxu1 %v7255_v0  ;;  %4844 = vmatprep.subr.mxu0 %v979_v63 }
  0xcb   : > { %697 = vmatmul.mubr.f32.gmra.mxu0 %v5935_v1  ;;  %4826 = vmatprep.mubr.f32.mxu1 %v5937_v2 }
  0xcc   : > { %1030 = vmatpush2.msra.mxu1 %v959_v3  ;;  %4845 = vmatpush3.msra.mxu0 %v979_v63  ;;  %v5997_v63 = vld [vmem:[#allocation2 + $0xa1] sm:$0xff]  ;;  %v1336_v3 = vld [vmem:[#allocation7 + $0x370] sm:$0xff] }
  0xcd   : > { %4827 = vmatmul.mubr.f32.gmra.mxu1 %v5941_v4  ;;  %1031 = vmatprep.subr.mxu1 %v7255_v0 }
  0xce   : > { %1032 = vmatpush2.msra.mxu1 %v958_v5  ;;  %701 = vmatprep.mubr.f32.mxu0 %v5792_v33  ;;  %v974_v5 = vld [vmem:[#allocation7 + $0x2b8] sm:$0xff] }
  0xcf   : > { %1033 = vmatprep.subr.mxu1 %v7255_v0  ;;  %702 = vmatmul.mubr.f32.gmra.mxu0 %v5945_v6 }
  0xd0   : > { %4829 = vmatprep.mubr.f32.mxu1 %v5949_v7  ;;  %1034 = vmatpush2.msra.mxu1 %v957_v8  ;;  %v6002_v8 = vld [vmem:[#allocation2 + $0xa0] sm:$0xff] }
  0xd1   : > { %4846 = vmatprep.subr.mxu0 %v978_v9  ;;  %4830 = vmatmul.mubr.f32.gmra.mxu1 %v5952_v10 }
  0xd2   : > { %1035 = vmatprep.subr.mxu1 %v7255_v0  ;;  %4847 = vmatpush3.msra.mxu0 %v978_v9  ;;  %v6009_v9 = vld [vmem:[#allocation2 + $0xb0] sm:$0xff] }
  0xd3   : > { %1036 = vmatpush2.msra.mxu1 %v956_v11  ;;  %706 = vmatprep.mubr.f32.mxu0 %v5796_v34  ;;  %v1334_v11 = vld [vmem:[#allocation7 + $0x360] sm:$0xff] }
  0xd4   : > { %1037 = vmatprep.subr.mxu1 %v7255_v0  ;;  %707 = vmatmul.mubr.f32.gmra.mxu0 %v5958_v12 }
  0xd5   : > { %4832 = vmatprep.mubr.f32.mxu1 %v5961_v13  ;;  %1038 = vmatpush2.msra.mxu1 %v955_v14  ;;  %v973_v14 = vld [vmem:[#allocation7 + $0x2b0] sm:$0xff] }
  0xd6   : > { %4833 = vmatmul.mubr.f32.gmra.mxu1 %v5964_v17  ;;  %1039 = vmatprep.subr.mxu1 %v7255_v0 }
  0xd7   : > { %4848 = vmatprep.subr.mxu0 %v977_v18  ;;  %1040 = vmatpush2.msra.mxu1 %v954_v20  ;;  %v1332_v20 = vld [vmem:[#allocation7 + $0x350] sm:$0xff] }
  0xd8   : > { %4849 = vmatpush3.msra.mxu0 %v977_v18  ;;  %711 = vmatprep.mubr.f32.mxu0 %v5801_v37  ;;  %v6016_v18 = vld [vmem:[#allocation2 + $0xc0] sm:$0xff] }
  0xd9   : > { %1041 = vmatprep.subr.mxu1 %v7255_v0  ;;  %712 = vmatmul.mubr.f32.gmra.mxu0 %v5971_v21 }
  0xda   : > { %4835 = vmatprep.mubr.f32.mxu1 %v5973_v25  ;;  %1042 = vmatpush2.msra.mxu1 %v953_v28  ;;  %v972_v28 = vld [vmem:[#allocation7 + $0x2a8] sm:$0xff] }
  0xdb   : > { %4836 = vmatmul.mubr.f32.gmra.mxu1 %v5976_v31  ;;  %1043 = vmatprep.subr.mxu1 %v7255_v0 }
  0xdc   : > { %1044 = vmatpush2.msra.mxu1 %v952_v36  ;;  %4850 = vmatprep.subr.mxu0 %v976_v40  ;;  %v6024_v36 = vld [vmem:[#allocation2 + $0xd0] sm:$0xff] }
  0xdd   : > { %716 = vmatprep.mubr.f32.mxu0 %v5805_v38  ;;  %1045 = vmatprep.subr.mxu1 %v7255_v0 }
  0xde   : > { %4851 = vmatpush3.msra.mxu0 %v976_v40  ;;  %1046 = vmatpush2.msra.mxu1 %v951_v41  ;;  %v1330_v40 = vld [vmem:[#allocation7 + $0x340] sm:$0xff] }
  0xdf   : > { %717 = vmatmul.mubr.f32.gmra.mxu0 %v5983_v49  ;;  %1047 = vmatprep.mubr.f32.mxu1 %v5882_v22  ;;  %v6032_v41 = vld [vmem:[#allocation2 + $0xe0] sm:$0xff] }
  0xe0   : > { %1048 = vmatmul.mubr.f32.vlgmr.msra.gmra.mxu1 %v5886_v23  ;;  %720 = vmatprep.mubr.f32.mxu0 %v5987_v52 }
  0xe1   : > { %4852 = vmatprep.subr.mxu0 %v975_v54  ;;  %1370 = vmatprep.subr.mxu1 %v7255_v0 }
  0xe2   : > { %1051 = vmatprep.mubr.f32.mxu1 %v5769_v15  ;;  %4853 = vmatpush3.msra.mxu0 %v975_v54  ;;  %v1335_v15 = vld [vmem:[#allocation7 + $0x368] sm:$0xff]  ;;  %v1329_v54 = vld [vmem:[#allocation7 + $0x338] sm:$0xff] }
  0xe3   : > { %721 = vmatmul.mubr.f32.gmra.mxu0 %v5993_v60  ;;  %1371 = vmatpush1.msra.mxu1 %v1337_v62  ;;  %v1328_v62 = vld [vmem:[#allocation7 + $0x330] sm:$0xff] }
  0xe4   : > { %1052 = vmatmul.mubr.f32.gmra.mxu1 %v5898_v32  ;;  %1372 = vmatprep.subr.mxu1 %v7255_v0 }
  0xe5   : > { %724 = vmatprep.mubr.f32.mxu0 %v5997_v63  ;;  %1373 = vmatpush1.msra.mxu1 %v1336_v3  ;;  %v970_v3 = vld [vmem:[#allocation7 + $0x298] sm:$0xff] }
  0xe6   : > { %1056 = vmatprep.mubr.f32.mxu1 %v5778_v26  ;;  %4854 = vmatprep.subr.mxu0 %v974_v5  ;;  %v1333_v26 = vld [vmem:[#allocation7 + $0x358] sm:$0xff] }
  0xe7   : > { %725 = vmatmul.mubr.f32.gmra.mxu0 %v6002_v8  ;;  %1374 = vmatprep.subr.mxu1 %v7255_v0 }
  0xe8   : > { %1057 = vmatmul.mubr.f32.gmra.mxu1 %v5911_v45  ;;  %4855 = vmatpush3.msra.mxu0 %v974_v5  ;;  %v1327_v5 = vld [vmem:[#allocation7 + $0x328] sm:$0xff] }
  0xe9   : > { %1375 = vmatpush1.msra.mxu1 %v1335_v15  ;;  %729 = vmatprep.mubr.f32.mxu0 %v5813_v43  ;;  %v1326_v15 = vld [vmem:[#allocation7 + $0x320] sm:$0xff] }
  0xea   : > { %1376 = vmatprep.subr.mxu1 %v7255_v0  ;;  %1061 = vmatprep.mubr.f32.mxu1 %v5782_v27  ;;  %v1331_v27 = vld [vmem:[#allocation7 + $0x348] sm:$0xff] }
  0xeb   : > { %730 = vmatmul.mubr.f32.gmra.mxu0 %v6009_v9  ;;  %1377 = vmatpush1.msra.mxu1 %v1334_v11  ;;  %v969_v11 = vld [vmem:[#allocation7 + $0x290] sm:$0xff] }
  0xec   : > { %1062 = vmatmul.mubr.f32.gmra.mxu1 %v5925_v58  ;;  %4856 = vmatprep.subr.mxu0 %v973_v14 }
  0xed   : > { %1378 = vmatprep.subr.mxu1 %v7255_v0  ;;  %4857 = vmatpush3.msra.mxu0 %v973_v14  ;;  %v6054_v14 = vld [vmem:[#allocation2 + $0x110] sm:$0xff] }
  0xee   : > { %1379 = vmatpush1.msra.mxu1 %v1333_v26  ;;  %734 = vmatprep.mubr.f32.mxu0 %v5820_v46  ;;  %v1324_v26 = vld [vmem:[#allocation7 + $0x310] sm:$0xff] }
  0xef   : > { %735 = vmatmul.mubr.f32.gmra.mxu0 %v6016_v18  ;;  %1066 = vmatprep.mubr.f32.mxu1 %v5787_v30  ;;  %v971_v30 = vld [vmem:[#allocation7 + $0x2a0] sm:$0xff] }
  0xf0   : > { %1380 = vmatprep.subr.mxu1 %v7255_v0  ;;  %1067 = vmatmul.mubr.f32.gmra.mxu1 %v5935_v1 }
  0xf1   : > { %1381 = vmatpush1.msra.mxu1 %v1332_v20  ;;  %4858 = vmatprep.subr.mxu0 %v972_v28  ;;  %v968_v20 = vld [vmem:[#allocation7 + $0x288] sm:$0xff] }
  0xf2   : > { %1382 = vmatprep.subr.mxu1 %v7255_v0  ;;  %739 = vmatprep.mubr.f32.mxu0 %v5825_v48 }
  0xf3   : > { %4859 = vmatpush3.msra.mxu0 %v972_v28  ;;  %1383 = vmatpush1.msra.mxu1 %v1331_v27  ;;  %v6062_v28 = vld [vmem:[#allocation2 + $0x120] sm:$0xff] }
  0xf4   : > { %740 = vmatmul.mubr.f32.gmra.mxu0 %v6024_v36  ;;  %1071 = vmatprep.mubr.f32.mxu1 %v5792_v33  ;;  %v6038_v33 = vld [vmem:[#allocation2 + $0xf0] sm:$0xff]  ;;  %v1322_v27 = vld [vmem:[#allocation7 + $0x300] sm:$0xff] }
  0xf5   : > { %1072 = vmatmul.mubr.f32.gmra.mxu1 %v5945_v6  ;;  %1384 = vmatprep.subr.mxu1 %v7255_v0 }
  0xf6   : > { %1385 = vmatpush1.msra.mxu1 %v1330_v40  ;;  %744 = vmatprep.mubr.f32.mxu0 %v5832_v51  ;;  %v6066_v40 = vld [vmem:[#allocation2 + $0x131] sm:$0xff] }
  0xf7   : > { %4860 = vmatprep.subr.mxu0 %v971_v30  ;;  %1386 = vmatprep.subr.mxu1 %v7255_v0 }
  0xf8   : > { %745 = vmatmul.mubr.f32.gmra.mxu0 %v6032_v41  ;;  %1076 = vmatprep.mubr.f32.mxu1 %v5796_v34  ;;  %v6046_v34 = vld [vmem:[#allocation2 + $0x100] sm:$0xff] }
  0xf9   : > { %4861 = vmatpush3.msra.mxu0 %v971_v30  ;;  %1387 = vmatpush1.msra.mxu1 %v1329_v54  ;;  %v967_v30 = vld [vmem:[#allocation7 + $0x280] sm:$0xff]  ;;  %v6072_v54 = vld [vmem:[#allocation2 + $0x130] sm:$0xff] }
  0xfa   : > { %1077 = vmatmul.mubr.f32.gmra.mxu1 %v5958_v12  ;;  %1388 = vmatprep.subr.mxu1 %v7255_v0 }
  0xfb   : > { %749 = vmatprep.mubr.f32.mxu0 %v5837_v53  ;;  %1389 = vmatpush1.msra.mxu1 %v1328_v62  ;;  %v1353_v62 = vld [vmem:[#allocation7 + $0x3f8] sm:$0xff] }
  0xfc   : > { %750 = vmatmul.mubr.f32.gmra.mxu0 %v6038_v33  ;;  %1081 = vmatprep.mubr.f32.mxu1 %v5801_v37  ;;  %v1325_v37 = vld [vmem:[#allocation7 + $0x318] sm:$0xff] }
  0xfd   : > { %4862 = vmatprep.subr.mxu0 %v970_v3  ;;  %1390 = vmatprep.subr.mxu1 %v7255_v0 }
  0xfe   : > { %1082 = vmatmul.mubr.f32.gmra.mxu1 %v5971_v21  ;;  %4863 = vmatpush3.msra.mxu0 %v970_v3  ;;  %v1352_v3 = vld [vmem:[#allocation7 + $0x3f0] sm:$0xff] }
  0xff   : > { %1391 = vmatpush1.msra.mxu1 %v1327_v5  ;;  %754 = vmatprep.mubr.f32.mxu0 %v5842_v55  ;;  %v1369_v5 = vld [vmem:[#allocation7 + $0x478] sm:$0xff] }
 0x100   : > { %1392 = vmatprep.subr.mxu1 %v7255_v0  ;;  %755 = vmatmul.mubr.f32.gmra.mxu0 %v6046_v34 }
 0x101   : > { %1086 = vmatprep.mubr.f32.mxu1 %v5805_v38  ;;  %1393 = vmatpush1.msra.mxu1 %v1326_v15  ;;  %v1323_v38 = vld [vmem:[#allocation7 + $0x308] sm:$0xff] }
 0x102   : > { %1087 = vmatmul.mubr.f32.gmra.mxu1 %v5983_v49  ;;  %4864 = vmatprep.subr.mxu0 %v969_v11  ;;  %v1351_v15 = vld [vmem:[#allocation7 + $0x3e8] sm:$0xff] }
 0x103   : > { %1394 = vmatprep.subr.mxu1 %v7255_v0  ;;  %4865 = vmatpush3.msra.mxu0 %v969_v11  ;;  %v1350_v11 = vld [vmem:[#allocation7 + $0x3e0] sm:$0xff] }
 0x104   : > { %1395 = vmatpush1.msra.mxu1 %v1325_v37  ;;  %759 = vmatprep.mubr.f32.mxu0 %v5847_v57  ;;  %v1365_v37 = vld [vmem:[#allocation7 + $0x458] sm:$0xff] }
 0x105   : > { %760 = vmatmul.mubr.f32.gmra.mxu0 %v6054_v14  ;;  %1091 = vmatprep.mubr.f32.mxu1 %v5987_v52 }
 0x106   : > { %1396 = vmatprep.subr.mxu1 %v7255_v0  ;;  %1092 = vmatmul.mubr.f32.gmra.mxu1 %v5993_v60 }
 0x107   : > { %1397 = vmatpush1.msra.mxu1 %v1324_v26  ;;  %4866 = vmatprep.subr.mxu0 %v968_v20  ;;  %v1347_v26 = vld [vmem:[#allocation7 + $0x3c8] sm:$0xff] }
 0x108   : > { %1398 = vmatprep.subr.mxu1 %v7255_v0  ;;  %764 = vmatprep.mubr.f32.mxu0 %v5852_v59 }
 0x109   : > { %4867 = vmatpush3.msra.mxu0 %v968_v20  ;;  %1399 = vmatpush1.msra.mxu1 %v1323_v38  ;;  %v1346_v20 = vld [vmem:[#allocation7 + $0x3c0] sm:$0xff]  ;;  %v1363_v38 = vld [vmem:[#allocation7 + $0x448] sm:$0xff] }
 0x10a   : > { %765 = vmatmul.mubr.f32.gmra.mxu0 %v6062_v28  ;;  %1095 = vmatprep.mubr.f32.mxu1 %v5997_v63 }
 0x10b   : > { %1096 = vmatmul.mubr.f32.gmra.mxu1 %v6002_v8  ;;  %1400 = vmatprep.subr.mxu1 %v7255_v0 }
 0x10c   : > { %1401 = vmatpush1.msra.mxu1 %v1322_v27  ;;  %768 = vmatprep.mubr.f32.mxu0 %v6066_v40  ;;  %v1345_v27 = vld [vmem:[#allocation7 + $0x3b8] sm:$0xff] }
 0x10d   : > { %4868 = vmatprep.subr.mxu0 %v967_v30  ;;  %1402 = vmatprep.subr.mxu1 %v7255_v0 }
 0x10e   : > { %769 = vmatmul.mubr.f32.gmra.mxu0 %v6072_v54  ;;  %1099 = vmatprep.mubr.f32.mxu1 %v5813_v43  ;;  %v1368_v43 = vld [vmem:[#allocation7 + $0x470] sm:$0xff] }
 0x10f   : > { %4869 = vmatpush3.msra.mxu0 %v967_v30  ;;  %1403 = vmatpush2.msra.mxu1 %v1353_v62  ;;  %v1344_v30 = vld [vmem:[#allocation7 + $0x3b0] sm:$0xff]  ;;  %v1361_v62 = vld [vmem:[#allocation7 + $0x438] sm:$0xff] }
 0x110   : > { %1100 = vmatmul.mubr.f32.gmra.mxu1 %v6009_v9  ;;  %1404 = vmatprep.subr.mxu1 %v7255_v0 }
 0x111   : > { %4870 = vmatprep.mubr.f32.mxu0 %v5810_v42  ;;  %1405 = vmatpush2.msra.mxu1 %v1352_v3  ;;  %v1367_v42 = vld [vmem:[#allocation7 + $0x468] sm:$0xff]  ;;  %v1360_v3 = vld [vmem:[#allocation7 + $0x430] sm:$0xff] }
 0x112   : > { %1104 = vmatprep.mubr.f32.mxu1 %v5820_v46  ;;  %4871 = vmatmul.mubr.f32.vlgmr.msra.gmra.mxu0 %v5817_v44  ;;  %v1349_v44 = vld [vmem:[#allocation7 + $0x3d8] sm:$0xff]  ;;  %v1366_v46 = vld [vmem:[#allocation7 + $0x460] sm:$0xff] }
 0x113   : > { %1406 = vmatprep.subr.mxu1 %v7255_v0  ;;  %4900 = vmatprep.subr.mxu0 %v1369_v5 }
 0x114   : > { %1105 = vmatmul.mubr.f32.gmra.mxu1 %v6016_v18  ;;  %4901 = vmatpush3.msra.mxu0 %v1369_v5  ;;  %v1342_v5 = vld [vmem:[#allocation7 + $0x3a0] sm:$0xff] }
 0x115   : > { %1407 = vmatpush2.msra.mxu1 %v1351_v15  ;;  %4873 = vmatprep.mubr.f32.mxu0 %v5874_v16  ;;  %v1341_v15 = vld [vmem:[#allocation7 + $0x398] sm:$0xff] }
 0x116   : > { %1408 = vmatprep.subr.mxu1 %v7255_v0  ;;  %4902 = vmatprep.subr.mxu0 %v1368_v43 }
 0x117   : > { %1109 = vmatprep.mubr.f32.mxu1 %v5825_v48  ;;  %4874 = vmatmul.mubr.f32.gmra.mxu0 %v5878_v19  ;;  %v1348_v48 = vld [vmem:[#allocation7 + $0x3d0] sm:$0xff] }
 0x118   : > { %1409 = vmatpush2.msra.mxu1 %v1350_v11  ;;  %4903 = vmatpush3.msra.mxu0 %v1368_v43  ;;  %v1340_v43 = vld [vmem:[#allocation7 + $0x390] sm:$0xff]  ;;  %v1358_v11 = vld [vmem:[#allocation7 + $0x420] sm:$0xff] }
 0x119   : > { %1110 = vmatmul.mubr.f32.gmra.mxu1 %v6024_v36  ;;  %1410 = vmatprep.subr.mxu1 %v7255_v0 }
 0x11a   : > { %4904 = vmatprep.subr.mxu0 %v1367_v42  ;;  %1411 = vmatpush2.msra.mxu1 %v1349_v44  ;;  %v1338_v44 = vld [vmem:[#allocation7 + $0x380] sm:$0xff] }
 0x11b   : > { %4905 = vmatpush3.msra.mxu0 %v1367_v42  ;;  %4876 = vmatprep.mubr.f32.mxu0 %v5889_v24  ;;  %v1357_v42 = vld [vmem:[#allocation7 + $0x418] sm:$0xff] }
 0x11c   : > { %1114 = vmatprep.mubr.f32.mxu1 %v5832_v51  ;;  %4877 = vmatmul.mubr.f32.gmra.mxu0 %v5892_v29  ;;  %v1364_v51 = vld [vmem:[#allocation7 + $0x450] sm:$0xff] }
 0x11d   : > { %1412 = vmatprep.subr.mxu1 %v7255_v0  ;;  %4906 = vmatprep.subr.mxu0 %v1366_v46 }
 0x11e   : > { %1115 = vmatmul.mubr.f32.gmra.mxu1 %v6032_v41  ;;  %4907 = vmatpush3.msra.mxu0 %v1366_v46  ;;  %v1356_v46 = vld [vmem:[#allocation7 + $0x410] sm:$0xff] }
 0x11f   : > { %1413 = vmatpush2.msra.mxu1 %v1348_v48  ;;  %4908 = vmatprep.subr.mxu0 %v1365_v37  ;;  %v1355_v48 = vld [vmem:[#allocation7 + $0x408] sm:$0xff] }
 0x120   : > { %1414 = vmatprep.subr.mxu1 %v7255_v0  ;;  %4879 = vmatprep.mubr.f32.mxu0 %v5901_v35 }
 0x121   : > { %1415 = vmatpush2.msra.mxu1 %v1347_v26  ;;  %4909 = vmatpush3.msra.mxu0 %v1365_v37  ;;  %v5275_v37 = vld [vmem:[#allocation2 + $0x11] sm:$0xff]  ;;  %v1354_v26 = vld [vmem:[#allocation7 + $0x400] sm:$0xff] }
 0x122   : > { %1119 = vmatprep.mubr.f32.mxu1 %v5837_v53  ;;  %4880 = vmatmul.mubr.f32.gmra.mxu0 %v5904_v39  ;;  %v1362_v53 = vld [vmem:[#allocation7 + $0x440] sm:$0xff] }
 0x123   : > { %1120 = vmatmul.mubr.f32.gmra.mxu1 %v6038_v33  ;;  %1416 = vmatprep.subr.mxu1 %v7255_v0 }
 0x124   : > { %4910 = vmatprep.subr.mxu0 %v1364_v51  ;;  %1417 = vmatpush2.msra.mxu1 %v1346_v20  ;;  %v5279_v20 = vld [vmem:[#allocation2 + $0x31] sm:$0xff] }
 0x125   : > { %4911 = vmatpush3.msra.mxu0 %v1364_v51  ;;  %4882 = vmatprep.mubr.f32.mxu0 %v5913_v47  ;;  %v5276_v51 = vld [vmem:[#allocation2 + $0x2] sm:$0xff] }
 0x126   : > { %1418 = vmatprep.subr.mxu1 %v7255_v0  ;;  %4912 = vmatprep.subr.mxu0 %v1363_v38 }
 0x127   : > { %1124 = vmatprep.mubr.f32.mxu1 %v5842_v55  ;;  %4883 = vmatmul.mubr.f32.gmra.mxu0 %v5916_v50  ;;  %v1343_v55 = vld [vmem:[#allocation7 + $0x3a8] sm:$0xff] }
 0x128   : > { %1419 = vmatpush2.msra.mxu1 %v1345_v27  ;;  %4913 = vmatpush3.msra.mxu0 %v1363_v38  ;;  %v1991_v38 = vld [vmem:[#allocation7 + $0x5f8] sm:$0xff]  ;;  %v1990_v27 = vld [vmem:[#allocation7 + $0x5f0] sm:$0xff] }
 0x129   : > { %1125 = vmatmul.mubr.f32.gmra.mxu1 %v6046_v34  ;;  %1420 = vmatprep.subr.mxu1 %v7255_v0 }
 0x12a   : > { %4914 = vmatprep.subr.mxu0 %v1362_v53  ;;  %4885 = vmatprep.mubr.f32.mxu0 %v5923_v56 }
 0x12b   : > { %1421 = vmatpush2.msra.mxu1 %v1344_v30  ;;  %4915 = vmatpush3.msra.mxu0 %v1362_v53  ;;  %v1945_v53 = vld [vmem:[#allocation7 + $0x488] sm:$0xff] }
 0x12c   : > { %1129 = vmatprep.mubr.f32.mxu1 %v5847_v57  ;;  %4886 = vmatmul.mubr.f32.gmra.mxu0 %v5929_v61  ;;  %v1359_v57 = vld [vmem:[#allocation7 + $0x428] sm:$0xff] }
 0x12d   : > { %1422 = vmatprep.subr.mxu1 %v7255_v0  ;;  %4916 = vmatprep.subr.mxu0 %v1361_v62 }
 0x12e   : > { %1130 = vmatmul.mubr.f32.gmra.mxu1 %v6054_v14  ;;  %4917 = vmatpush3.msra.mxu0 %v1361_v62 }
 0x12f   : > { %1423 = vmatpush2.msra.mxu1 %v1343_v55  ;;  %4888 = vmatprep.mubr.f32.mxu0 %v5937_v2  ;;  %v1944_v55 = vld [vmem:[#allocation7 + $0x480] sm:$0xff] }
 0x130   : > { %1424 = vmatprep.subr.mxu1 %v7255_v0  ;;  %4918 = vmatprep.subr.mxu0 %v1360_v3 }
 0x131   : > { %1134 = vmatprep.mubr.f32.mxu1 %v5852_v59  ;;  %4889 = vmatmul.mubr.f32.gmra.mxu0 %v5941_v4  ;;  %v1339_v59 = vld [vmem:[#allocation7 + $0x388] sm:$0xff] }
 0x132   : > { %1425 = vmatpush2.msra.mxu1 %v1342_v5  ;;  %4919 = vmatpush3.msra.mxu0 %v1360_v3 }
 0x133   : > { %1135 = vmatmul.mubr.f32.gmra.mxu1 %v6062_v28  ;;  %1426 = vmatprep.subr.mxu1 %v7255_v0 }
 0x134   : > { %4920 = vmatprep.subr.mxu0 %v1359_v57  ;;  %1427 = vmatpush2.msra.mxu1 %v1341_v15 }
 0x135   : > { %4921 = vmatpush3.msra.mxu0 %v1359_v57  ;;  %4891 = vmatprep.mubr.f32.mxu0 %v5949_v7  ;;  %v1975_v57 = vld [vmem:[#allocation7 + $0x578] sm:$0xff] }
 0x136   : > { %1428 = vmatprep.subr.mxu1 %v7255_v0  ;;  %1139 = vmatprep.mubr.f32.mxu1 %v6066_v40 }
 0x137   : > { %4892 = vmatmul.mubr.f32.gmra.mxu0 %v5952_v10  ;;  %1429 = vmatpush2.msra.mxu1 %v1340_v43  ;;  %v1974_v43 = vld [vmem:[#allocation7 + $0x570] sm:$0xff] }
 0x138   : > { %4922 = vmatprep.subr.mxu0 %v1358_v11  ;;  %1140 = vmatmul.mubr.f32.gmra.mxu1 %v6072_v54 }
 0x139   : > { %1430 = vmatprep.subr.mxu1 %v7255_v0  ;;  %4923 = vmatpush3.msra.mxu0 %v1358_v11 }
 0x13a   : > { %1431 = vmatpush2.msra.mxu1 %v1339_v59  ;;  %4924 = vmatprep.subr.mxu0 %v1357_v42  ;;  %v1983_v59 = vld [vmem:[#allocation7 + $0x5b8] sm:$0xff] }
 0x13b   : > { %4894 = vmatprep.mubr.f32.mxu0 %v5961_v13  ;;  %1432 = vmatprep.subr.mxu1 %v7255_v0 }
 0x13c   : > { %4925 = vmatpush3.msra.mxu0 %v1357_v42  ;;  %1433 = vmatpush2.msra.mxu1 %v1338_v44  ;;  %v1973_v44 = vld [vmem:[#allocation7 + $0x568] sm:$0xff] }
 0x13d   : > { %4895 = vmatmul.mubr.f32.gmra.mxu0 %v5964_v17  ;;  %1434 = vmatprep.mubr.f32.mxu1 %v5882_v22  ;;  %v5277_v22 = vld [vmem:[#allocation2 + $0x21] sm:$0xff] }
 0x13e   : > { %1435 = vmatmul.mubr.f32.vlgmr.msra.gmra.mxu1 %v5886_v23  ;;  %4926 = vmatprep.subr.mxu0 %v1356_v46  ;;  %v5278_v23 = vld [vmem:[#allocation2 + $0x12] sm:$0xff] }
 0x13f   : > { %4927 = vmatpush3.msra.mxu0 %v1356_v46  ;;  %4897 = vmatprep.mubr.f32.mxu0 %v5973_v25 }
 0x140   : > { %4928 = vmatprep.subr.mxu0 %v1355_v48  ;;  %1438 = vmatprep.mubr.f32.mxu1 %v5275_v37  ;;  %v1972_v37 = vld [vmem:[#allocation7 + $0x560] sm:$0xff] }
 0x141   : > { %4898 = vmatmul.mubr.f32.gmra.mxu0 %v5976_v31  ;;  %4962 = vmatprep.subr.mxu1 %v1991_v38 }
 0x142   : > { %4929 = vmatpush3.msra.mxu0 %v1355_v48  ;;  %1439 = vmatmul.mubr.f32.gmra.mxu1 %v5898_v32  ;;  %v5280_v32 = vld [vmem:[#allocation2 + $0x41] sm:$0xff]  ;;  %v5291_v48 = vld [vmem:[#allocation2 + $0x111] sm:$0xff] }
 0x143   : > { %4930 = vmatprep.subr.mxu0 %v1354_v26  ;;  %4932 = vmatprep.mubr.f32.mxu0 %v5276_v51 }
 0x144   : > { %4931 = vmatpush3.msra.mxu0 %v1354_v26  ;;  %1442 = vmatprep.mubr.f32.mxu1 %v5277_v22  ;;  %v1971_v22 = vld [vmem:[#allocation7 + $0x558] sm:$0xff] }
 0x145   : > { %4933 = vmatmul.mubr.f32.vlgmr.msra.gmra.mxu0 %v5278_v23  ;;  %1992 = vmatprep.subr.mxu0 %v7255_v0  ;;  %v5292_v23 = vld [vmem:[#allocation2 + $0x121] sm:$0xff] }
 0x146   : > { %1443 = vmatmul.mubr.f32.gmra.mxu1 %v5911_v45  ;;  %4935 = vmatprep.mubr.f32.mxu0 %v5874_v16  ;;  %v1959_v16 = vld [vmem:[#allocation7 + $0x4f8] sm:$0xff] }
 0x147   : > { %1447 = vmatprep.mubr.f32.mxu1 %v5279_v20  ;;  %4963 = vmatpush3.msra.mxu1 %v1991_v38  ;;  %v5281_v45 = vld [vmem:[#allocation2 + $0x51] sm:$0xff] }
 0x148   : > { %4964 = vmatprep.subr.mxu1 %v1990_v27  ;;  %1993 = vmatpush1.msra.mxu0 %v1959_v16  ;;  %v1969_v16 = vld [vmem:[#allocation7 + $0x548] sm:$0xff] }
 0x149   : > { %4936 = vmatmul.mubr.f32.gmra.mxu0 %v5878_v19  ;;  %4965 = vmatpush3.msra.mxu1 %v1990_v27  ;;  %v1958_v19 = vld [vmem:[#allocation7 + $0x4f0] sm:$0xff] }
 0x14a   : > { %1448 = vmatmul.mubr.f32.gmra.mxu1 %v5925_v58  ;;  %4938 = vmatprep.mubr.f32.mxu0 %v5889_v24  ;;  %v5282_v24 = vld [vmem:[#allocation2 + $0x61] sm:$0xff] }
 0x14b   : > { %1452 = vmatprep.mubr.f32.mxu1 %v5280_v32  ;;  %1994 = vmatprep.subr.mxu0 %v7255_v0  ;;  %v5284_v58 = vld [vmem:[#allocation2 + $0x81] sm:$0xff]  ;;  %v1970_v32 = vld [vmem:[#allocation7 + $0x550] sm:$0xff] }
 0x14c   : > { %1995 = vmatpush1.msra.mxu0 %v1958_v19  ;;  %v1968_v19 = vld [vmem:[#allocation7 + $0x540] sm:$0xff] }
 0x14d   : > { %4939 = vmatmul.mubr.f32.gmra.mxu0 %v5892_v29  ;;  %1996 = vmatprep.subr.mxu0 %v7255_v0  ;;  %v1957_v29 = vld [vmem:[#allocation7 + $0x4e8] sm:$0xff] }
 0x14e   : > { %1453 = vmatmul.mubr.f32.gmra.mxu1 %v5935_v1  ;;  %4941 = vmatprep.mubr.f32.mxu0 %v5901_v35  ;;  %v1989_v35 = vld [vmem:[#allocation7 + $0x5e8] sm:$0xff]  ;;  %v1987_v1 = vld [vmem:[#allocation7 + $0x5d8] sm:$0xff] }
 0x14f   : > { %1457 = vmatprep.mubr.f32.mxu1 %v5281_v45  ;;  %1997 = vmatpush1.msra.mxu0 %v1957_v29 }
 0x150   : > { %4966 = vmatprep.subr.mxu1 %v1989_v35  ;;  %1998 = vmatprep.subr.mxu0 %v7255_v0 }
 0x151   : > { %4942 = vmatmul.mubr.f32.gmra.mxu0 %v5904_v39  ;;  %v5283_v39 = vld [vmem:[#allocation2 + $0x71] sm:$0xff]  ;;  %4967 = vmatpush3.msra.mxu1 %v1989_v35 }
 0x152   : > { %1458 = vmatmul.mubr.f32.gmra.mxu1 %v5945_v6  ;;  %4944 = vmatprep.mubr.f32.mxu0 %v5913_v47  ;;  %v1956_v47 = vld [vmem:[#allocation7 + $0x4e0] sm:$0xff] }
 0x153   : > { %1462 = vmatprep.mubr.f32.mxu1 %v5282_v24  ;;  %1999 = vmatpush1.msra.mxu0 %v1956_v47  ;;  %v1952_v6 = vld [vmem:[#allocation7 + $0x4c0] sm:$0xff]  ;;  %v1966_v47 = vld [vmem:[#allocation7 + $0x530] sm:$0xff] }
 0x154   : > { %2000 = vmatprep.subr.mxu0 %v7255_v0 }
 0x155   : > { %4945 = vmatmul.mubr.f32.gmra.mxu0 %v5916_v50  ;;  %v1988_v50 = vld [vmem:[#allocation7 + $0x5e0] sm:$0xff] }
 0x156   : > { %1463 = vmatmul.mubr.f32.gmra.mxu1 %v5958_v12  ;;  %4947 = vmatprep.mubr.f32.mxu0 %v5923_v56  ;;  %v1955_v56 = vld [vmem:[#allocation7 + $0x4d8] sm:$0xff]  ;;  %v5286_v12 = vld [vmem:[#allocation2 + $0xc1] sm:$0xff] }
 0x157   : > { %1467 = vmatprep.mubr.f32.mxu1 %v5283_v39  ;;  %4968 = vmatprep.subr.mxu1 %v1988_v50 }
 0x158   : > { %4969 = vmatpush3.msra.mxu1 %v1988_v50  ;;  %2001 = vmatpush1.msra.mxu0 %v1955_v56  ;;  %v1965_v56 = vld [vmem:[#allocation7 + $0x528] sm:$0xff] }
 0x159   : > { %4948 = vmatmul.mubr.f32.gmra.mxu0 %v5929_v61  ;;  %2002 = vmatprep.subr.mxu0 %v7255_v0  ;;  %v1954_v61 = vld [vmem:[#allocation7 + $0x4d0] sm:$0xff] }
 0x15a   : > { %1468 = vmatmul.mubr.f32.gmra.mxu1 %v5971_v21  ;;  %4950 = vmatprep.mubr.f32.mxu0 %v5937_v2  ;;  %v1953_v2 = vld [vmem:[#allocation7 + $0x4c8] sm:$0xff]  ;;  %v4810_v21 = vpop.f32.mrf.mxu1 }
 0x15b   : > { %1472 = vmatprep.mubr.f32.mxu1 %v5284_v58  ;;  %2003 = vmatpush1.msra.mxu0 %v1954_v61 }
 0x15c   : > { %2004 = vmatprep.subr.mxu0 %v7255_v0  ;;  %4970 = vmatprep.subr.mxu1 %v1987_v1 }
 0x15d   : > { %4951 = vmatmul.mubr.f32.gmra.mxu0 %v5941_v4  ;;  %4971 = vmatpush3.msra.mxu1 %v1987_v1  ;;  %v5285_v4 = vld [vmem:[#allocation2 + $0xb1] sm:$0xff] }
 0x15e   : > { %1473 = vmatmul.mubr.f32.gmra.mxu1 %v5983_v49  ;;  %4953 = vmatprep.mubr.f32.mxu0 %v5949_v7  ;;  %v1986_v7 = vld [vmem:[#allocation7 + $0x5d0] sm:$0xff]  ;;  %v1985_v49 = vld [vmem:[#allocation7 + $0x5c8] sm:$0xff] }
 0x15f   : > { %1477 = vmatprep.mubr.f32.mxu1 %v5987_v52  ;;  %2005 = vmatpush1.msra.mxu0 %v1953_v2  ;;  %v1947_v52 = vld [vmem:[#allocation7 + $0x498] sm:$0xff] }
 0x160   : > { %2006 = vmatprep.subr.mxu0 %v7255_v0  ;;  %4972 = vmatprep.subr.mxu1 %v1986_v7 }
 0x161   : > { %4954 = vmatmul.mubr.f32.gmra.mxu0 %v5952_v10  ;;  %v1951_v10 = vld [vmem:[#allocation7 + $0x4b8] sm:$0xff]  ;;  %4973 = vmatpush3.msra.mxu1 %v1986_v7  ;;  %v1980_v7 = vld [vmem:[#allocation7 + $0x5a0] sm:$0xff] }
 0x162   : > { %1478 = vmatmul.mubr.f32.gmra.mxu1 %v5993_v60  ;;  %4956 = vmatprep.mubr.f32.mxu0 %v5961_v13  ;;  %v1950_v13 = vld [vmem:[#allocation7 + $0x4b0] sm:$0xff]  ;;  %v6176_v60 = vpop.f32.mrf.mxu1 }
 0x163   : > { %1482 = vmatprep.mubr.f32.mxu1 %v5997_v63  ;;  %2007 = vmatpush1.msra.mxu0 %v1952_v6  ;;  %v5288_v63 = vld [vmem:[#allocation2 + $0xe1] sm:$0xff] }
 0x164   : > { %2008 = vmatprep.subr.mxu0 %v7255_v0  ;;  %4974 = vmatprep.subr.mxu1 %v1985_v49 }
 0x165   : > { %4957 = vmatmul.mubr.f32.gmra.mxu0 %v5964_v17  ;;  %v1949_v17 = vld [vmem:[#allocation7 + $0x4a8] sm:$0xff]  ;;  %4975 = vmatpush3.msra.mxu1 %v1985_v49 }
 0x166   : > { %1483 = vmatmul.mubr.f32.gmra.mxu1 %v6002_v8  ;;  %4959 = vmatprep.mubr.f32.mxu0 %v5973_v25  ;;  %v5287_v25 = vld [vmem:[#allocation2 + $0xd1] sm:$0xff]  ;;  %v1803_v49 = vld [vmem:[#allocation2 + $0x1] sm:$0xff] }
 0x167   : > { %1486 = vmatprep.mubr.f32.mxu1 %v5285_v4  ;;  %2009 = vmatpush1.msra.mxu0 %v1951_v10  ;;  %v1946_v8 = vld [vmem:[#allocation7 + $0x490] sm:$0xff]  ;;  %v1963_v10 = vld [vmem:[#allocation7 + $0x518] sm:$0xff] }
 0x168   : > { %2010 = vmatprep.subr.mxu0 %v7255_v0 }
 0x169   : > { %4960 = vmatmul.mubr.f32.gmra.mxu0 %v5976_v31  ;;  %v1948_v31 = vld [vmem:[#allocation7 + $0x4a0] sm:$0xff] }
 0x16a   : > { %1487 = vmatmul.mubr.f32.gmra.mxu1 %v6009_v9  ;;  %2011 = vmatpush1.msra.mxu0 %v1950_v13  ;;  %v1979_v13 = vld [vmem:[#allocation7 + $0x598] sm:$0xff] }
 0x16b   : > { %1490 = vmatprep.mubr.f32.mxu1 %v5286_v12  ;;  %2012 = vmatprep.subr.mxu0 %v7255_v0 }
 0x16c   : > { %2013 = vmatpush1.msra.mxu0 %v1949_v17  ;;  %v1962_v17 = vld [vmem:[#allocation7 + $0x510] sm:$0xff]  ;;  %2056 = vmatprep.mubr.f32.mxu0 %v1803_v49 }
 0x16d   : > { %2014 = vmatprep.subr.mxu0 %v7255_v0 }
 0x16e   : > { %1491 = vmatmul.mubr.f32.gmra.mxu1 %v6016_v18  ;;  %2015 = vmatpush1.msra.mxu0 %v1948_v31  ;;  %v1984_v18 = vld [vmem:[#allocation7 + $0x5c0] sm:$0xff]  ;;  %v1961_v31 = vld [vmem:[#allocation7 + $0x508] sm:$0xff] }
 0x16f   : > { %1495 = vmatprep.mubr.f32.mxu1 %v5287_v25  ;;  %2016 = vmatprep.subr.mxu0 %v7255_v0  ;;  %v1978_v25 = vld [vmem:[#allocation7 + $0x590] sm:$0xff] }
 0x170   : > { %2017 = vmatpush1.msra.mxu0 %v1947_v52  ;;  %4976 = vmatprep.subr.mxu1 %v1984_v18 }
 0x171   : > { %2018 = vmatprep.subr.mxu0 %v7255_v0  ;;  %4977 = vmatpush3.msra.mxu1 %v1984_v18 }
 0x172   : > { %1496 = vmatmul.mubr.f32.gmra.mxu1 %v6024_v36  ;;  %2019 = vmatpush1.msra.mxu0 %v1946_v8  ;;  %v5289_v36 = vld [vmem:[#allocation2 + $0xf1] sm:$0xff]  ;;  %v1960_v8 = vld [vmem:[#allocation7 + $0x500] sm:$0xff] }
 0x173   : > { %1500 = vmatprep.mubr.f32.mxu1 %v5288_v63  ;;  %2020 = vmatprep.subr.mxu0 %v7255_v0 }
 0x174   : > { %v6180_v9 = vpop.f32.mrf.mxu1  ;;  %2021 = vmatpush1.msra.mxu0 %v1945_v53  ;;  %4978 = vmatprep.subr.mxu1 %v1983_v59  ;;  %v1763_v53 = vld [vmem:[#allocation2] sm:$0xff] }
 0x175   : > { %2022 = vmatprep.subr.mxu0 %v7255_v0  ;;  %4979 = vmatpush3.msra.mxu1 %v1983_v59  ;;  %v2362_v59 = vld [vmem:[#allocation7 + $0x778] sm:$0xff] }
 0x176   : > { %1501 = vmatmul.mubr.f32.gmra.mxu1 %v6032_v41  ;;  %v6184_v30 = vpop.f32.mrf.mxu1  ;;  %2023 = vmatpush1.msra.mxu0 %v1944_v55  ;;  %v5290_v41 = vld [vmem:[#allocation2 + $0x101] sm:$0xff] }
 0x177   : > { %1505 = vmatprep.mubr.f32.mxu1 %v5289_v36  ;;  %v6186_v62 = vpop.f32.mrf.mxu0  ;;  %2024 = vmatprep.subr.mxu0 %v7255_v0  ;;  %v1976_v55 = vld [vmem:[#allocation7 + $0x580] sm:$0xff] }
 0x178   : > { %2025 = vmatpush2.msra.mxu0 %v1975_v57 }
 0x179   : > { %v6189_v3 = vpop.f32.mrf.mxu1  ;;  %v680_v5 = vpop.f32.mrf.mxu0  ;;  %2026 = vmatprep.subr.mxu0 %v7255_v0 }
 0x17a   : > { %1506 = vmatmul.mubr.f32.gmra.mxu1 %v6038_v33  ;;  %2027 = vmatpush2.msra.mxu0 %v1974_v43  ;;  %v1843_v5 = vld [vmem:[#allocation2 + $0x2] sm:$0xff] }
 0x17b   : > { %1510 = vmatprep.mubr.f32.mxu1 %v5290_v41  ;;  %v6193_v15 = vpop.f32.mrf.mxu1  ;;  %2028 = vmatprep.subr.mxu0 %v7255_v0 }
 0x17c   : > { %v683_v11 = vpop.f32.mrf.mxu0  ;;  %2029 = vmatpush2.msra.mxu0 %v1973_v44 }
 0x17d   : > { %v6196_v42 = vadd.f32 %v4810_v21, %v683_v11  ;;  %2030 = vmatprep.subr.mxu0 %v7255_v0 }
 0x17e   : > { %1511 = vmatmul.mubr.f32.gmra.mxu1 %v6046_v34  ;;  %v6200_v33 = vpop.f32.mrf.mxu1  ;;  %v685_v46 = vpop.f32.mrf.mxu0  ;;  %2031 = vmatpush2.msra.mxu0 %v1972_v37  ;;  %v1982_v34 = vld [vmem:[#allocation7 + $0x5b0] sm:$0xff] }
 0x17f   : > { %1515 = vmatprep.mubr.f32.mxu1 %v5291_v48  ;;  %2032 = vmatprep.subr.mxu0 %v7255_v0 }
 0x180   : > { %v6203_v26 = vpop.f32.mrf.mxu1  ;;  %4980 = vmatprep.subr.mxu1 %v1982_v34  ;;  %2033 = vmatpush2.msra.mxu0 %v1971_v22 }
 0x181   : > { %v6205_v51 = vpop.f32.mrf.mxu0  ;;  %4981 = vmatpush3.msra.mxu1 %v1982_v34  ;;  %2034 = vmatprep.subr.mxu0 %v7255_v0 }
 0x182   : > { %1516 = vmatmul.mubr.f32.gmra.mxu1 %v6054_v14  ;;  %2035 = vmatpush2.msra.mxu0 %v1970_v32  ;;  %v1981_v14 = vld [vmem:[#allocation7 + $0x5a8] sm:$0xff] }
 0x183   : > { %1520 = vmatprep.mubr.f32.mxu1 %v5292_v23  ;;  %v4822_v20 = vpop.f32.mrf.mxu1  ;;  %v690_v38 = vpop.f32.mrf.mxu0  ;;  %2036 = vmatprep.subr.mxu0 %v7255_v0 }
 0x184   : > { %2037 = vmatpush2.msra.mxu0 %v1969_v16  ;;  %4982 = vmatprep.subr.mxu1 %v1981_v14  ;;  %v2361_v20 = vld [vmem:[#allocation7 + $0x770] sm:$0xff] }
 0x185   : > { %v879_v27 = vpop.f32.mrf.mxu1  ;;  %2038 = vmatprep.subr.mxu0 %v7255_v0  ;;  %4983 = vmatpush3.msra.mxu1 %v1981_v14  ;;  %v2360_v14 = vld [vmem:[#allocation7 + $0x768] sm:$0xff] }
 0x186   : > { %1521 = vmatmul.mubr.f32.gmra.mxu1 %v6062_v28  ;;  %v1967_v28 = vld [vmem:[#allocation7 + $0x538] sm:$0xff]  ;;  %2039 = vmatpush2.msra.mxu0 %v1968_v19 }
 0x187   : > { %1525 = vmatprep.mubr.f32.mxu1 %v6066_v40  ;;  %v693_v45 = vpop.f32.mrf.mxu0  ;;  %2040 = vmatprep.subr.mxu0 %v7255_v0 }
 0x188   : > { %v6215_v24 = vadd.f32 %v6180_v9, %v693_v45  ;;  %v6217_v29 = vpop.f32.mrf.mxu1  ;;  %2041 = vmatpush2.msra.mxu0 %v1967_v28  ;;  %4984 = vmatprep.subr.mxu1 %v1980_v7  ;;  %v1977_v9 = vld [vmem:[#allocation7 + $0x588] sm:$0xff]  ;;  %v2359_v45 = vld [vmem:[#allocation7 + $0x760] sm:$0xff] }
 0x189   : > { %v695_v35 = vpop.f32.mrf.mxu0  ;;  %2042 = vmatprep.subr.mxu0 %v7255_v0  ;;  %4985 = vmatpush3.msra.mxu1 %v1980_v7 }
 0x18a   : > { %1526 = vmatmul.mubr.f32.gmra.mxu1 %v6072_v54  ;;  %v6221_v39 = vpop.f32.mrf.mxu1  ;;  %2043 = vmatpush2.msra.mxu0 %v1966_v47  ;;  %v1964_v54 = vld [vmem:[#allocation7 + $0x520] sm:$0xff]  ;;  %v2358_v47 = vld [vmem:[#allocation7 + $0x758] sm:$0xff] }
 0x18b   : > { %v6223_v40 = vpop.f32.mrf.mxu0  ;;  %2044 = vmatprep.subr.mxu0 %v7255_v0  ;;  %4986 = vmatprep.subr.mxu1 %v1979_v13 }
 0x18c   : > { %2045 = vmatpush2.msra.mxu0 %v1965_v56  ;;  %4987 = vmatpush3.msra.mxu1 %v1979_v13 }
 0x18d   : > { %v6226_v50 = vpop.f32.mrf.mxu1  ;;  %v700_v58 = vpop.f32.mrf.mxu0  ;;  %2046 = vmatprep.subr.mxu0 %v7255_v0  ;;  %4988 = vmatprep.subr.mxu1 %v1978_v25 }
 0x18e   : > { %2047 = vmatpush2.msra.mxu0 %v1964_v54  ;;  %4989 = vmatpush3.msra.mxu1 %v1978_v25 }
 0x18f   : > { %v6229_v61 = vpop.f32.mrf.mxu1  ;;  %v703_v1 = vpop.f32.mrf.mxu0  ;;  %2048 = vmatprep.subr.mxu0 %v7255_v0  ;;  %4990 = vmatprep.subr.mxu1 %v1977_v9 }
 0x190   : > { %v6233_v2 = vadd.f32 %v6189_v3, %v703_v1  ;;  %2049 = vmatpush2.msra.mxu0 %v1963_v10  ;;  %4991 = vmatpush3.msra.mxu1 %v1977_v9 }
 0x191   : > { %v6235_v4 = vpop.f32.mrf.mxu1  ;;  %v705_v6 = vpop.f32.mrf.mxu0  ;;  %2050 = vmatprep.subr.mxu0 %v7255_v0  ;;  %4992 = vmatprep.subr.mxu1 %v1976_v55 }
 0x192   : > { %2051 = vmatpush2.msra.mxu0 %v1962_v17  ;;  %4993 = vmatpush3.msra.mxu1 %v1976_v55  ;;  %v2356_v55 = vld [vmem:[#allocation7 + $0x748] sm:$0xff] }
 0x193   : > { %v6238_v12 = vpop.f32.mrf.mxu1  ;;  %2052 = vmatprep.subr.mxu0 %v7255_v0  ;;  %4994 = vmatprep.mubr.f32.mxu1 %v1843_v5 }
 0x194   : > { %v6241_v21 = vpop.f32.mrf.mxu0  ;;  %2053 = vmatpush2.msra.mxu0 %v1961_v31  ;;  %2363 = vmatprep.subr.mxu1 %v7255_v0 }
 0x195   : > { %2054 = vmatprep.subr.mxu0 %v7255_v0 }
 0x196   : > { %v6244_v52 = vpop.f32.mrf.mxu1  ;;  %v710_v63 = vpop.f32.mrf.mxu0  ;;  %2055 = vmatpush2.msra.mxu0 %v1960_v8 }
 0x197   : > { %2057 = vmatmul.mubr.f32.vlgmr.msra.gmra.mxu0 %v1763_v53  ;;  %5024 = vmatprep.subr.mxu0 %v2362_v59  ;;  %v2357_v63 = vld [vmem:[#allocation7 + $0x750] sm:$0xff] }
 0x198   : > { %v6247_v18 = vpop.f32.mrf.mxu1  ;;  %5025 = vmatpush3.msra.mxu0 %v2362_v59 }
 0x199   : > { %v713_v36 = vpop.f32.mrf.mxu0  ;;  %5026 = vmatprep.subr.mxu0 %v2361_v20 }
 0x19a   : > { %v6251_v3 = vadd.f32 %v6200_v33, %v713_v36  ;;  %5027 = vmatpush3.msra.mxu0 %v2361_v20 }
 0x19b   : > { %v4837_v57 = vpop.f32.mrf.mxu1  ;;  %v715_v41 = vpop.f32.mrf.mxu0  ;;  %5028 = vmatprep.subr.mxu0 %v2360_v14 }
 0x19c   : > { %5029 = vmatpush3.msra.mxu0 %v2360_v14  ;;  %v2353_v14 = vld [vmem:[#allocation7 + $0x730] sm:$0xff] }
 0x19d   : > { %v927_v43 = vpop.f32.mrf.mxu1  ;;  %5030 = vmatprep.subr.mxu0 %v2359_v45 }
 0x19e   : > { %5031 = vmatpush3.msra.mxu0 %v2359_v45 }
 0x19f   : > { %v718_v11 = vpop.f32.mrf.mxu0  ;;  %5032 = vmatprep.subr.mxu0 %v2358_v47 }
 0x1a0   : > { %v1049_v44 = vpop.f32.mrf.mxu1  ;;  %5033 = vmatpush3.msra.mxu0 %v2358_v47  ;;  %v2355_v11 = vld [vmem:[#allocation7 + $0x740] sm:$0xff] }
 0x1a1   : > { %v719_v46 = vpop.f32.mrf.mxu0  ;;  %5034 = vmatprep.subr.mxu0 %v2357_v63 }
 0x1a2   : > { %v1050_v33 = vpop.f32.mrf.mxu1  ;;  %5035 = vmatpush3.msra.mxu0 %v2357_v63  ;;  %v2350_v63 = vld [vmem:[#allocation7 + $0x718] sm:$0xff] }
 0x1a3   : > { %v722_v48 = vpop.f32.mrf.mxu0  ;;  %5036 = vmatprep.subr.mxu0 %v2356_v55 }
 0x1a4   : > { %v6254_v37 = vpop.f32.mrf.mxu1  ;;  %5037 = vmatpush3.msra.mxu0 %v2356_v55  ;;  %v2354_v48 = vld [vmem:[#allocation7 + $0x738] sm:$0xff]  ;;  %v2349_v55 = vld [vmem:[#allocation7 + $0x710] sm:$0xff] }
 0x1a5   : > { %v723_v22 = vpop.f32.mrf.mxu0  ;;  %5038 = vmatprep.subr.mxu0 %v2355_v11 }
 0x1a6   : > { %v1055_v34 = vpop.f32.mrf.mxu1  ;;  %5039 = vmatpush3.msra.mxu0 %v2355_v11 }
 0x1a7   : > { %v6256_v23 = vpop.f32.mrf.mxu0  ;;  %5040 = vmatprep.subr.mxu0 %v2354_v48 }
 0x1a8   : > { %v6258_v38 = vpop.f32.mrf.mxu1  ;;  %5041 = vmatpush3.msra.mxu0 %v2354_v48 }
 0x1a9   : > { %v728_v32 = vpop.f32.mrf.mxu0  ;;  %5042 = vmatprep.subr.mxu0 %v2353_v14 }
 0x1aa   : > { %v1060_v27 = vpop.f32.mrf.mxu1  ;;  %5043 = vmatpush3.msra.mxu0 %v2353_v14 }
 0x1ab   : > { %v731_v16 = vpop.f32.mrf.mxu0 }
 0x1ac   : > { %v6261_v19 = vadd.f32 %v6217_v29, %v731_v16  ;;  %v6263_v35 = vpop.f32.mrf.mxu1 }
 0x1ad   : > { %v733_v28 = vpop.f32.mrf.mxu0 }
 0x1ae   : > { %v1065_v58 = vpop.f32.mrf.mxu1 }
 0x1af   : > { %v6265_v56 = vpop.f32.mrf.mxu0  ;;  %v840_v58 = vadd.f32 %v6176_v60, %v6186_v62 }
 0x1b0   : > { %v6267_v1 = vpop.f32.mrf.mxu1 }
 0x1b1   : > { %v738_v54 = vpop.f32.mrf.mxu0 }
 0x1b2   : > { %v1070_v6 = vpop.f32.mrf.mxu1 }
 0x1b3   : > { %v2352_v6 = vld [vmem:[#allocation7 + $0x728] sm:$0xff] }
 0x1b4   : > { %v741_v7 = vpop.f32.mrf.mxu0  ;;  %5044 = vmatprep.subr.mxu0 %v2352_v6 }
 0x1b5   : > { %v6270_v29 = vadd.f32 %v6226_v50, %v741_v7  ;;  %v6272_v10 = vpop.f32.mrf.mxu1  ;;  %v2351_v7 = vld [vmem:[#allocation7 + $0x720] sm:$0xff]  ;;  %5045 = vmatpush3.msra.mxu0 %v2352_v6 }
 0x1b6   : > { %v743_v13 = vpop.f32.mrf.mxu0  ;;  %5046 = vmatprep.subr.mxu0 %v2351_v7 }
 0x1b7   : > { %v1075_v17 = vpop.f32.mrf.mxu1  ;;  %5047 = vmatpush3.msra.mxu0 %v2351_v7 }
 0x1b8   : > { %v6274_v25 = vpop.f32.mrf.mxu0  ;;  %5048 = vmatprep.subr.mxu0 %v2350_v63 }
 0x1b9   : > { %5049 = vmatpush3.msra.mxu0 %v2350_v63  ;;  %v898_v63 = vadd.f32 %v6229_v61, %v6265_v56 }
 0x1ba   : > { %v6276_v31 = vpop.f32.mrf.mxu1  ;;  %v748_v49 = vpop.f32.mrf.mxu0  ;;  %5050 = vmatprep.subr.mxu0 %v2349_v55 }
 0x1bb   : > { %5051 = vmatpush3.msra.mxu0 %v2349_v55 }
 0x1bc   : > { %v1080_v8 = vpop.f32.mrf.mxu1  ;;  %v751_v9 = vpop.f32.mrf.mxu0 }
 0x1bd   : > { %v6279_v53 = vadd.f32 %v6235_v4, %v751_v9 }
 0x1be   : > { %v6281_v36 = vpop.f32.mrf.mxu1  ;;  %v753_v50 = vpop.f32.mrf.mxu0 }
 0x1bf   : > { %v850_v50 = vadd.f32 %v6184_v30, %v6205_v51  ;;  %v860_v30 = vadd.f32 %v6193_v15, %v6223_v40 }
 0x1c0   : > { %v1085_v5 = vpop.f32.mrf.mxu1  ;;  %v6283_v57 = vpop.f32.mrf.mxu0 }
 0x1c2   : > { %v6285_v41 = vpop.f32.mrf.mxu1  ;;  %v758_v43 = vpop.f32.mrf.mxu0 }
 0x1c4   : > { %v1090_v59 = vpop.f32.mrf.mxu1 }
 0x1c5   : > { %v761_v44 = vpop.f32.mrf.mxu0 }
 0x1c6   : > { %v6288_v4 = vadd.f32 %v6244_v52, %v761_v44  ;;  %v1093_v46 = vpop.f32.mrf.mxu1 }
 0x1c7   : > { %v763_v33 = vpop.f32.mrf.mxu0 }
 0x1c8   : > { %v1094_v22 = vpop.f32.mrf.mxu1 }
 0x1c9   : > { %v2348_v22 = vld [vmem:[#allocation7 + $0x708] sm:$0xff] }
 0x1ca   : > { %v766_v34 = vpop.f32.mrf.mxu0  ;;  %5052 = vmatprep.subr.mxu0 %v2348_v22 }
 0x1cb   : > { %v1097_v20 = vpop.f32.mrf.mxu1  ;;  %5053 = vmatpush3.msra.mxu0 %v2348_v22 }
 0x1cc   : > { %v767_v32 = vpop.f32.mrf.mxu0  ;;  %v870_v20 = vadd.f32 %v6203_v26, %v6241_v21 }
 0x1cd   : > { %v1098_v27 = vpop.f32.mrf.mxu1  ;;  %v2347_v32 = vld [vmem:[#allocation7 + $0x700] sm:$0xff] }
 0x1ce   : > { %v770_v16 = vpop.f32.mrf.mxu0  ;;  %5054 = vmatprep.subr.mxu0 %v2347_v32 }
 0x1cf   : > { %5055 = vmatpush3.msra.mxu0 %v2347_v32 }
 0x1d0   : > { %v6290_v45 = vpop.f32.mrf.mxu1  ;;  %v771_v28 = vpop.f32.mrf.mxu0  ;;  %2750 = vmatprep.subr.mxu0 %v7255_v0 }
 0x1d2   : > { %v1103_v47 = vpop.f32.mrf.mxu1  ;;  %v4872_v52 = vpop.f32.mrf.mxu0 }
 0x1d3   : > { %v1215_v54 = vadd.f32 %v4872_v52, %v6254_v37 }
 0x1d4   : > { %v6295_v13 = vpop.f32.mrf.mxu1  ;;  %v1210_v17 = vpop.f32.mrf.mxu0 }
 0x1d5   : > { %v6297_v49 = vadd.f32 %v1215_v54, %v840_v58 }
 0x1d6   : > { %v1108_v8 = vpop.f32.mrf.mxu1 }
 0x1d7   : > { %v4875_v9 = vpop.f32.mrf.mxu0 }
 0x1d8   : > { %v1225_v60 = vadd.f32 %v4875_v9, %v6263_v35 }
 0x1d9   : > { %v1111_v62 = vpop.f32.mrf.mxu1  ;;  %v1219_v37 = vpop.f32.mrf.mxu0 }
 0x1da   : > { %v6302_v5 = vadd.f32 %v1225_v60, %v850_v50  ;;  %v1220_v43 = vadd.f32 %v1219_v37, %v6258_v38 }
 0x1db   : > { %v1113_v11 = vpop.f32.mrf.mxu1 }
 0x1dc   : > { %v6306_v59 = vadd.f32 %v1220_v43, %v6196_v42  ;;  %v4878_v44 = vpop.f32.mrf.mxu0 }
 0x1dd   : > { %v1235_v51 = vadd.f32 %v4878_v44, %v6272_v10 }
 0x1de   : > { %v1116_v35 = vpop.f32.mrf.mxu1  ;;  %v1229_v46 = vpop.f32.mrf.mxu0 }
 0x1df   : > { %v6311_v33 = vadd.f32 %v1235_v51, %v860_v30  ;;  %v1230_v48 = vadd.f32 %v1229_v46, %v6267_v1 }
 0x1e0   : > { %v1118_v38 = vpop.f32.mrf.mxu1 }
 0x1e1   : > { %v6315_v34 = vadd.f32 %v1230_v48, %v6215_v24 }
 0x1e2   : > { %v4881_v42 = vpop.f32.mrf.mxu0 }
 0x1e3   : > { %v1245_v15 = vadd.f32 %v4881_v42, %v6281_v36  ;;  %v1121_v40 = vpop.f32.mrf.mxu1 }
 0x1e4   : > { %v1239_v10 = vpop.f32.mrf.mxu0 }
 0x1e5   : > { %v6320_v27 = vadd.f32 %v1245_v15, %v870_v20  ;;  %v1240_v1 = vadd.f32 %v1239_v10, %v6276_v31  ;;  %v1123_v16 = vpop.f32.mrf.mxu1  ;;  %v888_v31 = vadd.f32 %v6221_v39, %v6256_v23 }
 0x1e7   : > { %v6324_v24 = vadd.f32 %v1240_v1, %v6233_v2  ;;  %v4884_v14 = vpop.f32.mrf.mxu0 }
 0x1e8   : > { %v6361_v14 = vld [vmem:[#allocation9] ss:$0 sm:$0xff] }
 0x1e9   : > { %v1126_v28 = vpop.f32.mrf.mxu1  ;;  %v1249_v26 = vpop.f32.mrf.mxu0 }
 0x1ea   : > { %v1250_v21 = vadd.f32 %v1249_v26, %v6285_v41 }
 0x1eb   : > { %v1128_v36 = vpop.f32.mrf.mxu1 }
 0x1ec   : > { %v6329_v47 = vadd.f32 %v1250_v21, %v6251_v3  ;;  %v4887_v52 = vpop.f32.mrf.mxu0 }
 0x1ed   : > { %v1263_v58 = vadd.f32 %v4887_v52, %v6290_v45  ;;  %v908_v45 = vadd.f32 %v6238_v12, %v6274_v25 }
 0x1ee   : > { %v1131_v54 = vpop.f32.mrf.mxu1  ;;  %v1258_v2 = vpop.f32.mrf.mxu0 }
 0x1ef   : > { %v6334_v6 = vadd.f32 %v1263_v58, %v888_v31 }
 0x1f0   : > { %v1133_v7 = vpop.f32.mrf.mxu1 }
 0x1f1   : > { %v4890_v17 = vpop.f32.mrf.mxu0 }
 0x1f2   : > { %v1273_v41 = vadd.f32 %v4890_v17, %v1111_v62 }
 0x1f3   : > { %v1136_v8 = vpop.f32.mrf.mxu1  ;;  %v1267_v9 = vpop.f32.mrf.mxu0 }
 0x1f4   : > { %v6338_v3 = vadd.f32 %v1273_v41, %v898_v63  ;;  %v1268_v50 = vadd.f32 %v1267_v9, %v6295_v13  ;;  %v918_v13 = vadd.f32 %v6247_v18, %v6283_v57 }
 0x1f5   : > { %v1138_v60 = vpop.f32.mrf.mxu1 }
 0x1f6   : > { %v6342_v39 = vadd.f32 %v1268_v50, %v6261_v19 }
 0x1f7   : > { %v4893_v23 = vpop.f32.mrf.mxu0 }
 0x1f8   : > { %v1283_v37 = vadd.f32 %v4893_v23, %v1121_v40  ;;  %v1141_v55 = vpop.f32.mrf.mxu1 }
 0x1f9   : > { %v1277_v43 = vpop.f32.mrf.mxu0 }
 0x1fa   : > { %v6346_v11 = vadd.f32 %v1283_v37, %v908_v45  ;;  %v1278_v61 = vadd.f32 %v1277_v43, %v1116_v35  ;;  %v1142_v56 = vpop.f32.mrf.mxu1 }
 0x1fc   : > { %v6349_v62 = vadd.f32 %v1278_v61, %v6270_v29 }
 0x1fd   : > { %v4896_v44 = vpop.f32.mrf.mxu0 }
 0x1fe   : > { %v1293_v19 = vadd.f32 %v4896_v44, %v1131_v54  ;;  %v1436_v30 = vpop.f32.mrf.mxu1 }
 0x1ff   : > { %v1287_v51 = vpop.f32.mrf.mxu0 }
 0x200   : > { %v6353_v46 = vadd.f32 %v1293_v19, %v918_v13  ;;  %v1288_v12 = vadd.f32 %v1287_v51, %v1126_v28  ;;  %v1437_v25 = vpop.f32.mrf.mxu1 }
 0x201   : > { %v4899_v48 = vpop.f32.mrf.mxu0  ;;  %v2330_v25 = vld [vmem:[#allocation7 + $0x678] sm:$0xff] }
 0x202   : > { %v6356_v22 = vadd.f32 %v1288_v12, %v6279_v53  ;;  %v1440_v35 = vpop.f32.mrf.mxu1 }
 0x203   : > { %v1297_v38 = vpop.f32.mrf.mxu0 }
 0x204   : > { %v1298_v42 = vadd.f32 %v1297_v38, %v1136_v8  ;;  %v1441_v29 = vpop.f32.mrf.mxu1 }
 0x205   : > { %v4934_v20 = vpop.f32.mrf.mxu0 }
 0x206   : > { %v6359_v15 = vadd.f32 %v1298_v42, %v6288_v4  ;;  %v1444_v18 = vpop.f32.mrf.mxu1  ;;  %v2329_v20 = vld [vmem:[#allocation7 + $0x670] sm:$0xff] }
 0x207   : > { %v1597_v57 = vpop.f32.mrf.mxu0 }
 0x208   : > { %v1446_v40 = vpop.f32.mrf.mxu1 }
 0x209   : > { %v4937_v10 = vpop.f32.mrf.mxu0 }
 0x20a   : > { %v1449_v32 = vpop.f32.mrf.mxu1 }
 0x20b   : > { %v1611_v1 = vadd.f32 %v4937_v10, %v1449_v32  ;;  %v1605_v16 = vpop.f32.mrf.mxu0 }
 0x20c   : > { %v1606_v28 = vadd.f32 %v1605_v16, %v1444_v18  ;;  %v1451_v53 = vpop.f32.mrf.mxu1 }
 0x20d   : > { %v1693_v26 = vadd.f32 %v1611_v1, %v6306_v59  ;;  %v4940_v21 = vpop.f32.mrf.mxu0 }
 0x20e   : > { %v1692_v36 = vadd.f32 %v1606_v28, %v6297_v49  ;;  %v1454_v52 = vpop.f32.mrf.mxu1 }
 0x20f   : > { %v1716_v4 = vadd.f32 %v6361_v14, %v1693_v26  ;;  %v1615_v31 = vpop.f32.mrf.mxu0  ;;  %v2327_v26 = vld [vmem:[#allocation7 + $0x660] sm:$0xff] }
 0x210   : > { %v1715_v58 = vadd.f32 %v6361_v14, %v1692_v36  ;;  %v1616_v54 = vadd.f32 %v1615_v31, %v1454_v52  ;;  %v1456_v2 = vpop.f32.mrf.mxu1 }
 0x211   : > { %v6367_v7 = vmax.f32 %v1716_v4, 0.0  ;;  %v4943_v17 = vpop.f32.mrf.mxu0 }
 0x212   : > { %v6369_v63 = vmax.f32 %v1715_v58, 0.0  ;;  %v1694_v41 = vadd.f32 %v1616_v54, %v6302_v5  ;;  %v1459_v8 = vpop.f32.mrf.mxu1  ;;  %v2326_v58 = vld [vmem:[#allocation7 + $0x658] sm:$0xff] }
 0x213   : > { %1748 = vst [vmem:[#allocation2 + $0x21] sm:$0xff] %v6367_v7  ;;  %v1621_v59 = vadd.f32 %v4940_v21, %v1459_v8  ;;  %v1625_v49 = vpop.f32.mrf.mxu0  ;;  %v2325_v8 = vld [vmem:[#allocation7 + $0x650] sm:$0xff] }
 0x214   : > { %1747 = vst [vmem:[#allocation2 + $0x11] sm:$0xff] %v6369_v63  ;;  %v1717_v9 = vadd.f32 %v6361_v14, %v1694_v41  ;;  %v1461_v50 = vpop.f32.mrf.mxu1  ;;  %2061 = vmatprep.mubr.f32.mxu0 %v6369_v63 }
 0x215   : > { %v1695_v60 = vadd.f32 %v1621_v59, %v6315_v34  ;;  %v4946_v23 = vpop.f32.mrf.mxu0 }
 0x216   : > { %v6377_v45 = vmax.f32 %v1717_v9, 0.0  ;;  %v1464_v37 = vpop.f32.mrf.mxu1  ;;  %v2324_v9 = vld [vmem:[#allocation7 + $0x648] sm:$0xff] }
 0x217   : > { %v1718_v5 = vadd.f32 %v6361_v14, %v1695_v60  ;;  %v1626_v55 = vadd.f32 %v1625_v49, %v1464_v37  ;;  %v1635_v43 = vpop.f32.mrf.mxu0  ;;  %v2323_v37 = vld [vmem:[#allocation7 + $0x640] sm:$0xff] }
 0x218   : > { %1749 = vst [vmem:[#allocation2 + $0x31] sm:$0xff] %v6377_v45  ;;  %v1466_v61 = vpop.f32.mrf.mxu1 }
 0x219   : > { %v6381_v56 = vmax.f32 %v1718_v5, 0.0  ;;  %v1696_v44 = vadd.f32 %v1626_v55, %v6311_v33  ;;  %v4949_v13 = vpop.f32.mrf.mxu0 }
 0x21a   : > { %v1469_v19 = vpop.f32.mrf.mxu1  ;;  %v6392_v38 = vld [vmem:[#allocation2 + $0x22] sm:$0xff] }
 0x21b   : > { %1750 = vst [vmem:[#allocation2 + $0x41] sm:$0xff] %v6381_v56  ;;  %v1719_v34 = vadd.f32 %v6361_v14, %v1696_v44  ;;  %v1631_v30 = vadd.f32 %v4943_v17, %v1469_v19  ;;  %v6386_v51 = vld [vmem:[#allocation2 + $0x12] sm:$0xff]  ;;  %v1645_v48 = vpop.f32.mrf.mxu0  ;;  %v6403_v10 = vld [vmem:[#allocation2 + $0x20] sm:$0xff] }
 0x21c   : > { %7280 = vst [vmem:[#allocation18_spill] sm:$0xff] %v6386_v51  ;;  %v6388_v12 = vld [vmem:[#allocation2 + $0x10] sm:$0xff]  ;;  %v1471_v35 = vpop.f32.mrf.mxu1  ;;  %4995 = vmatmul.mubr.f32.vlgmr.msra.gmra.mxu1 %v6386_v51 }
 0x21d   : > { %7281 = vst [vmem:[#allocation19_spill] sm:$0xff] %v6388_v12  ;;  %2062 = vmatmul.mubr.f32.gmra.mxu0 %v6388_v12  ;;  %v6394_v33 = vmax.f32 %v1719_v34, 0.0  ;;  %v1697_v42 = vadd.f32 %v1631_v30, %v6324_v24  ;;  %4997 = vmatprep.mubr.f32.mxu1 %v6392_v38  ;;  %v2328_v24 = vld [vmem:[#allocation7 + $0x668] sm:$0xff]  ;;  %v2321_v34 = vld [vmem:[#allocation7 + $0x630] sm:$0xff] }
 0x21e   : > { %2066 = vmatprep.mubr.f32.mxu0 %v6367_v7  ;;  %v1474_v29 = vpop.f32.mrf.mxu1  ;;  %2364 = vmatpush1.msra.mxu1 %v2330_v25  ;;  %v2320_v35 = vld [vmem:[#allocation7 + $0x628] sm:$0xff] }
 0x21f   : > { %1751 = vst [vmem:[#allocation2 + $0x51] sm:$0xff] %v6394_v33  ;;  %v1720_v18 = vadd.f32 %v6361_v14, %v1697_v42  ;;  %v1636_v57 = vadd.f32 %v1635_v43, %v1474_v29  ;;  %v6401_v40 = vld [vmem:[#allocation2 + $0x32] sm:$0xff]  ;;  %2365 = vmatprep.subr.mxu1 %v7255_v0 }
 0x220   : > { %v1476_v32 = vpop.f32.mrf.mxu1  ;;  %4998 = vmatmul.mubr.f32.gmra.mxu1 %v6401_v40  ;;  %v6418_v52 = vld [vmem:[#allocation2 + $0x30] sm:$0xff]  ;;  %v2322_v43 = vld [vmem:[#allocation7 + $0x638] sm:$0xff] }
 0x221   : > { %2067 = vmatmul.mubr.f32.gmra.mxu0 %v6403_v10  ;;  %v6408_v1 = vmax.f32 %v1720_v18, 0.0  ;;  %v1698_v16 = vadd.f32 %v1636_v57, %v6320_v27  ;;  %2366 = vmatpush1.msra.mxu1 %v2329_v20  ;;  %v2319_v32 = vld [vmem:[#allocation7 + $0x620] sm:$0xff] }
 0x222   : > { %2071 = vmatprep.mubr.f32.mxu0 %v6377_v45  ;;  %v1479_v28 = vpop.f32.mrf.mxu1  ;;  %v6412_v53 = vld [vmem:[#allocation2 + $0x42] sm:$0xff]  ;;  %2367 = vmatprep.subr.mxu1 %v7255_v0 }
 0x223   : > { %1752 = vst [vmem:[#allocation2 + $0x61] sm:$0xff] %v6408_v1  ;;  %v1721_v21 = vadd.f32 %v6361_v14, %v1698_v16  ;;  %v1641_v36 = vadd.f32 %v4946_v23, %v1479_v28  ;;  %5000 = vmatprep.mubr.f32.mxu1 %v6412_v53  ;;  %2368 = vmatpush1.msra.mxu1 %v2328_v24  ;;  %v6432_v41 = vld [vmem:[#allocation2 + $0x40] sm:$0xff]  ;;  %v6467_v16 = vld [vmem:[#allocation2 + $0x92] sm:$0xff] }
 0x224   : > { %v1481_v27 = vpop.f32.mrf.mxu1  ;;  %2369 = vmatprep.subr.mxu1 %v7255_v0 }
 0x225   : > { %2072 = vmatmul.mubr.f32.gmra.mxu0 %v6418_v52  ;;  %v6422_v4 = vmax.f32 %v1721_v21, 0.0  ;;  %v1699_v31 = vadd.f32 %v1641_v36, %v6329_v47  ;;  %2370 = vmatpush1.msra.mxu1 %v2327_v26  ;;  %v4952_v47 = vpop.f32.mrf.mxu0  ;;  %v2318_v21 = vld [vmem:[#allocation7 + $0x618] sm:$0xff] }
 0x226   : > { %2076 = vmatprep.mubr.f32.mxu0 %v6381_v56  ;;  %v1484_v54 = vpop.f32.mrf.mxu1  ;;  %v6426_v2 = vld [vmem:[#allocation2 + $0x52] sm:$0xff]  ;;  %2371 = vmatprep.subr.mxu1 %v7255_v0 }
 0x227   : > { %1753 = vst [vmem:[#allocation2 + $0x71] sm:$0xff] %v6422_v4  ;;  %v1722_v17 = vadd.f32 %v6361_v14, %v1699_v31  ;;  %5001 = vmatmul.mubr.f32.gmra.mxu1 %v6426_v2  ;;  %v6444_v23 = vld [vmem:[#allocation2 + $0x50] sm:$0xff]  ;;  %v1653_v55 = vpop.f32.mrf.mxu0 }
 0x228   : > { %v1485_v59 = vpop.f32.mrf.mxu1  ;;  %2372 = vmatpush1.msra.mxu1 %v2326_v58  ;;  %v6474_v27 = vld [vmem:[#allocation2 + $0x91] sm:$0xff] }
 0x229   : > { %2077 = vmatmul.mubr.f32.gmra.mxu0 %v6432_v41  ;;  %v6435_v49 = vmax.f32 %v1722_v17, 0.0  ;;  %2373 = vmatprep.subr.mxu1 %v7255_v0  ;;  %v4955_v25 = vpop.f32.mrf.mxu0  ;;  %v6482_v17 = vld [vmem:[#allocation2 + $0xa2] sm:$0xff] }
 0x22a   : > { %2081 = vmatprep.mubr.f32.mxu0 %v6394_v33  ;;  %v1488_v50 = vpop.f32.mrf.mxu1  ;;  %v6439_v60 = vld [vmem:[#allocation2 + $0x62] sm:$0xff]  ;;  %2374 = vmatpush1.msra.mxu1 %v2325_v8 }
 0x22b   : > { %1754 = vst [vmem:[#allocation2 + $0x81] sm:$0xff] %v6435_v49  ;;  %5003 = vmatprep.mubr.f32.mxu1 %v6439_v60  ;;  %2375 = vmatprep.subr.mxu1 %v7255_v0  ;;  %v6453_v19 = vld [vmem:[#allocation2 + $0x60] sm:$0xff]  ;;  %v1663_v24 = vpop.f32.mrf.mxu0  ;;  %v6490_v50 = vld [vmem:[#allocation2 + $0x90] sm:$0xff] }
 0x22c   : > { %v1489_v5 = vpop.f32.mrf.mxu1  ;;  %2376 = vmatpush1.msra.mxu1 %v2324_v9 }
 0x22d   : > { %2082 = vmatmul.mubr.f32.gmra.mxu0 %v6444_v23  ;;  %2377 = vmatprep.subr.mxu1 %v7255_v0  ;;  %v4958_v59 = vpop.f32.mrf.mxu0 }
 0x22e   : > { %2086 = vmatprep.mubr.f32.mxu0 %v6408_v1  ;;  %v1492_v61 = vpop.f32.mrf.mxu1  ;;  %v6449_v44 = vld [vmem:[#allocation2 + $0x72] sm:$0xff]  ;;  %2378 = vmatpush1.msra.mxu1 %v2323_v37  ;;  %v2316_v37 = vld [vmem:[#allocation7 + $0x608] sm:$0xff] }
 0x22f   : > { %v1654_v13 = vadd.f32 %v1653_v55, %v1492_v61  ;;  %5004 = vmatmul.mubr.f32.gmra.mxu1 %v6449_v44  ;;  %2379 = vmatprep.subr.mxu1 %v7255_v0  ;;  %v6464_v57 = vld [vmem:[#allocation2 + $0x70] sm:$0xff]  ;;  %v6493_v55 = vld [vmem:[#allocation2 + $0xa1] sm:$0xff] }
 0x230   : > { %v1494_v30 = vpop.f32.mrf.mxu1  ;;  %2380 = vmatpush1.msra.mxu1 %v2322_v43 }
 0x231   : > { %2087 = vmatmul.mubr.f32.gmra.mxu0 %v6453_v19  ;;  %v1700_v48 = vadd.f32 %v1654_v13, %v6334_v6  ;;  %2381 = vmatprep.subr.mxu1 %v7255_v0 }
 0x232   : > { %2091 = vmatprep.mubr.f32.mxu0 %v6422_v4  ;;  %v1497_v42 = vpop.f32.mrf.mxu1  ;;  %v6459_v29 = vld [vmem:[#allocation2 + $0x82] sm:$0xff]  ;;  %2382 = vmatpush1.msra.mxu1 %v2321_v34  ;;  %v1673_v34 = vpop.f32.mrf.mxu0 }
 0x233   : > { %v1723_v20 = vadd.f32 %v6361_v14, %v1700_v48  ;;  %v1659_v18 = vadd.f32 %v4952_v47, %v1497_v42  ;;  %5006 = vmatprep.mubr.f32.mxu1 %v6459_v29  ;;  %2383 = vmatprep.subr.mxu1 %v7255_v0  ;;  %v6479_v54 = vld [vmem:[#allocation2 + $0x80] sm:$0xff]  ;;  %v2346_v42 = vld [vmem:[#allocation7 + $0x6f8] sm:$0xff] }
 0x234   : > { %v1499_v6 = vpop.f32.mrf.mxu1  ;;  %2384 = vmatpush1.msra.mxu1 %v2320_v35  ;;  %v6504_v35 = vld [vmem:[#allocation2 + $0xa0] sm:$0xff] }
 0x235   : > { %2092 = vmatmul.mubr.f32.gmra.mxu0 %v6464_v57  ;;  %v6469_v28 = vmax.f32 %v1723_v20, 0.0  ;;  %v1701_v26 = vadd.f32 %v1659_v18, %v6342_v39  ;;  %2385 = vmatprep.subr.mxu1 %v7255_v0  ;;  %v2317_v39 = vld [vmem:[#allocation7 + $0x610] sm:$0xff] }
 0x236   : > { %2096 = vmatprep.mubr.f32.mxu0 %v6435_v49  ;;  %v1502_v36 = vpop.f32.mrf.mxu1  ;;  %2386 = vmatpush1.msra.mxu1 %v2319_v32 }
 0x237   : > { %1755 = vst [vmem:[#allocation2 + $0xb1] sm:$0xff] %v6469_v28  ;;  %v1724_v31 = vadd.f32 %v6361_v14, %v1701_v26  ;;  %v1664_v58 = vadd.f32 %v1663_v24, %v1502_v36  ;;  %2387 = vmatprep.subr.mxu1 %v7255_v0  ;;  %5007 = vmatmul.mubr.f32.gmra.mxu1 %v6467_v16  ;;  %v4961_v24 = vpop.f32.mrf.mxu0  ;;  %v2344_v36 = vld [vmem:[#allocation7 + $0x6e8] sm:$0xff] }
 0x238   : > { %v1504_v8 = vpop.f32.mrf.mxu1  ;;  %2388 = vmatpush1.msra.mxu1 %v2318_v21  ;;  %5009 = vmatprep.mubr.f32.mxu1 %v6482_v17 }
 0x239   : > { %2097 = vmatmul.mubr.f32.gmra.mxu0 %v6479_v54  ;;  %v6485_v47 = vmax.f32 %v1724_v31, 0.0  ;;  %v1702_v9 = vadd.f32 %v1664_v58, %v6338_v3  ;;  %2389 = vmatprep.subr.mxu1 %v7255_v0  ;;  %v2315_v3 = vld [vmem:[#allocation7 + $0x600] sm:$0xff] }
 0x23a   : > { %2100 = vmatprep.mubr.f32.mxu0 %v6474_v27  ;;  %v1507_v5 = vpop.f32.mrf.mxu1  ;;  %2390 = vmatpush1.msra.mxu1 %v2317_v39 }
 0x23b   : > { %1756 = vst [vmem:[#allocation2 + $0xc1] sm:$0xff] %v6485_v47  ;;  %v1725_v43 = vadd.f32 %v6361_v14, %v1702_v9  ;;  %v1669_v61 = vadd.f32 %v4955_v25, %v1507_v5  ;;  %2391 = vmatprep.subr.mxu1 %v7255_v0  ;;  %v1683_v5 = vpop.f32.mrf.mxu0 }
 0x23c   : > { %v1509_v13 = vpop.f32.mrf.mxu1  ;;  %2392 = vmatpush1.msra.mxu1 %v2316_v37 }
 0x23d   : > { %2101 = vmatmul.mubr.f32.gmra.mxu0 %v6490_v50  ;;  %v6499_v30 = vmax.f32 %v1725_v43, 0.0  ;;  %v1703_v48 = vadd.f32 %v1669_v61, %v6349_v62  ;;  %2393 = vmatprep.subr.mxu1 %v7255_v0  ;;  %v2345_v62 = vld [vmem:[#allocation7 + $0x6f0] sm:$0xff] }
 0x23e   : > { %2104 = vmatprep.mubr.f32.mxu0 %v6493_v55  ;;  %v1512_v25 = vpop.f32.mrf.mxu1  ;;  %v6506_v20 = vld [vmem:[#allocation2 + $0xb2] sm:$0xff]  ;;  %2394 = vmatpush1.msra.mxu1 %v2315_v3 }
 0x23f   : > { %1757 = vst [vmem:[#allocation2 + $0xd1] sm:$0xff] %v6499_v30  ;;  %v1726_v18 = vadd.f32 %v6361_v14, %v1703_v48  ;;  %v1674_v32 = vadd.f32 %v1673_v34, %v1512_v25  ;;  %5010 = vmatmul.mubr.f32.gmra.mxu1 %v6506_v20  ;;  %2395 = vmatprep.subr.mxu1 %v7255_v0  ;;  %v6524_v9 = vld [vmem:[#allocation2 + $0xb0] sm:$0xff] }
 0x240   : > { %v1514_v6 = vpop.f32.mrf.mxu1  ;;  %2396 = vmatpush2.msra.mxu1 %v2346_v42 }
 0x241   : > { %2105 = vmatmul.mubr.f32.gmra.mxu0 %v6504_v35  ;;  %v6513_v26 = vmax.f32 %v1726_v18, 0.0  ;;  %v1704_v21 = vadd.f32 %v1674_v32, %v6346_v11  ;;  %2397 = vmatprep.subr.mxu1 %v7255_v0  ;;  %v2343_v11 = vld [vmem:[#allocation7 + $0x6e0] sm:$0xff] }
 0x242   : > { %2109 = vmatprep.mubr.f32.mxu0 %v6469_v28  ;;  %v1517_v31 = vpop.f32.mrf.mxu1  ;;  %v6518_v58 = vld [vmem:[#allocation2 + $0xc2] sm:$0xff]  ;;  %2398 = vmatpush2.msra.mxu1 %v2345_v62 }
 0x243   : > { %1758 = vst [vmem:[#allocation2 + $0xe1] sm:$0xff] %v6513_v26  ;;  %v1727_v39 = vadd.f32 %v6361_v14, %v1704_v21  ;;  %v1679_v8 = vadd.f32 %v4958_v59, %v1517_v31  ;;  %5012 = vmatprep.mubr.f32.mxu1 %v6518_v58  ;;  %2399 = vmatprep.subr.mxu1 %v7255_v0  ;;  %v2342_v59 = vld [vmem:[#allocation7 + $0x6d8] sm:$0xff]  ;;  %v6538_v42 = vld [vmem:[#allocation2 + $0xc0] sm:$0xff]  ;;  %v2340_v62 = vld [vmem:[#allocation7 + $0x6c8] sm:$0xff] }
 0x244   : > { %v1519_v37 = vpop.f32.mrf.mxu1  ;;  %2400 = vmatpush2.msra.mxu1 %v2344_v36 }
 0x245   : > { %2110 = vmatmul.mubr.f32.gmra.mxu0 %v6524_v9  ;;  %v6527_v43 = vmax.f32 %v1727_v39, 0.0  ;;  %v1705_v61 = vadd.f32 %v1679_v8, %v6356_v22  ;;  %2401 = vmatprep.subr.mxu1 %v7255_v0  ;;  %v2341_v22 = vld [vmem:[#allocation7 + $0x6d0] sm:$0xff] }
 0x246   : > { %2114 = vmatprep.mubr.f32.mxu0 %v6485_v47  ;;  %v1522_v3 = vpop.f32.mrf.mxu1  ;;  %v6532_v13 = vld [vmem:[#allocation2 + $0xd2] sm:$0xff]  ;;  %2402 = vmatpush2.msra.mxu1 %v2343_v11 }
 0x247   : > { %1759 = vst [vmem:[#allocation2 + $0xf1] sm:$0xff] %v6527_v43  ;;  %v1728_v34 = vadd.f32 %v6361_v14, %v1705_v61  ;;  %v1684_v48 = vadd.f32 %v1683_v5, %v1522_v3  ;;  %5013 = vmatmul.mubr.f32.gmra.mxu1 %v6532_v13  ;;  %2403 = vmatprep.subr.mxu1 %v7255_v0  ;;  %v6552_v39 = vld [vmem:[#allocation2 + $0xd0] sm:$0xff] }
 0x248   : > { %v1524_v25 = vpop.f32.mrf.mxu1  ;;  %2404 = vmatpush2.msra.mxu1 %v2342_v59  ;;  %v2337_v3 = vld [vmem:[#allocation7 + $0x6b0] sm:$0xff] }
 0x249   : > { %2115 = vmatmul.mubr.f32.gmra.mxu0 %v6538_v42  ;;  %v6541_v18 = vmax.f32 %v1728_v34, 0.0  ;;  %v1706_v32 = vadd.f32 %v1684_v48, %v6353_v46  ;;  %2405 = vmatprep.subr.mxu1 %v7255_v0  ;;  %v2339_v46 = vld [vmem:[#allocation7 + $0x6c0] sm:$0xff]  ;;  %v2336_v34 = vld [vmem:[#allocation7 + $0x6a8] sm:$0xff]  ;;  %v2334_v25 = vld [vmem:[#allocation7 + $0x698] sm:$0xff] }
 0x24a   : > { %2119 = vmatprep.mubr.f32.mxu0 %v6499_v30  ;;  %v1527_v6 = vpop.f32.mrf.mxu1  ;;  %v6546_v21 = vld [vmem:[#allocation2 + $0xe2] sm:$0xff]  ;;  %2406 = vmatpush2.msra.mxu1 %v2341_v22 }
 0x24b   : > { %1760 = vst [vmem:[#allocation2 + $0x101] sm:$0xff] %v6541_v18  ;;  %v1729_v36 = vadd.f32 %v6361_v14, %v1706_v32  ;;  %v1689_v31 = vadd.f32 %v4961_v24, %v1527_v6  ;;  %5015 = vmatprep.mubr.f32.mxu1 %v6546_v21  ;;  %2407 = vmatprep.subr.mxu1 %v7255_v0  ;;  %v2338_v24 = vld [vmem:[#allocation7 + $0x6b8] sm:$0xff]  ;;  %v6566_v59 = vld [vmem:[#allocation2 + $0xe0] sm:$0xff]  ;;  %v2333_v6 = vld [vmem:[#allocation7 + $0x690] sm:$0xff] }
 0x24c   : > { %v1529_v8 = vpop.f32.mrf.mxu1  ;;  %2408 = vmatpush2.msra.mxu1 %v2340_v62  ;;  %v2335_v22 = vld [vmem:[#allocation7 + $0x6a0] sm:$0xff] }
 0x24d   : > { %2120 = vmatmul.mubr.f32.gmra.mxu0 %v6552_v39  ;;  %v6555_v11 = vmax.f32 %v1729_v36, 0.0  ;;  %v1707_v37 = vadd.f32 %v1689_v31, %v6359_v15  ;;  %2409 = vmatprep.subr.mxu1 %v7255_v0  ;;  %v6592_v36 = vld [vmem:[#allocation2 + $0x132] sm:$0xff] }
 0x24e   : > { %2124 = vmatprep.mubr.f32.mxu0 %v6513_v26  ;;  %v6560_v5 = vld [vmem:[#allocation2 + $0xf2] sm:$0xff]  ;;  %2410 = vmatpush2.msra.mxu1 %v2339_v46  ;;  %v2332_v46 = vld [vmem:[#allocation7 + $0x688] sm:$0xff] }
 0x24f   : > { %1761 = vst [vmem:[#allocation2 + $0x111] sm:$0xff] %v6555_v11  ;;  %v1730_v61 = vadd.f32 %v6361_v14, %v1707_v37  ;;  %5016 = vmatmul.mubr.f32.gmra.mxu1 %v6560_v5  ;;  %2411 = vmatprep.subr.mxu1 %v7255_v0  ;;  %v6578_v14 = vld [vmem:[#allocation2 + $0xf0] sm:$0xff] }
 0x250   : > { %2412 = vmatpush2.msra.mxu1 %v2338_v24  ;;  %v2331_v24 = vld [vmem:[#allocation7 + $0x680] sm:$0xff] }
 0x251   : > { %2125 = vmatmul.mubr.f32.gmra.mxu0 %v6566_v59  ;;  %v6569_v15 = vmax.f32 %v1730_v61, 0.0  ;;  %2413 = vmatprep.subr.mxu1 %v7255_v0 }
 0x252   : > { %2129 = vmatprep.mubr.f32.mxu0 %v6527_v43  ;;  %v6573_v48 = vld [vmem:[#allocation2 + $0x102] sm:$0xff]  ;;  %2414 = vmatpush2.msra.mxu1 %v2337_v3 }
 0x253   : > { %1762 = vst [vmem:[#allocation2 + $0x121] sm:$0xff] %v6569_v15  ;;  %5018 = vmatprep.mubr.f32.mxu1 %v6573_v48  ;;  %2415 = vmatprep.subr.mxu1 %v7255_v0  ;;  %v6587_v62 = vld [vmem:[#allocation2 + $0x100] sm:$0xff] }
 0x254   : > { %2416 = vmatpush2.msra.mxu1 %v2336_v34  ;;  %v6606_v3 = vld [vmem:[#allocation2 + $0x1] sm:$0xff]  ;;  %v2749_v34 = vld [vmem:[#allocation7 + $0x8f8] sm:$0xff] }
 0x255   : > { %2130 = vmatmul.mubr.f32.gmra.mxu0 %v6578_v14  ;;  %2417 = vmatprep.subr.mxu1 %v7255_v0 }
 0x256   : > { %2134 = vmatprep.mubr.f32.mxu0 %v6541_v18  ;;  %v6583_v32 = vld [vmem:[#allocation2 + $0x112] sm:$0xff]  ;;  %2418 = vmatpush2.msra.mxu1 %v2335_v22 }
 0x257   : > { %5019 = vmatmul.mubr.f32.gmra.mxu1 %v6583_v32  ;;  %2419 = vmatprep.subr.mxu1 %v7255_v0  ;;  %v6598_v8 = vld [vmem:[#allocation2 + $0x110] sm:$0xff]  ;;  %v6600_v37 = vpop.f32.mrf.mxu0 }
 0x258   : > { %2420 = vmatpush2.msra.mxu1 %v2334_v25  ;;  %7283 = vst [vmem:[#allocation21_spill] sm:$0xff] %v6600_v37  ;;  %v6611_v25 = vld [vmem:[#allocation2 + $0x131] sm:$0xff] }
 0x259   : > { %2135 = vmatmul.mubr.f32.gmra.mxu0 %v6587_v62  ;;  %2421 = vmatprep.subr.mxu1 %v7255_v0  ;;  %v2060_v61 = vpop.f32.mrf.mxu0  ;;  %v2717_v37 = vld [vmem:[#allocation7 + $0x7f8] sm:$0xff] }
 0x25a   : > { %2139 = vmatprep.mubr.f32.mxu0 %v6555_v11  ;;  %v6594_v31 = vld [vmem:[#allocation2 + $0x122] sm:$0xff]  ;;  %2422 = vmatpush2.msra.mxu1 %v2333_v6  ;;  %v6618_v61 = vld [vmem:[#allocation2 + $0x130] sm:$0xff] }
 0x25b   : > { %7282 = vst [vmem:[#allocation20_spill] sm:$0xff] %v6594_v31  ;;  %5021 = vmatprep.mubr.f32.mxu1 %v6594_v31  ;;  %2423 = vmatprep.subr.mxu1 %v7255_v0  ;;  %v6609_v22 = vld [vmem:[#allocation2 + $0x120] sm:$0xff] }
 0x25c   : > { %5022 = vmatmul.mubr.f32.gmra.mxu1 %v6592_v36  ;;  %v6613_v6 = vld [vmem:[#allocation2] sm:$0xff] }
 0x25d   : > { %2140 = vmatmul.mubr.f32.gmra.mxu0 %v6598_v8  ;;  %2424 = vmatpush2.msra.mxu1 %v2332_v46  ;;  %v2748_v46 = vld [vmem:[#allocation7 + $0x8f0] sm:$0xff] }
 0x25e   : > { %2144 = vmatprep.mubr.f32.mxu0 %v6569_v15  ;;  %2425 = vmatprep.subr.mxu1 %v7255_v0  ;;  %v6624_v0 = vld [vmem:[#allocation2 + $0x2] sm:$0xff] }
 0x25f   : > { %2427 = vmatprep.mubr.f32.mxu1 %v6606_v3  ;;  %2426 = vmatpush2.msra.mxu1 %v2331_v24  ;;  %v2747_v24 = vld [vmem:[#allocation7 + $0x8e8] sm:$0xff] }
 0x260   : > { %2428 = vmatmul.mubr.f32.vlgmr.msra.gmra.mxu1 %v6613_v6  ;;  %5086 = vmatprep.subr.mxu1 %v2749_v34 }
 0x261   : > { %2145 = vmatmul.mubr.f32.gmra.mxu0 %v6609_v22  ;;  %2431 = vmatprep.mubr.f32.mxu1 %v6369_v63 }
 0x262   : > { %5087 = vmatpush3.msra.mxu1 %v2749_v34  ;;  %2148 = vmatprep.mubr.f32.mxu0 %v6611_v25  ;;  %v2716_v34 = vld [vmem:[#allocation7 + $0x7f0] sm:$0xff] }
 0x263   : > { %5088 = vmatprep.subr.mxu1 %v2748_v46 }
 0x264   : > { %2432 = vmatmul.mubr.f32.gmra.mxu1 %v6388_v12  ;;  %v7284_v12 = vmov 0.0  }
 0x265   : > { %2149 = vmatmul.mubr.f32.gmra.mxu0 %v6618_v61  ;;  %2436 = vmatprep.mubr.f32.mxu1 %v6367_v7  ;;  %v2715_v7 = vld [vmem:[#allocation7 + $0x7e8] sm:$0xff] }
 0x266   : > { %5056 = vmatprep.mubr.f32.mxu0 %v6624_v0  ;;  %5089 = vmatpush3.msra.mxu1 %v2748_v46  ;;  %v2746_v46 = vld [vmem:[#allocation7 + $0x8e0] sm:$0xff] }
 0x267   : > { %5090 = vmatprep.subr.mxu1 %v2747_v24 }
 0x268   : > { %2437 = vmatmul.mubr.f32.gmra.mxu1 %v6403_v10 }
 0x269   : > { %5057 = vmatmul.mubr.f32.vlgmr.msra.gmra.mxu0 %v6386_v51  ;;  %2441 = vmatprep.mubr.f32.mxu1 %v6377_v45  ;;  %v2714_v51 = vld [vmem:[#allocation7 + $0x7e0] sm:$0xff] }
 0x26a   : > { %2751 = vmatpush1.msra.mxu0 %v2717_v37  ;;  %5059 = vmatprep.mubr.f32.mxu0 %v6392_v38  ;;  %v2713_v37 = vld [vmem:[#allocation7 + $0x7d8] sm:$0xff] }
 0x26b   : > { %2752 = vmatprep.subr.mxu0 %v7284_v12  ;;  %5091 = vmatpush3.msra.mxu1 %v2747_v24  ;;  %v2712_v24 = vld [vmem:[#allocation7 + $0x7d0] sm:$0xff] }
 0x26c   : > { %2753 = vmatpush1.msra.mxu0 %v2716_v34  ;;  %2442 = vmatmul.mubr.f32.gmra.mxu1 %v6418_v52  ;;  %v2711_v34 = vld [vmem:[#allocation7 + $0x7c8] sm:$0xff] }
 0x26d   : > { %2754 = vmatprep.subr.mxu0 %v7284_v12  ;;  %2446 = vmatprep.mubr.f32.mxu1 %v6381_v56 }
 0x26e   : > { %5060 = vmatmul.mubr.f32.gmra.mxu0 %v6401_v40  ;;  %5092 = vmatprep.subr.mxu1 %v2746_v46 }
 0x26f   : > { %2755 = vmatpush1.msra.mxu0 %v2715_v7  ;;  %5062 = vmatprep.mubr.f32.mxu0 %v6412_v53  ;;  %v2710_v7 = vld [vmem:[#allocation7 + $0x7c0] sm:$0xff] }
 0x270   : > { %2756 = vmatprep.subr.mxu0 %v7284_v12  ;;  %2447 = vmatmul.mubr.f32.gmra.mxu1 %v6432_v41 }
 0x271   : > { %2757 = vmatpush1.msra.mxu0 %v2714_v51  ;;  %2451 = vmatprep.mubr.f32.mxu1 %v6394_v33  ;;  %v2745_v51 = vld [vmem:[#allocation7 + $0x8d8] sm:$0xff] }
 0x272   : > { %2758 = vmatprep.subr.mxu0 %v7284_v12  ;;  %5063 = vmatmul.mubr.f32.gmra.mxu0 %v6426_v2 }
 0x273   : > { %5093 = vmatpush3.msra.mxu1 %v2746_v46  ;;  %2759 = vmatpush1.msra.mxu0 %v2713_v37  ;;  %v2709_v46 = vld [vmem:[#allocation7 + $0x7b8] sm:$0xff]  ;;  %v2744_v37 = vld [vmem:[#allocation7 + $0x8d0] sm:$0xff] }
 0x274   : > { %5065 = vmatprep.mubr.f32.mxu0 %v6439_v60  ;;  %2760 = vmatprep.subr.mxu0 %v7284_v12 }
 0x275   : > { %2452 = vmatmul.mubr.f32.gmra.mxu1 %v6444_v23  ;;  %2761 = vmatpush1.msra.mxu0 %v2712_v24  ;;  %v2708_v24 = vld [vmem:[#allocation7 + $0x7b0] sm:$0xff] }
 0x276   : > { %2456 = vmatprep.mubr.f32.mxu1 %v6408_v1  ;;  %2762 = vmatprep.subr.mxu0 %v7284_v12 }
 0x277   : > { %5066 = vmatmul.mubr.f32.gmra.mxu0 %v6449_v44  ;;  %5094 = vmatprep.subr.mxu1 %v2745_v51 }
 0x278   : > { %2763 = vmatpush1.msra.mxu0 %v2711_v34  ;;  %5068 = vmatprep.mubr.f32.mxu0 %v6459_v29  ;;  %v2707_v34 = vld [vmem:[#allocation7 + $0x7a8] sm:$0xff] }
 0x279   : > { %2764 = vmatprep.subr.mxu0 %v7284_v12  ;;  %5095 = vmatpush3.msra.mxu1 %v2745_v51  ;;  %v2706_v51 = vld [vmem:[#allocation7 + $0x7a0] sm:$0xff] }
 0x27a   : > { %2765 = vmatpush1.msra.mxu0 %v2710_v7  ;;  %2457 = vmatmul.mubr.f32.gmra.mxu1 %v6453_v19  ;;  %v2743_v7 = vld [vmem:[#allocation7 + $0x8c8] sm:$0xff] }
 0x27b   : > { %2766 = vmatprep.subr.mxu0 %v7284_v12  ;;  %2461 = vmatprep.mubr.f32.mxu1 %v6422_v4 }
 0x27c   : > { %5069 = vmatmul.mubr.f32.gmra.mxu0 %v6467_v16  ;;  %5096 = vmatprep.subr.mxu1 %v2744_v37 }
 0x27d   : > { %2767 = vmatpush1.msra.mxu0 %v2709_v46  ;;  %5071 = vmatprep.mubr.f32.mxu0 %v6482_v17  ;;  %v2705_v46 = vld [vmem:[#allocation7 + $0x798] sm:$0xff] }
 0x27e   : > { %2768 = vmatprep.subr.mxu0 %v7284_v12  ;;  %2462 = vmatmul.mubr.f32.gmra.mxu1 %v6464_v57 }
 0x27f   : > { %2769 = vmatpush1.msra.mxu0 %v2708_v24  ;;  %5097 = vmatpush3.msra.mxu1 %v2744_v37  ;;  %v2704_v37 = vld [vmem:[#allocation7 + $0x790] sm:$0xff]  ;;  %v2742_v24 = vld [vmem:[#allocation7 + $0x8c0] sm:$0xff] }
 0x280   : > { %2770 = vmatprep.subr.mxu0 %v7284_v12  ;;  %2466 = vmatprep.mubr.f32.mxu1 %v6435_v49 }
 0x281   : > { %5072 = vmatmul.mubr.f32.gmra.mxu0 %v6506_v20  ;;  %5098 = vmatprep.subr.mxu1 %v2743_v7 }
 0x282   : > { %2771 = vmatpush1.msra.mxu0 %v2707_v34  ;;  %5074 = vmatprep.mubr.f32.mxu0 %v6518_v58  ;;  %v2703_v34 = vld [vmem:[#allocation7 + $0x788] sm:$0xff] }
 0x283   : > { %2772 = vmatprep.subr.mxu0 %v7284_v12  ;;  %2467 = vmatmul.mubr.f32.gmra.mxu1 %v6479_v54 }
 0x284   : > { %2773 = vmatpush1.msra.mxu0 %v2706_v51  ;;  %5099 = vmatpush3.msra.mxu1 %v2743_v7  ;;  %v2702_v51 = vld [vmem:[#allocation7 + $0x780] sm:$0xff]  ;;  %v2733_v7 = vld [vmem:[#allocation7 + $0x878] sm:$0xff] }
 0x285   : > { %2774 = vmatprep.subr.mxu0 %v7284_v12  ;;  %5075 = vmatmul.mubr.f32.gmra.mxu0 %v6532_v13 }
 0x286   : > { %2775 = vmatpush1.msra.mxu0 %v2705_v46  ;;  %5077 = vmatprep.mubr.f32.mxu0 %v6546_v21  ;;  %v2741_v46 = vld [vmem:[#allocation7 + $0x8b8] sm:$0xff] }
 0x287   : > { %2776 = vmatprep.subr.mxu0 %v7284_v12  ;;  %2471 = vmatprep.mubr.f32.mxu1 %v6474_v27 }
 0x288   : > { %2777 = vmatpush1.msra.mxu0 %v2704_v37  ;;  %2472 = vmatmul.mubr.f32.gmra.mxu1 %v6490_v50  ;;  %v2732_v37 = vld [vmem:[#allocation7 + $0x870] sm:$0xff] }
 0x289   : > { %2778 = vmatprep.subr.mxu0 %v7284_v12  ;;  %5078 = vmatmul.mubr.f32.gmra.mxu0 %v6560_v5 }
 0x28a   : > { %5100 = vmatprep.subr.mxu1 %v2742_v24  ;;  %2779 = vmatpush1.msra.mxu0 %v2703_v34  ;;  %v2740_v34 = vld [vmem:[#allocation7 + $0x8b0] sm:$0xff] }
 0x28b   : > { %5080 = vmatprep.mubr.f32.mxu0 %v6573_v48  ;;  %2780 = vmatprep.subr.mxu0 %v7284_v12 }
 0x28c   : > { %5101 = vmatpush3.msra.mxu1 %v2742_v24  ;;  %2475 = vmatprep.mubr.f32.mxu1 %v6493_v55  ;;  %v2731_v24 = vld [vmem:[#allocation7 + $0x868] sm:$0xff] }
 0x28d   : > { %2781 = vmatpush1.msra.mxu0 %v2702_v51  ;;  %2476 = vmatmul.mubr.f32.gmra.mxu1 %v6504_v35  ;;  %v2730_v51 = vld [vmem:[#allocation7 + $0x860] sm:$0xff] }
 0x28e   : > { %2782 = vmatprep.subr.mxu0 %v7284_v12  ;;  %2479 = vmatprep.mubr.f32.mxu1 %v6469_v28 }
 0x28f   : > { %5081 = vmatmul.mubr.f32.gmra.mxu0 %v6583_v32  ;;  %5102 = vmatprep.subr.mxu1 %v2741_v46 }
 0x290   : > { %2783 = vmatpush2.msra.mxu0 %v2733_v7  ;;  %5083 = vmatprep.mubr.f32.mxu0 %v6594_v31  ;;  %v2729_v7 = vld [vmem:[#allocation7 + $0x858] sm:$0xff]  ;;  %v2739_v31 = vld [vmem:[#allocation7 + $0x8a8] sm:$0xff] }
 0x291   : > { %2784 = vmatprep.subr.mxu0 %v7284_v12  ;;  %5103 = vmatpush3.msra.mxu1 %v2741_v46  ;;  %v2728_v46 = vld [vmem:[#allocation7 + $0x850] sm:$0xff] }
 0x292   : > { %2785 = vmatpush2.msra.mxu0 %v2732_v37  ;;  %2480 = vmatmul.mubr.f32.gmra.mxu1 %v6524_v9  ;;  %v2727_v37 = vld [vmem:[#allocation7 + $0x848] sm:$0xff] }
 0x293   : > { %2786 = vmatprep.subr.mxu0 %v7284_v12  ;;  %2484 = vmatprep.mubr.f32.mxu1 %v6485_v47 }
 0x294   : > { %2787 = vmatpush2.msra.mxu0 %v2731_v24  ;;  %5104 = vmatprep.subr.mxu1 %v2740_v34  ;;  %v2738_v24 = vld [vmem:[#allocation7 + $0x8a0] sm:$0xff] }
 0x295   : > { %2788 = vmatprep.subr.mxu0 %v7284_v12  ;;  %5105 = vmatpush3.msra.mxu1 %v2740_v34  ;;  %v2726_v34 = vld [vmem:[#allocation7 + $0x840] sm:$0xff] }
 0x296   : > { %2789 = vmatpush2.msra.mxu0 %v2730_v51  ;;  %2485 = vmatmul.mubr.f32.gmra.mxu1 %v6538_v42  ;;  %v2725_v51 = vld [vmem:[#allocation7 + $0x838] sm:$0xff] }
 0x297   : > { %2790 = vmatprep.subr.mxu0 %v7284_v12  ;;  %2489 = vmatprep.mubr.f32.mxu1 %v6499_v30 }
 0x298   : > { %2791 = vmatpush2.msra.mxu0 %v2729_v7  ;;  %5106 = vmatprep.subr.mxu1 %v2739_v31  ;;  %v2737_v7 = vld [vmem:[#allocation7 + $0x898] sm:$0xff] }
 0x299   : > { %2792 = vmatprep.subr.mxu0 %v7284_v12  ;;  %5107 = vmatpush3.msra.mxu1 %v2739_v31  ;;  %v2724_v31 = vld [vmem:[#allocation7 + $0x830] sm:$0xff] }
 0x29a   : > { %2793 = vmatpush2.msra.mxu0 %v2728_v46  ;;  %2490 = vmatmul.mubr.f32.gmra.mxu1 %v6552_v39  ;;  %v2723_v46 = vld [vmem:[#allocation7 + $0x828] sm:$0xff] }
 0x29b   : > { %2794 = vmatprep.subr.mxu0 %v7284_v12  ;;  %2494 = vmatprep.mubr.f32.mxu1 %v6513_v26 }
 0x29c   : > { %2795 = vmatpush2.msra.mxu0 %v2727_v37  ;;  %5108 = vmatprep.subr.mxu1 %v2738_v24  ;;  %v2722_v37 = vld [vmem:[#allocation7 + $0x820] sm:$0xff] }
 0x29d   : > { %2796 = vmatprep.subr.mxu0 %v7284_v12  ;;  %5109 = vmatpush3.msra.mxu1 %v2738_v24  ;;  %v2736_v24 = vld [vmem:[#allocation7 + $0x890] sm:$0xff] }
 0x29e   : > { %2797 = vmatpush2.msra.mxu0 %v2726_v34  ;;  %2495 = vmatmul.mubr.f32.gmra.mxu1 %v6566_v59  ;;  %v2721_v34 = vld [vmem:[#allocation7 + $0x818] sm:$0xff] }
 0x29f   : > { %2798 = vmatprep.subr.mxu0 %v7284_v12  ;;  %2499 = vmatprep.mubr.f32.mxu1 %v6527_v43 }
 0x2a0   : > { %2799 = vmatpush2.msra.mxu0 %v2725_v51  ;;  %5110 = vmatprep.subr.mxu1 %v2737_v7  ;;  %v2720_v51 = vld [vmem:[#allocation7 + $0x810] sm:$0xff] }
 0x2a1   : > { %2800 = vmatprep.subr.mxu0 %v7284_v12  ;;  %5111 = vmatpush3.msra.mxu1 %v2737_v7  ;;  %v2719_v7 = vld [vmem:[#allocation7 + $0x808] sm:$0xff] }
 0x2a2   : > { %2801 = vmatpush2.msra.mxu0 %v2724_v31  ;;  %2500 = vmatmul.mubr.f32.gmra.mxu1 %v6578_v14  ;;  %v2735_v31 = vld [vmem:[#allocation7 + $0x888] sm:$0xff] }
 0x2a3   : > { %2802 = vmatprep.subr.mxu0 %v7284_v12  ;;  %2504 = vmatprep.mubr.f32.mxu1 %v6541_v18 }
 0x2a4   : > { %2803 = vmatpush2.msra.mxu0 %v2723_v46  ;;  %5112 = vmatprep.subr.mxu1 %v2736_v24  ;;  %v2718_v46 = vld [vmem:[#allocation7 + $0x800] sm:$0xff] }
 0x2a5   : > { %2804 = vmatprep.subr.mxu0 %v7284_v12  ;;  %5084 = vmatmul.mubr.f32.gmra.mxu0 %v6592_v36 }
 0x2a6   : > { %2805 = vmatpush2.msra.mxu0 %v2722_v37  ;;  %2505 = vmatmul.mubr.f32.gmra.mxu1 %v6587_v62  ;;  %v2734_v37 = vld [vmem:[#allocation7 + $0x880] sm:$0xff] }
 0x2a7   : > { %2806 = vmatprep.subr.mxu0 %v7284_v12  ;;  %2509 = vmatprep.mubr.f32.mxu1 %v6555_v11 }
 0x2a8   : > { %2807 = vmatpush2.msra.mxu0 %v2721_v34  ;;  %5113 = vmatpush3.msra.mxu1 %v2736_v24  ;;  %v5296_v24 = vld [vmem:[#allocation2 + $0x21] sm:$0xff] }
 0x2a9   : > { %2808 = vmatprep.subr.mxu0 %v7284_v12  ;;  %2814 = vmatprep.mubr.f32.mxu0 %v6606_v3  ;;  %v7285_v3 = vld [vmem:[#allocation19_spill] sm:$0xff]  ;;  %v7286_v34 = vld [vmem:[#allocation18_spill] sm:$0xff] }
 0x2aa   : > { %2809 = vmatpush2.msra.mxu0 %v2720_v51  ;;  %2510 = vmatmul.mubr.f32.gmra.mxu1 %v6598_v8  ;;  %v3144_v51 = vld [vmem:[#allocation10 + $0x80] sm:$0xff] }
 0x2ab   : > { %2810 = vmatprep.subr.mxu0 %v7284_v12  ;;  %2514 = vmatprep.mubr.f32.mxu1 %v6569_v15 }
 0x2ac   : > { %2811 = vmatpush2.msra.mxu0 %v2719_v7  ;;  %5114 = vmatprep.subr.mxu1 %v2735_v31  ;;  %v6821_v7 = vld [vmem:[#allocation10 + $0x198] sm:$0xff] }
 0x2ad   : > { %2812 = vmatprep.subr.mxu0 %v7284_v12  ;;  %5115 = vmatpush3.msra.mxu1 %v2735_v31 }
 0x2ae   : > { %2813 = vmatpush2.msra.mxu0 %v2718_v46  ;;  %2515 = vmatmul.mubr.f32.gmra.mxu1 %v6609_v22  ;;  %v6824_v46 = vld [vmem:[#allocation10 + $0x190] sm:$0xff] }
 0x2af   : > { %2815 = vmatmul.mubr.f32.vlgmr.msra.gmra.mxu0 %v6613_v6  ;;  %2519 = vmatprep.mubr.f32.mxu1 %v6611_v25 }
 0x2b0   : > { %2818 = vmatprep.mubr.f32.mxu0 %v6369_v63  ;;  %5116 = vmatprep.subr.mxu1 %v2734_v37  ;;  %v6753_v63 = vld [vmem:[#allocation10 + $0x1f8] sm:$0xff] }
 0x2b1   : > { %5117 = vmatpush3.msra.mxu1 %v2734_v37  ;;  %3762 = vmatprep.subr.mxu0 %v6753_v63 }
 0x2b2   : > { %2520 = vmatmul.mubr.f32.gmra.mxu1 %v6618_v61 }
 0x2b3   : > { %2819 = vmatmul.mubr.f32.gmra.mxu0 %v7285_v3  ;;  %5118 = vmatprep.mubr.f32.mxu1 %v6624_v0  ;;  %v7287_v0 = vld [vmem:[#allocation20_spill] sm:$0xff] }
 0x2b4   : > { %2822 = vmatprep.mubr.f32.mxu0 %v5296_v24  ;;  %v6831_v24 = vld [vmem:[#allocation10 + $0x188] sm:$0xff] }
 0x2b6   : > { %5119 = vmatmul.mubr.f32.vlgmr.msra.gmra.mxu1 %v7286_v34  ;;  %v3142_v34 = vld [vmem:[#allocation10 + $0x70] sm:$0xff] }
 0x2b7   : > { %2823 = vmatmul.mubr.f32.gmra.mxu0 %v6403_v10  ;;  %5121 = vmatprep.mubr.f32.mxu1 %v6392_v38  ;;  %v6767_v10 = vld [vmem:[#allocation10 + $0x1e0] sm:$0xff] }
 0x2b8   : > { %2827 = vmatprep.mubr.f32.mxu0 %v6377_v45  ;;  %v6755_v45 = vld [vmem:[#allocation10 + $0x1f0] sm:$0xff] }
 0x2b9   : > { %3763 = vmatpush1.msra.mxu0 %v6755_v45 }
 0x2ba   : > { %5122 = vmatmul.mubr.f32.gmra.mxu1 %v6401_v40  ;;  %v6765_v40 = vld [vmem:[#allocation10 + $0x1e8] sm:$0xff] }
 0x2bb   : > { %2828 = vmatmul.mubr.f32.gmra.mxu0 %v6418_v52  ;;  %5124 = vmatprep.mubr.f32.mxu1 %v6412_v53 }
 0x2bc   : > { %2832 = vmatprep.mubr.f32.mxu0 %v6381_v56  ;;  %3764 = vmatprep.subr.mxu0 %v6765_v40 }
 0x2bd   : > { %3765 = vmatpush1.msra.mxu0 %v6767_v10 }
 0x2be   : > { %5125 = vmatmul.mubr.f32.gmra.mxu1 %v6426_v2  ;;  %v3158_v2 = vld [vmem:[#allocation10 + $0xf0] sm:$0xff] }
 0x2bf   : > { %2833 = vmatmul.mubr.f32.gmra.mxu0 %v6432_v41  ;;  %5127 = vmatprep.mubr.f32.mxu1 %v6439_v60  ;;  %v6777_v41 = vld [vmem:[#allocation10 + $0x1d8] sm:$0xff] }
 0x2c0   : > { %2837 = vmatprep.mubr.f32.mxu0 %v6394_v33  ;;  %3766 = vmatprep.subr.mxu0 %v6777_v41 }
 0x2c2   : > { %5128 = vmatmul.mubr.f32.gmra.mxu1 %v6449_v44 }
 0x2c3   : > { %2838 = vmatmul.mubr.f32.gmra.mxu0 %v6444_v23  ;;  %5130 = vmatprep.mubr.f32.mxu1 %v6459_v29  ;;  %v6784_v29 = vld [vmem:[#allocation10 + $0x1d0] sm:$0xff] }
 0x2c4   : > { %2842 = vmatprep.mubr.f32.mxu0 %v6408_v1  ;;  %3767 = vmatpush1.msra.mxu0 %v6784_v29 }
 0x2c6   : > { %5131 = vmatmul.mubr.f32.gmra.mxu1 %v6467_v16 }
 0x2c7   : > { %2843 = vmatmul.mubr.f32.gmra.mxu0 %v6453_v19  ;;  %5133 = vmatprep.mubr.f32.mxu1 %v6482_v17  ;;  %v3157_v19 = vld [vmem:[#allocation10 + $0xe8] sm:$0xff] }
 0x2c8   : > { %2847 = vmatprep.mubr.f32.mxu0 %v6422_v4  ;;  %v3159_v4 = vld [vmem:[#allocation10 + $0xf8] sm:$0xff] }
 0x2c9   : > { %3172 = vmatprep.subr.mxu1 %v3159_v4  ;;  %v3141_v4 = vld [vmem:[#allocation10 + $0x68] sm:$0xff] }
 0x2ca   : > { %5134 = vmatmul.mubr.f32.gmra.mxu1 %v6506_v20 }
 0x2cb   : > { %2848 = vmatmul.mubr.f32.gmra.mxu0 %v6464_v57  ;;  %5136 = vmatprep.mubr.f32.mxu1 %v6518_v58  ;;  %v3156_v57 = vld [vmem:[#allocation10 + $0xe0] sm:$0xff] }
 0x2cc   : > { %2852 = vmatprep.mubr.f32.mxu0 %v6435_v49  ;;  %3173 = vmatpush1.msra.mxu1 %v3158_v2  ;;  %v6842_v2 = vld [vmem:[#allocation10 + $0x170] sm:$0xff] }
 0x2cd   : > { %3174 = vmatprep.subr.mxu1 %v3157_v19  ;;  %v6849_v19 = vld [vmem:[#allocation10 + $0x160] sm:$0xff] }
 0x2ce   : > { %5137 = vmatmul.mubr.f32.gmra.mxu1 %v6532_v13  ;;  %v6803_v13 = vld [vmem:[#allocation10 + $0x1b8] sm:$0xff] }
 0x2cf   : > { %2853 = vmatmul.mubr.f32.gmra.mxu0 %v6479_v54  ;;  %5139 = vmatprep.mubr.f32.mxu1 %v6546_v21 }
 0x2d0   : > { %2857 = vmatprep.mubr.f32.mxu0 %v6474_v27  ;;  %v3154_v27 = vld [vmem:[#allocation10 + $0xd0] sm:$0xff]  ;;  %3175 = vmatpush1.msra.mxu1 %v3156_v57 }
 0x2d1   : > { %v3138_v57 = vld [vmem:[#allocation10 + $0x50] sm:$0xff] }
 0x2d2   : > { %5140 = vmatmul.mubr.f32.gmra.mxu1 %v6560_v5 }
 0x2d3   : > { %2858 = vmatmul.mubr.f32.gmra.mxu0 %v6490_v50  ;;  %5142 = vmatprep.mubr.f32.mxu1 %v6573_v48  ;;  %v3153_v50 = vld [vmem:[#allocation10 + $0xc8] sm:$0xff] }
 0x2d4   : > { %2862 = vmatprep.mubr.f32.mxu0 %v6493_v55  ;;  %v6795_v55 = vld [vmem:[#allocation10 + $0x1c0] sm:$0xff]  ;;  %v6814_v48 = vld [vmem:[#allocation10 + $0x1a8] sm:$0xff] }
 0x2d6   : > { %5143 = vmatmul.mubr.f32.gmra.mxu1 %v6583_v32  ;;  %v3147_v32 = vld [vmem:[#allocation10 + $0x98] sm:$0xff] }
 0x2d7   : > { %2863 = vmatmul.mubr.f32.gmra.mxu0 %v6504_v35  ;;  %5145 = vmatprep.mubr.f32.mxu1 %v7287_v0  ;;  %v3152_v35 = vld [vmem:[#allocation10 + $0xc0] sm:$0xff] }
 0x2d8   : > { %2866 = vmatprep.mubr.f32.mxu0 %v6469_v28  ;;  %v3155_v28 = vld [vmem:[#allocation10 + $0xd8] sm:$0xff]  ;;  %v6835_v0 = vld [vmem:[#allocation10 + $0x180] sm:$0xff] }
 0x2d9   : > { %3176 = vmatprep.subr.mxu1 %v3155_v28 }
 0x2da   : > { %5146 = vmatmul.mubr.f32.gmra.mxu1 %v6592_v36  ;;  %v3145_v36 = vld [vmem:[#allocation10 + $0x88] sm:$0xff] }
 0x2db   : > { %2867 = vmatmul.mubr.f32.gmra.mxu0 %v6524_v9  ;;  %3236 = vmatprep.mubr.f32.mxu1 %v7284_v12 }
 0x2dc   : > { %2870 = vmatprep.mubr.f32.mxu0 %v6485_v47  ;;  %v4996_v56 = vpop.f32.mrf.mxu1  ;;  %v6793_v47 = vld [vmem:[#allocation10 + $0x1c8] sm:$0xff]  ;;  %3177 = vmatpush1.msra.mxu1 %v3154_v27  ;;  %v6855_v27 = vld [vmem:[#allocation10 + $0x150] sm:$0xff] }
 0x2dd   : > { %v2063_v38 = vpop.f32.mrf.mxu0  ;;  %3768 = vmatprep.subr.mxu0 %v6793_v47  ;;  %3178 = vmatprep.subr.mxu1 %v3153_v50  ;;  %v3137_v50 = vld [vmem:[#allocation10 + $0x48] sm:$0xff] }
 0x2de   : > { %v6763_v33 = vadd.f32 %v4996_v56, %v2063_v38  ;;  %v6773_v53 = vpop.f32.mrf.mxu1  ;;  %3769 = vmatpush1.msra.mxu0 %v6795_v55  ;;  %3179 = vmatpush1.msra.mxu1 %v3152_v35  ;;  %v6839_v38 = vld [vmem:[#allocation10 + $0x178] sm:$0xff] }
 0x2df   : > { %2871 = vmatmul.mubr.f32.gmra.mxu0 %v6538_v42  ;;  %v2065_v1 = vpop.f32.mrf.mxu0  ;;  %v3149_v42 = vld [vmem:[#allocation10 + $0xa8] sm:$0xff]  ;;  %3770 = vmatprep.subr.mxu0 %v6803_v13 }
 0x2e0   : > { %2875 = vmatprep.mubr.f32.mxu0 %v6499_v30  ;;  %v4999_v60 = vpop.f32.mrf.mxu1 }
 0x2e1   : > { %v6775_v52 = vpop.f32.mrf.mxu0 }
 0x2e2   : > { %v6791_v17 = vpop.f32.mrf.mxu1 }
 0x2e3   : > { %2876 = vmatmul.mubr.f32.gmra.mxu0 %v6552_v39  ;;  %v2070_v49 = vpop.f32.mrf.mxu0  ;;  %v3148_v39 = vld [vmem:[#allocation10 + $0xa0] sm:$0xff] }
 0x2e4   : > { %2880 = vmatprep.mubr.f32.mxu0 %v6513_v26  ;;  %v3151_v26 = vld [vmem:[#allocation10 + $0xb8] sm:$0xff]  ;;  %v3140_v49 = vld [vmem:[#allocation10 + $0x60] sm:$0xff] }
 0x2e5   : > { %v2073_v23 = vpop.f32.mrf.mxu0  ;;  %3180 = vmatprep.subr.mxu1 %v3151_v26  ;;  %v3135_v26 = vld [vmem:[#allocation10 + $0x38] sm:$0xff] }
 0x2e6   : > { %v6782_v44 = vadd.f32 %v4999_v60, %v2073_v23  ;;  %v6845_v60 = vld [vmem:[#allocation10 + $0x168] sm:$0xff]  ;;  %v3139_v23 = vld [vmem:[#allocation10 + $0x58] sm:$0xff] }
 0x2e7   : > { %2881 = vmatmul.mubr.f32.gmra.mxu0 %v6566_v59  ;;  %v2075_v16 = vpop.f32.mrf.mxu0  ;;  %v5002_v20 = vpop.f32.mrf.mxu1 }
 0x2e8   : > { %2885 = vmatprep.mubr.f32.mxu0 %v6527_v43  ;;  %v3150_v43 = vld [vmem:[#allocation10 + $0xb0] sm:$0xff]  ;;  %v6852_v16 = vld [vmem:[#allocation10 + $0x158] sm:$0xff] }
 0x2e9   : > { %v6789_v54 = vpop.f32.mrf.mxu0  ;;  %v6808_v5 = vpop.f32.mrf.mxu1  ;;  %3181 = vmatpush1.msra.mxu1 %v3150_v43  ;;  %v6864_v43 = vld [vmem:[#allocation10 + $0x138] sm:$0xff] }
 0x2ea   : > { %3182 = vmatprep.subr.mxu1 %v3149_v42  ;;  %v3134_v42 = vld [vmem:[#allocation10 + $0x30] sm:$0xff] }
 0x2eb   : > { %2886 = vmatmul.mubr.f32.gmra.mxu0 %v6578_v14  ;;  %v2080_v30 = vpop.f32.mrf.mxu0  ;;  %3183 = vmatpush1.msra.mxu1 %v3148_v39  ;;  %v6867_v39 = vld [vmem:[#allocation10 + $0x130] sm:$0xff] }
 0x2ec   : > { %2890 = vmatprep.mubr.f32.mxu0 %v6541_v18  ;;  %v6806_v18 = vld [vmem:[#allocation10 + $0x1b0] sm:$0xff]  ;;  %3184 = vmatprep.subr.mxu1 %v3147_v32  ;;  %v3136_v30 = vld [vmem:[#allocation10 + $0x40] sm:$0xff] }
 0x2ed   : > { %v2083_v58 = vpop.f32.mrf.mxu0  ;;  %3771 = vmatpush1.msra.mxu0 %v6806_v18 }
 0x2ee   : > { %v6801_v9 = vadd.f32 %v5002_v20, %v2083_v58  ;;  %3772 = vmatprep.subr.mxu0 %v6814_v48  ;;  %v6861_v20 = vld [vmem:[#allocation10 + $0x140] sm:$0xff] }
 0x2ef   : > { %2891 = vmatmul.mubr.f32.gmra.mxu0 %v6587_v62  ;;  %v2085_v21 = vpop.f32.mrf.mxu0  ;;  %v5005_v14 = vpop.f32.mrf.mxu1  ;;  %v3146_v62 = vld [vmem:[#allocation10 + $0x90] sm:$0xff] }
 0x2f0   : > { %2895 = vmatprep.mubr.f32.mxu0 %v6555_v11  ;;  %v6818_v11 = vld [vmem:[#allocation10 + $0x1a0] sm:$0xff]  ;;  %3185 = vmatpush1.msra.mxu1 %v3146_v62  ;;  %v6870_v62 = vld [vmem:[#allocation10 + $0x128] sm:$0xff] }
 0x2f1   : > { %v6811_v59 = vpop.f32.mrf.mxu0  ;;  %3186 = vmatprep.subr.mxu1 %v3145_v36  ;;  %v6826_v37 = vpop.f32.mrf.mxu1  ;;  %3773 = vmatpush1.msra.mxu0 %v6818_v11  ;;  %7288 = vst [vmem:[#allocation19_spill] sm:$0xff] %v6870_v62  ;;  %v3132_v36 = vld [vmem:[#allocation10 + $0x20] sm:$0xff] }
 0x2f2   : > { %3187 = vmatpush1.msra.mxu1 %v3144_v51  ;;  %3774 = vmatprep.subr.mxu0 %v6821_v7 }
 0x2f3   : > { %2896 = vmatmul.mubr.f32.gmra.mxu0 %v6598_v8  ;;  %v2090_v6 = vpop.f32.mrf.mxu0  ;;  %v3143_v8 = vld [vmem:[#allocation10 + $0x78] sm:$0xff] }
 0x2f4   : > { %2900 = vmatprep.mubr.f32.mxu0 %v6569_v15  ;;  %3775 = vmatpush1.msra.mxu0 %v6824_v46 }
 0x2f5   : > { %v2093_v31 = vpop.f32.mrf.mxu0  ;;  %3188 = vmatprep.subr.mxu1 %v3143_v8  ;;  %3776 = vmatprep.subr.mxu0 %v6831_v24  ;;  %v3131_v8 = vld [vmem:[#allocation10 + $0x18] sm:$0xff] }
 0x2f6   : > { %v6828_v3 = vadd.f32 %v5005_v14, %v2093_v31  ;;  %3189 = vmatpush1.msra.mxu1 %v3142_v34  ;;  %3777 = vmatpush1.msra.mxu0 %v6835_v0  ;;  %v3133_v14 = vld [vmem:[#allocation10 + $0x28] sm:$0xff]  ;;  %v6875_v31 = vld [vmem:[#allocation10 + $0x120] sm:$0xff]  ;;  %v3130_v34 = vld [vmem:[#allocation10 + $0x10] sm:$0xff] }
 0x2f7   : > { %2901 = vmatmul.mubr.f32.gmra.mxu0 %v6609_v22  ;;  %v2095_v15 = vpop.f32.mrf.mxu0  ;;  %v5008_v56 = vpop.f32.mrf.mxu1  ;;  %3778 = vmatprep.subr.mxu0 %v6839_v38  ;;  %7289 = vst [vmem:[#allocation18_spill] sm:$0xff] %v6875_v31 }
 0x2f8   : > { %2905 = vmatprep.mubr.f32.mxu0 %v6611_v25  ;;  %3190 = vmatprep.subr.mxu1 %v3141_v4  ;;  %v6878_v15 = vld [vmem:[#allocation10 + $0x118] sm:$0xff]  ;;  %v3129_v4 = vld [vmem:[#allocation10 + $0x8] sm:$0xff] }
 0x2f9   : > { %v2098_v1 = vpop.f32.mrf.mxu0  ;;  %v2259_v22 = vpop.f32.mrf.mxu1  ;;  %3779 = vmatpush1.msra.mxu0 %v6842_v2  ;;  %3191 = vmatpush1.msra.mxu1 %v3140_v49  ;;  %7290 = vst [vmem:[#allocation20_spill] sm:$0xff] %v6878_v15  ;;  %v6886_v49 = vld [vmem:[#allocation10 + $0x108] sm:$0xff] }
 0x2fa   : > { %3780 = vmatprep.subr.mxu0 %v6845_v60  ;;  %3192 = vmatprep.subr.mxu1 %v3139_v23  ;;  %v6881_v1 = vld [vmem:[#allocation10 + $0x110] sm:$0xff]  ;;  %7292 = vst [vmem:[#allocation23_spill] sm:$0xff] %v6886_v49 }
 0x2fb   : > { %2906 = vmatmul.mubr.f32.gmra.mxu0 %v6618_v61  ;;  %v2099_v25 = vpop.f32.mrf.mxu0  ;;  %v6858_v61 = vld [vmem:[#allocation10 + $0x148] sm:$0xff]  ;;  %3193 = vmatpush1.msra.mxu1 %v3138_v57  ;;  %7291 = vst [vmem:[#allocation22_spill] sm:$0xff] %v6881_v1  ;;  %v6889_v57 = vld [vmem:[#allocation10 + $0x100] sm:$0xff] }
 0x2fc   : > { %3781 = vmatpush1.msra.mxu0 %v6849_v19  ;;  %3194 = vmatprep.subr.mxu1 %v3137_v50  ;;  %v3128_v25 = vld [vmem:[#allocation10] sm:$0xff]  ;;  %7293 = vst [vmem:[#allocation24_spill] sm:$0xff] %v6889_v57 }
 0x2fd   : > { %v2102_v28 = vpop.f32.mrf.mxu0  ;;  %3782 = vmatprep.subr.mxu0 %v6852_v16  ;;  %3195 = vmatpush1.msra.mxu1 %v3136_v30 }
 0x2fe   : > { %3783 = vmatpush1.msra.mxu0 %v6855_v27  ;;  %3196 = vmatprep.subr.mxu1 %v3135_v26 }
 0x2ff   : > { %v2103_v35 = vpop.f32.mrf.mxu0  ;;  %v5011_v58 = vpop.f32.mrf.mxu1  ;;  %3784 = vmatprep.subr.mxu0 %v6858_v61  ;;  %3197 = vmatpush1.msra.mxu1 %v3134_v42 }
 0x300   : > { %3785 = vmatpush1.msra.mxu0 %v6861_v20  ;;  %3198 = vmatprep.subr.mxu1 %v3133_v14 }
 0x301   : > { %v2106_v21 = vpop.f32.mrf.mxu0  ;;  %v2267_v32 = vpop.f32.mrf.mxu1  ;;  %3786 = vmatprep.subr.mxu0 %v6864_v43  ;;  %3199 = vmatpush1.msra.mxu1 %v3132_v36 }
 0x302   : > { %v6872_v6 = vadd.f32 %v2267_v32, %v2106_v21  ;;  %3787 = vmatpush1.msra.mxu0 %v6867_v39  ;;  %3200 = vmatprep.subr.mxu1 %v3131_v8 }
 0x303   : > { %v2108_v51 = vpop.f32.mrf.mxu0  ;;  %3788 = vmatprep.subr.mxu0 %v6870_v62  ;;  %3201 = vmatpush1.msra.mxu1 %v3130_v34 }
 0x304   : > { %3789 = vmatpush1.msra.mxu0 %v6875_v31  ;;  %3202 = vmatprep.subr.mxu1 %v3129_v4 }
 0x305   : > { %v2111_v56 = vpop.f32.mrf.mxu0  ;;  %3790 = vmatprep.subr.mxu0 %v6878_v15  ;;  %3203 = vmatpush1.msra.mxu1 %v3128_v25 }
 0x306   : > { %v6883_v22 = vadd.f32 %v5011_v58, %v2111_v56  ;;  %3791 = vmatpush1.msra.mxu0 %v6881_v1  ;;  %3826 = vmatprep.mubr.f32.mxu0 %v7284_v12 }
 0x307   : > { %v2113_v23 = vpop.f32.mrf.mxu0  ;;  %v5014_v28 = vpop.f32.mrf.mxu1  ;;  %3792 = vmatprep.subr.mxu0 %v6886_v49  ;;  %5148 = vmatprep.subr.mxu1 %v6753_v63 }
 0x308   : > { %3793 = vmatpush1.msra.mxu0 %v6889_v57 }
 0x309   : > { %v2116_v50 = vpop.f32.mrf.mxu0  ;;  %v2277_v30 = vpop.f32.mrf.mxu1 }
 0x30a   : > { %v6895_v35 = vadd.f32 %v2277_v30, %v2116_v50 }
 0x30b   : > { %v2118_v26 = vpop.f32.mrf.mxu0 }
 0x30d   : > { %v2121_v58 = vpop.f32.mrf.mxu0 }
 0x30e   : > { %v6898_v42 = vadd.f32 %v5014_v28, %v2121_v58 }
 0x30f   : > { %v2123_v21 = vpop.f32.mrf.mxu0  ;;  %v5017_v14 = vpop.f32.mrf.mxu1 }
 0x311   : > { %v2126_v32 = vpop.f32.mrf.mxu0  ;;  %v2287_v36 = vpop.f32.mrf.mxu1 }
 0x312   : > { %v6900_v51 = vadd.f32 %v2287_v36, %v2126_v32 }
 0x313   : > { %v2128_v8 = vpop.f32.mrf.mxu0 }
 0x315   : > { %v2131_v34 = vpop.f32.mrf.mxu0 }
 0x316   : > { %v6902_v56 = vadd.f32 %v5017_v14, %v2131_v34 }
 0x317   : > { %v2133_v4 = vpop.f32.mrf.mxu0  ;;  %v5020_v25 = vpop.f32.mrf.mxu1 }
 0x319   : > { %v2136_v23 = vpop.f32.mrf.mxu0  ;;  %v2297_v50 = vpop.f32.mrf.mxu1 }
 0x31a   : > { %v6904_v30 = vadd.f32 %v2297_v50, %v2136_v23 }
 0x31b   : > { %v2138_v63 = vpop.f32.mrf.mxu0 }
 0x31c   : > { %v5023_v26 = vpop.f32.mrf.mxu1 }
 0x31d   : > { %v2141_v28 = vpop.f32.mrf.mxu0 }
 0x31e   : > { %v6906_v58 = vadd.f32 %v5020_v25, %v2141_v28  ;;  %v2307_v21 = vpop.f32.mrf.mxu1  ;;  %v2230_v25 = vadd.f32 %v6791_v17, %v6775_v52 }
 0x31f   : > { %v2143_v57 = vpop.f32.mrf.mxu0 }
 0x320   : > { %v2429_v49 = vpop.f32.mrf.mxu1 }
 0x321   : > { %v2146_v32 = vpop.f32.mrf.mxu0 }
 0x322   : > { %v2430_v36 = vpop.f32.mrf.mxu1 }
 0x323   : > { %v2147_v8 = vpop.f32.mrf.mxu0 }
 0x324   : > { %v2433_v1 = vpop.f32.mrf.mxu1 }
 0x325   : > { %v2150_v14 = vpop.f32.mrf.mxu0 }
 0x326   : > { %v2435_v34 = vpop.f32.mrf.mxu1 }
 0x327   : > { %v2151_v4 = vpop.f32.mrf.mxu0 }
 0x328   : > { %v2438_v15 = vpop.f32.mrf.mxu1  ;;  %v2240_v4 = vadd.f32 %v6808_v5, %v6789_v54  ;;  %v2250_v54 = vadd.f32 %v6826_v37, %v6811_v59 }
 0x329   : > { %v5058_v31 = vpop.f32.mrf.mxu0 }
 0x32a   : > { %v6908_v62 = vadd.f32 %v5058_v31, %v2433_v1  ;;  %v2440_v23 = vpop.f32.mrf.mxu1 }
 0x32b   : > { %v2590_v50 = vpop.f32.mrf.mxu0 }
 0x32c   : > { %v2443_v63 = vpop.f32.mrf.mxu1 }
 0x32e   : > { %v5061_v26 = vpop.f32.mrf.mxu0  ;;  %v2445_v49 = vpop.f32.mrf.mxu1 }
 0x32f   : > { %v2605_v57 = vadd.f32 %v5061_v26, %v2443_v63 }
 0x330   : > { %v2599_v28 = vpop.f32.mrf.mxu0  ;;  %v2448_v36 = vpop.f32.mrf.mxu1 }
 0x331   : > { %v6912_v21 = vadd.f32 %v2605_v57, %v2230_v25  ;;  %v2600_v32 = vadd.f32 %v2599_v28, %v2438_v15 }
 0x332   : > { %v5064_v14 = vpop.f32.mrf.mxu0  ;;  %v2450_v31 = vpop.f32.mrf.mxu1 }
 0x333   : > { %v6915_v8 = vadd.f32 %v2600_v32, %v6763_v33 }
 0x334   : > { %v2609_v1 = vpop.f32.mrf.mxu0 }
 0x335   : > { %v2453_v34 = vpop.f32.mrf.mxu1  ;;  %v2610_v23 = vadd.f32 %v2609_v1, %v2448_v36 }
 0x336   : > { %v2615_v50 = vadd.f32 %v5064_v14, %v2453_v34 }
 0x337   : > { %v5067_v52 = vpop.f32.mrf.mxu0  ;;  %v2455_v17 = vpop.f32.mrf.mxu1  ;;  %v6920_v63 = vadd.f32 %v2610_v23, %v6782_v44 }
 0x338   : > { %v6922_v26 = vadd.f32 %v2615_v50, %v2240_v4 }
 0x339   : > { %v2619_v15 = vpop.f32.mrf.mxu0 }
 0x33a   : > { %v2458_v25 = vpop.f32.mrf.mxu1 }
 0x33b   : > { %v2620_v33 = vadd.f32 %v2619_v15, %v2458_v25 }
 0x33c   : > { %v5070_v57 = vpop.f32.mrf.mxu0  ;;  %v2460_v49 = vpop.f32.mrf.mxu1 }
 0x33d   : > { %v6925_v28 = vadd.f32 %v2620_v33, %v6801_v9 }
 0x33e   : > { %v2629_v32 = vpop.f32.mrf.mxu0  ;;  %v2463_v31 = vpop.f32.mrf.mxu1 }
 0x33f   : > { %v2625_v5 = vadd.f32 %v5067_v52, %v2463_v31 }
 0x340   : > { %v2465_v14 = vpop.f32.mrf.mxu1 }
 0x341   : > { %v5073_v36 = vpop.f32.mrf.mxu0  ;;  %v6929_v44 = vadd.f32 %v2625_v5, %v2250_v54 }
 0x343   : > { %v2638_v1 = vpop.f32.mrf.mxu0  ;;  %v2468_v34 = vpop.f32.mrf.mxu1 }
 0x344   : > { %v2630_v4 = vadd.f32 %v2629_v32, %v2468_v34 }
 0x345   : > { %v2470_v23 = vpop.f32.mrf.mxu1  ;;  %v5076_v25 = vpop.f32.mrf.mxu0 }
 0x346   : > { %v6932_v50 = vadd.f32 %v2630_v4, %v6828_v3 }
 0x347   : > { %v2647_v57 = vpop.f32.mrf.mxu0 }
 0x348   : > { %v2473_v17 = vpop.f32.mrf.mxu1 }
 0x349   : > { %v5079_v31 = vpop.f32.mrf.mxu0 }
 0x34a   : > { %v2474_v9 = vpop.f32.mrf.mxu1 }
 0x34b   : > { %v2657_v3 = vpop.f32.mrf.mxu0 }
 0x34d   : > { %v2477_v15 = vpop.f32.mrf.mxu1 }
 0x34f   : > { %v2478_v33 = vpop.f32.mrf.mxu1  ;;  %v5082_v17 = vpop.f32.mrf.mxu0 }
 0x351   : > { %v2667_v33 = vpop.f32.mrf.mxu0 }
 0x352   : > { %v2481_v49 = vpop.f32.mrf.mxu1 }
 0x353   : > { %v2643_v59 = vadd.f32 %v5073_v36, %v2481_v49 }
 0x354   : > { %v2483_v37 = vpop.f32.mrf.mxu1 }
 0x355   : > { %v6935_v52 = vadd.f32 %v2643_v59, %v6872_v6 }
 0x356   : > { %v2486_v54 = vpop.f32.mrf.mxu1 }
 0x357   : > { %v2648_v5 = vadd.f32 %v2647_v57, %v2486_v54 }
 0x358   : > { %v2488_v32 = vpop.f32.mrf.mxu1 }
 0x359   : > { %v6938_v14 = vadd.f32 %v2648_v5, %v6883_v22 }
 0x35a   : > { %v2491_v1 = vpop.f32.mrf.mxu1 }
 0x35b   : > { %v2653_v34 = vadd.f32 %v5076_v25, %v2491_v1 }
 0x35c   : > { %v2493_v4 = vpop.f32.mrf.mxu1 }
 0x35d   : > { %v6941_v23 = vadd.f32 %v2653_v34, %v6895_v35 }
 0x35e   : > { %v2496_v36 = vpop.f32.mrf.mxu1 }
 0x35f   : > { %v2658_v9 = vadd.f32 %v2657_v3, %v2496_v36 }
 0x360   : > { %v2498_v15 = vpop.f32.mrf.mxu1 }
 0x361   : > { %v6944_v6 = vadd.f32 %v2658_v9, %v6898_v42 }
 0x362   : > { %v2501_v57 = vpop.f32.mrf.mxu1 }
 0x363   : > { %v2663_v49 = vadd.f32 %v5079_v31, %v2501_v57 }
 0x364   : > { %v2503_v59 = vpop.f32.mrf.mxu1 }
 0x365   : > { %v5085_v22 = vpop.f32.mrf.mxu0  ;;  %v6947_v37 = vadd.f32 %v2663_v49, %v6900_v51 }
 0x366   : > { %v2506_v25 = vpop.f32.mrf.mxu1 }
 0x367   : > { %v2668_v54 = vadd.f32 %v2667_v33, %v2506_v25  ;;  %v2677_v1 = vpop.f32.mrf.mxu0 }
 0x368   : > { %v2508_v5 = vpop.f32.mrf.mxu1 }
 0x369   : > { %v6950_v35 = vadd.f32 %v2668_v54, %v6902_v56 }
 0x36a   : > { %v2511_v32 = vpop.f32.mrf.mxu1 }
 0x36b   : > { %v2673_v3 = vadd.f32 %v5082_v17, %v2511_v32 }
 0x36c   : > { %v2513_v34 = vpop.f32.mrf.mxu1 }
 0x36d   : > { %v6953_v42 = vadd.f32 %v2673_v3, %v6904_v30  ;;  %v7294_v30 = vld [vmem:[#allocation21_spill] sm:$0xff] }
 0x36e   : > { %v2516_v4 = vpop.f32.mrf.mxu1  ;;  %v2220_v32 = vadd.f32 %v6773_v53, %v7294_v30 }
 0x36f   : > { %v2816_v31 = vpop.f32.mrf.mxu0  ;;  %v2678_v36 = vadd.f32 %v2677_v1, %v2516_v4 }
 0x370   : > { %v2518_v9 = vpop.f32.mrf.mxu1  ;;  %v2685_v4 = vadd.f32 %v6908_v62, %v2220_v32 }
 0x371   : > { %v2817_v15 = vpop.f32.mrf.mxu0  ;;  %v6956_v51 = vadd.f32 %v2678_v36, %v6906_v58 }
 0x372   : > { %v2521_v33 = vpop.f32.mrf.mxu1 }
 0x373   : > { %v2820_v57 = vpop.f32.mrf.mxu0  ;;  %v6962_v33 = vld [vmem:[#allocation9 + $0x1] ss:$0 sm:$0xff] }
 0x374   : > { %v2522_v49 = vpop.f32.mrf.mxu1 }
 0x375   : > { %v2821_v56 = vpop.f32.mrf.mxu0 }
 0x376   : > { %v5120_v22 = vpop.f32.mrf.mxu1 }
 0x377   : > { %v2824_v59 = vpop.f32.mrf.mxu0 }
 0x378   : > { %v2977_v25 = vpop.f32.mrf.mxu1 }
 0x379   : > { %v2826_v17 = vpop.f32.mrf.mxu0 }
 0x37a   : > { %v5123_v5 = vpop.f32.mrf.mxu1 }
 0x37b   : > { %v2829_v54 = vpop.f32.mrf.mxu0 }
 0x37c   : > { %v2991_v3 = vadd.f32 %v5123_v5, %v2829_v54  ;;  %v2985_v34 = vpop.f32.mrf.mxu1 }
 0x37d   : > { %v2831_v1 = vpop.f32.mrf.mxu0  ;;  %v2986_v58 = vadd.f32 %v2985_v34, %v2824_v59 }
 0x37e   : > { %v5126_v36 = vpop.f32.mrf.mxu1  ;;  %v3073_v9 = vadd.f32 %v2991_v3, %v6915_v8 }
 0x37f   : > { %v2834_v31 = vpop.f32.mrf.mxu0  ;;  %v3072_v15 = vadd.f32 %v2986_v58, %v2685_v4 }
 0x380   : > { %v2995_v49 = vpop.f32.mrf.mxu1  ;;  %v3097_v25 = vadd.f32 %v6962_v33, %v3073_v9 }
 0x381   : > { %v2836_v57 = vpop.f32.mrf.mxu0  ;;  %v3096_v56 = vadd.f32 %v6962_v33, %v3072_v15  ;;  %v2996_v22 = vadd.f32 %v2995_v49, %v2834_v31 }
 0x382   : > { %v5129_v53 = vpop.f32.mrf.mxu1  ;;  %v3113_v3 = vmax.f32 %v3097_v25, 0.0 }
 0x383   : > { %v2839_v17 = vpop.f32.mrf.mxu0  ;;  %v3112_v54 = vmax.f32 %v3096_v56, 0.0  ;;  %v3074_v62 = vadd.f32 %v2996_v22, %v6912_v21 }
 0x384   : > { %v3001_v59 = vadd.f32 %v5126_v36, %v2839_v17  ;;  %v3005_v30 = vpop.f32.mrf.mxu1 }
 0x385   : > { %v2841_v5 = vpop.f32.mrf.mxu0  ;;  %3237 = vmatmul.mubr.f32.vlgmr.msra.gmra.mxu1 %v3112_v54  ;;  %3827 = vmatmul.mubr.f32.vlgmr.msra.gmra.mxu0 %v3112_v54  ;;  %v3098_v1 = vadd.f32 %v6962_v33, %v3074_v62 }
 0x386   : > { %v5132_v32 = vpop.f32.mrf.mxu1  ;;  %3242 = vmatprep.mubr.f32.mxu1 %v7284_v12  ;;  %5164 = vmatpush1.msra.mxu1 %v6755_v45  ;;  %v3075_v34 = vadd.f32 %v3001_v59, %v6920_v63 }
 0x387   : > { %v2844_v8 = vpop.f32.mrf.mxu0  ;;  %3832 = vmatprep.mubr.f32.mxu0 %v7284_v12  ;;  %5149 = vmatprep.subr.mxu1 %v6765_v40  ;;  %v3114_v45 = vmax.f32 %v3098_v1, 0.0 }
 0x388   : > { %v3006_v4 = vadd.f32 %v3005_v30, %v2844_v8  ;;  %v3015_v58 = vpop.f32.mrf.mxu1  ;;  %5165 = vmatpush1.msra.mxu1 %v6767_v10  ;;  %v3099_v63 = vadd.f32 %v6962_v33, %v3075_v34 }
 0x389   : > { %v2846_v21 = vpop.f32.mrf.mxu0  ;;  %3243 = vmatmul.mubr.f32.gmra.mxu1 %v3113_v3  ;;  %3833 = vmatmul.mubr.f32.gmra.mxu0 %v3113_v3 }
 0x38a   : > { %v5135_v36 = vpop.f32.mrf.mxu1  ;;  %3248 = vmatprep.mubr.f32.mxu1 %v7284_v12  ;;  %3838 = vmatprep.mubr.f32.mxu0 %v7284_v12  ;;  %v3076_v9 = vadd.f32 %v3006_v4, %v6922_v26  ;;  %v3115_v49 = vmax.f32 %v3099_v63, 0.0 }
 0x38b   : > { %v2849_v31 = vpop.f32.mrf.mxu0  ;;  %5150 = vmatprep.subr.mxu1 %v6777_v41 }
 0x38c   : > { %v3011_v15 = vadd.f32 %v5129_v53, %v2849_v31  ;;  %v3025_v57 = vpop.f32.mrf.mxu1  ;;  %5166 = vmatpush1.msra.mxu1 %v6784_v29  ;;  %v3100_v56 = vadd.f32 %v6962_v33, %v3076_v9 }
 0x38d   : > { %v2851_v40 = vpop.f32.mrf.mxu0  ;;  %3249 = vmatmul.mubr.f32.gmra.mxu1 %v3114_v45  ;;  %3839 = vmatmul.mubr.f32.gmra.mxu0 %v3114_v45 }
 0x38e   : > { %3254 = vmatprep.mubr.f32.mxu1 %v7284_v12  ;;  %3844 = vmatprep.mubr.f32.mxu0 %v7284_v12  ;;  %v3077_v22 = vadd.f32 %v3011_v15, %v6925_v28  ;;  %v3116_v17 = vmax.f32 %v3100_v56, 0.0 }
 0x38f   : > { %v2854_v10 = vpop.f32.mrf.mxu0  ;;  %5151 = vmatprep.subr.mxu1 %v6793_v47 }
 0x390   : > { %v3016_v26 = vadd.f32 %v3015_v58, %v2854_v10  ;;  %5167 = vmatpush1.msra.mxu1 %v6795_v55  ;;  %v3101_v53 = vadd.f32 %v6962_v33, %v3077_v22 }
 0x391   : > { %v2856_v41 = vpop.f32.mrf.mxu0  ;;  %3255 = vmatmul.mubr.f32.gmra.mxu1 %v3115_v49  ;;  %3845 = vmatmul.mubr.f32.gmra.mxu0 %v3115_v49 }
 0x392   : > { %3260 = vmatprep.mubr.f32.mxu1 %v7284_v12  ;;  %3850 = vmatprep.mubr.f32.mxu0 %v7284_v12  ;;  %v3078_v25 = vadd.f32 %v3016_v26, %v6929_v44  ;;  %v3117_v55 = vmax.f32 %v3101_v53, 0.0  ;;  %v7295_v41 = vld [vmem:[#allocation19_spill] sm:$0xff] }
 0x393   : > { %v2859_v29 = vpop.f32.mrf.mxu0  ;;  %5152 = vmatprep.subr.mxu1 %v6803_v13  ;;  %v5138_v13 = vpop.f32.mrf.mxu1 }
 0x394   : > { %v3021_v54 = vadd.f32 %v5132_v32, %v2859_v29  ;;  %5168 = vmatpush1.msra.mxu1 %v6806_v18  ;;  %v3102_v62 = vadd.f32 %v6962_v33, %v3078_v25  ;;  %v7297_v25 = vld [vmem:[#allocation20_spill] sm:$0xff] }
 0x395   : > { %v2861_v28 = vpop.f32.mrf.mxu0  ;;  %3261 = vmatmul.mubr.f32.gmra.mxu1 %v3116_v17  ;;  %3851 = vmatmul.mubr.f32.gmra.mxu0 %v3116_v17 }
 0x396   : > { %3266 = vmatprep.mubr.f32.mxu1 %v7284_v12  ;;  %3856 = vmatprep.mubr.f32.mxu0 %v7284_v12  ;;  %v3079_v59 = vadd.f32 %v3021_v54, %v6932_v50  ;;  %v3118_v5 = vmax.f32 %v3102_v62, 0.0 }
 0x397   : > { %v2864_v47 = vpop.f32.mrf.mxu0  ;;  %5153 = vmatprep.subr.mxu1 %v6814_v48  ;;  %v3033_v48 = vpop.f32.mrf.mxu1 }
 0x398   : > { %5169 = vmatpush1.msra.mxu1 %v6818_v11  ;;  %v3103_v30 = vadd.f32 %v6962_v33, %v3079_v59  ;;  %v7298_v47 = vld [vmem:[#allocation22_spill] sm:$0xff]  ;;  %v7299_v59 = vld [vmem:[#allocation23_spill] sm:$0xff] }
 0x399   : > { %v2865_v44 = vpop.f32.mrf.mxu0  ;;  %3267 = vmatmul.mubr.f32.gmra.mxu1 %v3117_v55  ;;  %3857 = vmatmul.mubr.f32.gmra.mxu0 %v3117_v55 }
 0x39a   : > { %3272 = vmatprep.mubr.f32.mxu1 %v7284_v12  ;;  %3862 = vmatprep.mubr.f32.mxu0 %v7284_v12  ;;  %v3119_v50 = vmax.f32 %v3103_v30, 0.0  ;;  %v7300_v44 = vld [vmem:[#allocation24_spill] sm:$0xff] }
 0x39b   : > { %v2868_v18 = vpop.f32.mrf.mxu0  ;;  %5154 = vmatprep.subr.mxu1 %v6821_v7 }
 0x39c   : > { %5170 = vmatpush1.msra.mxu1 %v6824_v46  ;;  %v5141_v46 = vpop.f32.mrf.mxu1 }
 0x39d   : > { %v2869_v8 = vpop.f32.mrf.mxu0  ;;  %3273 = vmatmul.mubr.f32.gmra.mxu1 %v3118_v5  ;;  %3863 = vmatmul.mubr.f32.gmra.mxu0 %v3118_v5 }
 0x39e   : > { %3278 = vmatprep.mubr.f32.mxu1 %v7284_v12  ;;  %3868 = vmatprep.mubr.f32.mxu0 %v7284_v12 }
 0x39f   : > { %v2872_v11 = vpop.f32.mrf.mxu0  ;;  %5155 = vmatprep.subr.mxu1 %v6831_v24 }
 0x3a0   : > { %v3034_v32 = vadd.f32 %v3033_v48, %v2872_v11  ;;  %5171 = vmatpush1.msra.mxu1 %v6835_v0 }
 0x3a1   : > { %v2874_v3 = vpop.f32.mrf.mxu0  ;;  %3279 = vmatmul.mubr.f32.gmra.mxu1 %v3119_v50  ;;  %3869 = vmatmul.mubr.f32.gmra.mxu0 %v3119_v50  ;;  %v3160_v50 = vld [vmem:[#allocation12] sm:$0x3] }
 0x3a2   : > { %v3080_v7 = vadd.f32 %v3034_v32, %v6935_v52  ;;  %3284 = vmatprep.mubr.f32.mxu1 %v7284_v12  ;;  %3874 = vmatprep.mubr.f32.mxu0 %v7284_v12  ;;  %v3043_v52 = vpop.f32.mrf.mxu1  ;;  %v3750_v32 = vld [vmem:[#allocation12] sm:$0x3] }
 0x3a3   : > { %v2877_v1 = vpop.f32.mrf.mxu0  ;;  %5156 = vmatprep.subr.mxu1 %v6839_v38 }
 0x3a4   : > { %v3104_v34 = vadd.f32 %v6962_v33, %v3080_v7  ;;  %v3039_v4 = vadd.f32 %v5138_v13, %v2877_v1  ;;  %5172 = vmatpush1.msra.mxu1 %v6842_v2 }
 0x3a5   : > { %v2879_v21 = vpop.f32.mrf.mxu0  ;;  %5157 = vmatprep.subr.mxu1 %v6845_v60  ;;  %v5144_v60 = vpop.f32.mrf.mxu1 }
 0x3a6   : > { %v3120_v24 = vmax.f32 %v3104_v34, 0.0  ;;  %v3081_v0 = vadd.f32 %v3039_v4, %v6938_v14  ;;  %5173 = vmatpush1.msra.mxu1 %v6849_v19 }
 0x3a7   : > { %v2882_v58 = vpop.f32.mrf.mxu0  ;;  %5158 = vmatprep.subr.mxu1 %v6852_v16  ;;  %v3053_v16 = vpop.f32.mrf.mxu1 }
 0x3a8   : > { %v3105_v31 = vadd.f32 %v6962_v33, %v3081_v0  ;;  %v3044_v36 = vadd.f32 %v3043_v52, %v2882_v58  ;;  %3285 = vmatmul.mubr.f32.gmra.mxu1 %v3120_v24  ;;  %3875 = vmatmul.mubr.f32.gmra.mxu0 %v3120_v24 }
 0x3a9   : > { %v2884_v45 = vpop.f32.mrf.mxu0  ;;  %3290 = vmatprep.mubr.f32.mxu1 %v7284_v12  ;;  %3880 = vmatprep.mubr.f32.mxu0 %v7284_v12 }
 0x3aa   : > { %v3121_v38 = vmax.f32 %v3105_v31, 0.0  ;;  %v3082_v2 = vadd.f32 %v3044_v36, %v6941_v23  ;;  %5174 = vmatpush1.msra.mxu1 %v6855_v27 }
 0x3ab   : > { %v2887_v14 = vpop.f32.mrf.mxu0  ;;  %5159 = vmatprep.subr.mxu1 %v6858_v61 }
 0x3ac   : > { %v3106_v19 = vadd.f32 %v6962_v33, %v3082_v2  ;;  %v3049_v63 = vadd.f32 %v5141_v46, %v2887_v14  ;;  %3291 = vmatmul.mubr.f32.gmra.mxu1 %v3121_v38  ;;  %3881 = vmatmul.mubr.f32.gmra.mxu0 %v3121_v38 }
 0x3ad   : > { %v2889_v9 = vpop.f32.mrf.mxu0  ;;  %3296 = vmatprep.mubr.f32.mxu1 %v7284_v12  ;;  %3886 = vmatprep.mubr.f32.mxu0 %v7284_v12 }
 0x3ae   : > { %v3122_v15 = vmax.f32 %v3106_v19, 0.0  ;;  %v3083_v40 = vadd.f32 %v3049_v63, %v6944_v6  ;;  %5175 = vmatpush1.msra.mxu1 %v6861_v20  ;;  %v5147_v6 = vpop.f32.mrf.mxu1 }
 0x3af   : > { %v2892_v23 = vpop.f32.mrf.mxu0  ;;  %5160 = vmatprep.subr.mxu1 %v6864_v43 }
 0x3b0   : > { %v3107_v27 = vadd.f32 %v6962_v33, %v3083_v40  ;;  %v3054_v57 = vadd.f32 %v3053_v16, %v2892_v23  ;;  %3297 = vmatmul.mubr.f32.gmra.mxu1 %v3122_v15  ;;  %3887 = vmatmul.mubr.f32.gmra.mxu0 %v3122_v15  ;;  %v3063_v43 = vpop.f32.mrf.mxu1 }
 0x3b1   : > { %v2894_v10 = vpop.f32.mrf.mxu0  ;;  %3302 = vmatprep.mubr.f32.mxu1 %v7284_v12  ;;  %3892 = vmatprep.mubr.f32.mxu0 %v7284_v12 }
 0x3b2   : > { %v3123_v49 = vmax.f32 %v3107_v27, 0.0  ;;  %v3084_v56 = vadd.f32 %v3054_v57, %v6947_v37  ;;  %5176 = vmatpush1.msra.mxu1 %v6867_v39  ;;  %v7296_v37 = vld [vmem:[#allocation18_spill] sm:$0xff] }
 0x3b3   : > { %v2897_v61 = vpop.f32.mrf.mxu0  ;;  %5161 = vmatprep.subr.mxu1 %v7295_v41 }
 0x3b4   : > { %v3108_v20 = vadd.f32 %v6962_v33, %v3084_v56  ;;  %v3059_v22 = vadd.f32 %v5144_v60, %v2897_v61  ;;  %3303 = vmatmul.mubr.f32.gmra.mxu1 %v3123_v49  ;;  %3893 = vmatmul.mubr.f32.gmra.mxu0 %v3123_v49 }
 0x3b5   : > { %v2899_v26 = vpop.f32.mrf.mxu0  ;;  %3308 = vmatprep.mubr.f32.mxu1 %v7284_v12  ;;  %5177 = vmatpush1.msra.mxu1 %v7296_v37 }
 0x3b6   : > { %v3124_v29 = vmax.f32 %v3108_v20, 0.0  ;;  %v3085_v17 = vadd.f32 %v3059_v22, %v6950_v35  ;;  %5162 = vmatprep.subr.mxu1 %v7297_v25 }
 0x3b7   : > { %v2902_v53 = vpop.f32.mrf.mxu0  ;;  %5178 = vmatpush1.msra.mxu1 %v7298_v47 }
 0x3b8   : > { %v3109_v39 = vadd.f32 %v6962_v33, %v3085_v17  ;;  %v3064_v54 = vadd.f32 %v3063_v43, %v2902_v53  ;;  %3309 = vmatmul.mubr.f32.gmra.mxu1 %v3124_v29  ;;  %5163 = vmatprep.subr.mxu1 %v7299_v59 }
 0x3b9   : > { %v2904_v28 = vpop.f32.mrf.mxu0  ;;  %3314 = vmatprep.mubr.f32.mxu1 %v7284_v12  ;;  %5179 = vmatpush1.msra.mxu1 %v7300_v44 }
 0x3ba   : > { %v3125_v55 = vmax.f32 %v3109_v39, 0.0  ;;  %v3086_v62 = vadd.f32 %v3064_v54, %v6953_v42 }
 0x3bb   : > { %v2907_v35 = vpop.f32.mrf.mxu0 }
 0x3bc   : > { %v3110_v13 = vadd.f32 %v6962_v33, %v3086_v62  ;;  %v3069_v18 = vadd.f32 %v5147_v6, %v2907_v35  ;;  %3315 = vmatmul.mubr.f32.gmra.mxu1 %v3125_v55 }
 0x3bd   : > { %v2909_v5 = vpop.f32.mrf.mxu0  ;;  %3320 = vmatprep.mubr.f32.mxu1 %v7284_v12 }
 0x3be   : > { %v3126_v30 = vmax.f32 %v3110_v13, 0.0  ;;  %v3087_v8 = vadd.f32 %v3069_v18, %v6956_v51  ;;  %v3162_v51 = vlaneseq }
 0x3c0   : > { %v3111_v48 = vadd.f32 %v6962_v33, %v3087_v8  ;;  %3321 = vmatmul.mubr.f32.gmra.mxu1 %v3126_v30  ;;  %v3163_v33 = vshrl.u32 %v3162_v51, 7 }
 0x3c1   : > { %3326 = vmatprep.mubr.f32.mxu1 %v7284_v12 }
 0x3c2   : > { %v3127_v42 = vmax.f32 %v3111_v48, 0.0  ;;  %v3164_v11 = vsub.s32 0, %v3163_v33  ;;  %v3168_v3 = vsub.s32 1, %v3163_v33 }
 0x3c4   : > { %3327 = vmatmul.mubr.f32.gmra.mxu1 %v3127_v42  ;;  %v7055_v7 = vrot.slane %v3160_v50, %v3164_v11  ;;  %v7057_v46 = vrot.slane %v3750_v32, %v3164_v11  ;;  %v7059_v1 = vrot.slane %v3160_v50, %v3168_v3  ;;  %v7061_v34 = vrot.slane %v3750_v32, %v3168_v3 }
 0x3c5   : > { %3898 = vmatprep.mubr.f32.mxu1 %v7284_v12 }
 0x3c8   : > { %3899 = vmatmul.mubr.f32.vlgmr.msra.gmra.mxu1 %v3124_v29 }
 0x3c9   : > { %3904 = vmatprep.mubr.f32.mxu1 %v7284_v12 }
 0x3cc   : > { %3905 = vmatmul.mubr.f32.gmra.mxu1 %v3125_v55 }
 0x3cd   : > { %3910 = vmatprep.mubr.f32.mxu1 %v7284_v12 }
 0x3d0   : > { %3911 = vmatmul.mubr.f32.gmra.mxu1 %v3126_v30 }
 0x3d1   : > { %3916 = vmatprep.mubr.f32.mxu1 %v7284_v12 }
 0x3d4   : > { %3917 = vmatmul.mubr.f32.gmra.mxu1 %v3127_v42 }
 0x445   : > { %v3238_v4 = vpop.f32.mrf.mxu1  ;;  %v3828_v21 = vpop.f32.mrf.mxu0 }
 0x446   : > { %v3239_v12 = vadd.f32 %v3238_v4, %v7055_v7  ;;  %v3829_v24 = vadd.f32 %v3828_v21, %v7057_v46 }
 0x447   : > { %v3240_v0 = vpop.f32.mrf.mxu1  ;;  %v3830_v52 = vpop.f32.mrf.mxu0 }
 0x448   : > { %v3241_v58 = vadd.f32 %v3240_v0, %v7059_v1  ;;  %v3831_v31 = vadd.f32 %v3830_v52, %v7061_v34  ;;  %v3333_v38 = vmax.f32 %v3239_v12, 0.0  ;;  %v3923_v2 = vmax.f32 %v3829_v24, 0.0 }
 0x449   : > { %v3244_v36 = vpop.f32.mrf.mxu1  ;;  %v3834_v45 = vpop.f32.mrf.mxu0 }
 0x44a   : > { %v3334_v60 = vmax.f32 %v3241_v58, 0.0  ;;  %v3924_v14 = vmax.f32 %v3831_v31, 0.0  ;;  %v3245_v19 = vadd.f32 %v3244_v36, %v7055_v7  ;;  %v3835_v63 = vadd.f32 %v3834_v45, %v7057_v46 }
 0x44b   : > { %v3246_v9 = vpop.f32.mrf.mxu1  ;;  %v3836_v15 = vpop.f32.mrf.mxu0 }
 0x44c   : > { %v3397_v40 = vcombine.low %v3333_v38, %v3334_v60  ;;  %v3398_v16 = vcombine.high %v3333_v38, %v3334_v60  ;;  %v3987_v23 = vcombine.low %v3923_v2, %v3924_v14  ;;  %v3988_v27 = vcombine.high %v3923_v2, %v3924_v14 }
 0x44d   : > { %v3247_v57 = vadd.f32 %v3246_v9, %v7059_v1  ;;  %v3837_v10 = vadd.f32 %v3836_v15, %v7061_v34  ;;  %v3250_v49 = vpop.f32.mrf.mxu1  ;;  %v3840_v56 = vpop.f32.mrf.mxu0  ;;  %v3335_v20 = vmax.f32 %v3245_v19, 0.0  ;;  %v3925_v22 = vmax.f32 %v3835_v63, 0.0 }
 0x44e   : > { %4454 = vst.sshfl [vmem:[%s7072_s26] sm:$0xff pattern:$0x75316420] %v3397_v40  ;;  %4455 = vst.sshfl [vmem:[%s7072_s26 + $0x8] sm:$0xff pattern:$0x75316420] %v3398_v16  ;;  %v3251_v61 = vadd.f32 %v3250_v49, %v7055_v7  ;;  %v3841_v6 = vadd.f32 %v3840_v56, %v7057_v46 }
 0x44f   : > { %4526 = vst.sshfl [vmem:[%s7072_s26 + $0x10] sm:$0xff pattern:$0x75316420] %v3987_v23  ;;  %4527 = vst.sshfl [vmem:[%s7072_s26 + $0x18] sm:$0xff pattern:$0x75316420] %v3988_v27  ;;  %v3252_v29 = vpop.f32.mrf.mxu1  ;;  %v3842_v17 = vpop.f32.mrf.mxu0 }
 0x450   : > { %v3336_v26 = vmax.f32 %v3247_v57, 0.0  ;;  %v3926_v41 = vmax.f32 %v3837_v10, 0.0  ;;  %v3253_v37 = vadd.f32 %v3252_v29, %v7059_v1  ;;  %v3843_v43 = vadd.f32 %v3842_v17, %v7061_v34 }
 0x451   : > { %v3256_v28 = vpop.f32.mrf.mxu1  ;;  %v3846_v47 = vpop.f32.mrf.mxu0  ;;  %v3337_v55 = vmax.f32 %v3251_v61, 0.0  ;;  %v3927_v62 = vmax.f32 %v3841_v6, 0.0 }
 0x452   : > { %v3399_v53 = vcombine.low %v3335_v20, %v3336_v26  ;;  %v3400_v25 = vcombine.high %v3335_v20, %v3336_v26  ;;  %v3989_v39 = vcombine.low %v3925_v22, %v3926_v41  ;;  %v3990_v54 = vcombine.high %v3925_v22, %v3926_v41 }
 0x453   : > { %v3338_v59 = vmax.f32 %v3253_v37, 0.0  ;;  %v3928_v35 = vmax.f32 %v3843_v43, 0.0  ;;  %v3257_v44 = vadd.f32 %v3256_v28, %v7055_v7  ;;  %v3847_v13 = vadd.f32 %v3846_v47, %v7057_v46  ;;  %v3258_v18 = vpop.f32.mrf.mxu1  ;;  %v3848_v5 = vpop.f32.mrf.mxu0 }
 0x454   : > { %4456 = vst.sshfl [vmem:[%s7072_s26 + $0x20] sm:$0xff pattern:$0x75316420] %v3399_v53  ;;  %4457 = vst.sshfl [vmem:[%s7072_s26 + $0x28] sm:$0xff pattern:$0x75316420] %v3400_v25  ;;  %v3259_v51 = vadd.f32 %v3258_v18, %v7059_v1  ;;  %v3849_v33 = vadd.f32 %v3848_v5, %v7061_v34 }
 0x455   : > { %4528 = vst.sshfl [vmem:[%s7072_s26 + $0x30] sm:$0xff pattern:$0x75316420] %v3989_v39  ;;  %4529 = vst.sshfl [vmem:[%s7072_s26 + $0x38] sm:$0xff pattern:$0x75316420] %v3990_v54  ;;  %v3401_v30 = vcombine.low %v3337_v55, %v3338_v59  ;;  %v3402_v8 = vcombine.high %v3337_v55, %v3338_v59  ;;  %v3991_v48 = vcombine.low %v3927_v62, %v3928_v35  ;;  %v3262_v11 = vpop.f32.mrf.mxu1  ;;  %v3852_v50 = vpop.f32.mrf.mxu0 }
 0x456   : > { %v3992_v42 = vcombine.high %v3927_v62, %v3928_v35  ;;  %v3263_v32 = vadd.f32 %v3262_v11, %v7055_v7  ;;  %v3853_v3 = vadd.f32 %v3852_v50, %v7057_v46  ;;  %v3339_v4 = vmax.f32 %v3257_v44, 0.0 }
 0x457   : > { %4458 = vst.sshfl [vmem:[%s7072_s26 + $0x40] sm:$0xff pattern:$0x75316420] %v3401_v30  ;;  %4459 = vst.sshfl [vmem:[%s7072_s26 + $0x48] sm:$0xff pattern:$0x75316420] %v3402_v8  ;;  %v3264_v0 = vpop.f32.mrf.mxu1  ;;  %v3854_v52 = vpop.f32.mrf.mxu0 }
 0x458   : > { %4530 = vst.sshfl [vmem:[%s7072_s26 + $0x50] sm:$0xff pattern:$0x75316420] %v3991_v48  ;;  %4531 = vst.sshfl [vmem:[%s7072_s26 + $0x58] sm:$0xff pattern:$0x75316420] %v3992_v42  ;;  %v3265_v58 = vadd.f32 %v3264_v0, %v7059_v1  ;;  %v3855_v31 = vadd.f32 %v3854_v52, %v7061_v34 }
 0x459   : > { %v3929_v21 = vmax.f32 %v3847_v13, 0.0  ;;  %v3340_v12 = vmax.f32 %v3259_v51, 0.0  ;;  %v3930_v24 = vmax.f32 %v3849_v33, 0.0  ;;  %v3268_v60 = vpop.f32.mrf.mxu1  ;;  %v3858_v14 = vpop.f32.mrf.mxu0  ;;  %v3341_v19 = vmax.f32 %v3263_v32, 0.0 }
 0x45a   : > { %v3931_v63 = vmax.f32 %v3853_v3, 0.0  ;;  %v3342_v9 = vmax.f32 %v3265_v58, 0.0  ;;  %v3932_v15 = vmax.f32 %v3855_v31, 0.0  ;;  %v3269_v40 = vadd.f32 %v3268_v60, %v7055_v7 }
 0x45b   : > { %v3403_v36 = vcombine.low %v3339_v4, %v3340_v12  ;;  %v3404_v45 = vcombine.high %v3339_v4, %v3340_v12  ;;  %v3993_v38 = vcombine.low %v3929_v21, %v3930_v24  ;;  %v3994_v2 = vcombine.high %v3929_v21, %v3930_v24  ;;  %v3270_v23 = vpop.f32.mrf.mxu1  ;;  %v3860_v27 = vpop.f32.mrf.mxu0 }
 0x45c   : > { %v3859_v16 = vadd.f32 %v3858_v14, %v7057_v46  ;;  %v3405_v57 = vcombine.low %v3341_v19, %v3342_v9  ;;  %v3406_v10 = vcombine.high %v3341_v19, %v3342_v9  ;;  %v3995_v49 = vcombine.low %v3931_v63, %v3932_v15 }
 0x45d   : > { %4460 = vst.sshfl [vmem:[%s7072_s26 + $0x60] sm:$0xff pattern:$0x75316420] %v3403_v36  ;;  %4461 = vst.sshfl [vmem:[%s7072_s26 + $0x68] sm:$0xff pattern:$0x75316420] %v3404_v45  ;;  %v3996_v56 = vcombine.high %v3931_v63, %v3932_v15  ;;  %v3271_v61 = vadd.f32 %v3270_v23, %v7059_v1  ;;  %v3861_v6 = vadd.f32 %v3860_v27, %v7061_v34  ;;  %v3274_v20 = vpop.f32.mrf.mxu1  ;;  %v3864_v22 = vpop.f32.mrf.mxu0 }
 0x45e   : > { %4532 = vst.sshfl [vmem:[%s7072_s26 + $0x70] sm:$0xff pattern:$0x75316420] %v3993_v38  ;;  %4533 = vst.sshfl [vmem:[%s7072_s26 + $0x78] sm:$0xff pattern:$0x75316420] %v3994_v2  ;;  %v3275_v26 = vadd.f32 %v3274_v20, %v7055_v7  ;;  %v3865_v41 = vadd.f32 %v3864_v22, %v7057_v46 }
 0x45f   : > { %4462 = vst.sshfl [vmem:[%s7072_s26 + $0x80] sm:$0xff pattern:$0x75316420] %v3405_v57  ;;  %4463 = vst.sshfl [vmem:[%s7072_s26 + $0x88] sm:$0xff pattern:$0x75316420] %v3406_v10  ;;  %v3276_v53 = vpop.f32.mrf.mxu1  ;;  %v3866_v25 = vpop.f32.mrf.mxu0 }
 0x460   : > { %4534 = vst.sshfl [vmem:[%s7072_s26 + $0x90] sm:$0xff pattern:$0x75316420] %v3995_v49  ;;  %4535 = vst.sshfl [vmem:[%s7072_s26 + $0x98] sm:$0xff pattern:$0x75316420] %v3996_v56  ;;  %v3277_v39 = vadd.f32 %v3276_v53, %v7059_v1  ;;  %v3867_v54 = vadd.f32 %v3866_v25, %v7061_v34 }
 0x461   : > { %v3343_v29 = vmax.f32 %v3269_v40, 0.0  ;;  %v3933_v17 = vmax.f32 %v3859_v16, 0.0  ;;  %v3344_v37 = vmax.f32 %v3271_v61, 0.0  ;;  %v3934_v43 = vmax.f32 %v3861_v6, 0.0  ;;  %v3280_v59 = vpop.f32.mrf.mxu1  ;;  %v3870_v35 = vpop.f32.mrf.mxu0 }
 0x462   : > { %v3345_v44 = vmax.f32 %v3275_v26, 0.0  ;;  %v3935_v13 = vmax.f32 %v3865_v41, 0.0  ;;  %v3346_v18 = vmax.f32 %v3277_v39, 0.0  ;;  %v3936_v5 = vmax.f32 %v3867_v54, 0.0 }
 0x463   : > { %v3407_v28 = vcombine.low %v3343_v29, %v3344_v37  ;;  %v3408_v47 = vcombine.high %v3343_v29, %v3344_v37  ;;  %v3997_v55 = vcombine.low %v3933_v17, %v3934_v43  ;;  %v3998_v62 = vcombine.high %v3933_v17, %v3934_v43  ;;  %v3282_v48 = vpop.f32.mrf.mxu1  ;;  %v3872_v42 = vpop.f32.mrf.mxu0 }
 0x464   : > { %v3281_v30 = vadd.f32 %v3280_v59, %v7055_v7  ;;  %v3871_v8 = vadd.f32 %v3870_v35, %v7057_v46  ;;  %v3409_v51 = vcombine.low %v3345_v44, %v3346_v18  ;;  %v3410_v33 = vcombine.high %v3345_v44, %v3346_v18 }
 0x465   : > { %4464 = vst.sshfl [vmem:[%s7072_s26 + $0xa0] sm:$0xff pattern:$0x75316420] %v3407_v28  ;;  %4465 = vst.sshfl [vmem:[%s7072_s26 + $0xa8] sm:$0xff pattern:$0x75316420] %v3408_v47  ;;  %v3999_v11 = vcombine.low %v3935_v13, %v3936_v5  ;;  %v4000_v50 = vcombine.high %v3935_v13, %v3936_v5  ;;  %v3283_v32 = vadd.f32 %v3282_v48, %v7059_v1 }
 0x466   : > { %4536 = vst.sshfl [vmem:[%s7072_s26 + $0xb0] sm:$0xff pattern:$0x75316420] %v3997_v55  ;;  %4537 = vst.sshfl [vmem:[%s7072_s26 + $0xb8] sm:$0xff pattern:$0x75316420] %v3998_v62  ;;  %v3873_v3 = vadd.f32 %v3872_v42, %v7061_v34 }
 0x467   : > { %4466 = vst.sshfl [vmem:[%s7072_s26 + $0xc0] sm:$0xff pattern:$0x75316420] %v3409_v51  ;;  %4467 = vst.sshfl [vmem:[%s7072_s26 + $0xc8] sm:$0xff pattern:$0x75316420] %v3410_v33 }
 0x468   : > { %4538 = vst.sshfl [vmem:[%s7072_s26 + $0xd0] sm:$0xff pattern:$0x75316420] %v3999_v11  ;;  %4539 = vst.sshfl [vmem:[%s7072_s26 + $0xd8] sm:$0xff pattern:$0x75316420] %v4000_v50  ;;  %v3286_v0 = vpop.f32.mrf.mxu1  ;;  %v3876_v52 = vpop.f32.mrf.mxu0 }
 0x469   : > { %v3347_v4 = vmax.f32 %v3281_v30, 0.0  ;;  %v3937_v21 = vmax.f32 %v3871_v8, 0.0  ;;  %v3348_v12 = vmax.f32 %v3283_v32, 0.0  ;;  %v3938_v24 = vmax.f32 %v3873_v3, 0.0 }
 0x46a   : > { %v3287_v58 = vadd.f32 %v3286_v0, %v7055_v7  ;;  %v3877_v31 = vadd.f32 %v3876_v52, %v7057_v46  ;;  %v3288_v60 = vpop.f32.mrf.mxu1  ;;  %v3878_v14 = vpop.f32.mrf.mxu0 }
 0x46b   : > { %v3411_v36 = vcombine.low %v3347_v4, %v3348_v12  ;;  %v3412_v45 = vcombine.high %v3347_v4, %v3348_v12  ;;  %v4001_v38 = vcombine.low %v3937_v21, %v3938_v24  ;;  %v4002_v2 = vcombine.high %v3937_v21, %v3938_v24 }
 0x46c   : > { %v3289_v19 = vadd.f32 %v3288_v60, %v7059_v1  ;;  %v3879_v63 = vadd.f32 %v3878_v14, %v7061_v34  ;;  %v3292_v9 = vpop.f32.mrf.mxu1  ;;  %v3882_v15 = vpop.f32.mrf.mxu0  ;;  %v3349_v40 = vmax.f32 %v3287_v58, 0.0  ;;  %v3939_v16 = vmax.f32 %v3877_v31, 0.0 }
 0x46d   : > { %4468 = vst.sshfl [vmem:[%s7072_s26 + $0xe0] sm:$0xff pattern:$0x75316420] %v3411_v36  ;;  %4469 = vst.sshfl [vmem:[%s7072_s26 + $0xe8] sm:$0xff pattern:$0x75316420] %v3412_v45  ;;  %v3293_v57 = vadd.f32 %v3292_v9, %v7055_v7  ;;  %v3883_v10 = vadd.f32 %v3882_v15, %v7057_v46 }
 0x46e   : > { %4540 = vst.sshfl [vmem:[%s7072_s26 + $0xf0] sm:$0xff pattern:$0x75316420] %v4001_v38  ;;  %4541 = vst.sshfl [vmem:[%s7072_s26 + $0xf8] sm:$0xff pattern:$0x75316420] %v4002_v2  ;;  %v3294_v49 = vpop.f32.mrf.mxu1  ;;  %v3884_v56 = vpop.f32.mrf.mxu0 }
 0x46f   : > { %v3350_v23 = vmax.f32 %v3289_v19, 0.0  ;;  %v3940_v27 = vmax.f32 %v3879_v63, 0.0  ;;  %v3295_v26 = vadd.f32 %v3294_v49, %v7059_v1  ;;  %v3885_v41 = vadd.f32 %v3884_v56, %v7061_v34 }
 0x470   : > { %v3298_v29 = vpop.f32.mrf.mxu1  ;;  %v3888_v17 = vpop.f32.mrf.mxu0  ;;  %v3351_v53 = vmax.f32 %v3293_v57, 0.0  ;;  %v3941_v25 = vmax.f32 %v3883_v10, 0.0 }
 0x471   : > { %v3413_v61 = vcombine.low %v3349_v40, %v3350_v23  ;;  %v3414_v6 = vcombine.high %v3349_v40, %v3350_v23  ;;  %v4003_v20 = vcombine.low %v3939_v16, %v3940_v27  ;;  %v4004_v22 = vcombine.high %v3939_v16, %v3940_v27 }
 0x472   : > { %v3299_v37 = vadd.f32 %v3298_v29, %v7055_v7  ;;  %v3889_v43 = vadd.f32 %v3888_v17, %v7057_v46  ;;  %v3352_v39 = vmax.f32 %v3295_v26, 0.0  ;;  %v3942_v54 = vmax.f32 %v3885_v41, 0.0  ;;  %v3300_v28 = vpop.f32.mrf.mxu1  ;;  %v3890_v47 = vpop.f32.mrf.mxu0 }
 0x473   : > { %4470 = vst.sshfl [vmem:[%s7072_s26 + $0x100] sm:$0xff pattern:$0x75316420] %v3413_v61  ;;  %4471 = vst.sshfl [vmem:[%s7072_s26 + $0x108] sm:$0xff pattern:$0x75316420] %v3414_v6  ;;  %v3301_v55 = vadd.f32 %v3300_v28, %v7059_v1  ;;  %v3891_v62 = vadd.f32 %v3890_v47, %v7061_v34 }
 0x474   : > { %4542 = vst.sshfl [vmem:[%s7072_s26 + $0x110] sm:$0xff pattern:$0x75316420] %v4003_v20  ;;  %4543 = vst.sshfl [vmem:[%s7072_s26 + $0x118] sm:$0xff pattern:$0x75316420] %v4004_v22  ;;  %v3415_v59 = vcombine.low %v3351_v53, %v3352_v39  ;;  %v3416_v35 = vcombine.high %v3351_v53, %v3352_v39  ;;  %v4005_v44 = vcombine.low %v3941_v25, %v3942_v54  ;;  %v3304_v18 = vpop.f32.mrf.mxu1  ;;  %v3894_v5 = vpop.f32.mrf.mxu0 }
 0x475   : > { %v4006_v13 = vcombine.high %v3941_v25, %v3942_v54  ;;  %v3353_v30 = vmax.f32 %v3299_v37, 0.0  ;;  %v3943_v8 = vmax.f32 %v3889_v43, 0.0  ;;  %v3354_v48 = vmax.f32 %v3301_v55, 0.0 }
 0x476   : > { %v3944_v42 = vmax.f32 %v3891_v62, 0.0  ;;  %4472 = vst.sshfl [vmem:[%s7072_s26 + $0x120] sm:$0xff pattern:$0x75316420] %v3415_v59  ;;  %v3305_v51 = vadd.f32 %v3304_v18, %v7055_v7  ;;  %v3895_v33 = vadd.f32 %v3894_v5, %v7057_v46  ;;  %v3306_v11 = vpop.f32.mrf.mxu1  ;;  %v3896_v50 = vpop.f32.mrf.mxu0 }
 0x477   : > { %4473 = vst.sshfl [vmem:[%s7072_s26 + $0x128] sm:$0xff pattern:$0x75316420] %v3416_v35  ;;  %4544 = vst.sshfl [vmem:[%s7072_s26 + $0x130] sm:$0xff pattern:$0x75316420] %v4005_v44  ;;  %v3417_v32 = vcombine.low %v3353_v30, %v3354_v48  ;;  %v3418_v3 = vcombine.high %v3353_v30, %v3354_v48  ;;  %v3307_v12 = vadd.f32 %v3306_v11, %v7059_v1 }
 0x478   : > { %4545 = vst.sshfl [vmem:[%s7072_s26 + $0x138] sm:$0xff pattern:$0x75316420] %v4006_v13  ;;  %v4007_v4 = vcombine.low %v3943_v8, %v3944_v42  ;;  %v4008_v21 = vcombine.high %v3943_v8, %v3944_v42  ;;  %v3897_v24 = vadd.f32 %v3896_v50, %v7061_v34  ;;  %v3310_v0 = vpop.f32.mrf.mxu1  ;;  %v3355_v58 = vmax.f32 %v3305_v51, 0.0 }
 0x479   : > { %4474 = vst.sshfl [vmem:[%s7072_s26 + $0x140] sm:$0xff pattern:$0x75316420] %v3417_v32  ;;  %4475 = vst.sshfl [vmem:[%s7072_s26 + $0x148] sm:$0xff pattern:$0x75316420] %v3418_v3  ;;  %v3311_v52 = vadd.f32 %v3310_v0, %v7055_v7 }
 0x47a   : > { %4546 = vst.sshfl [vmem:[%s7072_s26 + $0x150] sm:$0xff pattern:$0x75316420] %v4007_v4  ;;  %4547 = vst.sshfl [vmem:[%s7072_s26 + $0x158] sm:$0xff pattern:$0x75316420] %v4008_v21  ;;  %v3312_v38 = vpop.f32.mrf.mxu1 }
 0x47b   : > { %v3945_v31 = vmax.f32 %v3895_v33, 0.0  ;;  %v3356_v36 = vmax.f32 %v3307_v12, 0.0  ;;  %v3946_v45 = vmax.f32 %v3897_v24, 0.0  ;;  %v3313_v2 = vadd.f32 %v3312_v38, %v7059_v1 }
 0x47c   : > { %v3316_v9 = vpop.f32.mrf.mxu1  ;;  %v3357_v15 = vmax.f32 %v3311_v52, 0.0 }
 0x47d   : > { %v3419_v60 = vcombine.low %v3355_v58, %v3356_v36  ;;  %v3420_v14 = vcombine.high %v3355_v58, %v3356_v36  ;;  %v4009_v19 = vcombine.low %v3945_v31, %v3946_v45  ;;  %v4010_v63 = vcombine.high %v3945_v31, %v3946_v45 }
 0x47e   : > { %v3358_v40 = vmax.f32 %v3313_v2, 0.0  ;;  %v3317_v16 = vadd.f32 %v3316_v9, %v7055_v7  ;;  %v3318_v23 = vpop.f32.mrf.mxu1 }
 0x47f   : > { %4476 = vst.sshfl [vmem:[%s7072_s26 + $0x160] sm:$0xff pattern:$0x75316420] %v3419_v60  ;;  %4477 = vst.sshfl [vmem:[%s7072_s26 + $0x168] sm:$0xff pattern:$0x75316420] %v3420_v14  ;;  %v3319_v10 = vadd.f32 %v3318_v23, %v7059_v1 }
 0x480   : > { %4548 = vst.sshfl [vmem:[%s7072_s26 + $0x170] sm:$0xff pattern:$0x75316420] %v4009_v19  ;;  %4549 = vst.sshfl [vmem:[%s7072_s26 + $0x178] sm:$0xff pattern:$0x75316420] %v4010_v63  ;;  %v3421_v27 = vcombine.low %v3357_v15, %v3358_v40  ;;  %v3422_v57 = vcombine.high %v3357_v15, %v3358_v40  ;;  %v3322_v49 = vpop.f32.mrf.mxu1 }
 0x481   : > { %v3359_v56 = vmax.f32 %v3317_v16, 0.0  ;;  %v3360_v61 = vmax.f32 %v3319_v10, 0.0  ;;  %v3323_v6 = vadd.f32 %v3322_v49, %v7055_v7 }
 0x482   : > { %4478 = vst.sshfl [vmem:[%s7072_s26 + $0x180] sm:$0xff pattern:$0x75316420] %v3421_v27  ;;  %4479 = vst.sshfl [vmem:[%s7072_s26 + $0x188] sm:$0xff pattern:$0x75316420] %v3422_v57  ;;  %v3324_v20 = vpop.f32.mrf.mxu1 }
 0x483   : > { %v3423_v22 = vcombine.low %v3359_v56, %v3360_v61  ;;  %v3424_v26 = vcombine.high %v3359_v56, %v3360_v61  ;;  %v3325_v41 = vadd.f32 %v3324_v20, %v7059_v1  ;;  %v3361_v17 = vmax.f32 %v3323_v6, 0.0 }
 0x484   : > { %v3328_v29 = vpop.f32.mrf.mxu1 }
 0x485   : > { %4480 = vst.sshfl [vmem:[%s7072_s26 + $0x1a0] sm:$0xff pattern:$0x75316420] %v3423_v22  ;;  %4481 = vst.sshfl [vmem:[%s7072_s26 + $0x1a8] sm:$0xff pattern:$0x75316420] %v3424_v26  ;;  %v3329_v43 = vadd.f32 %v3328_v29, %v7055_v7 }
 0x486   : > { %v3362_v37 = vmax.f32 %v3325_v41, 0.0  ;;  %v3330_v53 = vpop.f32.mrf.mxu1 }
 0x487   : > { %v3331_v54 = vadd.f32 %v3330_v53, %v7059_v1  ;;  %v3363_v47 = vmax.f32 %v3329_v43, 0.0 }
 0x488   : > { %v3425_v25 = vcombine.low %v3361_v17, %v3362_v37  ;;  %v3426_v39 = vcombine.high %v3361_v17, %v3362_v37  ;;  %v3900_v28 = vpop.f32.mrf.mxu1 }
 0x489   : > { %v3364_v55 = vmax.f32 %v3331_v54, 0.0  ;;  %v3901_v62 = vadd.f32 %v3900_v28, %v7057_v46 }
 0x48a   : > { %4482 = vst.sshfl [vmem:[%s7072_s26 + $0x1c0] sm:$0xff pattern:$0x75316420] %v3425_v25  ;;  %4483 = vst.sshfl [vmem:[%s7072_s26 + $0x1c8] sm:$0xff pattern:$0x75316420] %v3426_v39  ;;  %v3902_v59 = vpop.f32.mrf.mxu1 }
 0x48b   : > { %v3427_v35 = vcombine.low %v3363_v47, %v3364_v55  ;;  %v3428_v44 = vcombine.high %v3363_v47, %v3364_v55  ;;  %v3903_v7 = vadd.f32 %v3902_v59, %v7061_v34  ;;  %v3947_v18 = vmax.f32 %v3901_v62, 0.0 }
 0x48c   : > { %v3906_v13 = vpop.f32.mrf.mxu1 }
 0x48d   : > { %4484 = vst.sshfl [vmem:[%s7072_s26 + $0x1e0] sm:$0xff pattern:$0x75316420] %v3427_v35  ;;  %4485 = vst.sshfl [vmem:[%s7072_s26 + $0x1e8] sm:$0xff pattern:$0x75316420] %v3428_v44  ;;  %v3907_v1 = vadd.f32 %v3906_v13, %v7057_v46 }
 0x48e   : > { %v3948_v5 = vmax.f32 %v3903_v7, 0.0  ;;  %v3908_v30 = vpop.f32.mrf.mxu1 }
 0x48f   : > { %v3909_v42 = vadd.f32 %v3908_v30, %v7061_v34  ;;  %v3949_v33 = vmax.f32 %v3907_v1, 0.0 }
 0x490   : > { %v4011_v8 = vcombine.low %v3947_v18, %v3948_v5  ;;  %v4012_v48 = vcombine.high %v3947_v18, %v3948_v5  ;;  %v3912_v51 = vpop.f32.mrf.mxu1 }
 0x491   : > { %v3950_v11 = vmax.f32 %v3909_v42, 0.0  ;;  %v3913_v50 = vadd.f32 %v3912_v51, %v7057_v46 }
 0x492   : > { %4550 = vst.sshfl [vmem:[%s7072_s26 + $0x190] sm:$0xff pattern:$0x75316420] %v4011_v8  ;;  %4551 = vst.sshfl [vmem:[%s7072_s26 + $0x198] sm:$0xff pattern:$0x75316420] %v4012_v48  ;;  %v3914_v32 = vpop.f32.mrf.mxu1 }
 0x493   : > { %v4013_v3 = vcombine.low %v3949_v33, %v3950_v11  ;;  %v4014_v4 = vcombine.high %v3949_v33, %v3950_v11  ;;  %v3915_v21 = vadd.f32 %v3914_v32, %v7061_v34  ;;  %v3951_v24 = vmax.f32 %v3913_v50, 0.0 }
 0x494   : > { %v3918_v12 = vpop.f32.mrf.mxu1 }
 0x495   : > { %4552 = vst.sshfl [vmem:[%s7072_s26 + $0x1b0] sm:$0xff pattern:$0x75316420] %v4013_v3  ;;  %4553 = vst.sshfl [vmem:[%s7072_s26 + $0x1b8] sm:$0xff pattern:$0x75316420] %v4014_v4  ;;  %v3919_v52 = vadd.f32 %v3918_v12, %v7057_v46 }
 0x496   : > { %v3952_v0 = vmax.f32 %v3915_v21, 0.0  ;;  %v3920_v58 = vpop.f32.mrf.mxu1 }
 0x497   : > { %v3921_v45 = vadd.f32 %v3920_v58, %v7061_v34  ;;  %v3953_v38 = vmax.f32 %v3919_v52, 0.0 }
 0x498   : > { %v4015_v31 = vcombine.low %v3951_v24, %v3952_v0  ;;  %v4016_v36 = vcombine.high %v3951_v24, %v3952_v0 }
 0x499   : > { %v3954_v2 = vmax.f32 %v3921_v45, 0.0 }
 0x49a   : > { %4554 = vst.sshfl [vmem:[%s7072_s26 + $0x1d0] sm:$0xff pattern:$0x75316420] %v4015_v31  ;;  %4555 = vst.sshfl [vmem:[%s7072_s26 + $0x1d8] sm:$0xff pattern:$0x75316420] %v4016_v36 }
 0x49b   : > { %v4017_v46 = vcombine.low %v3953_v38, %v3954_v2  ;;  %v4018_v60 = vcombine.high %v3953_v38, %v3954_v2 }
 0x49d   : > { %4556 = vst.sshfl [vmem:[%s7072_s26 + $0x1f0] sm:$0xff pattern:$0x75316420] %v4017_v46  ;;  %4557 = vst.sshfl [vmem:[%s7072_s26 + $0x1f8] sm:$0xff pattern:$0x75316420] %v4018_v60 }
 0x49e   : > { %5442 = shalt.err (!%p5439_p10)
}
 0x49f   : > { %s5443_s15 = scalar_lea.hbm %s7197_s13, 8192  ;;  %s5447_s30 = scalar_lea.hbm %s7249_s5, 16384 }
 0x4a0   : > { %p5444_p0 = scmp.ne.s32.totalorder %s7197_s13, %s5443_s15  ;;  %p5448_p9 = scmp.lt.s32.totalorder %s7197_s13, %s7249_s5 }
 0x4a1   : > { %p5449_p11 = scmp.lt.s32.totalorder %s5447_s30, %s5443_s15 }
 0x4a2   : > { %p5445_p4 = pnand %p5444_p0, %p7301_p2 }
 0x4a3   : > { %p5450_p5 = por %p5449_p11, %p5448_p9 }
 0x4a4   : > { %p5446_p8 = pneg %p5445_p4 }
 0x4a6   : > { %p5451_p1 = pnand %p5450_p5, %p5446_p8 }
 0x4a8   : > { %5454 = shalt.err (!%p5451_p1)
}
 0x4a9   : > { %s5515_s9 = smov 128   ;;  %s5516_s11 = smov 8  }
 0x4aa   : > { %5198 = dma.vmem_to_hbm [thread:$0]  (%p7301_p2), %s7199_s6, 8192, %s7197_s13, %s4309_s22, %s5515_s9, %s5515_s9, %s5516_s11  }
 0x4ab PF: > { %s4338_s12 = sand.u32 1, %s5489_s18   ;;  %p7302_p6 = scmp.ne.s32.totalorder %s7267_s25, 0 }
 0x4ac   : > { %p7303_p12 = scmp.ge.s32.totalorder %s5501_s21, 2  ;;  %s4339_s7 = scalar_lea.sflag [#allocation6], %s4338_s12 }
 0x4ae   : > { %p5218_p3 = pnand %p7303_p12, %p7302_p6 }
 0x4b0   : > { %p5219_p7 = pneg %p5218_p3 }
 0x4b2   : > { %5484 = dma.done.wait (%p5219_p7), %s4339_s7, 8192  }
 0x4b3   : > { %5486 = vsyncadd (%p5219_p7), %s4339_s7, 4294959104  ;;  %p20_p13 = scmp.ge.s32.totalorder %s5638_s14, 4   ;;  %s7304_s18 = smov %s5493_s19 }
 0x4b4   : > { %s7305_s19 = smov %s5497_s20  ;;  %s7306_s20 = smov %s5648_s16 }
 0x4b5   : > { %s7307_s21 = smov %s5638_s14  ;;  %22 = sbr.rel (!%p20_p13) target bundleno = 7 (0x7), region = 111 }
 0x4ba   :  { %4344 = vsyncpa [#allocation5], 1 }
 0x4bb   :  { %4346 = vsyncpa [#allocation5 + $0x1], 1 }
 0x4bc   :  { %4347 = vsyncpa [#allocation8], 1 }
 0x4bd   :  { %4348 = vsyncpa [#allocation11], 1 }
 0x4be   :  { %4349 = vsyncpa [#allocation6], 1 }
 0x4bf   :  { %4351 = vsyncpa [#allocation6 + $0x1], 1 }

// kernel: tpu_custom_call.1
= control target key start
LH: loop header
LB: loop body
LE: loop exit
PB: predicated region body
PF: predicated region fallthrough
CT: control target
= control target key end

     0   :  { %10 = vsyncpa [#allocation5], 0  ;;  %s7244_s0 = inlined_call_operand.hbm [shape: f32[4,8,8,128], index: 0, kind: input, shape index: {}]   ;;  %s7245_s1 = inlined_call_operand.hbm [shape: f32[2,3,384,128], index: 1, kind: input, shape index: {}]   ;;  %s7246_s2 = inlined_call_operand.hbm [shape: f32[2,1,128], index: 2, kind: input, shape index: {}]   ;;  %s7247_s3 = inlined_call_operand.hbm [shape: f32[2,128,256], index: 3, kind: input, shape index: {}]   ;;  %s7248_s4 = inlined_call_operand.hbm [shape: f32[1,256], index: 4, kind: input, shape index: {}]   ;;  %s7249_s5 = inlined_call_operand.hbm [shape: f32[4,8,2,16,128], index: 5, kind: output, shape index: {}]  }
   0x1   :  { %12 = vsyncpa [#allocation5 + $0x1], 0 }
   0x2   :  { %13 = vsyncpa [#allocation8], 0 }
   0x3   :  { %14 = vsyncpa [#allocation11], 0 }
   0x4   :  { %15 = vsyncpa [#allocation6], 0 }
   0x5   :  { %17 = vsyncpa [#allocation6 + $0x1], 0  ;;  %s5547_s18 = smov 0   ;;  %s5549_s19 = smov 0  }
   0x6   :  { %s5551_s20 = smov 0   ;;  %s5553_s21 = smov 0  }
   0x7 LB: > { %s5568_s22 = sadd.s32 4294967295, %s5501_s21   ;;  %s4434_s23 = sadd.s32 4294967294, %s5501_s21   ;;  %s5501_s21 = sphi %s5553_s21, %s7307_s21   ;;  %s5497_s20 = sphi %s5551_s20, %s7306_s20   ;;  %s5493_s19 = sphi %s5549_s19, %s7305_s19   ;;  %s5489_s18 = sphi %s5547_s18, %s7304_s18  }
   0x8   : > { %p43_p0 = scmp.ne.s32.totalorder %s5493_s19, %s5489_s18  ;;  %p7250_p1 = scmp.eq.s32.totalorder %s5568_s22, 0 }
   0x9   : > { %p157_p3 = scmp.eq.s32.totalorder %s4434_s23, 1  ;;  %p4435_p5 = scmp.ge.s32.totalorder %s5501_s21, 1 }
   0xa   : > { %p5577_p4 = por %p7250_p1, %p43_p0  ;;  %p164_p7 = scmp.lt.s32.totalorder %s5501_s21, 3 }
   0xb   : > { %p5582_p6 = por %p157_p3, %p43_p0  ;;  %s5503_s27 = smov [#allocation7]  }
   0xc   : > { %s7266_s24 = scalar_select %p5577_p4, 1, 0 }
   0xd   : > { %s7267_s25 = scalar_select %p5582_p6, 1, 0 }
   0xe   : > { %p5587_p8 = pnand %p4435_p5, %p164_p7  ;;  %s176_s28 = sshll.u32 %s5503_s27, 4  ;;  %s177_s28 = int_to_ptr.vmem [resolvable:$true] %s176_s28 }
   0xf   : > { %s5504_s30 = smov [#allocation10]   ;;  %s5308_s7 = scalar_lea.vmem %s177_s28, 36864 }
  0x10   : > { %s7268_s26 = scalar_select %p5587_p8, 1, 0 }
  0x11   : > { %p5200_p9 = pneg %p5587_p8  ;;  %s202_s6 = sshll.u32 %s5504_s30, 4  ;;  %s203_s6 = int_to_ptr.vmem [resolvable:$true] %s202_s6 }
  0x12   : > { %p5309_p13 = scmp.ne.s32.totalorder %s177_s28, %s5308_s7  ;;  %p5316_p5 = scmp.lt.s32.totalorder %s177_s28, %s177_s28 }
  0x13   : > { %p5596_p11 = pnand %p5200_p9, %p7250_p1  ;;  %p5317_p7 = scmp.lt.s32.totalorder %s5308_s7, %s5308_s7 }
  0x15   : > { %p5299_p12 = pneg %p5596_p11  ;;  %p5318_p10 = por %p5317_p7, %p5316_p5 }
  0x17   : > { %p5311_p0 = pnand %p5309_p13, %p5299_p12 }
  0x19   : > { %p5312_p3 = pneg %p5311_p0 }
  0x1b   : > { %p5319_p9 = pnand %p5318_p10, %p5312_p3 }
  0x1d   : > { %5322 = shalt.err (!%p5319_p9)
}
  0x1e   : > { %s7251_s8 = smov 128   ;;  %s5506_s9 = smov 8  }
  0x1f   : > { %5203 = dma.hbm_to_vmem [thread:$0]  (!%p5596_p11), %s7245_s1, 36864, %s177_s28, [#allocation8], %s7251_s8, %s7251_s8, %s5506_s9  }
  0x20   : > { %s5334_s12 = scalar_lea.vmem %s203_s6, 8192  ;;  %p5342_p10 = scmp.lt.s32.totalorder %s203_s6, %s203_s6 }
  0x21   : > { %p5335_p13 = scmp.ne.s32.totalorder %s203_s6, %s5334_s12  ;;  %p5343_p3 = scmp.lt.s32.totalorder %s5334_s12, %s5334_s12 }
  0x23   : > { %p5337_p0 = pnand %p5335_p13, %p5299_p12  ;;  %p5344_p7 = por %p5343_p3, %p5342_p10 }
  0x25   : > { %p5338_p5 = pneg %p5337_p0 }
  0x27   : > { %p5345_p9 = pnand %p5344_p7, %p5338_p5 }
  0x29   : > { %5348 = shalt.err (!%p5345_p9)
}
  0x2a   : > { %s5507_s13 = smov 256   ;;  %s5508_s14 = smov 16  }
  0x2b   : > { %5209 = dma.hbm_to_vmem [thread:$0]  (!%p5596_p11), %s7247_s3, 8192, %s203_s6, [#allocation11], %s5507_s13, %s5507_s13, %s5508_s14  }
  0x2c   : > { %s5509_s17 = smov [#allocation9]   ;;  %s5510_s27 = smov [#allocation12]  }
  0x2d   : > { %s189_s23 = sshll.u32 %s5509_s17, 4  ;;  %s216_s28 = sshll.u32 %s5510_s27, 4  ;;  %s190_s23 = int_to_ptr.vmem [resolvable:$true] %s189_s23  ;;  %s217_s28 = int_to_ptr.vmem [resolvable:$true] %s216_s28 }
  0x2e   : > { %s5360_s30 = scalar_lea.vmem %s190_s23, 32  ;;  %p5368_p10 = scmp.lt.s32.totalorder %s190_s23, %s190_s23 }
  0x2f   : > { %p5361_p13 = scmp.ne.s32.totalorder %s190_s23, %s5360_s30  ;;  %p5369_p3 = scmp.lt.s32.totalorder %s5360_s30, %s5360_s30 }
  0x31   : > { %p5363_p0 = pnand %p5361_p13, %p5299_p12  ;;  %p5370_p7 = por %p5369_p3, %p5368_p10 }
  0x33   : > { %p5364_p5 = pneg %p5363_p0 }
  0x35   : > { %p5371_p9 = pnand %p5370_p7, %p5364_p5 }
  0x37   : > { %5374 = shalt.err (!%p5371_p9)
}
  0x38   : > { %s5511_s7 = smov 1   ;;  %s5386_s11 = scalar_lea.vmem %s217_s28, 32 }
  0x39   : > { %5206 = dma.hbm_to_vmem [thread:$0]  (!%p5596_p11), %s7246_s2, 32, %s190_s23, [#allocation8], %s5508_s14, %s5508_s14, %s5511_s7  }
  0x3a   : > { %p5387_p1 = scmp.ne.s32.totalorder %s217_s28, %s5386_s11  ;;  %p5394_p2 = scmp.lt.s32.totalorder %s217_s28, %s217_s28 }
  0x3b   : > { %p5395_p6 = scmp.lt.s32.totalorder %s5386_s11, %s5386_s11 }
  0x3c   : > { %p5389_p13 = pnand %p5387_p1, %p5299_p12 }
  0x3d   : > { %p5396_p10 = por %p5395_p6, %p5394_p2 }
  0x3e   : > { %p5390_p0 = pneg %p5389_p13 }
  0x40   : > { %p5397_p5 = pnand %p5396_p10, %p5390_p0 }
  0x42   : > { %5400 = shalt.err (!%p5397_p5)
}
  0x43   : > { %5212 = dma.hbm_to_vmem [thread:$0]  (!%p5596_p11), %s7248_s4, 32, %s217_s28, [#allocation11]  }
  0x44   : > { %s5638_s14 = sadd.s32 1, %s5501_s21   ;;  %s30_s29 = sadd.s32 1, %s5497_s20 }
  0x45   : > { %s27_s15 = ssub.s32 %s5501_s21, %s5638_s14  ;;  %p37_p2 = scmp.ne.s32.totalorder %s5497_s20, %s5493_s19 }
  0x46   : > { %p28_p1 = scmp.eq.s32.totalorder %s27_s15, 0  ;;  %p38_p6 = scmp.eq.s32.totalorder %s5501_s21, 0 }
  0x47   : > { %p5225_p12 = scmp.lt.s32.totalorder %s5501_s21, 2  ;;  %p7270_p7 = scmp.eq.s32.totalorder %s5568_s22, 1 }
  0x48   : > { %s5648_s16 = scalar_select %p28_p1, %s5497_s20, %s30_s29  }
  0x49   : > { %p39_p3 = por %p38_p6, %p37_p2  ;;  %p5652_p9 = por %p7270_p7, %p37_p2 }
  0x4a   : > { %s227_s23 = sand.u32 1, %s5497_s20   ;;  %s4525_s27 = sshll.u32 %s5501_s21, 11 }
  0x4b   : > { %s7271_s17 = scalar_select %p5652_p9, 1, 0 }
  0x4c   : > { %s4441_s28 = sshll.u32 %s227_s23, 7  ;;  %s5661_s6 = scalar_lea.hbm %s7244_s0, %s4525_s27 }
  0x4d   : > { %s231_s10 = scalar_lea.vmem [#allocation4], %s4441_s28  ;;  %p5663_p11 = pnand %p5225_p12, %p39_p3 }
  0x4e   : > { %s239_s11 = sshll.u32 %s231_s10, 4  ;;  %s5669_s13 = scalar_lea.sflag [#allocation5], %s227_s23  ;;  %s5667_s11 = int_to_ptr.vmem [resolvable:$true] %s239_s11 }
  0x4f   : > { %s5401_s15 = scalar_lea.hbm %s5661_s6, 2048  ;;  %p5403_p0 = pneg %p5663_p11 }
  0x50   : > { %p5402_p13 = scmp.ne.s32.totalorder %s5661_s6, %s5401_s15  ;;  %s5406_s28 = scalar_lea.hbm %s7244_s0, 4096 }
  0x51   : > { %p5407_p1 = scmp.lt.s32.totalorder %s5661_s6, %s7244_s0  ;;  %p5408_p2 = scmp.lt.s32.totalorder %s5406_s28, %s5401_s15 }
  0x52   : > { %p5404_p10 = pnand %p5403_p0, %p5402_p13 }
  0x53   : > { %p5409_p6 = por %p5408_p2, %p5407_p1 }
  0x54   : > { %p5405_p5 = pneg %p5404_p10 }
  0x56   : > { %p5410_p12 = pnand %p5409_p6, %p5405_p5 }
  0x58   : > { %5413 = shalt.err (!%p5410_p12)
}
  0x59   : > { %s5414_s23 = scalar_lea.vmem %s5667_s11, 2048  ;;  %s5512_s10 = smov [#allocation4]  }
  0x5a   : > { %p5415_p3 = scmp.ne.s32.totalorder %s5667_s11, %s5414_s23  ;;  %s5419_s8 = sshll.u32 %s5512_s10, 4  ;;  %s5420_s8 = int_to_ptr.vmem [resolvable:$false] %s5419_s8 }
  0x5b   : > { %s5421_s29 = scalar_lea.vmem %s5420_s8, 4096  ;;  %p5422_p10 = scmp.lt.s32.totalorder %s5667_s11, %s5420_s8 }
  0x5c   : > { %p5417_p7 = pnand %p5415_p3, %p5403_p0  ;;  %p5423_p9 = scmp.lt.s32.totalorder %s5421_s29, %s5414_s23 }
  0x5e   : > { %p5418_p13 = pneg %p5417_p7  ;;  %p5424_p4 = por %p5423_p9, %p5422_p10 }
  0x60   : > { %p5425_p8 = pnand %p5424_p4, %p5418_p13 }
  0x62   : > { %5428 = shalt.err (!%p5425_p8)
}
  0x63   : > { %s7273_s15 = smov 128   ;;  %p7274_p0 = scmp.ne.s32.totalorder %s7268_s26, 0 }
  0x64   : > { %5216 = dma.hbm_to_vmem [thread:$0]  (!%p5663_p11), %s5661_s6, 2048, %s5667_s11, %s5669_s13, %s7273_s15, %s7273_s15, %s5506_s9  }
  0x65   : > { %251 = sbr.rel (%p7274_p0) target bundleno = 1195 (0x4ab), region = 40 }
  0x6a   : > { %s5696_s27 = sand.u32 1, %s5493_s19   ;;  %p7275_p4 = scmp.ne.s32.totalorder %s7266_s24, 0 }
  0x6b   : > { %s4446_s8 = sshll.u32 %s5696_s27, 7  ;;  %s254_s28 = scalar_lea.sflag [#allocation5], %s5696_s27 }
  0x6c   : > { %s5700_s30 = scalar_lea.vmem [#allocation4], %s4446_s8 }
  0x6d   : > { %5472 = dma.done.wait (%p7275_p4), %s254_s28, 2048  }
  0x6e   : > { %5474 = vsyncadd (%p7275_p4), %s254_s28, 4294965248  ;;  %p7276_p8 = scmp.eq.s32.totalorder %s5568_s22, 0 }
  0x70   : > { %5476 = dma.done.wait (%p7276_p8), [#allocation8], 36896   ;;  %p7277_p9 = pmov %p7276_p8 }
  0x71   : > { %p7278_p11 = pmov %p7276_p8 }
  0x72   : > { %5478 = vsyncadd (%p7277_p9), [#allocation8], 4294930400 }
  0x73   : > { %5480 = dma.done.wait (%p7278_p11), [#allocation11], 8224   ;;  %p7279_p5 = pmov %p7276_p8 }
  0x74   : > { %v7255_v0 = vmov 0.0   ;;  %v579_v1 = vld [vmem:[#allocation7 + $0x78] sm:$0xff]  ;;  %v578_v3 = vld [vmem:[#allocation7 + $0x70] sm:$0xff]  ;;  %v577_v5 = vld [vmem:[#allocation7 + $0x68] sm:$0xff]  ;;  %s4451_s24 = sshll.u32 %s5696_s27, 9  ;;  %s4559_s9 = sshll.u32 %s5568_s22, 13 }
  0x75   : > { %5482 = vsyncadd (%p7279_p5), [#allocation11], 4294959072  ;;  %612 = vmatprep.subr.mxu0 %v7255_v0  ;;  %302 = vst [vmem:[#allocation2] sm:$0xff] %v7255_v0  ;;  %v611_v2 = vld [vmem:[#allocation7 + $0x178] sm:$0xff]  ;;  %v610_v4 = vld [vmem:[#allocation7 + $0x170] sm:$0xff]  ;;  %s7072_s26 = scalar_lea.vmem [#allocation13], %s4451_s24  ;;  %s7197_s13 = scalar_lea.hbm %s7249_s5, %s4559_s9 }
  0x76   : > { %303 = vst [vmem:[#allocation2 + $0x8] sm:$0x3] %v7255_v0  ;;  %304 = vst [vmem:[#allocation2 + $0xa0] sm:$0xff] %v7255_v0  ;;  %613 = vmatpush1.msra.mxu0 %v579_v1  ;;  %4776 = vmatprep.subr.mxu1 %v611_v2  ;;  %v609_v6 = vld [vmem:[#allocation7 + $0x168] sm:$0xff]  ;;  %v576_v7 = vld [vmem:[#allocation7 + $0x60] sm:$0xff]  ;;  %s4323_s6 = sshll.u32 %s7072_s26, 4  ;;  %s7199_s6 = int_to_ptr.vmem [resolvable:$true] %s4323_s6 }
  0x77   : > { %305 = vst [vmem:[#allocation2 + $0xa8] sm:$0x3] %v7255_v0  ;;  %307 = vst [vmem:[#allocation2 + $0x90] sm:$0xff] %v7255_v0  ;;  %614 = vmatprep.subr.mxu0 %v7255_v0  ;;  %4777 = vmatpush3.msra.mxu1 %v611_v2  ;;  %v608_v8 = vld [vmem:[#allocation7 + $0x160] sm:$0xff]  ;;  %v575_v9 = vld [vmem:[#allocation7 + $0x58] sm:$0xff]  ;;  %s4309_s22 = scalar_lea.sflag [#allocation6], %s5696_s27 }
  0x78   : > { %308 = vst [vmem:[#allocation2 + $0x98] sm:$0x3] %v7255_v0  ;;  %309 = vst [vmem:[#allocation2 + $0x130] sm:$0xff] %v7255_v0  ;;  %615 = vmatpush1.msra.mxu0 %v578_v3  ;;  %4778 = vmatprep.subr.mxu1 %v610_v4  ;;  %v607_v10 = vld [vmem:[#allocation7 + $0x158] sm:$0xff]  ;;  %v574_v11 = vld [vmem:[#allocation7 + $0x50] sm:$0xff]  ;;  %s5429_s7 = scalar_lea.vmem %s7199_s6, 8192 }
  0x79   : > { %310 = vst [vmem:[#allocation2 + $0x138] sm:$0x3] %v7255_v0  ;;  %312 = vst [vmem:[#allocation2 + $0x10] sm:$0x1] %v7255_v0  ;;  %616 = vmatprep.subr.mxu0 %v7255_v0  ;;  %4779 = vmatpush3.msra.mxu1 %v610_v4  ;;  %v606_v12 = vld [vmem:[#allocation7 + $0x150] sm:$0xff]  ;;  %v573_v13 = vld [vmem:[#allocation7 + $0x48] sm:$0xff]  ;;  %p5430_p1 = scmp.ne.s32.totalorder %s7199_s6, %s5429_s7 }
  0x7a   : > { %313 = vst [vmem:[#allocation2 + $0x20] sm:$0x1] %v7255_v0  ;;  %314 = vst [vmem:[#allocation2 + $0x30] sm:$0x1] %v7255_v0  ;;  %617 = vmatpush1.msra.mxu0 %v577_v5  ;;  %4780 = vmatprep.subr.mxu1 %v609_v6  ;;  %v605_v14 = vld [vmem:[#allocation7 + $0x148] sm:$0xff]  ;;  %v5769_v15 = vld [vmem:[%s5700_s30] sm:$0xff] }
  0x7b   : > { %315 = vst [vmem:[#allocation2 + $0x40] sm:$0x1] %v7255_v0  ;;  %316 = vst [vmem:[#allocation2 + $0x50] sm:$0x1] %v7255_v0  ;;  %618 = vmatprep.subr.mxu0 %v7255_v0  ;;  %4781 = vmatpush3.msra.mxu1 %v609_v6  ;;  %v572_v16 = vld [vmem:[#allocation7 + $0x40] sm:$0xff]  ;;  %v571_v18 = vld [vmem:[#allocation7 + $0x38] sm:$0xff] }
  0x7c   : > { %317 = vst [vmem:[#allocation2 + $0x60] sm:$0x1] %v7255_v0  ;;  %318 = vst [vmem:[#allocation2 + $0x70] sm:$0x1] %v7255_v0  ;;  %619 = vmatpush1.msra.mxu0 %v576_v7  ;;  %4782 = vmatprep.subr.mxu1 %v608_v8  ;;  %v604_v17 = vld [vmem:[#allocation7 + $0x140] sm:$0xff]  ;;  %v603_v19 = vld [vmem:[#allocation7 + $0x138] sm:$0xff] }
  0x7d   : > { %319 = vst [vmem:[#allocation2 + $0x80] sm:$0x1] %v7255_v0  ;;  %322 = vst [vmem:[#allocation2 + $0xb0] sm:$0x1] %v7255_v0  ;;  %620 = vmatprep.subr.mxu0 %v7255_v0  ;;  %4783 = vmatpush3.msra.mxu1 %v608_v8  ;;  %v570_v20 = vld [vmem:[#allocation7 + $0x30] sm:$0xff]  ;;  %v569_v22 = vld [vmem:[#allocation7 + $0x28] sm:$0xff] }
  0x7e   : > { %323 = vst [vmem:[#allocation2 + $0xc0] sm:$0x1] %v7255_v0  ;;  %324 = vst [vmem:[#allocation2 + $0xd0] sm:$0x1] %v7255_v0  ;;  %621 = vmatpush1.msra.mxu0 %v575_v9  ;;  %4784 = vmatprep.subr.mxu1 %v607_v10  ;;  %v602_v21 = vld [vmem:[#allocation7 + $0x130] sm:$0xff]  ;;  %v601_v23 = vld [vmem:[#allocation7 + $0x128] sm:$0xff] }
  0x7f   : > { %325 = vst [vmem:[#allocation2 + $0xe0] sm:$0x1] %v7255_v0  ;;  %326 = vst [vmem:[#allocation2 + $0xf0] sm:$0x1] %v7255_v0  ;;  %622 = vmatprep.subr.mxu0 %v7255_v0  ;;  %4785 = vmatpush3.msra.mxu1 %v607_v10  ;;  %v568_v24 = vld [vmem:[#allocation7 + $0x20] sm:$0xff]  ;;  %v5778_v26 = vld [vmem:[%s5700_s30 + $0x8] sm:$0xff] }
  0x80   : > { %327 = vst [vmem:[#allocation2 + $0x100] sm:$0x1] %v7255_v0  ;;  %328 = vst [vmem:[#allocation2 + $0x110] sm:$0x1] %v7255_v0  ;;  %623 = vmatpush1.msra.mxu0 %v574_v11  ;;  %4786 = vmatprep.subr.mxu1 %v606_v12  ;;  %v600_v25 = vld [vmem:[#allocation7 + $0x120] sm:$0xff]  ;;  %v5782_v27 = vld [vmem:[%s5700_s30 + $0x10] sm:$0xff] }
  0x81   : > { %329 = vst [vmem:[#allocation2 + $0x120] sm:$0x1] %v7255_v0  ;;  %332 = vst [vmem:[#allocation2 + $0x19] sm:$0x1] %v7255_v0  ;;  %624 = vmatprep.subr.mxu0 %v7255_v0  ;;  %4787 = vmatpush3.msra.mxu1 %v606_v12  ;;  %v567_v28 = vld [vmem:[#allocation7 + $0x18] sm:$0xff]  ;;  %v566_v31 = vld [vmem:[#allocation7 + $0x10] sm:$0xff] }
  0x82   : > { %333 = vst [vmem:[#allocation2 + $0x29] sm:$0x1] %v7255_v0  ;;  %334 = vst [vmem:[#allocation2 + $0x39] sm:$0x1] %v7255_v0  ;;  %625 = vmatpush1.msra.mxu0 %v573_v13  ;;  %4788 = vmatprep.subr.mxu1 %v605_v14  ;;  %v599_v29 = vld [vmem:[#allocation7 + $0x118] sm:$0xff]  ;;  %v598_v32 = vld [vmem:[#allocation7 + $0x110] sm:$0xff] }
  0x83   : > { %335 = vst [vmem:[#allocation2 + $0x49] sm:$0x1] %v7255_v0  ;;  %336 = vst [vmem:[#allocation2 + $0x59] sm:$0x1] %v7255_v0  ;;  %626 = vmatprep.subr.mxu0 %v7255_v0  ;;  %4789 = vmatpush3.msra.mxu1 %v605_v14  ;;  %v5787_v30 = vld [vmem:[%s5700_s30 + $0x18] sm:$0xff]  ;;  %v5792_v33 = vld [vmem:[%s5700_s30 + $0x20] sm:$0xff] }
  0x84   : > { %337 = vst [vmem:[#allocation2 + $0x69] sm:$0x1] %v7255_v0  ;;  %338 = vst [vmem:[#allocation2 + $0x79] sm:$0x1] %v7255_v0  ;;  %627 = vmatpush1.msra.mxu0 %v572_v16  ;;  %4790 = vmatprep.subr.mxu1 %v604_v17  ;;  %v5796_v34 = vld [vmem:[%s5700_s30 + $0x28] sm:$0xff]  ;;  %v5801_v37 = vld [vmem:[%s5700_s30 + $0x30] sm:$0xff] }
  0x85   : > { %339 = vst [vmem:[#allocation2 + $0x89] sm:$0x1] %v7255_v0  ;;  %342 = vst [vmem:[#allocation2 + $0xb9] sm:$0x1] %v7255_v0  ;;  %628 = vmatprep.subr.mxu0 %v7255_v0  ;;  %4791 = vmatpush3.msra.mxu1 %v604_v17  ;;  %v565_v35 = vld [vmem:[#allocation7 + $0x8] sm:$0xff]  ;;  %v5805_v38 = vld [vmem:[%s5700_s30 + $0x38] sm:$0xff] }
  0x86   : > { %343 = vst [vmem:[#allocation2 + $0xc9] sm:$0x1] %v7255_v0  ;;  %344 = vst [vmem:[#allocation2 + $0xd9] sm:$0x1] %v7255_v0  ;;  %629 = vmatpush1.msra.mxu0 %v571_v18  ;;  %4792 = vmatprep.subr.mxu1 %v603_v19  ;;  %v597_v36 = vld [vmem:[#allocation7 + $0x108] sm:$0xff]  ;;  %v564_v39 = vld [vmem:[#allocation7] sm:$0xff] }
  0x87   : > { %345 = vst [vmem:[#allocation2 + $0xe9] sm:$0x1] %v7255_v0  ;;  %346 = vst [vmem:[#allocation2 + $0xf9] sm:$0x1] %v7255_v0  ;;  %630 = vmatprep.subr.mxu0 %v7255_v0  ;;  %4793 = vmatpush3.msra.mxu1 %v603_v19  ;;  %v596_v40 = vld [vmem:[#allocation7 + $0x100] sm:$0xff]  ;;  %v595_v41 = vld [vmem:[#allocation7 + $0xf8] sm:$0xff] }
  0x88   : > { %347 = vst [vmem:[#allocation2 + $0x109] sm:$0x1] %v7255_v0  ;;  %348 = vst [vmem:[#allocation2 + $0x119] sm:$0x1] %v7255_v0  ;;  %631 = vmatpush1.msra.mxu0 %v570_v20  ;;  %4794 = vmatprep.subr.mxu1 %v602_v21  ;;  %v5813_v43 = vld [vmem:[%s5700_s30 + $0x40] sm:$0xff]  ;;  %v594_v45 = vld [vmem:[#allocation7 + $0xf0] sm:$0xff] }
  0x89   : > { %349 = vst [vmem:[#allocation2 + $0x129] sm:$0x1] %v7255_v0  ;;  %311 = vst [vmem:[#allocation2] sm:$0x1] %v7255_v0  ;;  %632 = vmatprep.subr.mxu0 %v7255_v0  ;;  %4795 = vmatpush3.msra.mxu1 %v602_v21  ;;  %v5820_v46 = vld [vmem:[%s5700_s30 + $0x48] sm:$0xff]  ;;  %v950_v47 = vld [vmem:[#allocation7 + $0x1f8] sm:$0xff] }
  0x8a   : > { %320 = vst [vmem:[#allocation2 + $0x90] sm:$0x1] %v7255_v0  ;;  %321 = vst [vmem:[#allocation2 + $0xa0] sm:$0x1] %v7255_v0  ;;  %633 = vmatpush1.msra.mxu0 %v569_v22  ;;  %4796 = vmatprep.subr.mxu1 %v601_v23  ;;  %v5825_v48 = vld [vmem:[%s5700_s30 + $0x50] sm:$0xff]  ;;  %v593_v49 = vld [vmem:[#allocation7 + $0xe8] sm:$0xff] }
  0x8b   : > { %330 = vst [vmem:[#allocation2 + $0x130] sm:$0x1] %v7255_v0  ;;  %331 = vst [vmem:[#allocation2 + $0x9] sm:$0x1] %v7255_v0  ;;  %634 = vmatprep.subr.mxu0 %v7255_v0  ;;  %4797 = vmatpush3.msra.mxu1 %v601_v23  ;;  %v949_v50 = vld [vmem:[#allocation7 + $0x1f0] sm:$0xff]  ;;  %v5832_v51 = vld [vmem:[%s5700_s30 + $0x58] sm:$0xff] }
  0x8c   : > { %340 = vst [vmem:[#allocation2 + $0x99] sm:$0x1] %v7255_v0  ;;  %341 = vst [vmem:[#allocation2 + $0xa9] sm:$0x1] %v7255_v0  ;;  %635 = vmatpush1.msra.mxu0 %v568_v24  ;;  %4798 = vmatprep.subr.mxu1 %v600_v25  ;;  %v592_v52 = vld [vmem:[#allocation7 + $0xe0] sm:$0xff]  ;;  %v948_v54 = vld [vmem:[#allocation7 + $0x1e8] sm:$0xff] }
  0x8d   : > { %350 = vst [vmem:[#allocation2 + $0x139] sm:$0x1] %v7255_v0  ;;  %368 = vst [vmem:[#allocation2 + $0x11] sm:$0xff] %v5769_v15  ;;  %636 = vmatprep.subr.mxu0 %v7255_v0  ;;  %4799 = vmatpush3.msra.mxu1 %v600_v25  ;;  %v5837_v53 = vld [vmem:[%s5700_s30 + $0x60] sm:$0xff]  ;;  %v5842_v55 = vld [vmem:[%s5700_s30 + $0x68] sm:$0xff]  ;;  %p7301_p2 = scmp.ne.s32.totalorder %s7271_s17, 0 }
  0x8e   : > { %369 = vst [vmem:[#allocation2 + $0x21] sm:$0xff] %v5778_v26  ;;  %370 = vst [vmem:[#allocation2 + $0x31] sm:$0xff] %v5782_v27  ;;  %637 = vmatpush1.msra.mxu0 %v567_v28  ;;  %4800 = vmatprep.subr.mxu1 %v599_v29  ;;  %v591_v56 = vld [vmem:[#allocation7 + $0xd8] sm:$0xff]  ;;  %v5847_v57 = vld [vmem:[%s5700_s30 + $0x70] sm:$0xff]  ;;  %s5514_s23 = smov [#allocation13]  }
  0x8f   : > { %371 = vst [vmem:[#allocation2 + $0x41] sm:$0xff] %v5787_v30  ;;  %372 = vst [vmem:[#allocation2 + $0x51] sm:$0xff] %v5792_v33  ;;  %638 = vmatprep.subr.mxu0 %v7255_v0  ;;  %4801 = vmatpush3.msra.mxu1 %v599_v29  ;;  %v947_v58 = vld [vmem:[#allocation7 + $0x1e0] sm:$0xff]  ;;  %v5852_v59 = vld [vmem:[%s5700_s30 + $0x78] sm:$0xff]  ;;  %p5431_p6 = pnand %p5430_p1, %p7301_p2  ;;  %s5433_s10 = sshll.u32 %s5514_s23, 4  ;;  %s5434_s10 = int_to_ptr.vmem [resolvable:$false] %s5433_s10 }
  0x90   : > { %373 = vst [vmem:[#allocation2 + $0x61] sm:$0xff] %v5796_v34  ;;  %639 = vmatpush1.msra.mxu0 %v566_v31  ;;  %4802 = vmatprep.subr.mxu1 %v598_v32  ;;  %374 = vst [vmem:[#allocation2 + $0x71] sm:$0xff] %v5801_v37  ;;  %v590_v60 = vld [vmem:[#allocation7 + $0xd0] sm:$0xff]  ;;  %v946_v61 = vld [vmem:[#allocation7 + $0x1d8] sm:$0xff]  ;;  %s5435_s29 = scalar_lea.vmem %s5434_s10, 16384  ;;  %p5436_p3 = scmp.lt.s32.totalorder %s7199_s6, %s5434_s10 }
  0x91   : > { %640 = vmatprep.subr.mxu0 %v7255_v0  ;;  %4803 = vmatpush3.msra.mxu1 %v598_v32  ;;  %375 = vst [vmem:[#allocation2 + $0x81] sm:$0xff] %v5805_v38  ;;  %376 = vst [vmem:[#allocation2 + $0xb1] sm:$0xff] %v5813_v43  ;;  %v589_v62 = vld [vmem:[#allocation7 + $0xc8] sm:$0xff]  ;;  %v945_v63 = vld [vmem:[#allocation7 + $0x1d0] sm:$0xff]  ;;  %p5432_p12 = pneg %p5431_p6  ;;  %p5437_p7 = scmp.lt.s32.totalorder %s5435_s29, %s5429_s7 }
  0x92   : > { %641 = vmatpush1.msra.mxu0 %v565_v35  ;;  %4804 = vmatprep.subr.mxu1 %v597_v36  ;;  %v5810_v42 = vld [vmem:[#allocation2 + $0x2] sm:$0xff]  ;;  %377 = vst [vmem:[#allocation2 + $0xc1] sm:$0xff] %v5820_v46  ;;  %378 = vst [vmem:[#allocation2 + $0xd1] sm:$0xff] %v5825_v48  ;;  %v587_v3 = vld [vmem:[#allocation7 + $0xb8] sm:$0xff] }
  0x93   : > { %642 = vmatprep.subr.mxu0 %v7255_v0  ;;  %4805 = vmatpush3.msra.mxu1 %v597_v36  ;;  %379 = vst [vmem:[#allocation2 + $0xe1] sm:$0xff] %v5832_v51  ;;  %380 = vst [vmem:[#allocation2 + $0xf1] sm:$0xff] %v5837_v53  ;;  %v588_v1 = vld [vmem:[#allocation7 + $0xc0] sm:$0xff]  ;;  %v944_v2 = vld [vmem:[#allocation7 + $0x1c8] sm:$0xff]  ;;  %p5438_p13 = por %p5437_p7, %p5436_p3 }
  0x94   : > { %643 = vmatpush1.msra.mxu0 %v564_v39  ;;  %4806 = vmatprep.subr.mxu1 %v596_v40  ;;  %v5817_v44 = vld [vmem:[#allocation2 + $0x12] sm:$0xff]  ;;  %381 = vst [vmem:[#allocation2 + $0x101] sm:$0xff] %v5842_v55  ;;  %382 = vst [vmem:[#allocation2 + $0x111] sm:$0xff] %v5847_v57  ;;  %v943_v4 = vld [vmem:[#allocation7 + $0x1c0] sm:$0xff] }
  0x95   : > { %644 = vmatprep.subr.mxu0 %v7255_v0  ;;  %4807 = vmatpush3.msra.mxu1 %v596_v40  ;;  %383 = vst [vmem:[#allocation2 + $0x121] sm:$0xff] %v5852_v59  ;;  %v586_v5 = vld [vmem:[#allocation7 + $0xb0] sm:$0xff]  ;;  %v942_v6 = vld [vmem:[#allocation7 + $0x1b8] sm:$0xff]  ;;  %v585_v7 = vld [vmem:[#allocation7 + $0xa8] sm:$0xff]  ;;  %p5439_p10 = pnand %p5438_p13, %p5432_p12 }
  0x96   : > { %645 = vmatpush2.msra.mxu0 %v595_v41  ;;  %4808 = vmatprep.mubr.f32.mxu1 %v5810_v42  ;;  %v941_v8 = vld [vmem:[#allocation7 + $0x1b0] sm:$0xff]  ;;  %v584_v9 = vld [vmem:[#allocation7 + $0xa0] sm:$0xff]  ;;  %v940_v10 = vld [vmem:[#allocation7 + $0x1a8] sm:$0xff] }
  0x97   : > { %983 = vmatprep.subr.mxu1 %v7255_v0  ;;  %646 = vmatprep.subr.mxu0 %v7255_v0  ;;  %v583_v11 = vld [vmem:[#allocation7 + $0x98] sm:$0xff]  ;;  %v939_v12 = vld [vmem:[#allocation7 + $0x1a0] sm:$0xff]  ;;  %v582_v13 = vld [vmem:[#allocation7 + $0x90] sm:$0xff] }
  0x98   : > { %4809 = vmatmul.mubr.f32.vlgmr.msra.gmra.mxu1 %v5817_v44  ;;  %647 = vmatpush2.msra.mxu0 %v594_v45  ;;  %v938_v14 = vld [vmem:[#allocation7 + $0x198] sm:$0xff]  ;;  %v5874_v16 = vld [vmem:[#allocation2 + $0x22] sm:$0xff]  ;;  %v937_v17 = vld [vmem:[#allocation7 + $0x190] sm:$0xff] }
  0x99   : > { %984 = vmatpush1.msra.mxu1 %v950_v47  ;;  %648 = vmatprep.subr.mxu0 %v7255_v0  ;;  %v581_v18 = vld [vmem:[#allocation7 + $0x88] sm:$0xff]  ;;  %v5878_v19 = vld [vmem:[#allocation2 + $0x32] sm:$0xff]  ;;  %v580_v21 = vld [vmem:[#allocation7 + $0x80] sm:$0xff] }
  0x9a   : > { %985 = vmatprep.subr.mxu1 %v7255_v0  ;;  %649 = vmatpush2.msra.mxu0 %v593_v49  ;;  %v936_v20 = vld [vmem:[#allocation7 + $0x188] sm:$0xff]  ;;  %v5886_v23 = vld [vmem:[#allocation2] sm:$0xff]  ;;  %v982_v28 = vld [vmem:[#allocation7 + $0x2f8] sm:$0xff] }
  0x9b   : > { %986 = vmatpush1.msra.mxu1 %v949_v50  ;;  %650 = vmatprep.subr.mxu0 %v7255_v0  ;;  %v5882_v22 = vld [vmem:[#allocation2 + $0x1] sm:$0xff]  ;;  %v5892_v29 = vld [vmem:[#allocation2 + $0x52] sm:$0xff] }
  0x9c   : > { %987 = vmatprep.subr.mxu1 %v7255_v0  ;;  %651 = vmatpush2.msra.mxu0 %v592_v52  ;;  %v5889_v24 = vld [vmem:[#allocation2 + $0x42] sm:$0xff]  ;;  %v966_v31 = vld [vmem:[#allocation7 + $0x278] sm:$0xff]  ;;  %v5898_v32 = vld [vmem:[#allocation2 + $0x10] sm:$0xff] }
  0x9d   : > { %988 = vmatpush1.msra.mxu1 %v948_v54  ;;  %652 = vmatprep.subr.mxu0 %v7255_v0  ;;  %v935_v25 = vld [vmem:[#allocation7 + $0x180] sm:$0xff]  ;;  %v965_v36 = vld [vmem:[#allocation7 + $0x270] sm:$0xff]  ;;  %v964_v41 = vld [vmem:[#allocation7 + $0x268] sm:$0xff] }
  0x9e   : > { %989 = vmatprep.subr.mxu1 %v7255_v0  ;;  %653 = vmatpush2.msra.mxu0 %v591_v56  ;;  %v5901_v35 = vld [vmem:[#allocation2 + $0x62] sm:$0xff]  ;;  %v5904_v39 = vld [vmem:[#allocation2 + $0x72] sm:$0xff] }
  0x9f   : > { %990 = vmatpush1.msra.mxu1 %v947_v58  ;;  %654 = vmatprep.subr.mxu0 %v7255_v0  ;;  %v981_v40 = vld [vmem:[#allocation7 + $0x2f0] sm:$0xff]  ;;  %v5911_v45 = vld [vmem:[#allocation2 + $0x20] sm:$0xff]  ;;  %v962_v52 = vld [vmem:[#allocation7 + $0x258] sm:$0xff] }
  0xa0   : > { %991 = vmatprep.subr.mxu1 %v7255_v0  ;;  %655 = vmatpush2.msra.mxu0 %v590_v60  ;;  %v5913_v47 = vld [vmem:[#allocation2 + $0x82] sm:$0xff]  ;;  %v5916_v50 = vld [vmem:[#allocation2 + $0x92] sm:$0xff] }
  0xa1   : > { %992 = vmatpush1.msra.mxu1 %v946_v61  ;;  %656 = vmatprep.subr.mxu0 %v7255_v0  ;;  %v963_v49 = vld [vmem:[#allocation7 + $0x260] sm:$0xff]  ;;  %v980_v54 = vld [vmem:[#allocation7 + $0x2e8] sm:$0xff]  ;;  %v5925_v58 = vld [vmem:[#allocation2 + $0x30] sm:$0xff] }
  0xa2   : > { %993 = vmatprep.subr.mxu1 %v7255_v0  ;;  %657 = vmatpush2.msra.mxu0 %v589_v62  ;;  %v5923_v56 = vld [vmem:[#allocation2 + $0xa2] sm:$0xff]  ;;  %v961_v60 = vld [vmem:[#allocation7 + $0x250] sm:$0xff] }
  0xa3   : > { %994 = vmatpush1.msra.mxu1 %v945_v63  ;;  %658 = vmatprep.subr.mxu0 %v7255_v0  ;;  %v5929_v61 = vld [vmem:[#allocation2 + $0xb2] sm:$0xff]  ;;  %v960_v62 = vld [vmem:[#allocation7 + $0x248] sm:$0xff]  ;;  %v979_v63 = vld [vmem:[#allocation7 + $0x2e0] sm:$0xff] }
  0xa4   : > { %995 = vmatprep.subr.mxu1 %v7255_v0  ;;  %659 = vmatpush2.msra.mxu0 %v588_v1  ;;  %v5935_v1 = vld [vmem:[#allocation2 + $0x40] sm:$0xff] }
  0xa5   : > { %996 = vmatpush1.msra.mxu1 %v944_v2  ;;  %660 = vmatprep.subr.mxu0 %v7255_v0  ;;  %v5937_v2 = vld [vmem:[#allocation2 + $0xc2] sm:$0xff] }
  0xa6   : > { %997 = vmatprep.subr.mxu1 %v7255_v0  ;;  %661 = vmatpush2.msra.mxu0 %v587_v3  ;;  %v959_v3 = vld [vmem:[#allocation7 + $0x240] sm:$0xff] }
  0xa7   : > { %998 = vmatpush1.msra.mxu1 %v943_v4  ;;  %662 = vmatprep.subr.mxu0 %v7255_v0  ;;  %v5941_v4 = vld [vmem:[#allocation2 + $0xd2] sm:$0xff] }
  0xa8   : > { %999 = vmatprep.subr.mxu1 %v7255_v0  ;;  %663 = vmatpush2.msra.mxu0 %v586_v5  ;;  %v958_v5 = vld [vmem:[#allocation7 + $0x238] sm:$0xff] }
  0xa9   : > { %1000 = vmatpush1.msra.mxu1 %v942_v6  ;;  %664 = vmatprep.subr.mxu0 %v7255_v0  ;;  %v5945_v6 = vld [vmem:[#allocation2 + $0x50] sm:$0xff] }
  0xaa   : > { %1001 = vmatprep.subr.mxu1 %v7255_v0  ;;  %665 = vmatpush2.msra.mxu0 %v585_v7  ;;  %v5949_v7 = vld [vmem:[#allocation2 + $0xe2] sm:$0xff] }
  0xab   : > { %1002 = vmatpush1.msra.mxu1 %v941_v8  ;;  %666 = vmatprep.subr.mxu0 %v7255_v0  ;;  %v957_v8 = vld [vmem:[#allocation7 + $0x230] sm:$0xff] }
  0xac   : > { %1003 = vmatprep.subr.mxu1 %v7255_v0  ;;  %667 = vmatpush2.msra.mxu0 %v584_v9  ;;  %v978_v9 = vld [vmem:[#allocation7 + $0x2d8] sm:$0xff] }
  0xad   : > { %1004 = vmatpush1.msra.mxu1 %v940_v10  ;;  %668 = vmatprep.subr.mxu0 %v7255_v0  ;;  %v5952_v10 = vld [vmem:[#allocation2 + $0xf2] sm:$0xff] }
  0xae   : > { %1005 = vmatprep.subr.mxu1 %v7255_v0  ;;  %669 = vmatpush2.msra.mxu0 %v583_v11  ;;  %v956_v11 = vld [vmem:[#allocation7 + $0x228] sm:$0xff] }
  0xaf   : > { %1006 = vmatpush1.msra.mxu1 %v939_v12  ;;  %670 = vmatprep.subr.mxu0 %v7255_v0  ;;  %v5958_v12 = vld [vmem:[#allocation2 + $0x60] sm:$0xff] }
  0xb0   : > { %1007 = vmatprep.subr.mxu1 %v7255_v0  ;;  %671 = vmatpush2.msra.mxu0 %v582_v13  ;;  %v5961_v13 = vld [vmem:[#allocation2 + $0x102] sm:$0xff] }
  0xb1   : > { %1008 = vmatpush1.msra.mxu1 %v938_v14  ;;  %672 = vmatprep.subr.mxu0 %v7255_v0  ;;  %v955_v14 = vld [vmem:[#allocation7 + $0x220] sm:$0xff] }
  0xb2   : > { %1009 = vmatprep.subr.mxu1 %v7255_v0  ;;  %4811 = vmatprep.mubr.f32.mxu1 %v5874_v16 }
  0xb3   : > { %1010 = vmatpush1.msra.mxu1 %v937_v17  ;;  %673 = vmatpush2.msra.mxu0 %v581_v18  ;;  %v5964_v17 = vld [vmem:[#allocation2 + $0x112] sm:$0xff] }
  0xb4   : > { %4812 = vmatmul.mubr.f32.gmra.mxu1 %v5878_v19  ;;  %1011 = vmatprep.subr.mxu1 %v7255_v0  ;;  %v977_v18 = vld [vmem:[#allocation7 + $0x2d0] sm:$0xff] }
  0xb5   : > { %674 = vmatprep.subr.mxu0 %v7255_v0  ;;  %1012 = vmatpush1.msra.mxu1 %v936_v20  ;;  %v954_v20 = vld [vmem:[#allocation7 + $0x218] sm:$0xff] }
  0xb6   : > { %675 = vmatpush2.msra.mxu0 %v580_v21  ;;  %676 = vmatprep.mubr.f32.mxu0 %v5882_v22  ;;  %v5971_v21 = vld [vmem:[#allocation2 + $0x70] sm:$0xff] }
  0xb7   : > { %1013 = vmatprep.subr.mxu1 %v7255_v0  ;;  %677 = vmatmul.mubr.f32.vlgmr.msra.gmra.mxu0 %v5886_v23 }
  0xb8   : > { %4814 = vmatprep.mubr.f32.mxu1 %v5889_v24  ;;  %1014 = vmatpush1.msra.mxu1 %v935_v25  ;;  %v5973_v25 = vld [vmem:[#allocation2 + $0x122] sm:$0xff] }
  0xb9   : > { %4838 = vmatprep.subr.mxu0 %v982_v28  ;;  %4815 = vmatmul.mubr.f32.gmra.mxu1 %v5892_v29 }
  0xba   : > { %1015 = vmatprep.subr.mxu1 %v7255_v0  ;;  %4839 = vmatpush3.msra.mxu0 %v982_v28  ;;  %v953_v28 = vld [vmem:[#allocation7 + $0x210] sm:$0xff] }
  0xbb   : > { %1016 = vmatpush2.msra.mxu1 %v966_v31  ;;  %681 = vmatprep.mubr.f32.mxu0 %v5769_v15  ;;  %v5976_v31 = vld [vmem:[#allocation2 + $0x132] sm:$0xff] }
  0xbc   : > { %1017 = vmatprep.subr.mxu1 %v7255_v0  ;;  %682 = vmatmul.mubr.f32.gmra.mxu0 %v5898_v32 }
  0xbd   : > { %4817 = vmatprep.mubr.f32.mxu1 %v5901_v35  ;;  %1018 = vmatpush2.msra.mxu1 %v965_v36  ;;  %v952_v36 = vld [vmem:[#allocation7 + $0x208] sm:$0xff] }
  0xbe   : > { %4818 = vmatmul.mubr.f32.gmra.mxu1 %v5904_v39  ;;  %1019 = vmatprep.subr.mxu1 %v7255_v0 }
  0xbf   : > { %4840 = vmatprep.subr.mxu0 %v981_v40  ;;  %1020 = vmatpush2.msra.mxu1 %v964_v41  ;;  %v951_v41 = vld [vmem:[#allocation7 + $0x200] sm:$0xff] }
  0xc0   : > { %4841 = vmatpush3.msra.mxu0 %v981_v40  ;;  %686 = vmatprep.mubr.f32.mxu0 %v5778_v26  ;;  %v976_v40 = vld [vmem:[#allocation7 + $0x2c8] sm:$0xff] }
  0xc1   : > { %1021 = vmatprep.subr.mxu1 %v7255_v0  ;;  %687 = vmatmul.mubr.f32.gmra.mxu0 %v5911_v45 }
  0xc2   : > { %4820 = vmatprep.mubr.f32.mxu1 %v5913_v47  ;;  %1022 = vmatpush2.msra.mxu1 %v963_v49  ;;  %v5983_v49 = vld [vmem:[#allocation2 + $0x80] sm:$0xff] }
  0xc3   : > { %4821 = vmatmul.mubr.f32.gmra.mxu1 %v5916_v50  ;;  %1023 = vmatprep.subr.mxu1 %v7255_v0 }
  0xc4   : > { %1024 = vmatpush2.msra.mxu1 %v962_v52  ;;  %4842 = vmatprep.subr.mxu0 %v980_v54  ;;  %v5987_v52 = vld [vmem:[#allocation2 + $0x91] sm:$0xff] }
  0xc5   : > { %691 = vmatprep.mubr.f32.mxu0 %v5782_v27  ;;  %1025 = vmatprep.subr.mxu1 %v7255_v0 }
  0xc6   : > { %4843 = vmatpush3.msra.mxu0 %v980_v54  ;;  %4823 = vmatprep.mubr.f32.mxu1 %v5923_v56  ;;  %v975_v54 = vld [vmem:[#allocation7 + $0x2c0] sm:$0xff] }
  0xc7   : > { %692 = vmatmul.mubr.f32.gmra.mxu0 %v5925_v58  ;;  %1026 = vmatpush2.msra.mxu1 %v961_v60  ;;  %v5993_v60 = vld [vmem:[#allocation2 + $0x90] sm:$0xff] }
  0xc8   : > { %4824 = vmatmul.mubr.f32.gmra.mxu1 %v5929_v61  ;;  %1027 = vmatprep.subr.mxu1 %v7255_v0 }
  0xc9   : > { %1028 = vmatpush2.msra.mxu1 %v960_v62  ;;  %696 = vmatprep.mubr.f32.mxu0 %v5787_v30  ;;  %v1337_v62 = vld [vmem:[#allocation7 + $0x378] sm:$0xff] }
  0xca   : > { %1029 = vmatprep.subr.mxu1 %v7255_v0  ;;  %4844 = vmatprep.subr.mxu0 %v979_v63 }
  0xcb   : > { %697 = vmatmul.mubr.f32.gmra.mxu0 %v5935_v1  ;;  %4826 = vmatprep.mubr.f32.mxu1 %v5937_v2 }
  0xcc   : > { %1030 = vmatpush2.msra.mxu1 %v959_v3  ;;  %4845 = vmatpush3.msra.mxu0 %v979_v63  ;;  %v5997_v63 = vld [vmem:[#allocation2 + $0xa1] sm:$0xff]  ;;  %v1336_v3 = vld [vmem:[#allocation7 + $0x370] sm:$0xff] }
  0xcd   : > { %4827 = vmatmul.mubr.f32.gmra.mxu1 %v5941_v4  ;;  %1031 = vmatprep.subr.mxu1 %v7255_v0 }
  0xce   : > { %1032 = vmatpush2.msra.mxu1 %v958_v5  ;;  %701 = vmatprep.mubr.f32.mxu0 %v5792_v33  ;;  %v974_v5 = vld [vmem:[#allocation7 + $0x2b8] sm:$0xff] }
  0xcf   : > { %1033 = vmatprep.subr.mxu1 %v7255_v0  ;;  %702 = vmatmul.mubr.f32.gmra.mxu0 %v5945_v6 }
  0xd0   : > { %4829 = vmatprep.mubr.f32.mxu1 %v5949_v7  ;;  %1034 = vmatpush2.msra.mxu1 %v957_v8  ;;  %v6002_v8 = vld [vmem:[#allocation2 + $0xa0] sm:$0xff] }
  0xd1   : > { %4846 = vmatprep.subr.mxu0 %v978_v9  ;;  %4830 = vmatmul.mubr.f32.gmra.mxu1 %v5952_v10 }
  0xd2   : > { %1035 = vmatprep.subr.mxu1 %v7255_v0  ;;  %4847 = vmatpush3.msra.mxu0 %v978_v9  ;;  %v6009_v9 = vld [vmem:[#allocation2 + $0xb0] sm:$0xff] }
  0xd3   : > { %1036 = vmatpush2.msra.mxu1 %v956_v11  ;;  %706 = vmatprep.mubr.f32.mxu0 %v5796_v34  ;;  %v1334_v11 = vld [vmem:[#allocation7 + $0x360] sm:$0xff] }
  0xd4   : > { %1037 = vmatprep.subr.mxu1 %v7255_v0  ;;  %707 = vmatmul.mubr.f32.gmra.mxu0 %v5958_v12 }
  0xd5   : > { %4832 = vmatprep.mubr.f32.mxu1 %v5961_v13  ;;  %1038 = vmatpush2.msra.mxu1 %v955_v14  ;;  %v973_v14 = vld [vmem:[#allocation7 + $0x2b0] sm:$0xff] }
  0xd6   : > { %4833 = vmatmul.mubr.f32.gmra.mxu1 %v5964_v17  ;;  %1039 = vmatprep.subr.mxu1 %v7255_v0 }
  0xd7   : > { %4848 = vmatprep.subr.mxu0 %v977_v18  ;;  %1040 = vmatpush2.msra.mxu1 %v954_v20  ;;  %v1332_v20 = vld [vmem:[#allocation7 + $0x350] sm:$0xff] }
  0xd8   : > { %4849 = vmatpush3.msra.mxu0 %v977_v18  ;;  %711 = vmatprep.mubr.f32.mxu0 %v5801_v37  ;;  %v6016_v18 = vld [vmem:[#allocation2 + $0xc0] sm:$0xff] }
  0xd9   : > { %1041 = vmatprep.subr.mxu1 %v7255_v0  ;;  %712 = vmatmul.mubr.f32.gmra.mxu0 %v5971_v21 }
  0xda   : > { %4835 = vmatprep.mubr.f32.mxu1 %v5973_v25  ;;  %1042 = vmatpush2.msra.mxu1 %v953_v28  ;;  %v972_v28 = vld [vmem:[#allocation7 + $0x2a8] sm:$0xff] }
  0xdb   : > { %4836 = vmatmul.mubr.f32.gmra.mxu1 %v5976_v31  ;;  %1043 = vmatprep.subr.mxu1 %v7255_v0 }
  0xdc   : > { %1044 = vmatpush2.msra.mxu1 %v952_v36  ;;  %4850 = vmatprep.subr.mxu0 %v976_v40  ;;  %v6024_v36 = vld [vmem:[#allocation2 + $0xd0] sm:$0xff] }
  0xdd   : > { %716 = vmatprep.mubr.f32.mxu0 %v5805_v38  ;;  %1045 = vmatprep.subr.mxu1 %v7255_v0 }
  0xde   : > { %4851 = vmatpush3.msra.mxu0 %v976_v40  ;;  %1046 = vmatpush2.msra.mxu1 %v951_v41  ;;  %v1330_v40 = vld [vmem:[#allocation7 + $0x340] sm:$0xff] }
  0xdf   : > { %717 = vmatmul.mubr.f32.gmra.mxu0 %v5983_v49  ;;  %1047 = vmatprep.mubr.f32.mxu1 %v5882_v22  ;;  %v6032_v41 = vld [vmem:[#allocation2 + $0xe0] sm:$0xff] }
  0xe0   : > { %1048 = vmatmul.mubr.f32.vlgmr.msra.gmra.mxu1 %v5886_v23  ;;  %720 = vmatprep.mubr.f32.mxu0 %v5987_v52 }
  0xe1   : > { %4852 = vmatprep.subr.mxu0 %v975_v54  ;;  %1370 = vmatprep.subr.mxu1 %v7255_v0 }
  0xe2   : > { %1051 = vmatprep.mubr.f32.mxu1 %v5769_v15  ;;  %4853 = vmatpush3.msra.mxu0 %v975_v54  ;;  %v1335_v15 = vld [vmem:[#allocation7 + $0x368] sm:$0xff]  ;;  %v1329_v54 = vld [vmem:[#allocation7 + $0x338] sm:$0xff] }
  0xe3   : > { %721 = vmatmul.mubr.f32.gmra.mxu0 %v5993_v60  ;;  %1371 = vmatpush1.msra.mxu1 %v1337_v62  ;;  %v1328_v62 = vld [vmem:[#allocation7 + $0x330] sm:$0xff] }
  0xe4   : > { %1052 = vmatmul.mubr.f32.gmra.mxu1 %v5898_v32  ;;  %1372 = vmatprep.subr.mxu1 %v7255_v0 }
  0xe5   : > { %724 = vmatprep.mubr.f32.mxu0 %v5997_v63  ;;  %1373 = vmatpush1.msra.mxu1 %v1336_v3  ;;  %v970_v3 = vld [vmem:[#allocation7 + $0x298] sm:$0xff] }
  0xe6   : > { %1056 = vmatprep.mubr.f32.mxu1 %v5778_v26  ;;  %4854 = vmatprep.subr.mxu0 %v974_v5  ;;  %v1333_v26 = vld [vmem:[#allocation7 + $0x358] sm:$0xff] }
  0xe7   : > { %725 = vmatmul.mubr.f32.gmra.mxu0 %v6002_v8  ;;  %1374 = vmatprep.subr.mxu1 %v7255_v0 }
  0xe8   : > { %1057 = vmatmul.mubr.f32.gmra.mxu1 %v5911_v45  ;;  %4855 = vmatpush3.msra.mxu0 %v974_v5  ;;  %v1327_v5 = vld [vmem:[#allocation7 + $0x328] sm:$0xff] }
  0xe9   : > { %1375 = vmatpush1.msra.mxu1 %v1335_v15  ;;  %729 = vmatprep.mubr.f32.mxu0 %v5813_v43  ;;  %v1326_v15 = vld [vmem:[#allocation7 + $0x320] sm:$0xff] }
  0xea   : > { %1376 = vmatprep.subr.mxu1 %v7255_v0  ;;  %1061 = vmatprep.mubr.f32.mxu1 %v5782_v27  ;;  %v1331_v27 = vld [vmem:[#allocation7 + $0x348] sm:$0xff] }
  0xeb   : > { %730 = vmatmul.mubr.f32.gmra.mxu0 %v6009_v9  ;;  %1377 = vmatpush1.msra.mxu1 %v1334_v11  ;;  %v969_v11 = vld [vmem:[#allocation7 + $0x290] sm:$0xff] }
  0xec   : > { %1062 = vmatmul.mubr.f32.gmra.mxu1 %v5925_v58  ;;  %4856 = vmatprep.subr.mxu0 %v973_v14 }
  0xed   : > { %1378 = vmatprep.subr.mxu1 %v7255_v0  ;;  %4857 = vmatpush3.msra.mxu0 %v973_v14  ;;  %v6054_v14 = vld [vmem:[#allocation2 + $0x110] sm:$0xff] }
  0xee   : > { %1379 = vmatpush1.msra.mxu1 %v1333_v26  ;;  %734 = vmatprep.mubr.f32.mxu0 %v5820_v46  ;;  %v1324_v26 = vld [vmem:[#allocation7 + $0x310] sm:$0xff] }
  0xef   : > { %735 = vmatmul.mubr.f32.gmra.mxu0 %v6016_v18  ;;  %1066 = vmatprep.mubr.f32.mxu1 %v5787_v30  ;;  %v971_v30 = vld [vmem:[#allocation7 + $0x2a0] sm:$0xff] }
  0xf0   : > { %1380 = vmatprep.subr.mxu1 %v7255_v0  ;;  %1067 = vmatmul.mubr.f32.gmra.mxu1 %v5935_v1 }
  0xf1   : > { %1381 = vmatpush1.msra.mxu1 %v1332_v20  ;;  %4858 = vmatprep.subr.mxu0 %v972_v28  ;;  %v968_v20 = vld [vmem:[#allocation7 + $0x288] sm:$0xff] }
  0xf2   : > { %1382 = vmatprep.subr.mxu1 %v7255_v0  ;;  %739 = vmatprep.mubr.f32.mxu0 %v5825_v48 }
  0xf3   : > { %4859 = vmatpush3.msra.mxu0 %v972_v28  ;;  %1383 = vmatpush1.msra.mxu1 %v1331_v27  ;;  %v6062_v28 = vld [vmem:[#allocation2 + $0x120] sm:$0xff] }
  0xf4   : > { %740 = vmatmul.mubr.f32.gmra.mxu0 %v6024_v36  ;;  %1071 = vmatprep.mubr.f32.mxu1 %v5792_v33  ;;  %v6038_v33 = vld [vmem:[#allocation2 + $0xf0] sm:$0xff]  ;;  %v1322_v27 = vld [vmem:[#allocation7 + $0x300] sm:$0xff] }
  0xf5   : > { %1072 = vmatmul.mubr.f32.gmra.mxu1 %v5945_v6  ;;  %1384 = vmatprep.subr.mxu1 %v7255_v0 }
  0xf6   : > { %1385 = vmatpush1.msra.mxu1 %v1330_v40  ;;  %744 = vmatprep.mubr.f32.mxu0 %v5832_v51  ;;  %v6066_v40 = vld [vmem:[#allocation2 + $0x131] sm:$0xff] }
  0xf7   : > { %4860 = vmatprep.subr.mxu0 %v971_v30  ;;  %1386 = vmatprep.subr.mxu1 %v7255_v0 }
  0xf8   : > { %745 = vmatmul.mubr.f32.gmra.mxu0 %v6032_v41  ;;  %1076 = vmatprep.mubr.f32.mxu1 %v5796_v34  ;;  %v6046_v34 = vld [vmem:[#allocation2 + $0x100] sm:$0xff] }
  0xf9   : > { %4861 = vmatpush3.msra.mxu0 %v971_v30  ;;  %1387 = vmatpush1.msra.mxu1 %v1329_v54  ;;  %v967_v30 = vld [vmem:[#allocation7 + $0x280] sm:$0xff]  ;;  %v6072_v54 = vld [vmem:[#allocation2 + $0x130] sm:$0xff] }
  0xfa   : > { %1077 = vmatmul.mubr.f32.gmra.mxu1 %v5958_v12  ;;  %1388 = vmatprep.subr.mxu1 %v7255_v0 }
  0xfb   : > { %749 = vmatprep.mubr.f32.mxu0 %v5837_v53  ;;  %1389 = vmatpush1.msra.mxu1 %v1328_v62  ;;  %v1353_v62 = vld [vmem:[#allocation7 + $0x3f8] sm:$0xff] }
  0xfc   : > { %750 = vmatmul.mubr.f32.gmra.mxu0 %v6038_v33  ;;  %1081 = vmatprep.mubr.f32.mxu1 %v5801_v37  ;;  %v1325_v37 = vld [vmem:[#allocation7 + $0x318] sm:$0xff] }
  0xfd   : > { %4862 = vmatprep.subr.mxu0 %v970_v3  ;;  %1390 = vmatprep.subr.mxu1 %v7255_v0 }
  0xfe   : > { %1082 = vmatmul.mubr.f32.gmra.mxu1 %v5971_v21  ;;  %4863 = vmatpush3.msra.mxu0 %v970_v3  ;;  %v1352_v3 = vld [vmem:[#allocation7 + $0x3f0] sm:$0xff] }
  0xff   : > { %1391 = vmatpush1.msra.mxu1 %v1327_v5  ;;  %754 = vmatprep.mubr.f32.mxu0 %v5842_v55  ;;  %v1369_v5 = vld [vmem:[#allocation7 + $0x478] sm:$0xff] }
 0x100   : > { %1392 = vmatprep.subr.mxu1 %v7255_v0  ;;  %755 = vmatmul.mubr.f32.gmra.mxu0 %v6046_v34 }
 0x101   : > { %1086 = vmatprep.mubr.f32.mxu1 %v5805_v38  ;;  %1393 = vmatpush1.msra.mxu1 %v1326_v15  ;;  %v1323_v38 = vld [vmem:[#allocation7 + $0x308] sm:$0xff] }
 0x102   : > { %1087 = vmatmul.mubr.f32.gmra.mxu1 %v5983_v49  ;;  %4864 = vmatprep.subr.mxu0 %v969_v11  ;;  %v1351_v15 = vld [vmem:[#allocation7 + $0x3e8] sm:$0xff] }
 0x103   : > { %1394 = vmatprep.subr.mxu1 %v7255_v0  ;;  %4865 = vmatpush3.msra.mxu0 %v969_v11  ;;  %v1350_v11 = vld [vmem:[#allocation7 + $0x3e0] sm:$0xff] }
 0x104   : > { %1395 = vmatpush1.msra.mxu1 %v1325_v37  ;;  %759 = vmatprep.mubr.f32.mxu0 %v5847_v57  ;;  %v1365_v37 = vld [vmem:[#allocation7 + $0x458] sm:$0xff] }
 0x105   : > { %760 = vmatmul.mubr.f32.gmra.mxu0 %v6054_v14  ;;  %1091 = vmatprep.mubr.f32.mxu1 %v5987_v52 }
 0x106   : > { %1396 = vmatprep.subr.mxu1 %v7255_v0  ;;  %1092 = vmatmul.mubr.f32.gmra.mxu1 %v5993_v60 }
 0x107   : > { %1397 = vmatpush1.msra.mxu1 %v1324_v26  ;;  %4866 = vmatprep.subr.mxu0 %v968_v20  ;;  %v1347_v26 = vld [vmem:[#allocation7 + $0x3c8] sm:$0xff] }
 0x108   : > { %1398 = vmatprep.subr.mxu1 %v7255_v0  ;;  %764 = vmatprep.mubr.f32.mxu0 %v5852_v59 }
 0x109   : > { %4867 = vmatpush3.msra.mxu0 %v968_v20  ;;  %1399 = vmatpush1.msra.mxu1 %v1323_v38  ;;  %v1346_v20 = vld [vmem:[#allocation7 + $0x3c0] sm:$0xff]  ;;  %v1363_v38 = vld [vmem:[#allocation7 + $0x448] sm:$0xff] }
 0x10a   : > { %765 = vmatmul.mubr.f32.gmra.mxu0 %v6062_v28  ;;  %1095 = vmatprep.mubr.f32.mxu1 %v5997_v63 }
 0x10b   : > { %1096 = vmatmul.mubr.f32.gmra.mxu1 %v6002_v8  ;;  %1400 = vmatprep.subr.mxu1 %v7255_v0 }
 0x10c   : > { %1401 = vmatpush1.msra.mxu1 %v1322_v27  ;;  %768 = vmatprep.mubr.f32.mxu0 %v6066_v40  ;;  %v1345_v27 = vld [vmem:[#allocation7 + $0x3b8] sm:$0xff] }
 0x10d   : > { %4868 = vmatprep.subr.mxu0 %v967_v30  ;;  %1402 = vmatprep.subr.mxu1 %v7255_v0 }
 0x10e   : > { %769 = vmatmul.mubr.f32.gmra.mxu0 %v6072_v54  ;;  %1099 = vmatprep.mubr.f32.mxu1 %v5813_v43  ;;  %v1368_v43 = vld [vmem:[#allocation7 + $0x470] sm:$0xff] }
 0x10f   : > { %4869 = vmatpush3.msra.mxu0 %v967_v30  ;;  %1403 = vmatpush2.msra.mxu1 %v1353_v62  ;;  %v1344_v30 = vld [vmem:[#allocation7 + $0x3b0] sm:$0xff]  ;;  %v1361_v62 = vld [vmem:[#allocation7 + $0x438] sm:$0xff] }
 0x110   : > { %1100 = vmatmul.mubr.f32.gmra.mxu1 %v6009_v9  ;;  %1404 = vmatprep.subr.mxu1 %v7255_v0 }
 0x111   : > { %4870 = vmatprep.mubr.f32.mxu0 %v5810_v42  ;;  %1405 = vmatpush2.msra.mxu1 %v1352_v3  ;;  %v1367_v42 = vld [vmem:[#allocation7 + $0x468] sm:$0xff]  ;;  %v1360_v3 = vld [vmem:[#allocation7 + $0x430] sm:$0xff] }
 0x112   : > { %1104 = vmatprep.mubr.f32.mxu1 %v5820_v46  ;;  %4871 = vmatmul.mubr.f32.vlgmr.msra.gmra.mxu0 %v5817_v44  ;;  %v1349_v44 = vld [vmem:[#allocation7 + $0x3d8] sm:$0xff]  ;;  %v1366_v46 = vld [vmem:[#allocation7 + $0x460] sm:$0xff] }
 0x113   : > { %1406 = vmatprep.subr.mxu1 %v7255_v0  ;;  %4900 = vmatprep.subr.mxu0 %v1369_v5 }
 0x114   : > { %1105 = vmatmul.mubr.f32.gmra.mxu1 %v6016_v18  ;;  %4901 = vmatpush3.msra.mxu0 %v1369_v5  ;;  %v1342_v5 = vld [vmem:[#allocation7 + $0x3a0] sm:$0xff] }
 0x115   : > { %1407 = vmatpush2.msra.mxu1 %v1351_v15  ;;  %4873 = vmatprep.mubr.f32.mxu0 %v5874_v16  ;;  %v1341_v15 = vld [vmem:[#allocation7 + $0x398] sm:$0xff] }
 0x116   : > { %1408 = vmatprep.subr.mxu1 %v7255_v0  ;;  %4902 = vmatprep.subr.mxu0 %v1368_v43 }
 0x117   : > { %1109 = vmatprep.mubr.f32.mxu1 %v5825_v48  ;;  %4874 = vmatmul.mubr.f32.gmra.mxu0 %v5878_v19  ;;  %v1348_v48 = vld [vmem:[#allocation7 + $0x3d0] sm:$0xff] }
 0x118   : > { %1409 = vmatpush2.msra.mxu1 %v1350_v11  ;;  %4903 = vmatpush3.msra.mxu0 %v1368_v43  ;;  %v1340_v43 = vld [vmem:[#allocation7 + $0x390] sm:$0xff]  ;;  %v1358_v11 = vld [vmem:[#allocation7 + $0x420] sm:$0xff] }
 0x119   : > { %1110 = vmatmul.mubr.f32.gmra.mxu1 %v6024_v36  ;;  %1410 = vmatprep.subr.mxu1 %v7255_v0 }
 0x11a   : > { %4904 = vmatprep.subr.mxu0 %v1367_v42  ;;  %1411 = vmatpush2.msra.mxu1 %v1349_v44  ;;  %v1338_v44 = vld [vmem:[#allocation7 + $0x380] sm:$0xff] }
 0x11b   : > { %4905 = vmatpush3.msra.mxu0 %v1367_v42  ;;  %4876 = vmatprep.mubr.f32.mxu0 %v5889_v24  ;;  %v1357_v42 = vld [vmem:[#allocation7 + $0x418] sm:$0xff] }
 0x11c   : > { %1114 = vmatprep.mubr.f32.mxu1 %v5832_v51  ;;  %4877 = vmatmul.mubr.f32.gmra.mxu0 %v5892_v29  ;;  %v1364_v51 = vld [vmem:[#allocation7 + $0x450] sm:$0xff] }
 0x11d   : > { %1412 = vmatprep.subr.mxu1 %v7255_v0  ;;  %4906 = vmatprep.subr.mxu0 %v1366_v46 }
 0x11e   : > { %1115 = vmatmul.mubr.f32.gmra.mxu1 %v6032_v41  ;;  %4907 = vmatpush3.msra.mxu0 %v1366_v46  ;;  %v1356_v46 = vld [vmem:[#allocation7 + $0x410] sm:$0xff] }
 0x11f   : > { %1413 = vmatpush2.msra.mxu1 %v1348_v48  ;;  %4908 = vmatprep.subr.mxu0 %v1365_v37  ;;  %v1355_v48 = vld [vmem:[#allocation7 + $0x408] sm:$0xff] }
 0x120   : > { %1414 = vmatprep.subr.mxu1 %v7255_v0  ;;  %4879 = vmatprep.mubr.f32.mxu0 %v5901_v35 }
 0x121   : > { %1415 = vmatpush2.msra.mxu1 %v1347_v26  ;;  %4909 = vmatpush3.msra.mxu0 %v1365_v37  ;;  %v5275_v37 = vld [vmem:[#allocation2 + $0x11] sm:$0xff]  ;;  %v1354_v26 = vld [vmem:[#allocation7 + $0x400] sm:$0xff] }
 0x122   : > { %1119 = vmatprep.mubr.f32.mxu1 %v5837_v53  ;;  %4880 = vmatmul.mubr.f32.gmra.mxu0 %v5904_v39  ;;  %v1362_v53 = vld [vmem:[#allocation7 + $0x440] sm:$0xff] }
 0x123   : > { %1120 = vmatmul.mubr.f32.gmra.mxu1 %v6038_v33  ;;  %1416 = vmatprep.subr.mxu1 %v7255_v0 }
 0x124   : > { %4910 = vmatprep.subr.mxu0 %v1364_v51  ;;  %1417 = vmatpush2.msra.mxu1 %v1346_v20  ;;  %v5279_v20 = vld [vmem:[#allocation2 + $0x31] sm:$0xff] }
 0x125   : > { %4911 = vmatpush3.msra.mxu0 %v1364_v51  ;;  %4882 = vmatprep.mubr.f32.mxu0 %v5913_v47  ;;  %v5276_v51 = vld [vmem:[#allocation2 + $0x2] sm:$0xff] }
 0x126   : > { %1418 = vmatprep.subr.mxu1 %v7255_v0  ;;  %4912 = vmatprep.subr.mxu0 %v1363_v38 }
 0x127   : > { %1124 = vmatprep.mubr.f32.mxu1 %v5842_v55  ;;  %4883 = vmatmul.mubr.f32.gmra.mxu0 %v5916_v50  ;;  %v1343_v55 = vld [vmem:[#allocation7 + $0x3a8] sm:$0xff] }
 0x128   : > { %1419 = vmatpush2.msra.mxu1 %v1345_v27  ;;  %4913 = vmatpush3.msra.mxu0 %v1363_v38  ;;  %v1991_v38 = vld [vmem:[#allocation7 + $0x5f8] sm:$0xff]  ;;  %v1990_v27 = vld [vmem:[#allocation7 + $0x5f0] sm:$0xff] }
 0x129   : > { %1125 = vmatmul.mubr.f32.gmra.mxu1 %v6046_v34  ;;  %1420 = vmatprep.subr.mxu1 %v7255_v0 }
 0x12a   : > { %4914 = vmatprep.subr.mxu0 %v1362_v53  ;;  %4885 = vmatprep.mubr.f32.mxu0 %v5923_v56 }
 0x12b   : > { %1421 = vmatpush2.msra.mxu1 %v1344_v30  ;;  %4915 = vmatpush3.msra.mxu0 %v1362_v53  ;;  %v1945_v53 = vld [vmem:[#allocation7 + $0x488] sm:$0xff] }
 0x12c   : > { %1129 = vmatprep.mubr.f32.mxu1 %v5847_v57  ;;  %4886 = vmatmul.mubr.f32.gmra.mxu0 %v5929_v61  ;;  %v1359_v57 = vld [vmem:[#allocation7 + $0x428] sm:$0xff] }
 0x12d   : > { %1422 = vmatprep.subr.mxu1 %v7255_v0  ;;  %4916 = vmatprep.subr.mxu0 %v1361_v62 }
 0x12e   : > { %1130 = vmatmul.mubr.f32.gmra.mxu1 %v6054_v14  ;;  %4917 = vmatpush3.msra.mxu0 %v1361_v62 }
 0x12f   : > { %1423 = vmatpush2.msra.mxu1 %v1343_v55  ;;  %4888 = vmatprep.mubr.f32.mxu0 %v5937_v2  ;;  %v1944_v55 = vld [vmem:[#allocation7 + $0x480] sm:$0xff] }
 0x130   : > { %1424 = vmatprep.subr.mxu1 %v7255_v0  ;;  %4918 = vmatprep.subr.mxu0 %v1360_v3 }
 0x131   : > { %1134 = vmatprep.mubr.f32.mxu1 %v5852_v59  ;;  %4889 = vmatmul.mubr.f32.gmra.mxu0 %v5941_v4  ;;  %v1339_v59 = vld [vmem:[#allocation7 + $0x388] sm:$0xff] }
 0x132   : > { %1425 = vmatpush2.msra.mxu1 %v1342_v5  ;;  %4919 = vmatpush3.msra.mxu0 %v1360_v3 }
 0x133   : > { %1135 = vmatmul.mubr.f32.gmra.mxu1 %v6062_v28  ;;  %1426 = vmatprep.subr.mxu1 %v7255_v0 }
 0x134   : > { %4920 = vmatprep.subr.mxu0 %v1359_v57  ;;  %1427 = vmatpush2.msra.mxu1 %v1341_v15 }
 0x135   : > { %4921 = vmatpush3.msra.mxu0 %v1359_v57  ;;  %4891 = vmatprep.mubr.f32.mxu0 %v5949_v7  ;;  %v1975_v57 = vld [vmem:[#allocation7 + $0x578] sm:$0xff] }
 0x136   : > { %1428 = vmatprep.subr.mxu1 %v7255_v0  ;;  %1139 = vmatprep.mubr.f32.mxu1 %v6066_v40 }
 0x137   : > { %4892 = vmatmul.mubr.f32.gmra.mxu0 %v5952_v10  ;;  %1429 = vmatpush2.msra.mxu1 %v1340_v43  ;;  %v1974_v43 = vld [vmem:[#allocation7 + $0x570] sm:$0xff] }
 0x138   : > { %4922 = vmatprep.subr.mxu0 %v1358_v11  ;;  %1140 = vmatmul.mubr.f32.gmra.mxu1 %v6072_v54 }
 0x139   : > { %1430 = vmatprep.subr.mxu1 %v7255_v0  ;;  %4923 = vmatpush3.msra.mxu0 %v1358_v11 }
 0x13a   : > { %1431 = vmatpush2.msra.mxu1 %v1339_v59  ;;  %4924 = vmatprep.subr.mxu0 %v1357_v42  ;;  %v1983_v59 = vld [vmem:[#allocation7 + $0x5b8] sm:$0xff] }
 0x13b   : > { %4894 = vmatprep.mubr.f32.mxu0 %v5961_v13  ;;  %1432 = vmatprep.subr.mxu1 %v7255_v0 }
 0x13c   : > { %4925 = vmatpush3.msra.mxu0 %v1357_v42  ;;  %1433 = vmatpush2.msra.mxu1 %v1338_v44  ;;  %v1973_v44 = vld [vmem:[#allocation7 + $0x568] sm:$0xff] }
 0x13d   : > { %4895 = vmatmul.mubr.f32.gmra.mxu0 %v5964_v17  ;;  %1434 = vmatprep.mubr.f32.mxu1 %v5882_v22  ;;  %v5277_v22 = vld [vmem:[#allocation2 + $0x21] sm:$0xff] }
 0x13e   : > { %1435 = vmatmul.mubr.f32.vlgmr.msra.gmra.mxu1 %v5886_v23  ;;  %4926 = vmatprep.subr.mxu0 %v1356_v46  ;;  %v5278_v23 = vld [vmem:[#allocation2 + $0x12] sm:$0xff] }
 0x13f   : > { %4927 = vmatpush3.msra.mxu0 %v1356_v46  ;;  %4897 = vmatprep.mubr.f32.mxu0 %v5973_v25 }
 0x140   : > { %4928 = vmatprep.subr.mxu0 %v1355_v48  ;;  %1438 = vmatprep.mubr.f32.mxu1 %v5275_v37  ;;  %v1972_v37 = vld [vmem:[#allocation7 + $0x560] sm:$0xff] }
 0x141   : > { %4898 = vmatmul.mubr.f32.gmra.mxu0 %v5976_v31  ;;  %4962 = vmatprep.subr.mxu1 %v1991_v38 }
 0x142   : > { %4929 = vmatpush3.msra.mxu0 %v1355_v48  ;;  %1439 = vmatmul.mubr.f32.gmra.mxu1 %v5898_v32  ;;  %v5280_v32 = vld [vmem:[#allocation2 + $0x41] sm:$0xff]  ;;  %v5291_v48 = vld [vmem:[#allocation2 + $0x111] sm:$0xff] }
 0x143   : > { %4930 = vmatprep.subr.mxu0 %v1354_v26  ;;  %4932 = vmatprep.mubr.f32.mxu0 %v5276_v51 }
 0x144   : > { %4931 = vmatpush3.msra.mxu0 %v1354_v26  ;;  %1442 = vmatprep.mubr.f32.mxu1 %v5277_v22  ;;  %v1971_v22 = vld [vmem:[#allocation7 + $0x558] sm:$0xff] }
 0x145   : > { %4933 = vmatmul.mubr.f32.vlgmr.msra.gmra.mxu0 %v5278_v23  ;;  %1992 = vmatprep.subr.mxu0 %v7255_v0  ;;  %v5292_v23 = vld [vmem:[#allocation2 + $0x121] sm:$0xff] }
 0x146   : > { %1443 = vmatmul.mubr.f32.gmra.mxu1 %v5911_v45  ;;  %4935 = vmatprep.mubr.f32.mxu0 %v5874_v16  ;;  %v1959_v16 = vld [vmem:[#allocation7 + $0x4f8] sm:$0xff] }
 0x147   : > { %1447 = vmatprep.mubr.f32.mxu1 %v5279_v20  ;;  %4963 = vmatpush3.msra.mxu1 %v1991_v38  ;;  %v5281_v45 = vld [vmem:[#allocation2 + $0x51] sm:$0xff] }
 0x148   : > { %4964 = vmatprep.subr.mxu1 %v1990_v27  ;;  %1993 = vmatpush1.msra.mxu0 %v1959_v16  ;;  %v1969_v16 = vld [vmem:[#allocation7 + $0x548] sm:$0xff] }
 0x149   : > { %4936 = vmatmul.mubr.f32.gmra.mxu0 %v5878_v19  ;;  %4965 = vmatpush3.msra.mxu1 %v1990_v27  ;;  %v1958_v19 = vld [vmem:[#allocation7 + $0x4f0] sm:$0xff] }
 0x14a   : > { %1448 = vmatmul.mubr.f32.gmra.mxu1 %v5925_v58  ;;  %4938 = vmatprep.mubr.f32.mxu0 %v5889_v24  ;;  %v5282_v24 = vld [vmem:[#allocation2 + $0x61] sm:$0xff] }
 0x14b   : > { %1452 = vmatprep.mubr.f32.mxu1 %v5280_v32  ;;  %1994 = vmatprep.subr.mxu0 %v7255_v0  ;;  %v5284_v58 = vld [vmem:[#allocation2 + $0x81] sm:$0xff]  ;;  %v1970_v32 = vld [vmem:[#allocation7 + $0x550] sm:$0xff] }
 0x14c   : > { %1995 = vmatpush1.msra.mxu0 %v1958_v19  ;;  %v1968_v19 = vld [vmem:[#allocation7 + $0x540] sm:$0xff] }
 0x14d   : > { %4939 = vmatmul.mubr.f32.gmra.mxu0 %v5892_v29  ;;  %1996 = vmatprep.subr.mxu0 %v7255_v0  ;;  %v1957_v29 = vld [vmem:[#allocation7 + $0x4e8] sm:$0xff] }
 0x14e   : > { %1453 = vmatmul.mubr.f32.gmra.mxu1 %v5935_v1  ;;  %4941 = vmatprep.mubr.f32.mxu0 %v5901_v35  ;;  %v1989_v35 = vld [vmem:[#allocation7 + $0x5e8] sm:$0xff]  ;;  %v1987_v1 = vld [vmem:[#allocation7 + $0x5d8] sm:$0xff] }
 0x14f   : > { %1457 = vmatprep.mubr.f32.mxu1 %v5281_v45  ;;  %1997 = vmatpush1.msra.mxu0 %v1957_v29 }
 0x150   : > { %4966 = vmatprep.subr.mxu1 %v1989_v35  ;;  %1998 = vmatprep.subr.mxu0 %v7255_v0 }
 0x151   : > { %4942 = vmatmul.mubr.f32.gmra.mxu0 %v5904_v39  ;;  %v5283_v39 = vld [vmem:[#allocation2 + $0x71] sm:$0xff]  ;;  %4967 = vmatpush3.msra.mxu1 %v1989_v35 }
 0x152   : > { %1458 = vmatmul.mubr.f32.gmra.mxu1 %v5945_v6  ;;  %4944 = vmatprep.mubr.f32.mxu0 %v5913_v47  ;;  %v1956_v47 = vld [vmem:[#allocation7 + $0x4e0] sm:$0xff] }
 0x153   : > { %1462 = vmatprep.mubr.f32.mxu1 %v5282_v24  ;;  %1999 = vmatpush1.msra.mxu0 %v1956_v47  ;;  %v1952_v6 = vld [vmem:[#allocation7 + $0x4c0] sm:$0xff]  ;;  %v1966_v47 = vld [vmem:[#allocation7 + $0x530] sm:$0xff] }
 0x154   : > { %2000 = vmatprep.subr.mxu0 %v7255_v0 }
 0x155   : > { %4945 = vmatmul.mubr.f32.gmra.mxu0 %v5916_v50  ;;  %v1988_v50 = vld [vmem:[#allocation7 + $0x5e0] sm:$0xff] }
 0x156   : > { %1463 = vmatmul.mubr.f32.gmra.mxu1 %v5958_v12  ;;  %4947 = vmatprep.mubr.f32.mxu0 %v5923_v56  ;;  %v1955_v56 = vld [vmem:[#allocation7 + $0x4d8] sm:$0xff]  ;;  %v5286_v12 = vld [vmem:[#allocation2 + $0xc1] sm:$0xff] }
 0x157   : > { %1467 = vmatprep.mubr.f32.mxu1 %v5283_v39  ;;  %4968 = vmatprep.subr.mxu1 %v1988_v50 }
 0x158   : > { %4969 = vmatpush3.msra.mxu1 %v1988_v50  ;;  %2001 = vmatpush1.msra.mxu0 %v1955_v56  ;;  %v1965_v56 = vld [vmem:[#allocation7 + $0x528] sm:$0xff] }
 0x159   : > { %4948 = vmatmul.mubr.f32.gmra.mxu0 %v5929_v61  ;;  %2002 = vmatprep.subr.mxu0 %v7255_v0  ;;  %v1954_v61 = vld [vmem:[#allocation7 + $0x4d0] sm:$0xff] }
 0x15a   : > { %1468 = vmatmul.mubr.f32.gmra.mxu1 %v5971_v21  ;;  %4950 = vmatprep.mubr.f32.mxu0 %v5937_v2  ;;  %v1953_v2 = vld [vmem:[#allocation7 + $0x4c8] sm:$0xff]  ;;  %v4810_v21 = vpop.f32.mrf.mxu1 }
 0x15b   : > { %1472 = vmatprep.mubr.f32.mxu1 %v5284_v58  ;;  %2003 = vmatpush1.msra.mxu0 %v1954_v61 }
 0x15c   : > { %2004 = vmatprep.subr.mxu0 %v7255_v0  ;;  %4970 = vmatprep.subr.mxu1 %v1987_v1 }
 0x15d   : > { %4951 = vmatmul.mubr.f32.gmra.mxu0 %v5941_v4  ;;  %4971 = vmatpush3.msra.mxu1 %v1987_v1  ;;  %v5285_v4 = vld [vmem:[#allocation2 + $0xb1] sm:$0xff] }
 0x15e   : > { %1473 = vmatmul.mubr.f32.gmra.mxu1 %v5983_v49  ;;  %4953 = vmatprep.mubr.f32.mxu0 %v5949_v7  ;;  %v1986_v7 = vld [vmem:[#allocation7 + $0x5d0] sm:$0xff]  ;;  %v1985_v49 = vld [vmem:[#allocation7 + $0x5c8] sm:$0xff] }
 0x15f   : > { %1477 = vmatprep.mubr.f32.mxu1 %v5987_v52  ;;  %2005 = vmatpush1.msra.mxu0 %v1953_v2  ;;  %v1947_v52 = vld [vmem:[#allocation7 + $0x498] sm:$0xff] }
 0x160   : > { %2006 = vmatprep.subr.mxu0 %v7255_v0  ;;  %4972 = vmatprep.subr.mxu1 %v1986_v7 }
 0x161   : > { %4954 = vmatmul.mubr.f32.gmra.mxu0 %v5952_v10  ;;  %v1951_v10 = vld [vmem:[#allocation7 + $0x4b8] sm:$0xff]  ;;  %4973 = vmatpush3.msra.mxu1 %v1986_v7  ;;  %v1980_v7 = vld [vmem:[#allocation7 + $0x5a0] sm:$0xff] }
 0x162   : > { %1478 = vmatmul.mubr.f32.gmra.mxu1 %v5993_v60  ;;  %4956 = vmatprep.mubr.f32.mxu0 %v5961_v13  ;;  %v1950_v13 = vld [vmem:[#allocation7 + $0x4b0] sm:$0xff]  ;;  %v6176_v60 = vpop.f32.mrf.mxu1 }
 0x163   : > { %1482 = vmatprep.mubr.f32.mxu1 %v5997_v63  ;;  %2007 = vmatpush1.msra.mxu0 %v1952_v6  ;;  %v5288_v63 = vld [vmem:[#allocation2 + $0xe1] sm:$0xff] }
 0x164   : > { %2008 = vmatprep.subr.mxu0 %v7255_v0  ;;  %4974 = vmatprep.subr.mxu1 %v1985_v49 }
 0x165   : > { %4957 = vmatmul.mubr.f32.gmra.mxu0 %v5964_v17  ;;  %v1949_v17 = vld [vmem:[#allocation7 + $0x4a8] sm:$0xff]  ;;  %4975 = vmatpush3.msra.mxu1 %v1985_v49 }
 0x166   : > { %1483 = vmatmul.mubr.f32.gmra.mxu1 %v6002_v8  ;;  %4959 = vmatprep.mubr.f32.mxu0 %v5973_v25  ;;  %v5287_v25 = vld [vmem:[#allocation2 + $0xd1] sm:$0xff]  ;;  %v1803_v49 = vld [vmem:[#allocation2 + $0x1] sm:$0xff] }
 0x167   : > { %1486 = vmatprep.mubr.f32.mxu1 %v5285_v4  ;;  %2009 = vmatpush1.msra.mxu0 %v1951_v10  ;;  %v1946_v8 = vld [vmem:[#allocation7 + $0x490] sm:$0xff]  ;;  %v1963_v10 = vld [vmem:[#allocation7 + $0x518] sm:$0xff] }
 0x168   : > { %2010 = vmatprep.subr.mxu0 %v7255_v0 }
 0x169   : > { %4960 = vmatmul.mubr.f32.gmra.mxu0 %v5976_v31  ;;  %v1948_v31 = vld [vmem:[#allocation7 + $0x4a0] sm:$0xff] }
 0x16a   : > { %1487 = vmatmul.mubr.f32.gmra.mxu1 %v6009_v9  ;;  %2011 = vmatpush1.msra.mxu0 %v1950_v13  ;;  %v1979_v13 = vld [vmem:[#allocation7 + $0x598] sm:$0xff] }
 0x16b   : > { %1490 = vmatprep.mubr.f32.mxu1 %v5286_v12  ;;  %2012 = vmatprep.subr.mxu0 %v7255_v0 }
 0x16c   : > { %2013 = vmatpush1.msra.mxu0 %v1949_v17  ;;  %v1962_v17 = vld [vmem:[#allocation7 + $0x510] sm:$0xff]  ;;  %2056 = vmatprep.mubr.f32.mxu0 %v1803_v49 }
 0x16d   : > { %2014 = vmatprep.subr.mxu0 %v7255_v0 }
 0x16e   : > { %1491 = vmatmul.mubr.f32.gmra.mxu1 %v6016_v18  ;;  %2015 = vmatpush1.msra.mxu0 %v1948_v31  ;;  %v1984_v18 = vld [vmem:[#allocation7 + $0x5c0] sm:$0xff]  ;;  %v1961_v31 = vld [vmem:[#allocation7 + $0x508] sm:$0xff] }
 0x16f   : > { %1495 = vmatprep.mubr.f32.mxu1 %v5287_v25  ;;  %2016 = vmatprep.subr.mxu0 %v7255_v0  ;;  %v1978_v25 = vld [vmem:[#allocation7 + $0x590] sm:$0xff] }
 0x170   : > { %2017 = vmatpush1.msra.mxu0 %v1947_v52  ;;  %4976 = vmatprep.subr.mxu1 %v1984_v18 }
 0x171   : > { %2018 = vmatprep.subr.mxu0 %v7255_v0  ;;  %4977 = vmatpush3.msra.mxu1 %v1984_v18 }
 0x172   : > { %1496 = vmatmul.mubr.f32.gmra.mxu1 %v6024_v36  ;;  %2019 = vmatpush1.msra.mxu0 %v1946_v8  ;;  %v5289_v36 = vld [vmem:[#allocation2 + $0xf1] sm:$0xff]  ;;  %v1960_v8 = vld [vmem:[#allocation7 + $0x500] sm:$0xff] }
 0x173   : > { %1500 = vmatprep.mubr.f32.mxu1 %v5288_v63  ;;  %2020 = vmatprep.subr.mxu0 %v7255_v0 }
 0x174   : > { %v6180_v9 = vpop.f32.mrf.mxu1  ;;  %2021 = vmatpush1.msra.mxu0 %v1945_v53  ;;  %4978 = vmatprep.subr.mxu1 %v1983_v59  ;;  %v1763_v53 = vld [vmem:[#allocation2] sm:$0xff] }
 0x175   : > { %2022 = vmatprep.subr.mxu0 %v7255_v0  ;;  %4979 = vmatpush3.msra.mxu1 %v1983_v59  ;;  %v2362_v59 = vld [vmem:[#allocation7 + $0x778] sm:$0xff] }
 0x176   : > { %1501 = vmatmul.mubr.f32.gmra.mxu1 %v6032_v41  ;;  %v6184_v30 = vpop.f32.mrf.mxu1  ;;  %2023 = vmatpush1.msra.mxu0 %v1944_v55  ;;  %v5290_v41 = vld [vmem:[#allocation2 + $0x101] sm:$0xff] }
 0x177   : > { %1505 = vmatprep.mubr.f32.mxu1 %v5289_v36  ;;  %v6186_v62 = vpop.f32.mrf.mxu0  ;;  %2024 = vmatprep.subr.mxu0 %v7255_v0  ;;  %v1976_v55 = vld [vmem:[#allocation7 + $0x580] sm:$0xff] }
 0x178   : > { %2025 = vmatpush2.msra.mxu0 %v1975_v57 }
 0x179   : > { %v6189_v3 = vpop.f32.mrf.mxu1  ;;  %v680_v5 = vpop.f32.mrf.mxu0  ;;  %2026 = vmatprep.subr.mxu0 %v7255_v0 }
 0x17a   : > { %1506 = vmatmul.mubr.f32.gmra.mxu1 %v6038_v33  ;;  %2027 = vmatpush2.msra.mxu0 %v1974_v43  ;;  %v1843_v5 = vld [vmem:[#allocation2 + $0x2] sm:$0xff] }
 0x17b   : > { %1510 = vmatprep.mubr.f32.mxu1 %v5290_v41  ;;  %v6193_v15 = vpop.f32.mrf.mxu1  ;;  %2028 = vmatprep.subr.mxu0 %v7255_v0 }
 0x17c   : > { %v683_v11 = vpop.f32.mrf.mxu0  ;;  %2029 = vmatpush2.msra.mxu0 %v1973_v44 }
 0x17d   : > { %v6196_v42 = vadd.f32 %v4810_v21, %v683_v11  ;;  %2030 = vmatprep.subr.mxu0 %v7255_v0 }
 0x17e   : > { %1511 = vmatmul.mubr.f32.gmra.mxu1 %v6046_v34  ;;  %v6200_v33 = vpop.f32.mrf.mxu1  ;;  %v685_v46 = vpop.f32.mrf.mxu0  ;;  %2031 = vmatpush2.msra.mxu0 %v1972_v37  ;;  %v1982_v34 = vld [vmem:[#allocation7 + $0x5b0] sm:$0xff] }
 0x17f   : > { %1515 = vmatprep.mubr.f32.mxu1 %v5291_v48  ;;  %2032 = vmatprep.subr.mxu0 %v7255_v0 }
 0x180   : > { %v6203_v26 = vpop.f32.mrf.mxu1  ;;  %4980 = vmatprep.subr.mxu1 %v1982_v34  ;;  %2033 = vmatpush2.msra.mxu0 %v1971_v22 }
 0x181   : > { %v6205_v51 = vpop.f32.mrf.mxu0  ;;  %4981 = vmatpush3.msra.mxu1 %v1982_v34  ;;  %2034 = vmatprep.subr.mxu0 %v7255_v0 }
 0x182   : > { %1516 = vmatmul.mubr.f32.gmra.mxu1 %v6054_v14  ;;  %2035 = vmatpush2.msra.mxu0 %v1970_v32  ;;  %v1981_v14 = vld [vmem:[#allocation7 + $0x5a8] sm:$0xff] }
 0x183   : > { %1520 = vmatprep.mubr.f32.mxu1 %v5292_v23  ;;  %v4822_v20 = vpop.f32.mrf.mxu1  ;;  %v690_v38 = vpop.f32.mrf.mxu0  ;;  %2036 = vmatprep.subr.mxu0 %v7255_v0 }
 0x184   : > { %2037 = vmatpush2.msra.mxu0 %v1969_v16  ;;  %4982 = vmatprep.subr.mxu1 %v1981_v14  ;;  %v2361_v20 = vld [vmem:[#allocation7 + $0x770] sm:$0xff] }
 0x185   : > { %v879_v27 = vpop.f32.mrf.mxu1  ;;  %2038 = vmatprep.subr.mxu0 %v7255_v0  ;;  %4983 = vmatpush3.msra.mxu1 %v1981_v14  ;;  %v2360_v14 = vld [vmem:[#allocation7 + $0x768] sm:$0xff] }
 0x186   : > { %1521 = vmatmul.mubr.f32.gmra.mxu1 %v6062_v28  ;;  %v1967_v28 = vld [vmem:[#allocation7 + $0x538] sm:$0xff]  ;;  %2039 = vmatpush2.msra.mxu0 %v1968_v19 }
 0x187   : > { %1525 = vmatprep.mubr.f32.mxu1 %v6066_v40  ;;  %v693_v45 = vpop.f32.mrf.mxu0  ;;  %2040 = vmatprep.subr.mxu0 %v7255_v0 }
 0x188   : > { %v6215_v24 = vadd.f32 %v6180_v9, %v693_v45  ;;  %v6217_v29 = vpop.f32.mrf.mxu1  ;;  %2041 = vmatpush2.msra.mxu0 %v1967_v28  ;;  %4984 = vmatprep.subr.mxu1 %v1980_v7  ;;  %v1977_v9 = vld [vmem:[#allocation7 + $0x588] sm:$0xff]  ;;  %v2359_v45 = vld [vmem:[#allocation7 + $0x760] sm:$0xff] }
 0x189   : > { %v695_v35 = vpop.f32.mrf.mxu0  ;;  %2042 = vmatprep.subr.mxu0 %v7255_v0  ;;  %4985 = vmatpush3.msra.mxu1 %v1980_v7 }
 0x18a   : > { %1526 = vmatmul.mubr.f32.gmra.mxu1 %v6072_v54  ;;  %v6221_v39 = vpop.f32.mrf.mxu1  ;;  %2043 = vmatpush2.msra.mxu0 %v1966_v47  ;;  %v1964_v54 = vld [vmem:[#allocation7 + $0x520] sm:$0xff]  ;;  %v2358_v47 = vld [vmem:[#allocation7 + $0x758] sm:$0xff] }
 0x18b   : > { %v6223_v40 = vpop.f32.mrf.mxu0  ;;  %2044 = vmatprep.subr.mxu0 %v7255_v0  ;;  %4986 = vmatprep.subr.mxu1 %v1979_v13 }
 0x18c   : > { %2045 = vmatpush2.msra.mxu0 %v1965_v56  ;;  %4987 = vmatpush3.msra.mxu1 %v1979_v13 }
 0x18d   : > { %v6226_v50 = vpop.f32.mrf.mxu1  ;;  %v700_v58 = vpop.f32.mrf.mxu0  ;;  %2046 = vmatprep.subr.mxu0 %v7255_v0  ;;  %4988 = vmatprep.subr.mxu1 %v1978_v25 }
 0x18e   : > { %2047 = vmatpush2.msra.mxu0 %v1964_v54  ;;  %4989 = vmatpush3.msra.mxu1 %v1978_v25 }
 0x18f   : > { %v6229_v61 = vpop.f32.mrf.mxu1  ;;  %v703_v1 = vpop.f32.mrf.mxu0  ;;  %2048 = vmatprep.subr.mxu0 %v7255_v0  ;;  %4990 = vmatprep.subr.mxu1 %v1977_v9 }
 0x190   : > { %v6233_v2 = vadd.f32 %v6189_v3, %v703_v1  ;;  %2049 = vmatpush2.msra.mxu0 %v1963_v10  ;;  %4991 = vmatpush3.msra.mxu1 %v1977_v9 }
 0x191   : > { %v6235_v4 = vpop.f32.mrf.mxu1  ;;  %v705_v6 = vpop.f32.mrf.mxu0  ;;  %2050 = vmatprep.subr.mxu0 %v7255_v0  ;;  %4992 = vmatprep.subr.mxu1 %v1976_v55 }
 0x192   : > { %2051 = vmatpush2.msra.mxu0 %v1962_v17  ;;  %4993 = vmatpush3.msra.mxu1 %v1976_v55  ;;  %v2356_v55 = vld [vmem:[#allocation7 + $0x748] sm:$0xff] }
 0x193   : > { %v6238_v12 = vpop.f32.mrf.mxu1  ;;  %2052 = vmatprep.subr.mxu0 %v7255_v0  ;;  %4994 = vmatprep.mubr.f32.mxu1 %v1843_v5 }
 0x194   : > { %v6241_v21 = vpop.f32.mrf.mxu0  ;;  %2053 = vmatpush2.msra.mxu0 %v1961_v31  ;;  %2363 = vmatprep.subr.mxu1 %v7255_v0 }
 0x195   : > { %2054 = vmatprep.subr.mxu0 %v7255_v0 }
 0x196   : > { %v6244_v52 = vpop.f32.mrf.mxu1  ;;  %v710_v63 = vpop.f32.mrf.mxu0  ;;  %2055 = vmatpush2.msra.mxu0 %v1960_v8 }
 0x197   : > { %2057 = vmatmul.mubr.f32.vlgmr.msra.gmra.mxu0 %v1763_v53  ;;  %5024 = vmatprep.subr.mxu0 %v2362_v59  ;;  %v2357_v63 = vld [vmem:[#allocation7 + $0x750] sm:$0xff] }
 0x198   : > { %v6247_v18 = vpop.f32.mrf.mxu1  ;;  %5025 = vmatpush3.msra.mxu0 %v2362_v59 }
 0x199   : > { %v713_v36 = vpop.f32.mrf.mxu0  ;;  %5026 = vmatprep.subr.mxu0 %v2361_v20 }
 0x19a   : > { %v6251_v3 = vadd.f32 %v6200_v33, %v713_v36  ;;  %5027 = vmatpush3.msra.mxu0 %v2361_v20 }
 0x19b   : > { %v4837_v57 = vpop.f32.mrf.mxu1  ;;  %v715_v41 = vpop.f32.mrf.mxu0  ;;  %5028 = vmatprep.subr.mxu0 %v2360_v14 }
 0x19c   : > { %5029 = vmatpush3.msra.mxu0 %v2360_v14  ;;  %v2353_v14 = vld [vmem:[#allocation7 + $0x730] sm:$0xff] }
 0x19d   : > { %v927_v43 = vpop.f32.mrf.mxu1  ;;  %5030 = vmatprep.subr.mxu0 %v2359_v45 }
 0x19e   : > { %5031 = vmatpush3.msra.mxu0 %v2359_v45 }
 0x19f   : > { %v718_v11 = vpop.f32.mrf.mxu0  ;;  %5032 = vmatprep.subr.mxu0 %v2358_v47 }
 0x1a0   : > { %v1049_v44 = vpop.f32.mrf.mxu1  ;;  %5033 = vmatpush3.msra.mxu0 %v2358_v47  ;;  %v2355_v11 = vld [vmem:[#allocation7 + $0x740] sm:$0xff] }
 0x1a1   : > { %v719_v46 = vpop.f32.mrf.mxu0  ;;  %5034 = vmatprep.subr.mxu0 %v2357_v63 }
 0x1a2   : > { %v1050_v33 = vpop.f32.mrf.mxu1  ;;  %5035 = vmatpush3.msra.mxu0 %v2357_v63  ;;  %v2350_v63 = vld [vmem:[#allocation7 + $0x718] sm:$0xff] }
 0x1a3   : > { %v722_v48 = vpop.f32.mrf.mxu0  ;;  %5036 = vmatprep.subr.mxu0 %v2356_v55 }
 0x1a4   : > { %v6254_v37 = vpop.f32.mrf.mxu1  ;;  %5037 = vmatpush3.msra.mxu0 %v2356_v55  ;;  %v2354_v48 = vld [vmem:[#allocation7 + $0x738] sm:$0xff]  ;;  %v2349_v55 = vld [vmem:[#allocation7 + $0x710] sm:$0xff] }
 0x1a5   : > { %v723_v22 = vpop.f32.mrf.mxu0  ;;  %5038 = vmatprep.subr.mxu0 %v2355_v11 }
 0x1a6   : > { %v1055_v34 = vpop.f32.mrf.mxu1  ;;  %5039 = vmatpush3.msra.mxu0 %v2355_v11 }
 0x1a7   : > { %v6256_v23 = vpop.f32.mrf.mxu0  ;;  %5040 = vmatprep.subr.mxu0 %v2354_v48 }
 0x1a8   : > { %v6258_v38 = vpop.f32.mrf.mxu1  ;;  %5041 = vmatpush3.msra.mxu0 %v2354_v48 }
 0x1a9   : > { %v728_v32 = vpop.f32.mrf.mxu0  ;;  %5042 = vmatprep.subr.mxu0 %v2353_v14 }
 0x1aa   : > { %v1060_v27 = vpop.f32.mrf.mxu1  ;;  %5043 = vmatpush3.msra.mxu0 %v2353_v14 }
 0x1ab   : > { %v731_v16 = vpop.f32.mrf.mxu0 }
 0x1ac   : > { %v6261_v19 = vadd.f32 %v6217_v29, %v731_v16  ;;  %v6263_v35 = vpop.f32.mrf.mxu1 }
 0x1ad   : > { %v733_v28 = vpop.f32.mrf.mxu0 }
 0x1ae   : > { %v1065_v58 = vpop.f32.mrf.mxu1 }
 0x1af   : > { %v6265_v56 = vpop.f32.mrf.mxu0  ;;  %v840_v58 = vadd.f32 %v6176_v60, %v6186_v62 }
 0x1b0   : > { %v6267_v1 = vpop.f32.mrf.mxu1 }
 0x1b1   : > { %v738_v54 = vpop.f32.mrf.mxu0 }
 0x1b2   : > { %v1070_v6 = vpop.f32.mrf.mxu1 }
 0x1b3   : > { %v2352_v6 = vld [vmem:[#allocation7 + $0x728] sm:$0xff] }
 0x1b4   : > { %v741_v7 = vpop.f32.mrf.mxu0  ;;  %5044 = vmatprep.subr.mxu0 %v2352_v6 }
 0x1b5   : > { %v6270_v29 = vadd.f32 %v6226_v50, %v741_v7  ;;  %v6272_v10 = vpop.f32.mrf.mxu1  ;;  %v2351_v7 = vld [vmem:[#allocation7 + $0x720] sm:$0xff]  ;;  %5045 = vmatpush3.msra.mxu0 %v2352_v6 }
 0x1b6   : > { %v743_v13 = vpop.f32.mrf.mxu0  ;;  %5046 = vmatprep.subr.mxu0 %v2351_v7 }
 0x1b7   : > { %v1075_v17 = vpop.f32.mrf.mxu1  ;;  %5047 = vmatpush3.msra.mxu0 %v2351_v7 }
 0x1b8   : > { %v6274_v25 = vpop.f32.mrf.mxu0  ;;  %5048 = vmatprep.subr.mxu0 %v2350_v63 }
 0x1b9   : > { %5049 = vmatpush3.msra.mxu0 %v2350_v63  ;;  %v898_v63 = vadd.f32 %v6229_v61, %v6265_v56 }
 0x1ba   : > { %v6276_v31 = vpop.f32.mrf.mxu1  ;;  %v748_v49 = vpop.f32.mrf.mxu0  ;;  %5050 = vmatprep.subr.mxu0 %v2349_v55 }
 0x1bb   : > { %5051 = vmatpush3.msra.mxu0 %v2349_v55 }
 0x1bc   : > { %v1080_v8 = vpop.f32.mrf.mxu1  ;;  %v751_v9 = vpop.f32.mrf.mxu0 }
 0x1bd   : > { %v6279_v53 = vadd.f32 %v6235_v4, %v751_v9 }
 0x1be   : > { %v6281_v36 = vpop.f32.mrf.mxu1  ;;  %v753_v50 = vpop.f32.mrf.mxu0 }
 0x1bf   : > { %v850_v50 = vadd.f32 %v6184_v30, %v6205_v51  ;;  %v860_v30 = vadd.f32 %v6193_v15, %v6223_v40 }
 0x1c0   : > { %v1085_v5 = vpop.f32.mrf.mxu1  ;;  %v6283_v57 = vpop.f32.mrf.mxu0 }
 0x1c2   : > { %v6285_v41 = vpop.f32.mrf.mxu1  ;;  %v758_v43 = vpop.f32.mrf.mxu0 }
 0x1c4   : > { %v1090_v59 = vpop.f32.mrf.mxu1 }
 0x1c5   : > { %v761_v44 = vpop.f32.mrf.mxu0 }
 0x1c6   : > { %v6288_v4 = vadd.f32 %v6244_v52, %v761_v44  ;;  %v1093_v46 = vpop.f32.mrf.mxu1 }
 0x1c7   : > { %v763_v33 = vpop.f32.mrf.mxu0 }
 0x1c8   : > { %v1094_v22 = vpop.f32.mrf.mxu1 }
 0x1c9   : > { %v2348_v22 = vld [vmem:[#allocation7 + $0x708] sm:$0xff] }
 0x1ca   : > { %v766_v34 = vpop.f32.mrf.mxu0  ;;  %5052 = vmatprep.subr.mxu0 %v2348_v22 }
 0x1cb   : > { %v1097_v20 = vpop.f32.mrf.mxu1  ;;  %5053 = vmatpush3.msra.mxu0 %v2348_v22 }
 0x1cc   : > { %v767_v32 = vpop.f32.mrf.mxu0  ;;  %v870_v20 = vadd.f32 %v6203_v26, %v6241_v21 }
 0x1cd   : > { %v1098_v27 = vpop.f32.mrf.mxu1  ;;  %v2347_v32 = vld [vmem:[#allocation7 + $0x700] sm:$0xff] }
 0x1ce   : > { %v770_v16 = vpop.f32.mrf.mxu0  ;;  %5054 = vmatprep.subr.mxu0 %v2347_v32 }
 0x1cf   : > { %5055 = vmatpush3.msra.mxu0 %v2347_v32 }
 0x1d0   : > { %v6290_v45 = vpop.f32.mrf.mxu1  ;;  %v771_v28 = vpop.f32.mrf.mxu0  ;;  %2750 = vmatprep.subr.mxu0 %v7255_v0 }
 0x1d2   : > { %v1103_v47 = vpop.f32.mrf.mxu1  ;;  %v4872_v52 = vpop.f32.mrf.mxu0 }
 0x1d3   : > { %v1215_v54 = vadd.f32 %v4872_v52, %v6254_v37 }
 0x1d4   : > { %v6295_v13 = vpop.f32.mrf.mxu1  ;;  %v1210_v17 = vpop.f32.mrf.mxu0 }
 0x1d5   : > { %v6297_v49 = vadd.f32 %v1215_v54, %v840_v58 }
 0x1d6   : > { %v1108_v8 = vpop.f32.mrf.mxu1 }
 0x1d7   : > { %v4875_v9 = vpop.f32.mrf.mxu0 }
 0x1d8   : > { %v1225_v60 = vadd.f32 %v4875_v9, %v6263_v35 }
 0x1d9   : > { %v1111_v62 = vpop.f32.mrf.mxu1  ;;  %v1219_v37 = vpop.f32.mrf.mxu0 }
 0x1da   : > { %v6302_v5 = vadd.f32 %v1225_v60, %v850_v50  ;;  %v1220_v43 = vadd.f32 %v1219_v37, %v6258_v38 }
 0x1db   : > { %v1113_v11 = vpop.f32.mrf.mxu1 }
 0x1dc   : > { %v6306_v59 = vadd.f32 %v1220_v43, %v6196_v42  ;;  %v4878_v44 = vpop.f32.mrf.mxu0 }
 0x1dd   : > { %v1235_v51 = vadd.f32 %v4878_v44, %v6272_v10 }
 0x1de   : > { %v1116_v35 = vpop.f32.mrf.mxu1  ;;  %v1229_v46 = vpop.f32.mrf.mxu0 }
 0x1df   : > { %v6311_v33 = vadd.f32 %v1235_v51, %v860_v30  ;;  %v1230_v48 = vadd.f32 %v1229_v46, %v6267_v1 }
 0x1e0   : > { %v1118_v38 = vpop.f32.mrf.mxu1 }
 0x1e1   : > { %v6315_v34 = vadd.f32 %v1230_v48, %v6215_v24 }
 0x1e2   : > { %v4881_v42 = vpop.f32.mrf.mxu0 }
 0x1e3   : > { %v1245_v15 = vadd.f32 %v4881_v42, %v6281_v36  ;;  %v1121_v40 = vpop.f32.mrf.mxu1 }
 0x1e4   : > { %v1239_v10 = vpop.f32.mrf.mxu0 }
 0x1e5   : > { %v6320_v27 = vadd.f32 %v1245_v15, %v870_v20  ;;  %v1240_v1 = vadd.f32 %v1239_v10, %v6276_v31  ;;  %v1123_v16 = vpop.f32.mrf.mxu1  ;;  %v888_v31 = vadd.f32 %v6221_v39, %v6256_v23 }
 0x1e7   : > { %v6324_v24 = vadd.f32 %v1240_v1, %v6233_v2  ;;  %v4884_v14 = vpop.f32.mrf.mxu0 }
 0x1e8   : > { %v6361_v14 = vld [vmem:[#allocation9] ss:$0 sm:$0xff] }
 0x1e9   : > { %v1126_v28 = vpop.f32.mrf.mxu1  ;;  %v1249_v26 = vpop.f32.mrf.mxu0 }
 0x1ea   : > { %v1250_v21 = vadd.f32 %v1249_v26, %v6285_v41 }
 0x1eb   : > { %v1128_v36 = vpop.f32.mrf.mxu1 }
 0x1ec   : > { %v6329_v47 = vadd.f32 %v1250_v21, %v6251_v3  ;;  %v4887_v52 = vpop.f32.mrf.mxu0 }
 0x1ed   : > { %v1263_v58 = vadd.f32 %v4887_v52, %v6290_v45  ;;  %v908_v45 = vadd.f32 %v6238_v12, %v6274_v25 }
 0x1ee   : > { %v1131_v54 = vpop.f32.mrf.mxu1  ;;  %v1258_v2 = vpop.f32.mrf.mxu0 }
 0x1ef   : > { %v6334_v6 = vadd.f32 %v1263_v58, %v888_v31 }
 0x1f0   : > { %v1133_v7 = vpop.f32.mrf.mxu1 }
 0x1f1   : > { %v4890_v17 = vpop.f32.mrf.mxu0 }
 0x1f2   : > { %v1273_v41 = vadd.f32 %v4890_v17, %v1111_v62 }
 0x1f3   : > { %v1136_v8 = vpop.f32.mrf.mxu1  ;;  %v1267_v9 = vpop.f32.mrf.mxu0 }
 0x1f4   : > { %v6338_v3 = vadd.f32 %v1273_v41, %v898_v63  ;;  %v1268_v50 = vadd.f32 %v1267_v9, %v6295_v13  ;;  %v918_v13 = vadd.f32 %v6247_v18, %v6283_v57 }
 0x1f5   : > { %v1138_v60 = vpop.f32.mrf.mxu1 }
 0x1f6   : > { %v6342_v39 = vadd.f32 %v1268_v50, %v6261_v19 }
 0x1f7   : > { %v4893_v23 = vpop.f32.mrf.mxu0 }
 0x1f8   : > { %v1283_v37 = vadd.f32 %v4893_v23, %v1121_v40  ;;  %v1141_v55 = vpop.f32.mrf.mxu1 }
 0x1f9   : > { %v1277_v43 = vpop.f32.mrf.mxu0 }
 0x1fa   : > { %v6346_v11 = vadd.f32 %v1283_v37, %v908_v45  ;;  %v1278_v61 = vadd.f32 %v1277_v43, %v1116_v35  ;;  %v1142_v56 = vpop.f32.mrf.mxu1 }
 0x1fc   : > { %v6349_v62 = vadd.f32 %v1278_v61, %v6270_v29 }
 0x1fd   : > { %v4896_v44 = vpop.f32.mrf.mxu0 }
 0x1fe   : > { %v1293_v19 = vadd.f32 %v4896_v44, %v1131_v54  ;;  %v1436_v30 = vpop.f32.mrf.mxu1 }
 0x1ff   : > { %v1287_v51 = vpop.f32.mrf.mxu0 }
 0x200   : > { %v6353_v46 = vadd.f32 %v1293_v19, %v918_v13  ;;  %v1288_v12 = vadd.f32 %v1287_v51, %v1126_v28  ;;  %v1437_v25 = vpop.f32.mrf.mxu1 }
 0x201   : > { %v4899_v48 = vpop.f32.mrf.mxu0  ;;  %v2330_v25 = vld [vmem:[#allocation7 + $0x678] sm:$0xff] }
 0x202   : > { %v6356_v22 = vadd.f32 %v1288_v12, %v6279_v53  ;;  %v1440_v35 = vpop.f32.mrf.mxu1 }
 0x203   : > { %v1297_v38 = vpop.f32.mrf.mxu0 }
 0x204   : > { %v1298_v42 = vadd.f32 %v1297_v38, %v1136_v8  ;;  %v1441_v29 = vpop.f32.mrf.mxu1 }
 0x205   : > { %v4934_v20 = vpop.f32.mrf.mxu0 }
 0x206   : > { %v6359_v15 = vadd.f32 %v1298_v42, %v6288_v4  ;;  %v1444_v18 = vpop.f32.mrf.mxu1  ;;  %v2329_v20 = vld [vmem:[#allocation7 + $0x670] sm:$0xff] }
 0x207   : > { %v1597_v57 = vpop.f32.mrf.mxu0 }
 0x208   : > { %v1446_v40 = vpop.f32.mrf.mxu1 }
 0x209   : > { %v4937_v10 = vpop.f32.mrf.mxu0 }
 0x20a   : > { %v1449_v32 = vpop.f32.mrf.mxu1 }
 0x20b   : > { %v1611_v1 = vadd.f32 %v4937_v10, %v1449_v32  ;;  %v1605_v16 = vpop.f32.mrf.mxu0 }
 0x20c   : > { %v1606_v28 = vadd.f32 %v1605_v16, %v1444_v18  ;;  %v1451_v53 = vpop.f32.mrf.mxu1 }
 0x20d   : > { %v1693_v26 = vadd.f32 %v1611_v1, %v6306_v59  ;;  %v4940_v21 = vpop.f32.mrf.mxu0 }
 0x20e   : > { %v1692_v36 = vadd.f32 %v1606_v28, %v6297_v49  ;;  %v1454_v52 = vpop.f32.mrf.mxu1 }
 0x20f   : > { %v1716_v4 = vadd.f32 %v6361_v14, %v1693_v26  ;;  %v1615_v31 = vpop.f32.mrf.mxu0  ;;  %v2327_v26 = vld [vmem:[#allocation7 + $0x660] sm:$0xff] }
 0x210   : > { %v1715_v58 = vadd.f32 %v6361_v14, %v1692_v36  ;;  %v1616_v54 = vadd.f32 %v1615_v31, %v1454_v52  ;;  %v1456_v2 = vpop.f32.mrf.mxu1 }
 0x211   : > { %v6367_v7 = vmax.f32 %v1716_v4, 0.0  ;;  %v4943_v17 = vpop.f32.mrf.mxu0 }
 0x212   : > { %v6369_v63 = vmax.f32 %v1715_v58, 0.0  ;;  %v1694_v41 = vadd.f32 %v1616_v54, %v6302_v5  ;;  %v1459_v8 = vpop.f32.mrf.mxu1  ;;  %v2326_v58 = vld [vmem:[#allocation7 + $0x658] sm:$0xff] }
 0x213   : > { %1748 = vst [vmem:[#allocation2 + $0x21] sm:$0xff] %v6367_v7  ;;  %v1621_v59 = vadd.f32 %v4940_v21, %v1459_v8  ;;  %v1625_v49 = vpop.f32.mrf.mxu0  ;;  %v2325_v8 = vld [vmem:[#allocation7 + $0x650] sm:$0xff] }
 0x214   : > { %1747 = vst [vmem:[#allocation2 + $0x11] sm:$0xff] %v6369_v63  ;;  %v1717_v9 = vadd.f32 %v6361_v14, %v1694_v41  ;;  %v1461_v50 = vpop.f32.mrf.mxu1  ;;  %2061 = vmatprep.mubr.f32.mxu0 %v6369_v63 }
 0x215   : > { %v1695_v60 = vadd.f32 %v1621_v59, %v6315_v34  ;;  %v4946_v23 = vpop.f32.mrf.mxu0 }
 0x216   : > { %v6377_v45 = vmax.f32 %v1717_v9, 0.0  ;;  %v1464_v37 = vpop.f32.mrf.mxu1  ;;  %v2324_v9 = vld [vmem:[#allocation7 + $0x648] sm:$0xff] }
 0x217   : > { %v1718_v5 = vadd.f32 %v6361_v14, %v1695_v60  ;;  %v1626_v55 = vadd.f32 %v1625_v49, %v1464_v37  ;;  %v1635_v43 = vpop.f32.mrf.mxu0  ;;  %v2323_v37 = vld [vmem:[#allocation7 + $0x640] sm:$0xff] }
 0x218   : > { %1749 = vst [vmem:[#allocation2 + $0x31] sm:$0xff] %v6377_v45  ;;  %v1466_v61 = vpop.f32.mrf.mxu1 }
 0x219   : > { %v6381_v56 = vmax.f32 %v1718_v5, 0.0  ;;  %v1696_v44 = vadd.f32 %v1626_v55, %v6311_v33  ;;  %v4949_v13 = vpop.f32.mrf.mxu0 }
 0x21a   : > { %v1469_v19 = vpop.f32.mrf.mxu1  ;;  %v6392_v38 = vld [vmem:[#allocation2 + $0x22] sm:$0xff] }
 0x21b   : > { %1750 = vst [vmem:[#allocation2 + $0x41] sm:$0xff] %v6381_v56  ;;  %v1719_v34 = vadd.f32 %v6361_v14, %v1696_v44  ;;  %v1631_v30 = vadd.f32 %v4943_v17, %v1469_v19  ;;  %v6386_v51 = vld [vmem:[#allocation2 + $0x12] sm:$0xff]  ;;  %v1645_v48 = vpop.f32.mrf.mxu0  ;;  %v6403_v10 = vld [vmem:[#allocation2 + $0x20] sm:$0xff] }
 0x21c   : > { %7280 = vst [vmem:[#allocation18_spill] sm:$0xff] %v6386_v51  ;;  %v6388_v12 = vld [vmem:[#allocation2 + $0x10] sm:$0xff]  ;;  %v1471_v35 = vpop.f32.mrf.mxu1  ;;  %4995 = vmatmul.mubr.f32.vlgmr.msra.gmra.mxu1 %v6386_v51 }
 0x21d   : > { %7281 = vst [vmem:[#allocation19_spill] sm:$0xff] %v6388_v12  ;;  %2062 = vmatmul.mubr.f32.gmra.mxu0 %v6388_v12  ;;  %v6394_v33 = vmax.f32 %v1719_v34, 0.0  ;;  %v1697_v42 = vadd.f32 %v1631_v30, %v6324_v24  ;;  %4997 = vmatprep.mubr.f32.mxu1 %v6392_v38  ;;  %v2328_v24 = vld [vmem:[#allocation7 + $0x668] sm:$0xff]  ;;  %v2321_v34 = vld [vmem:[#allocation7 + $0x630] sm:$0xff] }
 0x21e   : > { %2066 = vmatprep.mubr.f32.mxu0 %v6367_v7  ;;  %v1474_v29 = vpop.f32.mrf.mxu1  ;;  %2364 = vmatpush1.msra.mxu1 %v2330_v25  ;;  %v2320_v35 = vld [vmem:[#allocation7 + $0x628] sm:$0xff] }
 0x21f   : > { %1751 = vst [vmem:[#allocation2 + $0x51] sm:$0xff] %v6394_v33  ;;  %v1720_v18 = vadd.f32 %v6361_v14, %v1697_v42  ;;  %v1636_v57 = vadd.f32 %v1635_v43, %v1474_v29  ;;  %v6401_v40 = vld [vmem:[#allocation2 + $0x32] sm:$0xff]  ;;  %2365 = vmatprep.subr.mxu1 %v7255_v0 }
 0x220   : > { %v1476_v32 = vpop.f32.mrf.mxu1  ;;  %4998 = vmatmul.mubr.f32.gmra.mxu1 %v6401_v40  ;;  %v6418_v52 = vld [vmem:[#allocation2 + $0x30] sm:$0xff]  ;;  %v2322_v43 = vld [vmem:[#allocation7 + $0x638] sm:$0xff] }
 0x221   : > { %2067 = vmatmul.mubr.f32.gmra.mxu0 %v6403_v10  ;;  %v6408_v1 = vmax.f32 %v1720_v18, 0.0  ;;  %v1698_v16 = vadd.f32 %v1636_v57, %v6320_v27  ;;  %2366 = vmatpush1.msra.mxu1 %v2329_v20  ;;  %v2319_v32 = vld [vmem:[#allocation7 + $0x620] sm:$0xff] }
 0x222   : > { %2071 = vmatprep.mubr.f32.mxu0 %v6377_v45  ;;  %v1479_v28 = vpop.f32.mrf.mxu1  ;;  %v6412_v53 = vld [vmem:[#allocation2 + $0x42] sm:$0xff]  ;;  %2367 = vmatprep.subr.mxu1 %v7255_v0 }
 0x223   : > { %1752 = vst [vmem:[#allocation2 + $0x61] sm:$0xff] %v6408_v1  ;;  %v1721_v21 = vadd.f32 %v6361_v14, %v1698_v16  ;;  %v1641_v36 = vadd.f32 %v4946_v23, %v1479_v28  ;;  %5000 = vmatprep.mubr.f32.mxu1 %v6412_v53  ;;  %2368 = vmatpush1.msra.mxu1 %v2328_v24  ;;  %v6432_v41 = vld [vmem:[#allocation2 + $0x40] sm:$0xff]  ;;  %v6467_v16 = vld [vmem:[#allocation2 + $0x92] sm:$0xff] }
 0x224   : > { %v1481_v27 = vpop.f32.mrf.mxu1  ;;  %2369 = vmatprep.subr.mxu1 %v7255_v0 }
 0x225   : > { %2072 = vmatmul.mubr.f32.gmra.mxu0 %v6418_v52  ;;  %v6422_v4 = vmax.f32 %v1721_v21, 0.0  ;;  %v1699_v31 = vadd.f32 %v1641_v36, %v6329_v47  ;;  %2370 = vmatpush1.msra.mxu1 %v2327_v26  ;;  %v4952_v47 = vpop.f32.mrf.mxu0  ;;  %v2318_v21 = vld [vmem:[#allocation7 + $0x618] sm:$0xff] }
 0x226   : > { %2076 = vmatprep.mubr.f32.mxu0 %v6381_v56  ;;  %v1484_v54 = vpop.f32.mrf.mxu1  ;;  %v6426_v2 = vld [vmem:[#allocation2 + $0x52] sm:$0xff]  ;;  %2371 = vmatprep.subr.mxu1 %v7255_v0 }
 0x227   : > { %1753 = vst [vmem:[#allocation2 + $0x71] sm:$0xff] %v6422_v4  ;;  %v1722_v17 = vadd.f32 %v6361_v14, %v1699_v31  ;;  %5001 = vmatmul.mubr.f32.gmra.mxu1 %v6426_v2  ;;  %v6444_v23 = vld [vmem:[#allocation2 + $0x50] sm:$0xff]  ;;  %v1653_v55 = vpop.f32.mrf.mxu0 }
 0x228   : > { %v1485_v59 = vpop.f32.mrf.mxu1  ;;  %2372 = vmatpush1.msra.mxu1 %v2326_v58  ;;  %v6474_v27 = vld [vmem:[#allocation2 + $0x91] sm:$0xff] }
 0x229   : > { %2077 = vmatmul.mubr.f32.gmra.mxu0 %v6432_v41  ;;  %v6435_v49 = vmax.f32 %v1722_v17, 0.0  ;;  %2373 = vmatprep.subr.mxu1 %v7255_v0  ;;  %v4955_v25 = vpop.f32.mrf.mxu0  ;;  %v6482_v17 = vld [vmem:[#allocation2 + $0xa2] sm:$0xff] }
 0x22a   : > { %2081 = vmatprep.mubr.f32.mxu0 %v6394_v33  ;;  %v1488_v50 = vpop.f32.mrf.mxu1  ;;  %v6439_v60 = vld [vmem:[#allocation2 + $0x62] sm:$0xff]  ;;  %2374 = vmatpush1.msra.mxu1 %v2325_v8 }
 0x22b   : > { %1754 = vst [vmem:[#allocation2 + $0x81] sm:$0xff] %v6435_v49  ;;  %5003 = vmatprep.mubr.f32.mxu1 %v6439_v60  ;;  %2375 = vmatprep.subr.mxu1 %v7255_v0  ;;  %v6453_v19 = vld [vmem:[#allocation2 + $0x60] sm:$0xff]  ;;  %v1663_v24 = vpop.f32.mrf.mxu0  ;;  %v6490_v50 = vld [vmem:[#allocation2 + $0x90] sm:$0xff] }
 0x22c   : > { %v1489_v5 = vpop.f32.mrf.mxu1  ;;  %2376 = vmatpush1.msra.mxu1 %v2324_v9 }
 0x22d   : > { %2082 = vmatmul.mubr.f32.gmra.mxu0 %v6444_v23  ;;  %2377 = vmatprep.subr.mxu1 %v7255_v0  ;;  %v4958_v59 = vpop.f32.mrf.mxu0 }
 0x22e   : > { %2086 = vmatprep.mubr.f32.mxu0 %v6408_v1  ;;  %v1492_v61 = vpop.f32.mrf.mxu1  ;;  %v6449_v44 = vld [vmem:[#allocation2 + $0x72] sm:$0xff]  ;;  %2378 = vmatpush1.msra.mxu1 %v2323_v37  ;;  %v2316_v37 = vld [vmem:[#allocation7 + $0x608] sm:$0xff] }
 0x22f   : > { %v1654_v13 = vadd.f32 %v1653_v55, %v1492_v61  ;;  %5004 = vmatmul.mubr.f32.gmra.mxu1 %v6449_v44  ;;  %2379 = vmatprep.subr.mxu1 %v7255_v0  ;;  %v6464_v57 = vld [vmem:[#allocation2 + $0x70] sm:$0xff]  ;;  %v6493_v55 = vld [vmem:[#allocation2 + $0xa1] sm:$0xff] }
 0x230   : > { %v1494_v30 = vpop.f32.mrf.mxu1  ;;  %2380 = vmatpush1.msra.mxu1 %v2322_v43 }
 0x231   : > { %2087 = vmatmul.mubr.f32.gmra.mxu0 %v6453_v19  ;;  %v1700_v48 = vadd.f32 %v1654_v13, %v6334_v6  ;;  %2381 = vmatprep.subr.mxu1 %v7255_v0 }
 0x232   : > { %2091 = vmatprep.mubr.f32.mxu0 %v6422_v4  ;;  %v1497_v42 = vpop.f32.mrf.mxu1  ;;  %v6459_v29 = vld [vmem:[#allocation2 + $0x82] sm:$0xff]  ;;  %2382 = vmatpush1.msra.mxu1 %v2321_v34  ;;  %v1673_v34 = vpop.f32.mrf.mxu0 }
 0x233   : > { %v1723_v20 = vadd.f32 %v6361_v14, %v1700_v48  ;;  %v1659_v18 = vadd.f32 %v4952_v47, %v1497_v42  ;;  %5006 = vmatprep.mubr.f32.mxu1 %v6459_v29  ;;  %2383 = vmatprep.subr.mxu1 %v7255_v0  ;;  %v6479_v54 = vld [vmem:[#allocation2 + $0x80] sm:$0xff]  ;;  %v2346_v42 = vld [vmem:[#allocation7 + $0x6f8] sm:$0xff] }
 0x234   : > { %v1499_v6 = vpop.f32.mrf.mxu1  ;;  %2384 = vmatpush1.msra.mxu1 %v2320_v35  ;;  %v6504_v35 = vld [vmem:[#allocation2 + $0xa0] sm:$0xff] }
 0x235   : > { %2092 = vmatmul.mubr.f32.gmra.mxu0 %v6464_v57  ;;  %v6469_v28 = vmax.f32 %v1723_v20, 0.0  ;;  %v1701_v26 = vadd.f32 %v1659_v18, %v6342_v39  ;;  %2385 = vmatprep.subr.mxu1 %v7255_v0  ;;  %v2317_v39 = vld [vmem:[#allocation7 + $0x610] sm:$0xff] }
 0x236   : > { %2096 = vmatprep.mubr.f32.mxu0 %v6435_v49  ;;  %v1502_v36 = vpop.f32.mrf.mxu1  ;;  %2386 = vmatpush1.msra.mxu1 %v2319_v32 }
 0x237   : > { %1755 = vst [vmem:[#allocation2 + $0xb1] sm:$0xff] %v6469_v28  ;;  %v1724_v31 = vadd.f32 %v6361_v14, %v1701_v26  ;;  %v1664_v58 = vadd.f32 %v1663_v24, %v1502_v36  ;;  %2387 = vmatprep.subr.mxu1 %v7255_v0  ;;  %5007 = vmatmul.mubr.f32.gmra.mxu1 %v6467_v16  ;;  %v4961_v24 = vpop.f32.mrf.mxu0  ;;  %v2344_v36 = vld [vmem:[#allocation7 + $0x6e8] sm:$0xff] }
 0x238   : > { %v1504_v8 = vpop.f32.mrf.mxu1  ;;  %2388 = vmatpush1.msra.mxu1 %v2318_v21  ;;  %5009 = vmatprep.mubr.f32.mxu1 %v6482_v17 }
 0x239   : > { %2097 = vmatmul.mubr.f32.gmra.mxu0 %v6479_v54  ;;  %v6485_v47 = vmax.f32 %v1724_v31, 0.0  ;;  %v1702_v9 = vadd.f32 %v1664_v58, %v6338_v3  ;;  %2389 = vmatprep.subr.mxu1 %v7255_v0  ;;  %v2315_v3 = vld [vmem:[#allocation7 + $0x600] sm:$0xff] }
 0x23a   : > { %2100 = vmatprep.mubr.f32.mxu0 %v6474_v27  ;;  %v1507_v5 = vpop.f32.mrf.mxu1  ;;  %2390 = vmatpush1.msra.mxu1 %v2317_v39 }
 0x23b   : > { %1756 = vst [vmem:[#allocation2 + $0xc1] sm:$0xff] %v6485_v47  ;;  %v1725_v43 = vadd.f32 %v6361_v14, %v1702_v9  ;;  %v1669_v61 = vadd.f32 %v4955_v25, %v1507_v5  ;;  %2391 = vmatprep.subr.mxu1 %v7255_v0  ;;  %v1683_v5 = vpop.f32.mrf.mxu0 }
 0x23c   : > { %v1509_v13 = vpop.f32.mrf.mxu1  ;;  %2392 = vmatpush1.msra.mxu1 %v2316_v37 }
 0x23d   : > { %2101 = vmatmul.mubr.f32.gmra.mxu0 %v6490_v50  ;;  %v6499_v30 = vmax.f32 %v1725_v43, 0.0  ;;  %v1703_v48 = vadd.f32 %v1669_v61, %v6349_v62  ;;  %2393 = vmatprep.subr.mxu1 %v7255_v0  ;;  %v2345_v62 = vld [vmem:[#allocation7 + $0x6f0] sm:$0xff] }
 0x23e   : > { %2104 = vmatprep.mubr.f32.mxu0 %v6493_v55  ;;  %v1512_v25 = vpop.f32.mrf.mxu1  ;;  %v6506_v20 = vld [vmem:[#allocation2 + $0xb2] sm:$0xff]  ;;  %2394 = vmatpush1.msra.mxu1 %v2315_v3 }
 0x23f   : > { %1757 = vst [vmem:[#allocation2 + $0xd1] sm:$0xff] %v6499_v30  ;;  %v1726_v18 = vadd.f32 %v6361_v14, %v1703_v48  ;;  %v1674_v32 = vadd.f32 %v1673_v34, %v1512_v25  ;;  %5010 = vmatmul.mubr.f32.gmra.mxu1 %v6506_v20  ;;  %2395 = vmatprep.subr.mxu1 %v7255_v0  ;;  %v6524_v9 = vld [vmem:[#allocation2 + $0xb0] sm:$0xff] }
 0x240   : > { %v1514_v6 = vpop.f32.mrf.mxu1  ;;  %2396 = vmatpush2.msra.mxu1 %v2346_v42 }
 0x241   : > { %2105 = vmatmul.mubr.f32.gmra.mxu0 %v6504_v35  ;;  %v6513_v26 = vmax.f32 %v1726_v18, 0.0  ;;  %v1704_v21 = vadd.f32 %v1674_v32, %v6346_v11  ;;  %2397 = vmatprep.subr.mxu1 %v7255_v0  ;;  %v2343_v11 = vld [vmem:[#allocation7 + $0x6e0] sm:$0xff] }
 0x242   : > { %2109 = vmatprep.mubr.f32.mxu0 %v6469_v28  ;;  %v1517_v31 = vpop.f32.mrf.mxu1  ;;  %v6518_v58 = vld [vmem:[#allocation2 + $0xc2] sm:$0xff]  ;;  %2398 = vmatpush2.msra.mxu1 %v2345_v62 }
 0x243   : > { %1758 = vst [vmem:[#allocation2 + $0xe1] sm:$0xff] %v6513_v26  ;;  %v1727_v39 = vadd.f32 %v6361_v14, %v1704_v21  ;;  %v1679_v8 = vadd.f32 %v4958_v59, %v1517_v31  ;;  %5012 = vmatprep.mubr.f32.mxu1 %v6518_v58  ;;  %2399 = vmatprep.subr.mxu1 %v7255_v0  ;;  %v2342_v59 = vld [vmem:[#allocation7 + $0x6d8] sm:$0xff]  ;;  %v6538_v42 = vld [vmem:[#allocation2 + $0xc0] sm:$0xff]  ;;  %v2340_v62 = vld [vmem:[#allocation7 + $0x6c8] sm:$0xff] }
 0x244   : > { %v1519_v37 = vpop.f32.mrf.mxu1  ;;  %2400 = vmatpush2.msra.mxu1 %v2344_v36 }
 0x245   : > { %2110 = vmatmul.mubr.f32.gmra.mxu0 %v6524_v9  ;;  %v6527_v43 = vmax.f32 %v1727_v39, 0.0  ;;  %v1705_v61 = vadd.f32 %v1679_v8, %v6356_v22  ;;  %2401 = vmatprep.subr.mxu1 %v7255_v0  ;;  %v2341_v22 = vld [vmem:[#allocation7 + $0x6d0] sm:$0xff] }
 0x246   : > { %2114 = vmatprep.mubr.f32.mxu0 %v6485_v47  ;;  %v1522_v3 = vpop.f32.mrf.mxu1  ;;  %v6532_v13 = vld [vmem:[#allocation2 + $0xd2] sm:$0xff]  ;;  %2402 = vmatpush2.msra.mxu1 %v2343_v11 }
 0x247   : > { %1759 = vst [vmem:[#allocation2 + $0xf1] sm:$0xff] %v6527_v43  ;;  %v1728_v34 = vadd.f32 %v6361_v14, %v1705_v61  ;;  %v1684_v48 = vadd.f32 %v1683_v5, %v1522_v3  ;;  %5013 = vmatmul.mubr.f32.gmra.mxu1 %v6532_v13  ;;  %2403 = vmatprep.subr.mxu1 %v7255_v0  ;;  %v6552_v39 = vld [vmem:[#allocation2 + $0xd0] sm:$0xff] }
 0x248   : > { %v1524_v25 = vpop.f32.mrf.mxu1  ;;  %2404 = vmatpush2.msra.mxu1 %v2342_v59  ;;  %v2337_v3 = vld [vmem:[#allocation7 + $0x6b0] sm:$0xff] }
 0x249   : > { %2115 = vmatmul.mubr.f32.gmra.mxu0 %v6538_v42  ;;  %v6541_v18 = vmax.f32 %v1728_v34, 0.0  ;;  %v1706_v32 = vadd.f32 %v1684_v48, %v6353_v46  ;;  %2405 = vmatprep.subr.mxu1 %v7255_v0  ;;  %v2339_v46 = vld [vmem:[#allocation7 + $0x6c0] sm:$0xff]  ;;  %v2336_v34 = vld [vmem:[#allocation7 + $0x6a8] sm:$0xff]  ;;  %v2334_v25 = vld [vmem:[#allocation7 + $0x698] sm:$0xff] }
 0x24a   : > { %2119 = vmatprep.mubr.f32.mxu0 %v6499_v30  ;;  %v1527_v6 = vpop.f32.mrf.mxu1  ;;  %v6546_v21 = vld [vmem:[#allocation2 + $0xe2] sm:$0xff]  ;;  %2406 = vmatpush2.msra.mxu1 %v2341_v22 }
 0x24b   : > { %1760 = vst [vmem:[#allocation2 + $0x101] sm:$0xff] %v6541_v18  ;;  %v1729_v36 = vadd.f32 %v6361_v14, %v1706_v32  ;;  %v1689_v31 = vadd.f32 %v4961_v24, %v1527_v6  ;;  %5015 = vmatprep.mubr.f32.mxu1 %v6546_v21  ;;  %2407 = vmatprep.subr.mxu1 %v7255_v0  ;;  %v2338_v24 = vld [vmem:[#allocation7 + $0x6b8] sm:$0xff]  ;;  %v6566_v59 = vld [vmem:[#allocation2 + $0xe0] sm:$0xff]  ;;  %v2333_v6 = vld [vmem:[#allocation7 + $0x690] sm:$0xff] }
 0x24c   : > { %v1529_v8 = vpop.f32.mrf.mxu1  ;;  %2408 = vmatpush2.msra.mxu1 %v2340_v62  ;;  %v2335_v22 = vld [vmem:[#allocation7 + $0x6a0] sm:$0xff] }
 0x24d   : > { %2120 = vmatmul.mubr.f32.gmra.mxu0 %v6552_v39  ;;  %v6555_v11 = vmax.f32 %v1729_v36, 0.0  ;;  %v1707_v37 = vadd.f32 %v1689_v31, %v6359_v15  ;;  %2409 = vmatprep.subr.mxu1 %v7255_v0  ;;  %v6592_v36 = vld [vmem:[#allocation2 + $0x132] sm:$0xff] }
 0x24e   : > { %2124 = vmatprep.mubr.f32.mxu0 %v6513_v26  ;;  %v6560_v5 = vld [vmem:[#allocation2 + $0xf2] sm:$0xff]  ;;  %2410 = vmatpush2.msra.mxu1 %v2339_v46  ;;  %v2332_v46 = vld [vmem:[#allocation7 + $0x688] sm:$0xff] }
 0x24f   : > { %1761 = vst [vmem:[#allocation2 + $0x111] sm:$0xff] %v6555_v11  ;;  %v1730_v61 = vadd.f32 %v6361_v14, %v1707_v37  ;;  %5016 = vmatmul.mubr.f32.gmra.mxu1 %v6560_v5  ;;  %2411 = vmatprep.subr.mxu1 %v7255_v0  ;;  %v6578_v14 = vld [vmem:[#allocation2 + $0xf0] sm:$0xff] }
 0x250   : > { %2412 = vmatpush2.msra.mxu1 %v2338_v24  ;;  %v2331_v24 = vld [vmem:[#allocation7 + $0x680] sm:$0xff] }
 0x251   : > { %2125 = vmatmul.mubr.f32.gmra.mxu0 %v6566_v59  ;;  %v6569_v15 = vmax.f32 %v1730_v61, 0.0  ;;  %2413 = vmatprep.subr.mxu1 %v7255_v0 }
 0x252   : > { %2129 = vmatprep.mubr.f32.mxu0 %v6527_v43  ;;  %v6573_v48 = vld [vmem:[#allocation2 + $0x102] sm:$0xff]  ;;  %2414 = vmatpush2.msra.mxu1 %v2337_v3 }
 0x253   : > { %1762 = vst [vmem:[#allocation2 + $0x121] sm:$0xff] %v6569_v15  ;;  %5018 = vmatprep.mubr.f32.mxu1 %v6573_v48  ;;  %2415 = vmatprep.subr.mxu1 %v7255_v0  ;;  %v6587_v62 = vld [vmem:[#allocation2 + $0x100] sm:$0xff] }
 0x254   : > { %2416 = vmatpush2.msra.mxu1 %v2336_v34  ;;  %v6606_v3 = vld [vmem:[#allocation2 + $0x1] sm:$0xff]  ;;  %v2749_v34 = vld [vmem:[#allocation7 + $0x8f8] sm:$0xff] }
 0x255   : > { %2130 = vmatmul.mubr.f32.gmra.mxu0 %v6578_v14  ;;  %2417 = vmatprep.subr.mxu1 %v7255_v0 }
 0x256   : > { %2134 = vmatprep.mubr.f32.mxu0 %v6541_v18  ;;  %v6583_v32 = vld [vmem:[#allocation2 + $0x112] sm:$0xff]  ;;  %2418 = vmatpush2.msra.mxu1 %v2335_v22 }
 0x257   : > { %5019 = vmatmul.mubr.f32.gmra.mxu1 %v6583_v32  ;;  %2419 = vmatprep.subr.mxu1 %v7255_v0  ;;  %v6598_v8 = vld [vmem:[#allocation2 + $0x110] sm:$0xff]  ;;  %v6600_v37 = vpop.f32.mrf.mxu0 }
 0x258   : > { %2420 = vmatpush2.msra.mxu1 %v2334_v25  ;;  %7283 = vst [vmem:[#allocation21_spill] sm:$0xff] %v6600_v37  ;;  %v6611_v25 = vld [vmem:[#allocation2 + $0x131] sm:$0xff] }
 0x259   : > { %2135 = vmatmul.mubr.f32.gmra.mxu0 %v6587_v62  ;;  %2421 = vmatprep.subr.mxu1 %v7255_v0  ;;  %v2060_v61 = vpop.f32.mrf.mxu0  ;;  %v2717_v37 = vld [vmem:[#allocation7 + $0x7f8] sm:$0xff] }
 0x25a   : > { %2139 = vmatprep.mubr.f32.mxu0 %v6555_v11  ;;  %v6594_v31 = vld [vmem:[#allocation2 + $0x122] sm:$0xff]  ;;  %2422 = vmatpush2.msra.mxu1 %v2333_v6  ;;  %v6618_v61 = vld [vmem:[#allocation2 + $0x130] sm:$0xff] }
 0x25b   : > { %7282 = vst [vmem:[#allocation20_spill] sm:$0xff] %v6594_v31  ;;  %5021 = vmatprep.mubr.f32.mxu1 %v6594_v31  ;;  %2423 = vmatprep.subr.mxu1 %v7255_v0  ;;  %v6609_v22 = vld [vmem:[#allocation2 + $0x120] sm:$0xff] }
 0x25c   : > { %5022 = vmatmul.mubr.f32.gmra.mxu1 %v6592_v36  ;;  %v6613_v6 = vld [vmem:[#allocation2] sm:$0xff] }
 0x25d   : > { %2140 = vmatmul.mubr.f32.gmra.mxu0 %v6598_v8  ;;  %2424 = vmatpush2.msra.mxu1 %v2332_v46  ;;  %v2748_v46 = vld [vmem:[#allocation7 + $0x8f0] sm:$0xff] }
 0x25e   : > { %2144 = vmatprep.mubr.f32.mxu0 %v6569_v15  ;;  %2425 = vmatprep.subr.mxu1 %v7255_v0  ;;  %v6624_v0 = vld [vmem:[#allocation2 + $0x2] sm:$0xff] }
 0x25f   : > { %2427 = vmatprep.mubr.f32.mxu1 %v6606_v3  ;;  %2426 = vmatpush2.msra.mxu1 %v2331_v24  ;;  %v2747_v24 = vld [vmem:[#allocation7 + $0x8e8] sm:$0xff] }
 0x260   : > { %2428 = vmatmul.mubr.f32.vlgmr.msra.gmra.mxu1 %v6613_v6  ;;  %5086 = vmatprep.subr.mxu1 %v2749_v34 }
 0x261   : > { %2145 = vmatmul.mubr.f32.gmra.mxu0 %v6609_v22  ;;  %2431 = vmatprep.mubr.f32.mxu1 %v6369_v63 }
 0x262   : > { %5087 = vmatpush3.msra.mxu1 %v2749_v34  ;;  %2148 = vmatprep.mubr.f32.mxu0 %v6611_v25  ;;  %v2716_v34 = vld [vmem:[#allocation7 + $0x7f0] sm:$0xff] }
 0x263   : > { %5088 = vmatprep.subr.mxu1 %v2748_v46 }
 0x264   : > { %2432 = vmatmul.mubr.f32.gmra.mxu1 %v6388_v12  ;;  %v7284_v12 = vmov 0.0  }
 0x265   : > { %2149 = vmatmul.mubr.f32.gmra.mxu0 %v6618_v61  ;;  %2436 = vmatprep.mubr.f32.mxu1 %v6367_v7  ;;  %v2715_v7 = vld [vmem:[#allocation7 + $0x7e8] sm:$0xff] }
 0x266   : > { %5056 = vmatprep.mubr.f32.mxu0 %v6624_v0  ;;  %5089 = vmatpush3.msra.mxu1 %v2748_v46  ;;  %v2746_v46 = vld [vmem:[#allocation7 + $0x8e0] sm:$0xff] }
 0x267   : > { %5090 = vmatprep.subr.mxu1 %v2747_v24 }
 0x268   : > { %2437 = vmatmul.mubr.f32.gmra.mxu1 %v6403_v10 }
 0x269   : > { %5057 = vmatmul.mubr.f32.vlgmr.msra.gmra.mxu0 %v6386_v51  ;;  %2441 = vmatprep.mubr.f32.mxu1 %v6377_v45  ;;  %v2714_v51 = vld [vmem:[#allocation7 + $0x7e0] sm:$0xff] }
 0x26a   : > { %2751 = vmatpush1.msra.mxu0 %v2717_v37  ;;  %5059 = vmatprep.mubr.f32.mxu0 %v6392_v38  ;;  %v2713_v37 = vld [vmem:[#allocation7 + $0x7d8] sm:$0xff] }
 0x26b   : > { %2752 = vmatprep.subr.mxu0 %v7284_v12  ;;  %5091 = vmatpush3.msra.mxu1 %v2747_v24  ;;  %v2712_v24 = vld [vmem:[#allocation7 + $0x7d0] sm:$0xff] }
 0x26c   : > { %2753 = vmatpush1.msra.mxu0 %v2716_v34  ;;  %2442 = vmatmul.mubr.f32.gmra.mxu1 %v6418_v52  ;;  %v2711_v34 = vld [vmem:[#allocation7 + $0x7c8] sm:$0xff] }
 0x26d   : > { %2754 = vmatprep.subr.mxu0 %v7284_v12  ;;  %2446 = vmatprep.mubr.f32.mxu1 %v6381_v56 }
 0x26e   : > { %5060 = vmatmul.mubr.f32.gmra.mxu0 %v6401_v40  ;;  %5092 = vmatprep.subr.mxu1 %v2746_v46 }
 0x26f   : > { %2755 = vmatpush1.msra.mxu0 %v2715_v7  ;;  %5062 = vmatprep.mubr.f32.mxu0 %v6412_v53  ;;  %v2710_v7 = vld [vmem:[#allocation7 + $0x7c0] sm:$0xff] }
 0x270   : > { %2756 = vmatprep.subr.mxu0 %v7284_v12  ;;  %2447 = vmatmul.mubr.f32.gmra.mxu1 %v6432_v41 }
 0x271   : > { %2757 = vmatpush1.msra.mxu0 %v2714_v51  ;;  %2451 = vmatprep.mubr.f32.mxu1 %v6394_v33  ;;  %v2745_v51 = vld [vmem:[#allocation7 + $0x8d8] sm:$0xff] }
 0x272   : > { %2758 = vmatprep.subr.mxu0 %v7284_v12  ;;  %5063 = vmatmul.mubr.f32.gmra.mxu0 %v6426_v2 }
 0x273   : > { %5093 = vmatpush3.msra.mxu1 %v2746_v46  ;;  %2759 = vmatpush1.msra.mxu0 %v2713_v37  ;;  %v2709_v46 = vld [vmem:[#allocation7 + $0x7b8] sm:$0xff]  ;;  %v2744_v37 = vld [vmem:[#allocation7 + $0x8d0] sm:$0xff] }
 0x274   : > { %5065 = vmatprep.mubr.f32.mxu0 %v6439_v60  ;;  %2760 = vmatprep.subr.mxu0 %v7284_v12 }
 0x275   : > { %2452 = vmatmul.mubr.f32.gmra.mxu1 %v6444_v23  ;;  %2761 = vmatpush1.msra.mxu0 %v2712_v24  ;;  %v2708_v24 = vld [vmem:[#allocation7 + $0x7b0] sm:$0xff] }
 0x276   : > { %2456 = vmatprep.mubr.f32.mxu1 %v6408_v1  ;;  %2762 = vmatprep.subr.mxu0 %v7284_v12 }
 0x277   : > { %5066 = vmatmul.mubr.f32.gmra.mxu0 %v6449_v44  ;;  %5094 = vmatprep.subr.mxu1 %v2745_v51 }
 0x278   : > { %2763 = vmatpush1.msra.mxu0 %v2711_v34  ;;  %5068 = vmatprep.mubr.f32.mxu0 %v6459_v29  ;;  %v2707_v34 = vld [vmem:[#allocation7 + $0x7a8] sm:$0xff] }
 0x279   : > { %2764 = vmatprep.subr.mxu0 %v7284_v12  ;;  %5095 = vmatpush3.msra.mxu1 %v2745_v51  ;;  %v2706_v51 = vld [vmem:[#allocation7 + $0x7a0] sm:$0xff] }
 0x27a   : > { %2765 = vmatpush1.msra.mxu0 %v2710_v7  ;;  %2457 = vmatmul.mubr.f32.gmra.mxu1 %v6453_v19  ;;  %v2743_v7 = vld [vmem:[#allocation7 + $0x8c8] sm:$0xff] }
 0x27b   : > { %2766 = vmatprep.subr.mxu0 %v7284_v12  ;;  %2461 = vmatprep.mubr.f32.mxu1 %v6422_v4 }
 0x27c   : > { %5069 = vmatmul.mubr.f32.gmra.mxu0 %v6467_v16  ;;  %5096 = vmatprep.subr.mxu1 %v2744_v37 }
 0x27d   : > { %2767 = vmatpush1.msra.mxu0 %v2709_v46  ;;  %5071 = vmatprep.mubr.f32.mxu0 %v6482_v17  ;;  %v2705_v46 = vld [vmem:[#allocation7 + $0x798] sm:$0xff] }
 0x27e   : > { %2768 = vmatprep.subr.mxu0 %v7284_v12  ;;  %2462 = vmatmul.mubr.f32.gmra.mxu1 %v6464_v57 }
 0x27f   : > { %2769 = vmatpush1.msra.mxu0 %v2708_v24  ;;  %5097 = vmatpush3.msra.mxu1 %v2744_v37  ;;  %v2704_v37 = vld [vmem:[#allocation7 + $0x790] sm:$0xff]  ;;  %v2742_v24 = vld [vmem:[#allocation7 + $0x8c0] sm:$0xff] }
 0x280   : > { %2770 = vmatprep.subr.mxu0 %v7284_v12  ;;  %2466 = vmatprep.mubr.f32.mxu1 %v6435_v49 }
 0x281   : > { %5072 = vmatmul.mubr.f32.gmra.mxu0 %v6506_v20  ;;  %5098 = vmatprep.subr.mxu1 %v2743_v7 }
 0x282   : > { %2771 = vmatpush1.msra.mxu0 %v2707_v34  ;;  %5074 = vmatprep.mubr.f32.mxu0 %v6518_v58  ;;  %v2703_v34 = vld [vmem:[#allocation7 + $0x788] sm:$0xff] }
 0x283   : > { %2772 = vmatprep.subr.mxu0 %v7284_v12  ;;  %2467 = vmatmul.mubr.f32.gmra.mxu1 %v6479_v54 }
 0x284   : > { %2773 = vmatpush1.msra.mxu0 %v2706_v51  ;;  %5099 = vmatpush3.msra.mxu1 %v2743_v7  ;;  %v2702_v51 = vld [vmem:[#allocation7 + $0x780] sm:$0xff]  ;;  %v2733_v7 = vld [vmem:[#allocation7 + $0x878] sm:$0xff] }
 0x285   : > { %2774 = vmatprep.subr.mxu0 %v7284_v12  ;;  %5075 = vmatmul.mubr.f32.gmra.mxu0 %v6532_v13 }
 0x286   : > { %2775 = vmatpush1.msra.mxu0 %v2705_v46  ;;  %5077 = vmatprep.mubr.f32.mxu0 %v6546_v21  ;;  %v2741_v46 = vld [vmem:[#allocation7 + $0x8b8] sm:$0xff] }
 0x287   : > { %2776 = vmatprep.subr.mxu0 %v7284_v12  ;;  %2471 = vmatprep.mubr.f32.mxu1 %v6474_v27 }
 0x288   : > { %2777 = vmatpush1.msra.mxu0 %v2704_v37  ;;  %2472 = vmatmul.mubr.f32.gmra.mxu1 %v6490_v50  ;;  %v2732_v37 = vld [vmem:[#allocation7 + $0x870] sm:$0xff] }
 0x289   : > { %2778 = vmatprep.subr.mxu0 %v7284_v12  ;;  %5078 = vmatmul.mubr.f32.gmra.mxu0 %v6560_v5 }
 0x28a   : > { %5100 = vmatprep.subr.mxu1 %v2742_v24  ;;  %2779 = vmatpush1.msra.mxu0 %v2703_v34  ;;  %v2740_v34 = vld [vmem:[#allocation7 + $0x8b0] sm:$0xff] }
 0x28b   : > { %5080 = vmatprep.mubr.f32.mxu0 %v6573_v48  ;;  %2780 = vmatprep.subr.mxu0 %v7284_v12 }
 0x28c   : > { %5101 = vmatpush3.msra.mxu1 %v2742_v24  ;;  %2475 = vmatprep.mubr.f32.mxu1 %v6493_v55  ;;  %v2731_v24 = vld [vmem:[#allocation7 + $0x868] sm:$0xff] }
 0x28d   : > { %2781 = vmatpush1.msra.mxu0 %v2702_v51  ;;  %2476 = vmatmul.mubr.f32.gmra.mxu1 %v6504_v35  ;;  %v2730_v51 = vld [vmem:[#allocation7 + $0x860] sm:$0xff] }
 0x28e   : > { %2782 = vmatprep.subr.mxu0 %v7284_v12  ;;  %2479 = vmatprep.mubr.f32.mxu1 %v6469_v28 }
 0x28f   : > { %5081 = vmatmul.mubr.f32.gmra.mxu0 %v6583_v32  ;;  %5102 = vmatprep.subr.mxu1 %v2741_v46 }
 0x290   : > { %2783 = vmatpush2.msra.mxu0 %v2733_v7  ;;  %5083 = vmatprep.mubr.f32.mxu0 %v6594_v31  ;;  %v2729_v7 = vld [vmem:[#allocation7 + $0x858] sm:$0xff]  ;;  %v2739_v31 = vld [vmem:[#allocation7 + $0x8a8] sm:$0xff] }
 0x291   : > { %2784 = vmatprep.subr.mxu0 %v7284_v12  ;;  %5103 = vmatpush3.msra.mxu1 %v2741_v46  ;;  %v2728_v46 = vld [vmem:[#allocation7 + $0x850] sm:$0xff] }
 0x292   : > { %2785 = vmatpush2.msra.mxu0 %v2732_v37  ;;  %2480 = vmatmul.mubr.f32.gmra.mxu1 %v6524_v9  ;;  %v2727_v37 = vld [vmem:[#allocation7 + $0x848] sm:$0xff] }
 0x293   : > { %2786 = vmatprep.subr.mxu0 %v7284_v12  ;;  %2484 = vmatprep.mubr.f32.mxu1 %v6485_v47 }
 0x294   : > { %2787 = vmatpush2.msra.mxu0 %v2731_v24  ;;  %5104 = vmatprep.subr.mxu1 %v2740_v34  ;;  %v2738_v24 = vld [vmem:[#allocation7 + $0x8a0] sm:$0xff] }
 0x295   : > { %2788 = vmatprep.subr.mxu0 %v7284_v12  ;;  %5105 = vmatpush3.msra.mxu1 %v2740_v34  ;;  %v2726_v34 = vld [vmem:[#allocation7 + $0x840] sm:$0xff] }
 0x296   : > { %2789 = vmatpush2.msra.mxu0 %v2730_v51  ;;  %2485 = vmatmul.mubr.f32.gmra.mxu1 %v6538_v42  ;;  %v2725_v51 = vld [vmem:[#allocation7 + $0x838] sm:$0xff] }
 0x297   : > { %2790 = vmatprep.subr.mxu0 %v7284_v12  ;;  %2489 = vmatprep.mubr.f32.mxu1 %v6499_v30 }
 0x298   : > { %2791 = vmatpush2.msra.mxu0 %v2729_v7  ;;  %5106 = vmatprep.subr.mxu1 %v2739_v31  ;;  %v2737_v7 = vld [vmem:[#allocation7 + $0x898] sm:$0xff] }
 0x299   : > { %2792 = vmatprep.subr.mxu0 %v7284_v12  ;;  %5107 = vmatpush3.msra.mxu1 %v2739_v31  ;;  %v2724_v31 = vld [vmem:[#allocation7 + $0x830] sm:$0xff] }
 0x29a   : > { %2793 = vmatpush2.msra.mxu0 %v2728_v46  ;;  %2490 = vmatmul.mubr.f32.gmra.mxu1 %v6552_v39  ;;  %v2723_v46 = vld [vmem:[#allocation7 + $0x828] sm:$0xff] }
 0x29b   : > { %2794 = vmatprep.subr.mxu0 %v7284_v12  ;;  %2494 = vmatprep.mubr.f32.mxu1 %v6513_v26 }
 0x29c   : > { %2795 = vmatpush2.msra.mxu0 %v2727_v37  ;;  %5108 = vmatprep.subr.mxu1 %v2738_v24  ;;  %v2722_v37 = vld [vmem:[#allocation7 + $0x820] sm:$0xff] }
 0x29d   : > { %2796 = vmatprep.subr.mxu0 %v7284_v12  ;;  %5109 = vmatpush3.msra.mxu1 %v2738_v24  ;;  %v2736_v24 = vld [vmem:[#allocation7 + $0x890] sm:$0xff] }
 0x29e   : > { %2797 = vmatpush2.msra.mxu0 %v2726_v34  ;;  %2495 = vmatmul.mubr.f32.gmra.mxu1 %v6566_v59  ;;  %v2721_v34 = vld [vmem:[#allocation7 + $0x818] sm:$0xff] }
 0x29f   : > { %2798 = vmatprep.subr.mxu0 %v7284_v12  ;;  %2499 = vmatprep.mubr.f32.mxu1 %v6527_v43 }
 0x2a0   : > { %2799 = vmatpush2.msra.mxu0 %v2725_v51  ;;  %5110 = vmatprep.subr.mxu1 %v2737_v7  ;;  %v2720_v51 = vld [vmem:[#allocation7 + $0x810] sm:$0xff] }
 0x2a1   : > { %2800 = vmatprep.subr.mxu0 %v7284_v12  ;;  %5111 = vmatpush3.msra.mxu1 %v2737_v7  ;;  %v2719_v7 = vld [vmem:[#allocation7 + $0x808] sm:$0xff] }
 0x2a2   : > { %2801 = vmatpush2.msra.mxu0 %v2724_v31  ;;  %2500 = vmatmul.mubr.f32.gmra.mxu1 %v6578_v14  ;;  %v2735_v31 = vld [vmem:[#allocation7 + $0x888] sm:$0xff] }
 0x2a3   : > { %2802 = vmatprep.subr.mxu0 %v7284_v12  ;;  %2504 = vmatprep.mubr.f32.mxu1 %v6541_v18 }
 0x2a4   : > { %2803 = vmatpush2.msra.mxu0 %v2723_v46  ;;  %5112 = vmatprep.subr.mxu1 %v2736_v24  ;;  %v2718_v46 = vld [vmem:[#allocation7 + $0x800] sm:$0xff] }
 0x2a5   : > { %2804 = vmatprep.subr.mxu0 %v7284_v12  ;;  %5084 = vmatmul.mubr.f32.gmra.mxu0 %v6592_v36 }
 0x2a6   : > { %2805 = vmatpush2.msra.mxu0 %v2722_v37  ;;  %2505 = vmatmul.mubr.f32.gmra.mxu1 %v6587_v62  ;;  %v2734_v37 = vld [vmem:[#allocation7 + $0x880] sm:$0xff] }
 0x2a7   : > { %2806 = vmatprep.subr.mxu0 %v7284_v12  ;;  %2509 = vmatprep.mubr.f32.mxu1 %v6555_v11 }
 0x2a8   : > { %2807 = vmatpush2.msra.mxu0 %v2721_v34  ;;  %5113 = vmatpush3.msra.mxu1 %v2736_v24  ;;  %v5296_v24 = vld [vmem:[#allocation2 + $0x21] sm:$0xff] }
 0x2a9   : > { %2808 = vmatprep.subr.mxu0 %v7284_v12  ;;  %2814 = vmatprep.mubr.f32.mxu0 %v6606_v3  ;;  %v7285_v3 = vld [vmem:[#allocation19_spill] sm:$0xff]  ;;  %v7286_v34 = vld [vmem:[#allocation18_spill] sm:$0xff] }
 0x2aa   : > { %2809 = vmatpush2.msra.mxu0 %v2720_v51  ;;  %2510 = vmatmul.mubr.f32.gmra.mxu1 %v6598_v8  ;;  %v3144_v51 = vld [vmem:[#allocation10 + $0x80] sm:$0xff] }
 0x2ab   : > { %2810 = vmatprep.subr.mxu0 %v7284_v12  ;;  %2514 = vmatprep.mubr.f32.mxu1 %v6569_v15 }
 0x2ac   : > { %2811 = vmatpush2.msra.mxu0 %v2719_v7  ;;  %5114 = vmatprep.subr.mxu1 %v2735_v31  ;;  %v6821_v7 = vld [vmem:[#allocation10 + $0x198] sm:$0xff] }
 0x2ad   : > { %2812 = vmatprep.subr.mxu0 %v7284_v12  ;;  %5115 = vmatpush3.msra.mxu1 %v2735_v31 }
 0x2ae   : > { %2813 = vmatpush2.msra.mxu0 %v2718_v46  ;;  %2515 = vmatmul.mubr.f32.gmra.mxu1 %v6609_v22  ;;  %v6824_v46 = vld [vmem:[#allocation10 + $0x190] sm:$0xff] }
 0x2af   : > { %2815 = vmatmul.mubr.f32.vlgmr.msra.gmra.mxu0 %v6613_v6  ;;  %2519 = vmatprep.mubr.f32.mxu1 %v6611_v25 }
 0x2b0   : > { %2818 = vmatprep.mubr.f32.mxu0 %v6369_v63  ;;  %5116 = vmatprep.subr.mxu1 %v2734_v37  ;;  %v6753_v63 = vld [vmem:[#allocation10 + $0x1f8] sm:$0xff] }
 0x2b1   : > { %5117 = vmatpush3.msra.mxu1 %v2734_v37  ;;  %3762 = vmatprep.subr.mxu0 %v6753_v63 }
 0x2b2   : > { %2520 = vmatmul.mubr.f32.gmra.mxu1 %v6618_v61 }
 0x2b3   : > { %2819 = vmatmul.mubr.f32.gmra.mxu0 %v7285_v3  ;;  %5118 = vmatprep.mubr.f32.mxu1 %v6624_v0  ;;  %v7287_v0 = vld [vmem:[#allocation20_spill] sm:$0xff] }
 0x2b4   : > { %2822 = vmatprep.mubr.f32.mxu0 %v5296_v24  ;;  %v6831_v24 = vld [vmem:[#allocation10 + $0x188] sm:$0xff] }
 0x2b6   : > { %5119 = vmatmul.mubr.f32.vlgmr.msra.gmra.mxu1 %v7286_v34  ;;  %v3142_v34 = vld [vmem:[#allocation10 + $0x70] sm:$0xff] }
 0x2b7   : > { %2823 = vmatmul.mubr.f32.gmra.mxu0 %v6403_v10  ;;  %5121 = vmatprep.mubr.f32.mxu1 %v6392_v38  ;;  %v6767_v10 = vld [vmem:[#allocation10 + $0x1e0] sm:$0xff] }
 0x2b8   : > { %2827 = vmatprep.mubr.f32.mxu0 %v6377_v45  ;;  %v6755_v45 = vld [vmem:[#allocation10 + $0x1f0] sm:$0xff] }
 0x2b9   : > { %3763 = vmatpush1.msra.mxu0 %v6755_v45 }
 0x2ba   : > { %5122 = vmatmul.mubr.f32.gmra.mxu1 %v6401_v40  ;;  %v6765_v40 = vld [vmem:[#allocation10 + $0x1e8] sm:$0xff] }
 0x2bb   : > { %2828 = vmatmul.mubr.f32.gmra.mxu0 %v6418_v52  ;;  %5124 = vmatprep.mubr.f32.mxu1 %v6412_v53 }
 0x2bc   : > { %2832 = vmatprep.mubr.f32.mxu0 %v6381_v56  ;;  %3764 = vmatprep.subr.mxu0 %v6765_v40 }
 0x2bd   : > { %3765 = vmatpush1.msra.mxu0 %v6767_v10 }
 0x2be   : > { %5125 = vmatmul.mubr.f32.gmra.mxu1 %v6426_v2  ;;  %v3158_v2 = vld [vmem:[#allocation10 + $0xf0] sm:$0xff] }
 0x2bf   : > { %2833 = vmatmul.mubr.f32.gmra.mxu0 %v6432_v41  ;;  %5127 = vmatprep.mubr.f32.mxu1 %v6439_v60  ;;  %v6777_v41 = vld [vmem:[#allocation10 + $0x1d8] sm:$0xff] }
 0x2c0   : > { %2837 = vmatprep.mubr.f32.mxu0 %v6394_v33  ;;  %3766 = vmatprep.subr.mxu0 %v6777_v41 }
 0x2c2   : > { %5128 = vmatmul.mubr.f32.gmra.mxu1 %v6449_v44 }
 0x2c3   : > { %2838 = vmatmul.mubr.f32.gmra.mxu0 %v6444_v23  ;;  %5130 = vmatprep.mubr.f32.mxu1 %v6459_v29  ;;  %v6784_v29 = vld [vmem:[#allocation10 + $0x1d0] sm:$0xff] }
 0x2c4   : > { %2842 = vmatprep.mubr.f32.mxu0 %v6408_v1  ;;  %3767 = vmatpush1.msra.mxu0 %v6784_v29 }
 0x2c6   : > { %5131 = vmatmul.mubr.f32.gmra.mxu1 %v6467_v16 }
 0x2c7   : > { %2843 = vmatmul.mubr.f32.gmra.mxu0 %v6453_v19  ;;  %5133 = vmatprep.mubr.f32.mxu1 %v6482_v17  ;;  %v3157_v19 = vld [vmem:[#allocation10 + $0xe8] sm:$0xff] }
 0x2c8   : > { %2847 = vmatprep.mubr.f32.mxu0 %v6422_v4  ;;  %v3159_v4 = vld [vmem:[#allocation10 + $0xf8] sm:$0xff] }
 0x2c9   : > { %3172 = vmatprep.subr.mxu1 %v3159_v4  ;;  %v3141_v4 = vld [vmem:[#allocation10 + $0x68] sm:$0xff] }
 0x2ca   : > { %5134 = vmatmul.mubr.f32.gmra.mxu1 %v6506_v20 }
 0x2cb   : > { %2848 = vmatmul.mubr.f32.gmra.mxu0 %v6464_v57  ;;  %5136 = vmatprep.mubr.f32.mxu1 %v6518_v58  ;;  %v3156_v57 = vld [vmem:[#allocation10 + $0xe0] sm:$0xff] }
 0x2cc   : > { %2852 = vmatprep.mubr.f32.mxu0 %v6435_v49  ;;  %3173 = vmatpush1.msra.mxu1 %v3158_v2  ;;  %v6842_v2 = vld [vmem:[#allocation10 + $0x170] sm:$0xff] }
 0x2cd   : > { %3174 = vmatprep.subr.mxu1 %v3157_v19  ;;  %v6849_v19 = vld [vmem:[#allocation10 + $0x160] sm:$0xff] }
 0x2ce   : > { %5137 = vmatmul.mubr.f32.gmra.mxu1 %v6532_v13  ;;  %v6803_v13 = vld [vmem:[#allocation10 + $0x1b8] sm:$0xff] }
 0x2cf   : > { %2853 = vmatmul.mubr.f32.gmra.mxu0 %v6479_v54  ;;  %5139 = vmatprep.mubr.f32.mxu1 %v6546_v21 }
 0x2d0   : > { %2857 = vmatprep.mubr.f32.mxu0 %v6474_v27  ;;  %v3154_v27 = vld [vmem:[#allocation10 + $0xd0] sm:$0xff]  ;;  %3175 = vmatpush1.msra.mxu1 %v3156_v57 }
 0x2d1   : > { %v3138_v57 = vld [vmem:[#allocation10 + $0x50] sm:$0xff] }
 0x2d2   : > { %5140 = vmatmul.mubr.f32.gmra.mxu1 %v6560_v5 }
 0x2d3   : > { %2858 = vmatmul.mubr.f32.gmra.mxu0 %v6490_v50  ;;  %5142 = vmatprep.mubr.f32.mxu1 %v6573_v48  ;;  %v3153_v50 = vld [vmem:[#allocation10 + $0xc8] sm:$0xff] }
 0x2d4   : > { %2862 = vmatprep.mubr.f32.mxu0 %v6493_v55  ;;  %v6795_v55 = vld [vmem:[#allocation10 + $0x1c0] sm:$0xff]  ;;  %v6814_v48 = vld [vmem:[#allocation10 + $0x1a8] sm:$0xff] }
 0x2d6   : > { %5143 = vmatmul.mubr.f32.gmra.mxu1 %v6583_v32  ;;  %v3147_v32 = vld [vmem:[#allocation10 + $0x98] sm:$0xff] }
 0x2d7   : > { %2863 = vmatmul.mubr.f32.gmra.mxu0 %v6504_v35  ;;  %5145 = vmatprep.mubr.f32.mxu1 %v7287_v0  ;;  %v3152_v35 = vld [vmem:[#allocation10 + $0xc0] sm:$0xff] }
 0x2d8   : > { %2866 = vmatprep.mubr.f32.mxu0 %v6469_v28  ;;  %v3155_v28 = vld [vmem:[#allocation10 + $0xd8] sm:$0xff]  ;;  %v6835_v0 = vld [vmem:[#allocation10 + $0x180] sm:$0xff] }
 0x2d9   : > { %3176 = vmatprep.subr.mxu1 %v3155_v28 }
 0x2da   : > { %5146 = vmatmul.mubr.f32.gmra.mxu1 %v6592_v36  ;;  %v3145_v36 = vld [vmem:[#allocation10 + $0x88] sm:$0xff] }
 0x2db   : > { %2867 = vmatmul.mubr.f32.gmra.mxu0 %v6524_v9  ;;  %3236 = vmatprep.mubr.f32.mxu1 %v7284_v12 }
 0x2dc   : > { %2870 = vmatprep.mubr.f32.mxu0 %v6485_v47  ;;  %v4996_v56 = vpop.f32.mrf.mxu1  ;;  %v6793_v47 = vld [vmem:[#allocation10 + $0x1c8] sm:$0xff]  ;;  %3177 = vmatpush1.msra.mxu1 %v3154_v27  ;;  %v6855_v27 = vld [vmem:[#allocation10 + $0x150] sm:$0xff] }
 0x2dd   : > { %v2063_v38 = vpop.f32.mrf.mxu0  ;;  %3768 = vmatprep.subr.mxu0 %v6793_v47  ;;  %3178 = vmatprep.subr.mxu1 %v3153_v50  ;;  %v3137_v50 = vld [vmem:[#allocation10 + $0x48] sm:$0xff] }
 0x2de   : > { %v6763_v33 = vadd.f32 %v4996_v56, %v2063_v38  ;;  %v6773_v53 = vpop.f32.mrf.mxu1  ;;  %3769 = vmatpush1.msra.mxu0 %v6795_v55  ;;  %3179 = vmatpush1.msra.mxu1 %v3152_v35  ;;  %v6839_v38 = vld [vmem:[#allocation10 + $0x178] sm:$0xff] }
 0x2df   : > { %2871 = vmatmul.mubr.f32.gmra.mxu0 %v6538_v42  ;;  %v2065_v1 = vpop.f32.mrf.mxu0  ;;  %v3149_v42 = vld [vmem:[#allocation10 + $0xa8] sm:$0xff]  ;;  %3770 = vmatprep.subr.mxu0 %v6803_v13 }
 0x2e0   : > { %2875 = vmatprep.mubr.f32.mxu0 %v6499_v30  ;;  %v4999_v60 = vpop.f32.mrf.mxu1 }
 0x2e1   : > { %v6775_v52 = vpop.f32.mrf.mxu0 }
 0x2e2   : > { %v6791_v17 = vpop.f32.mrf.mxu1 }
 0x2e3   : > { %2876 = vmatmul.mubr.f32.gmra.mxu0 %v6552_v39  ;;  %v2070_v49 = vpop.f32.mrf.mxu0  ;;  %v3148_v39 = vld [vmem:[#allocation10 + $0xa0] sm:$0xff] }
 0x2e4   : > { %2880 = vmatprep.mubr.f32.mxu0 %v6513_v26  ;;  %v3151_v26 = vld [vmem:[#allocation10 + $0xb8] sm:$0xff]  ;;  %v3140_v49 = vld [vmem:[#allocation10 + $0x60] sm:$0xff] }
 0x2e5   : > { %v2073_v23 = vpop.f32.mrf.mxu0  ;;  %3180 = vmatprep.subr.mxu1 %v3151_v26  ;;  %v3135_v26 = vld [vmem:[#allocation10 + $0x38] sm:$0xff] }
 0x2e6   : > { %v6782_v44 = vadd.f32 %v4999_v60, %v2073_v23  ;;  %v6845_v60 = vld [vmem:[#allocation10 + $0x168] sm:$0xff]  ;;  %v3139_v23 = vld [vmem:[#allocation10 + $0x58] sm:$0xff] }
 0x2e7   : > { %2881 = vmatmul.mubr.f32.gmra.mxu0 %v6566_v59  ;;  %v2075_v16 = vpop.f32.mrf.mxu0  ;;  %v5002_v20 = vpop.f32.mrf.mxu1 }
 0x2e8   : > { %2885 = vmatprep.mubr.f32.mxu0 %v6527_v43  ;;  %v3150_v43 = vld [vmem:[#allocation10 + $0xb0] sm:$0xff]  ;;  %v6852_v16 = vld [vmem:[#allocation10 + $0x158] sm:$0xff] }
 0x2e9   : > { %v6789_v54 = vpop.f32.mrf.mxu0  ;;  %v6808_v5 = vpop.f32.mrf.mxu1  ;;  %3181 = vmatpush1.msra.mxu1 %v3150_v43  ;;  %v6864_v43 = vld [vmem:[#allocation10 + $0x138] sm:$0xff] }
 0x2ea   : > { %3182 = vmatprep.subr.mxu1 %v3149_v42  ;;  %v3134_v42 = vld [vmem:[#allocation10 + $0x30] sm:$0xff] }
 0x2eb   : > { %2886 = vmatmul.mubr.f32.gmra.mxu0 %v6578_v14  ;;  %v2080_v30 = vpop.f32.mrf.mxu0  ;;  %3183 = vmatpush1.msra.mxu1 %v3148_v39  ;;  %v6867_v39 = vld [vmem:[#allocation10 + $0x130] sm:$0xff] }
 0x2ec   : > { %2890 = vmatprep.mubr.f32.mxu0 %v6541_v18  ;;  %v6806_v18 = vld [vmem:[#allocation10 + $0x1b0] sm:$0xff]  ;;  %3184 = vmatprep.subr.mxu1 %v3147_v32  ;;  %v3136_v30 = vld [vmem:[#allocation10 + $0x40] sm:$0xff] }
 0x2ed   : > { %v2083_v58 = vpop.f32.mrf.mxu0  ;;  %3771 = vmatpush1.msra.mxu0 %v6806_v18 }
 0x2ee   : > { %v6801_v9 = vadd.f32 %v5002_v20, %v2083_v58  ;;  %3772 = vmatprep.subr.mxu0 %v6814_v48  ;;  %v6861_v20 = vld [vmem:[#allocation10 + $0x140] sm:$0xff] }
 0x2ef   : > { %2891 = vmatmul.mubr.f32.gmra.mxu0 %v6587_v62  ;;  %v2085_v21 = vpop.f32.mrf.mxu0  ;;  %v5005_v14 = vpop.f32.mrf.mxu1  ;;  %v3146_v62 = vld [vmem:[#allocation10 + $0x90] sm:$0xff] }
 0x2f0   : > { %2895 = vmatprep.mubr.f32.mxu0 %v6555_v11  ;;  %v6818_v11 = vld [vmem:[#allocation10 + $0x1a0] sm:$0xff]  ;;  %3185 = vmatpush1.msra.mxu1 %v3146_v62  ;;  %v6870_v62 = vld [vmem:[#allocation10 + $0x128] sm:$0xff] }
 0x2f1   : > { %v6811_v59 = vpop.f32.mrf.mxu0  ;;  %3186 = vmatprep.subr.mxu1 %v3145_v36  ;;  %v6826_v37 = vpop.f32.mrf.mxu1  ;;  %3773 = vmatpush1.msra.mxu0 %v6818_v11  ;;  %7288 = vst [vmem:[#allocation19_spill] sm:$0xff] %v6870_v62  ;;  %v3132_v36 = vld [vmem:[#allocation10 + $0x20] sm:$0xff] }
 0x2f2   : > { %3187 = vmatpush1.msra.mxu1 %v3144_v51  ;;  %3774 = vmatprep.subr.mxu0 %v6821_v7 }
 0x2f3   : > { %2896 = vmatmul.mubr.f32.gmra.mxu0 %v6598_v8  ;;  %v2090_v6 = vpop.f32.mrf.mxu0  ;;  %v3143_v8 = vld [vmem:[#allocation10 + $0x78] sm:$0xff] }
 0x2f4   : > { %2900 = vmatprep.mubr.f32.mxu0 %v6569_v15  ;;  %3775 = vmatpush1.msra.mxu0 %v6824_v46 }
 0x2f5   : > { %v2093_v31 = vpop.f32.mrf.mxu0  ;;  %3188 = vmatprep.subr.mxu1 %v3143_v8  ;;  %3776 = vmatprep.subr.mxu0 %v6831_v24  ;;  %v3131_v8 = vld [vmem:[#allocation10 + $0x18] sm:$0xff] }
 0x2f6   : > { %v6828_v3 = vadd.f32 %v5005_v14, %v2093_v31  ;;  %3189 = vmatpush1.msra.mxu1 %v3142_v34  ;;  %3777 = vmatpush1.msra.mxu0 %v6835_v0  ;;  %v3133_v14 = vld [vmem:[#allocation10 + $0x28] sm:$0xff]  ;;  %v6875_v31 = vld [vmem:[#allocation10 + $0x120] sm:$0xff]  ;;  %v3130_v34 = vld [vmem:[#allocation10 + $0x10] sm:$0xff] }
 0x2f7   : > { %2901 = vmatmul.mubr.f32.gmra.mxu0 %v6609_v22  ;;  %v2095_v15 = vpop.f32.mrf.mxu0  ;;  %v5008_v56 = vpop.f32.mrf.mxu1  ;;  %3778 = vmatprep.subr.mxu0 %v6839_v38  ;;  %7289 = vst [vmem:[#allocation18_spill] sm:$0xff] %v6875_v31 }
 0x2f8   : > { %2905 = vmatprep.mubr.f32.mxu0 %v6611_v25  ;;  %3190 = vmatprep.subr.mxu1 %v3141_v4  ;;  %v6878_v15 = vld [vmem:[#allocation10 + $0x118] sm:$0xff]  ;;  %v3129_v4 = vld [vmem:[#allocation10 + $0x8] sm:$0xff] }
 0x2f9   : > { %v2098_v1 = vpop.f32.mrf.mxu0  ;;  %v2259_v22 = vpop.f32.mrf.mxu1  ;;  %3779 = vmatpush1.msra.mxu0 %v6842_v2  ;;  %3191 = vmatpush1.msra.mxu1 %v3140_v49  ;;  %7290 = vst [vmem:[#allocation20_spill] sm:$0xff] %v6878_v15  ;;  %v6886_v49 = vld [vmem:[#allocation10 + $0x108] sm:$0xff] }
 0x2fa   : > { %3780 = vmatprep.subr.mxu0 %v6845_v60  ;;  %3192 = vmatprep.subr.mxu1 %v3139_v23  ;;  %v6881_v1 = vld [vmem:[#allocation10 + $0x110] sm:$0xff]  ;;  %7292 = vst [vmem:[#allocation23_spill] sm:$0xff] %v6886_v49 }
 0x2fb   : > { %2906 = vmatmul.mubr.f32.gmra.mxu0 %v6618_v61  ;;  %v2099_v25 = vpop.f32.mrf.mxu0  ;;  %v6858_v61 = vld [vmem:[#allocation10 + $0x148] sm:$0xff]  ;;  %3193 = vmatpush1.msra.mxu1 %v3138_v57  ;;  %7291 = vst [vmem:[#allocation22_spill] sm:$0xff] %v6881_v1  ;;  %v6889_v57 = vld [vmem:[#allocation10 + $0x100] sm:$0xff] }
 0x2fc   : > { %3781 = vmatpush1.msra.mxu0 %v6849_v19  ;;  %3194 = vmatprep.subr.mxu1 %v3137_v50  ;;  %v3128_v25 = vld [vmem:[#allocation10] sm:$0xff]  ;;  %7293 = vst [vmem:[#allocation24_spill] sm:$0xff] %v6889_v57 }
 0x2fd   : > { %v2102_v28 = vpop.f32.mrf.mxu0  ;;  %3782 = vmatprep.subr.mxu0 %v6852_v16  ;;  %3195 = vmatpush1.msra.mxu1 %v3136_v30 }
 0x2fe   : > { %3783 = vmatpush1.msra.mxu0 %v6855_v27  ;;  %3196 = vmatprep.subr.mxu1 %v3135_v26 }
 0x2ff   : > { %v2103_v35 = vpop.f32.mrf.mxu0  ;;  %v5011_v58 = vpop.f32.mrf.mxu1  ;;  %3784 = vmatprep.subr.mxu0 %v6858_v61  ;;  %3197 = vmatpush1.msra.mxu1 %v3134_v42 }
 0x300   : > { %3785 = vmatpush1.msra.mxu0 %v6861_v20  ;;  %3198 = vmatprep.subr.mxu1 %v3133_v14 }
 0x301   : > { %v2106_v21 = vpop.f32.mrf.mxu0  ;;  %v2267_v32 = vpop.f32.mrf.mxu1  ;;  %3786 = vmatprep.subr.mxu0 %v6864_v43  ;;  %3199 = vmatpush1.msra.mxu1 %v3132_v36 }
 0x302   : > { %v6872_v6 = vadd.f32 %v2267_v32, %v2106_v21  ;;  %3787 = vmatpush1.msra.mxu0 %v6867_v39  ;;  %3200 = vmatprep.subr.mxu1 %v3131_v8 }
 0x303   : > { %v2108_v51 = vpop.f32.mrf.mxu0  ;;  %3788 = vmatprep.subr.mxu0 %v6870_v62  ;;  %3201 = vmatpush1.msra.mxu1 %v3130_v34 }
 0x304   : > { %3789 = vmatpush1.msra.mxu0 %v6875_v31  ;;  %3202 = vmatprep.subr.mxu1 %v3129_v4 }
 0x305   : > { %v2111_v56 = vpop.f32.mrf.mxu0  ;;  %3790 = vmatprep.subr.mxu0 %v6878_v15  ;;  %3203 = vmatpush1.msra.mxu1 %v3128_v25 }
 0x306   : > { %v6883_v22 = vadd.f32 %v5011_v58, %v2111_v56  ;;  %3791 = vmatpush1.msra.mxu0 %v6881_v1  ;;  %3826 = vmatprep.mubr.f32.mxu0 %v7284_v12 }
 0x307   : > { %v2113_v23 = vpop.f32.mrf.mxu0  ;;  %v5014_v28 = vpop.f32.mrf.mxu1  ;;  %3792 = vmatprep.subr.mxu0 %v6886_v49  ;;  %5148 = vmatprep.subr.mxu1 %v6753_v63 }
 0x308   : > { %3793 = vmatpush1.msra.mxu0 %v6889_v57 }
 0x309   : > { %v2116_v50 = vpop.f32.mrf.mxu0  ;;  %v2277_v30 = vpop.f32.mrf.mxu1 }
 0x30a   : > { %v6895_v35 = vadd.f32 %v2277_v30, %v2116_v50 }
 0x30b   : > { %v2118_v26 = vpop.f32.mrf.mxu0 }
 0x30d   : > { %v2121_v58 = vpop.f32.mrf.mxu0 }
 0x30e   : > { %v6898_v42 = vadd.f32 %v5014_v28, %v2121_v58 }
 0x30f   : > { %v2123_v21 = vpop.f32.mrf.mxu0  ;;  %v5017_v14 = vpop.f32.mrf.mxu1 }
 0x311   : > { %v2126_v32 = vpop.f32.mrf.mxu0  ;;  %v2287_v36 = vpop.f32.mrf.mxu1 }
 0x312   : > { %v6900_v51 = vadd.f32 %v2287_v36, %v2126_v32 }
 0x313   : > { %v2128_v8 = vpop.f32.mrf.mxu0 }
 0x315   : > { %v2131_v34 = vpop.f32.mrf.mxu0 }
 0x316   : > { %v6902_v56 = vadd.f32 %v5017_v14, %v2131_v34 }
 0x317   : > { %v2133_v4 = vpop.f32.mrf.mxu0  ;;  %v5020_v25 = vpop.f32.mrf.mxu1 }
 0x319   : > { %v2136_v23 = vpop.f32.mrf.mxu0  ;;  %v2297_v50 = vpop.f32.mrf.mxu1 }
 0x31a   : > { %v6904_v30 = vadd.f32 %v2297_v50, %v2136_v23 }
 0x31b   : > { %v2138_v63 = vpop.f32.mrf.mxu0 }
 0x31c   : > { %v5023_v26 = vpop.f32.mrf.mxu1 }
 0x31d   : > { %v2141_v28 = vpop.f32.mrf.mxu0 }
 0x31e   : > { %v6906_v58 = vadd.f32 %v5020_v25, %v2141_v28  ;;  %v2307_v21 = vpop.f32.mrf.mxu1  ;;  %v2230_v25 = vadd.f32 %v6791_v17, %v6775_v52 }
 0x31f   : > { %v2143_v57 = vpop.f32.mrf.mxu0 }
 0x320   : > { %v2429_v49 = vpop.f32.mrf.mxu1 }
 0x321   : > { %v2146_v32 = vpop.f32.mrf.mxu0 }
 0x322   : > { %v2430_v36 = vpop.f32.mrf.mxu1 }
 0x323   : > { %v2147_v8 = vpop.f32.mrf.mxu0 }
 0x324   : > { %v2433_v1 = vpop.f32.mrf.mxu1 }
 0x325   : > { %v2150_v14 = vpop.f32.mrf.mxu0 }
 0x326   : > { %v2435_v34 = vpop.f32.mrf.mxu1 }
 0x327   : > { %v2151_v4 = vpop.f32.mrf.mxu0 }
 0x328   : > { %v2438_v15 = vpop.f32.mrf.mxu1  ;;  %v2240_v4 = vadd.f32 %v6808_v5, %v6789_v54  ;;  %v2250_v54 = vadd.f32 %v6826_v37, %v6811_v59 }
 0x329   : > { %v5058_v31 = vpop.f32.mrf.mxu0 }
 0x32a   : > { %v6908_v62 = vadd.f32 %v5058_v31, %v2433_v1  ;;  %v2440_v23 = vpop.f32.mrf.mxu1 }
 0x32b   : > { %v2590_v50 = vpop.f32.mrf.mxu0 }
 0x32c   : > { %v2443_v63 = vpop.f32.mrf.mxu1 }
 0x32e   : > { %v5061_v26 = vpop.f32.mrf.mxu0  ;;  %v2445_v49 = vpop.f32.mrf.mxu1 }
 0x32f   : > { %v2605_v57 = vadd.f32 %v5061_v26, %v2443_v63 }
 0x330   : > { %v2599_v28 = vpop.f32.mrf.mxu0  ;;  %v2448_v36 = vpop.f32.mrf.mxu1 }
 0x331   : > { %v6912_v21 = vadd.f32 %v2605_v57, %v2230_v25  ;;  %v2600_v32 = vadd.f32 %v2599_v28, %v2438_v15 }
 0x332   : > { %v5064_v14 = vpop.f32.mrf.mxu0  ;;  %v2450_v31 = vpop.f32.mrf.mxu1 }
 0x333   : > { %v6915_v8 = vadd.f32 %v2600_v32, %v6763_v33 }
 0x334   : > { %v2609_v1 = vpop.f32.mrf.mxu0 }
 0x335   : > { %v2453_v34 = vpop.f32.mrf.mxu1  ;;  %v2610_v23 = vadd.f32 %v2609_v1, %v2448_v36 }
 0x336   : > { %v2615_v50 = vadd.f32 %v5064_v14, %v2453_v34 }
 0x337   : > { %v5067_v52 = vpop.f32.mrf.mxu0  ;;  %v2455_v17 = vpop.f32.mrf.mxu1  ;;  %v6920_v63 = vadd.f32 %v2610_v23, %v6782_v44 }
 0x338   : > { %v6922_v26 = vadd.f32 %v2615_v50, %v2240_v4 }
 0x339   : > { %v2619_v15 = vpop.f32.mrf.mxu0 }
 0x33a   : > { %v2458_v25 = vpop.f32.mrf.mxu1 }
 0x33b   : > { %v2620_v33 = vadd.f32 %v2619_v15, %v2458_v25 }
 0x33c   : > { %v5070_v57 = vpop.f32.mrf.mxu0  ;;  %v2460_v49 = vpop.f32.mrf.mxu1 }
 0x33d   : > { %v6925_v28 = vadd.f32 %v2620_v33, %v6801_v9 }
 0x33e   : > { %v2629_v32 = vpop.f32.mrf.mxu0  ;;  %v2463_v31 = vpop.f32.mrf.mxu1 }
 0x33f   : > { %v2625_v5 = vadd.f32 %v5067_v52, %v2463_v31 }
 0x340   : > { %v2465_v14 = vpop.f32.mrf.mxu1 }
 0x341   : > { %v5073_v36 = vpop.f32.mrf.mxu0  ;;  %v6929_v44 = vadd.f32 %v2625_v5, %v2250_v54 }
 0x343   : > { %v2638_v1 = vpop.f32.mrf.mxu0  ;;  %v2468_v34 = vpop.f32.mrf.mxu1 }
 0x344   : > { %v2630_v4 = vadd.f32 %v2629_v32, %v2468_v34 }
 0x345   : > { %v2470_v23 = vpop.f32.mrf.mxu1  ;;  %v5076_v25 = vpop.f32.mrf.mxu0 }
 0x346   : > { %v6932_v50 = vadd.f32 %v2630_v4, %v6828_v3 }
 0x347   : > { %v2647_v57 = vpop.f32.mrf.mxu0 }
 0x348   : > { %v2473_v17 = vpop.f32.mrf.mxu1 }
 0x349   : > { %v5079_v31 = vpop.f32.mrf.mxu0 }
 0x34a   : > { %v2474_v9 = vpop.f32.mrf.mxu1 }
 0x34b   : > { %v2657_v3 = vpop.f32.mrf.mxu0 }
 0x34d   : > { %v2477_v15 = vpop.f32.mrf.mxu1 }
 0x34f   : > { %v2478_v33 = vpop.f32.mrf.mxu1  ;;  %v5082_v17 = vpop.f32.mrf.mxu0 }
 0x351   : > { %v2667_v33 = vpop.f32.mrf.mxu0 }
 0x352   : > { %v2481_v49 = vpop.f32.mrf.mxu1 }
 0x353   : > { %v2643_v59 = vadd.f32 %v5073_v36, %v2481_v49 }
 0x354   : > { %v2483_v37 = vpop.f32.mrf.mxu1 }
 0x355   : > { %v6935_v52 = vadd.f32 %v2643_v59, %v6872_v6 }
 0x356   : > { %v2486_v54 = vpop.f32.mrf.mxu1 }
 0x357   : > { %v2648_v5 = vadd.f32 %v2647_v57, %v2486_v54 }
 0x358   : > { %v2488_v32 = vpop.f32.mrf.mxu1 }
 0x359   : > { %v6938_v14 = vadd.f32 %v2648_v5, %v6883_v22 }
 0x35a   : > { %v2491_v1 = vpop.f32.mrf.mxu1 }
 0x35b   : > { %v2653_v34 = vadd.f32 %v5076_v25, %v2491_v1 }
 0x35c   : > { %v2493_v4 = vpop.f32.mrf.mxu1 }
 0x35d   : > { %v6941_v23 = vadd.f32 %v2653_v34, %v6895_v35 }
 0x35e   : > { %v2496_v36 = vpop.f32.mrf.mxu1 }
 0x35f   : > { %v2658_v9 = vadd.f32 %v2657_v3, %v2496_v36 }
 0x360   : > { %v2498_v15 = vpop.f32.mrf.mxu1 }
 0x361   : > { %v6944_v6 = vadd.f32 %v2658_v9, %v6898_v42 }
 0x362   : > { %v2501_v57 = vpop.f32.mrf.mxu1 }
 0x363   : > { %v2663_v49 = vadd.f32 %v5079_v31, %v2501_v57 }
 0x364   : > { %v2503_v59 = vpop.f32.mrf.mxu1 }
 0x365   : > { %v5085_v22 = vpop.f32.mrf.mxu0  ;;  %v6947_v37 = vadd.f32 %v2663_v49, %v6900_v51 }
 0x366   : > { %v2506_v25 = vpop.f32.mrf.mxu1 }
 0x367   : > { %v2668_v54 = vadd.f32 %v2667_v33, %v2506_v25  ;;  %v2677_v1 = vpop.f32.mrf.mxu0 }
 0x368   : > { %v2508_v5 = vpop.f32.mrf.mxu1 }
 0x369   : > { %v6950_v35 = vadd.f32 %v2668_v54, %v6902_v56 }
 0x36a   : > { %v2511_v32 = vpop.f32.mrf.mxu1 }
 0x36b   : > { %v2673_v3 = vadd.f32 %v5082_v17, %v2511_v32 }
 0x36c   : > { %v2513_v34 = vpop.f32.mrf.mxu1 }
 0x36d   : > { %v6953_v42 = vadd.f32 %v2673_v3, %v6904_v30  ;;  %v7294_v30 = vld [vmem:[#allocation21_spill] sm:$0xff] }
 0x36e   : > { %v2516_v4 = vpop.f32.mrf.mxu1  ;;  %v2220_v32 = vadd.f32 %v6773_v53, %v7294_v30 }
 0x36f   : > { %v2816_v31 = vpop.f32.mrf.mxu0  ;;  %v2678_v36 = vadd.f32 %v2677_v1, %v2516_v4 }
 0x370   : > { %v2518_v9 = vpop.f32.mrf.mxu1  ;;  %v2685_v4 = vadd.f32 %v6908_v62, %v2220_v32 }
 0x371   : > { %v2817_v15 = vpop.f32.mrf.mxu0  ;;  %v6956_v51 = vadd.f32 %v2678_v36, %v6906_v58 }
 0x372   : > { %v2521_v33 = vpop.f32.mrf.mxu1 }
 0x373   : > { %v2820_v57 = vpop.f32.mrf.mxu0  ;;  %v6962_v33 = vld [vmem:[#allocation9 + $0x1] ss:$0 sm:$0xff] }
 0x374   : > { %v2522_v49 = vpop.f32.mrf.mxu1 }
 0x375   : > { %v2821_v56 = vpop.f32.mrf.mxu0 }
 0x376   : > { %v5120_v22 = vpop.f32.mrf.mxu1 }
 0x377   : > { %v2824_v59 = vpop.f32.mrf.mxu0 }
 0x378   : > { %v2977_v25 = vpop.f32.mrf.mxu1 }
 0x379   : > { %v2826_v17 = vpop.f32.mrf.mxu0 }
 0x37a   : > { %v5123_v5 = vpop.f32.mrf.mxu1 }
 0x37b   : > { %v2829_v54 = vpop.f32.mrf.mxu0 }
 0x37c   : > { %v2991_v3 = vadd.f32 %v5123_v5, %v2829_v54  ;;  %v2985_v34 = vpop.f32.mrf.mxu1 }
 0x37d   : > { %v2831_v1 = vpop.f32.mrf.mxu0  ;;  %v2986_v58 = vadd.f32 %v2985_v34, %v2824_v59 }
 0x37e   : > { %v5126_v36 = vpop.f32.mrf.mxu1  ;;  %v3073_v9 = vadd.f32 %v2991_v3, %v6915_v8 }
 0x37f   : > { %v2834_v31 = vpop.f32.mrf.mxu0  ;;  %v3072_v15 = vadd.f32 %v2986_v58, %v2685_v4 }
 0x380   : > { %v2995_v49 = vpop.f32.mrf.mxu1  ;;  %v3097_v25 = vadd.f32 %v6962_v33, %v3073_v9 }
 0x381   : > { %v2836_v57 = vpop.f32.mrf.mxu0  ;;  %v3096_v56 = vadd.f32 %v6962_v33, %v3072_v15  ;;  %v2996_v22 = vadd.f32 %v2995_v49, %v2834_v31 }
 0x382   : > { %v5129_v53 = vpop.f32.mrf.mxu1  ;;  %v3113_v3 = vmax.f32 %v3097_v25, 0.0 }
 0x383   : > { %v2839_v17 = vpop.f32.mrf.mxu0  ;;  %v3112_v54 = vmax.f32 %v3096_v56, 0.0  ;;  %v3074_v62 = vadd.f32 %v2996_v22, %v6912_v21 }
 0x384   : > { %v3001_v59 = vadd.f32 %v5126_v36, %v2839_v17  ;;  %v3005_v30 = vpop.f32.mrf.mxu1 }
 0x385   : > { %v2841_v5 = vpop.f32.mrf.mxu0  ;;  %3237 = vmatmul.mubr.f32.vlgmr.msra.gmra.mxu1 %v3112_v54  ;;  %3827 = vmatmul.mubr.f32.vlgmr.msra.gmra.mxu0 %v3112_v54  ;;  %v3098_v1 = vadd.f32 %v6962_v33, %v3074_v62 }
 0x386   : > { %v5132_v32 = vpop.f32.mrf.mxu1  ;;  %3242 = vmatprep.mubr.f32.mxu1 %v7284_v12  ;;  %5164 = vmatpush1.msra.mxu1 %v6755_v45  ;;  %v3075_v34 = vadd.f32 %v3001_v59, %v6920_v63 }
 0x387   : > { %v2844_v8 = vpop.f32.mrf.mxu0  ;;  %3832 = vmatprep.mubr.f32.mxu0 %v7284_v12  ;;  %5149 = vmatprep.subr.mxu1 %v6765_v40  ;;  %v3114_v45 = vmax.f32 %v3098_v1, 0.0 }
 0x388   : > { %v3006_v4 = vadd.f32 %v3005_v30, %v2844_v8  ;;  %v3015_v58 = vpop.f32.mrf.mxu1  ;;  %5165 = vmatpush1.msra.mxu1 %v6767_v10  ;;  %v3099_v63 = vadd.f32 %v6962_v33, %v3075_v34 }
 0x389   : > { %v2846_v21 = vpop.f32.mrf.mxu0  ;;  %3243 = vmatmul.mubr.f32.gmra.mxu1 %v3113_v3  ;;  %3833 = vmatmul.mubr.f32.gmra.mxu0 %v3113_v3 }
 0x38a   : > { %v5135_v36 = vpop.f32.mrf.mxu1  ;;  %3248 = vmatprep.mubr.f32.mxu1 %v7284_v12  ;;  %3838 = vmatprep.mubr.f32.mxu0 %v7284_v12  ;;  %v3076_v9 = vadd.f32 %v3006_v4, %v6922_v26  ;;  %v3115_v49 = vmax.f32 %v3099_v63, 0.0 }
 0x38b   : > { %v2849_v31 = vpop.f32.mrf.mxu0  ;;  %5150 = vmatprep.subr.mxu1 %v6777_v41 }
 0x38c   : > { %v3011_v15 = vadd.f32 %v5129_v53, %v2849_v31  ;;  %v3025_v57 = vpop.f32.mrf.mxu1  ;;  %5166 = vmatpush1.msra.mxu1 %v6784_v29  ;;  %v3100_v56 = vadd.f32 %v6962_v33, %v3076_v9 }
 0x38d   : > { %v2851_v40 = vpop.f32.mrf.mxu0  ;;  %3249 = vmatmul.mubr.f32.gmra.mxu1 %v3114_v45  ;;  %3839 = vmatmul.mubr.f32.gmra.mxu0 %v3114_v45 }
 0x38e   : > { %3254 = vmatprep.mubr.f32.mxu1 %v7284_v12  ;;  %3844 = vmatprep.mubr.f32.mxu0 %v7284_v12  ;;  %v3077_v22 = vadd.f32 %v3011_v15, %v6925_v28  ;;  %v3116_v17 = vmax.f32 %v3100_v56, 0.0 }
 0x38f   : > { %v2854_v10 = vpop.f32.mrf.mxu0  ;;  %5151 = vmatprep.subr.mxu1 %v6793_v47 }
 0x390   : > { %v3016_v26 = vadd.f32 %v3015_v58, %v2854_v10  ;;  %5167 = vmatpush1.msra.mxu1 %v6795_v55  ;;  %v3101_v53 = vadd.f32 %v6962_v33, %v3077_v22 }
 0x391   : > { %v2856_v41 = vpop.f32.mrf.mxu0  ;;  %3255 = vmatmul.mubr.f32.gmra.mxu1 %v3115_v49  ;;  %3845 = vmatmul.mubr.f32.gmra.mxu0 %v3115_v49 }
 0x392   : > { %3260 = vmatprep.mubr.f32.mxu1 %v7284_v12  ;;  %3850 = vmatprep.mubr.f32.mxu0 %v7284_v12  ;;  %v3078_v25 = vadd.f32 %v3016_v26, %v6929_v44  ;;  %v3117_v55 = vmax.f32 %v3101_v53, 0.0  ;;  %v7295_v41 = vld [vmem:[#allocation19_spill] sm:$0xff] }
 0x393   : > { %v2859_v29 = vpop.f32.mrf.mxu0  ;;  %5152 = vmatprep.subr.mxu1 %v6803_v13  ;;  %v5138_v13 = vpop.f32.mrf.mxu1 }
 0x394   : > { %v3021_v54 = vadd.f32 %v5132_v32, %v2859_v29  ;;  %5168 = vmatpush1.msra.mxu1 %v6806_v18  ;;  %v3102_v62 = vadd.f32 %v6962_v33, %v3078_v25  ;;  %v7297_v25 = vld [vmem:[#allocation20_spill] sm:$0xff] }
 0x395   : > { %v2861_v28 = vpop.f32.mrf.mxu0  ;;  %3261 = vmatmul.mubr.f32.gmra.mxu1 %v3116_v17  ;;  %3851 = vmatmul.mubr.f32.gmra.mxu0 %v3116_v17 }
 0x396   : > { %3266 = vmatprep.mubr.f32.mxu1 %v7284_v12  ;;  %3856 = vmatprep.mubr.f32.mxu0 %v7284_v12  ;;  %v3079_v59 = vadd.f32 %v3021_v54, %v6932_v50  ;;  %v3118_v5 = vmax.f32 %v3102_v62, 0.0 }
 0x397   : > { %v2864_v47 = vpop.f32.mrf.mxu0  ;;  %5153 = vmatprep.subr.mxu1 %v6814_v48  ;;  %v3033_v48 = vpop.f32.mrf.mxu1 }
 0x398   : > { %5169 = vmatpush1.msra.mxu1 %v6818_v11  ;;  %v3103_v30 = vadd.f32 %v6962_v33, %v3079_v59  ;;  %v7298_v47 = vld [vmem:[#allocation22_spill] sm:$0xff]  ;;  %v7299_v59 = vld [vmem:[#allocation23_spill] sm:$0xff] }
 0x399   : > { %v2865_v44 = vpop.f32.mrf.mxu0  ;;  %3267 = vmatmul.mubr.f32.gmra.mxu1 %v3117_v55  ;;  %3857 = vmatmul.mubr.f32.gmra.mxu0 %v3117_v55 }
 0x39a   : > { %3272 = vmatprep.mubr.f32.mxu1 %v7284_v12  ;;  %3862 = vmatprep.mubr.f32.mxu0 %v7284_v12  ;;  %v3119_v50 = vmax.f32 %v3103_v30, 0.0  ;;  %v7300_v44 = vld [vmem:[#allocation24_spill] sm:$0xff] }
 0x39b   : > { %v2868_v18 = vpop.f32.mrf.mxu0  ;;  %5154 = vmatprep.subr.mxu1 %v6821_v7 }
 0x39c   : > { %5170 = vmatpush1.msra.mxu1 %v6824_v46  ;;  %v5141_v46 = vpop.f32.mrf.mxu1 }
 0x39d   : > { %v2869_v8 = vpop.f32.mrf.mxu0  ;;  %3273 = vmatmul.mubr.f32.gmra.mxu1 %v3118_v5  ;;  %3863 = vmatmul.mubr.f32.gmra.mxu0 %v3118_v5 }
 0x39e   : > { %3278 = vmatprep.mubr.f32.mxu1 %v7284_v12  ;;  %3868 = vmatprep.mubr.f32.mxu0 %v7284_v12 }
 0x39f   : > { %v2872_v11 = vpop.f32.mrf.mxu0  ;;  %5155 = vmatprep.subr.mxu1 %v6831_v24 }
 0x3a0   : > { %v3034_v32 = vadd.f32 %v3033_v48, %v2872_v11  ;;  %5171 = vmatpush1.msra.mxu1 %v6835_v0 }
 0x3a1   : > { %v2874_v3 = vpop.f32.mrf.mxu0  ;;  %3279 = vmatmul.mubr.f32.gmra.mxu1 %v3119_v50  ;;  %3869 = vmatmul.mubr.f32.gmra.mxu0 %v3119_v50  ;;  %v3160_v50 = vld [vmem:[#allocation12] sm:$0x3] }
 0x3a2   : > { %v3080_v7 = vadd.f32 %v3034_v32, %v6935_v52  ;;  %3284 = vmatprep.mubr.f32.mxu1 %v7284_v12  ;;  %3874 = vmatprep.mubr.f32.mxu0 %v7284_v12  ;;  %v3043_v52 = vpop.f32.mrf.mxu1  ;;  %v3750_v32 = vld [vmem:[#allocation12] sm:$0x3] }
 0x3a3   : > { %v2877_v1 = vpop.f32.mrf.mxu0  ;;  %5156 = vmatprep.subr.mxu1 %v6839_v38 }
 0x3a4   : > { %v3104_v34 = vadd.f32 %v6962_v33, %v3080_v7  ;;  %v3039_v4 = vadd.f32 %v5138_v13, %v2877_v1  ;;  %5172 = vmatpush1.msra.mxu1 %v6842_v2 }
 0x3a5   : > { %v2879_v21 = vpop.f32.mrf.mxu0  ;;  %5157 = vmatprep.subr.mxu1 %v6845_v60  ;;  %v5144_v60 = vpop.f32.mrf.mxu1 }
 0x3a6   : > { %v3120_v24 = vmax.f32 %v3104_v34, 0.0  ;;  %v3081_v0 = vadd.f32 %v3039_v4, %v6938_v14  ;;  %5173 = vmatpush1.msra.mxu1 %v6849_v19 }
 0x3a7   : > { %v2882_v58 = vpop.f32.mrf.mxu0  ;;  %5158 = vmatprep.subr.mxu1 %v6852_v16  ;;  %v3053_v16 = vpop.f32.mrf.mxu1 }
 0x3a8   : > { %v3105_v31 = vadd.f32 %v6962_v33, %v3081_v0  ;;  %v3044_v36 = vadd.f32 %v3043_v52, %v2882_v58  ;;  %3285 = vmatmul.mubr.f32.gmra.mxu1 %v3120_v24  ;;  %3875 = vmatmul.mubr.f32.gmra.mxu0 %v3120_v24 }
 0x3a9   : > { %v2884_v45 = vpop.f32.mrf.mxu0  ;;  %3290 = vmatprep.mubr.f32.mxu1 %v7284_v12  ;;  %3880 = vmatprep.mubr.f32.mxu0 %v7284_v12 }
 0x3aa   : > { %v3121_v38 = vmax.f32 %v3105_v31, 0.0  ;;  %v3082_v2 = vadd.f32 %v3044_v36, %v6941_v23  ;;  %5174 = vmatpush1.msra.mxu1 %v6855_v27 }
 0x3ab   : > { %v2887_v14 = vpop.f32.mrf.mxu0  ;;  %5159 = vmatprep.subr.mxu1 %v6858_v61 }
 0x3ac   : > { %v3106_v19 = vadd.f32 %v6962_v33, %v3082_v2  ;;  %v3049_v63 = vadd.f32 %v5141_v46, %v2887_v14  ;;  %3291 = vmatmul.mubr.f32.gmra.mxu1 %v3121_v38  ;;  %3881 = vmatmul.mubr.f32.gmra.mxu0 %v3121_v38 }
 0x3ad   : > { %v2889_v9 = vpop.f32.mrf.mxu0  ;;  %3296 = vmatprep.mubr.f32.mxu1 %v7284_v12  ;;  %3886 = vmatprep.mubr.f32.mxu0 %v7284_v12 }
 0x3ae   : > { %v3122_v15 = vmax.f32 %v3106_v19, 0.0  ;;  %v3083_v40 = vadd.f32 %v3049_v63, %v6944_v6  ;;  %5175 = vmatpush1.msra.mxu1 %v6861_v20  ;;  %v5147_v6 = vpop.f32.mrf.mxu1 }
 0x3af   : > { %v2892_v23 = vpop.f32.mrf.mxu0  ;;  %5160 = vmatprep.subr.mxu1 %v6864_v43 }
 0x3b0   : > { %v3107_v27 = vadd.f32 %v6962_v33, %v3083_v40  ;;  %v3054_v57 = vadd.f32 %v3053_v16, %v2892_v23  ;;  %3297 = vmatmul.mubr.f32.gmra.mxu1 %v3122_v15  ;;  %3887 = vmatmul.mubr.f32.gmra.mxu0 %v3122_v15  ;;  %v3063_v43 = vpop.f32.mrf.mxu1 }
 0x3b1   : > { %v2894_v10 = vpop.f32.mrf.mxu0  ;;  %3302 = vmatprep.mubr.f32.mxu1 %v7284_v12  ;;  %3892 = vmatprep.mubr.f32.mxu0 %v7284_v12 }
 0x3b2   : > { %v3123_v49 = vmax.f32 %v3107_v27, 0.0  ;;  %v3084_v56 = vadd.f32 %v3054_v57, %v6947_v37  ;;  %5176 = vmatpush1.msra.mxu1 %v6867_v39  ;;  %v7296_v37 = vld [vmem:[#allocation18_spill] sm:$0xff] }
 0x3b3   : > { %v2897_v61 = vpop.f32.mrf.mxu0  ;;  %5161 = vmatprep.subr.mxu1 %v7295_v41 }
 0x3b4   : > { %v3108_v20 = vadd.f32 %v6962_v33, %v3084_v56  ;;  %v3059_v22 = vadd.f32 %v5144_v60, %v2897_v61  ;;  %3303 = vmatmul.mubr.f32.gmra.mxu1 %v3123_v49  ;;  %3893 = vmatmul.mubr.f32.gmra.mxu0 %v3123_v49 }
 0x3b5   : > { %v2899_v26 = vpop.f32.mrf.mxu0  ;;  %3308 = vmatprep.mubr.f32.mxu1 %v7284_v12  ;;  %5177 = vmatpush1.msra.mxu1 %v7296_v37 }
 0x3b6   : > { %v3124_v29 = vmax.f32 %v3108_v20, 0.0  ;;  %v3085_v17 = vadd.f32 %v3059_v22, %v6950_v35  ;;  %5162 = vmatprep.subr.mxu1 %v7297_v25 }
 0x3b7   : > { %v2902_v53 = vpop.f32.mrf.mxu0  ;;  %5178 = vmatpush1.msra.mxu1 %v7298_v47 }
 0x3b8   : > { %v3109_v39 = vadd.f32 %v6962_v33, %v3085_v17  ;;  %v3064_v54 = vadd.f32 %v3063_v43, %v2902_v53  ;;  %3309 = vmatmul.mubr.f32.gmra.mxu1 %v3124_v29  ;;  %5163 = vmatprep.subr.mxu1 %v7299_v59 }
 0x3b9   : > { %v2904_v28 = vpop.f32.mrf.mxu0  ;;  %3314 = vmatprep.mubr.f32.mxu1 %v7284_v12  ;;  %5179 = vmatpush1.msra.mxu1 %v7300_v44 }
 0x3ba   : > { %v3125_v55 = vmax.f32 %v3109_v39, 0.0  ;;  %v3086_v62 = vadd.f32 %v3064_v54, %v6953_v42 }
 0x3bb   : > { %v2907_v35 = vpop.f32.mrf.mxu0 }
 0x3bc   : > { %v3110_v13 = vadd.f32 %v6962_v33, %v3086_v62  ;;  %v3069_v18 = vadd.f32 %v5147_v6, %v2907_v35  ;;  %3315 = vmatmul.mubr.f32.gmra.mxu1 %v3125_v55 }
 0x3bd   : > { %v2909_v5 = vpop.f32.mrf.mxu0  ;;  %3320 = vmatprep.mubr.f32.mxu1 %v7284_v12 }
 0x3be   : > { %v3126_v30 = vmax.f32 %v3110_v13, 0.0  ;;  %v3087_v8 = vadd.f32 %v3069_v18, %v6956_v51  ;;  %v3162_v51 = vlaneseq }
 0x3c0   : > { %v3111_v48 = vadd.f32 %v6962_v33, %v3087_v8  ;;  %3321 = vmatmul.mubr.f32.gmra.mxu1 %v3126_v30  ;;  %v3163_v33 = vshrl.u32 %v3162_v51, 7 }
 0x3c1   : > { %3326 = vmatprep.mubr.f32.mxu1 %v7284_v12 }
 0x3c2   : > { %v3127_v42 = vmax.f32 %v3111_v48, 0.0  ;;  %v3164_v11 = vsub.s32 0, %v3163_v33  ;;  %v3168_v3 = vsub.s32 1, %v3163_v33 }
 0x3c4   : > { %3327 = vmatmul.mubr.f32.gmra.mxu1 %v3127_v42  ;;  %v7055_v7 = vrot.slane %v3160_v50, %v3164_v11  ;;  %v7057_v46 = vrot.slane %v3750_v32, %v3164_v11  ;;  %v7059_v1 = vrot.slane %v3160_v50, %v3168_v3  ;;  %v7061_v34 = vrot.slane %v3750_v32, %v3168_v3 }
 0x3c5   : > { %3898 = vmatprep.mubr.f32.mxu1 %v7284_v12 }
 0x3c8   : > { %3899 = vmatmul.mubr.f32.vlgmr.msra.gmra.mxu1 %v3124_v29 }
 0x3c9   : > { %3904 = vmatprep.mubr.f32.mxu1 %v7284_v12 }
 0x3cc   : > { %3905 = vmatmul.mubr.f32.gmra.mxu1 %v3125_v55 }
 0x3cd   : > { %3910 = vmatprep.mubr.f32.mxu1 %v7284_v12 }
 0x3d0   : > { %3911 = vmatmul.mubr.f32.gmra.mxu1 %v3126_v30 }
 0x3d1   : > { %3916 = vmatprep.mubr.f32.mxu1 %v7284_v12 }
 0x3d4   : > { %3917 = vmatmul.mubr.f32.gmra.mxu1 %v3127_v42 }
 0x445   : > { %v3238_v4 = vpop.f32.mrf.mxu1  ;;  %v3828_v21 = vpop.f32.mrf.mxu0 }
 0x446   : > { %v3239_v12 = vadd.f32 %v3238_v4, %v7055_v7  ;;  %v3829_v24 = vadd.f32 %v3828_v21, %v7057_v46 }
 0x447   : > { %v3240_v0 = vpop.f32.mrf.mxu1  ;;  %v3830_v52 = vpop.f32.mrf.mxu0 }
 0x448   : > { %v3241_v58 = vadd.f32 %v3240_v0, %v7059_v1  ;;  %v3831_v31 = vadd.f32 %v3830_v52, %v7061_v34  ;;  %v3333_v38 = vmax.f32 %v3239_v12, 0.0  ;;  %v3923_v2 = vmax.f32 %v3829_v24, 0.0 }
 0x449   : > { %v3244_v36 = vpop.f32.mrf.mxu1  ;;  %v3834_v45 = vpop.f32.mrf.mxu0 }
 0x44a   : > { %v3334_v60 = vmax.f32 %v3241_v58, 0.0  ;;  %v3924_v14 = vmax.f32 %v3831_v31, 0.0  ;;  %v3245_v19 = vadd.f32 %v3244_v36, %v7055_v7  ;;  %v3835_v63 = vadd.f32 %v3834_v45, %v7057_v46 }
 0x44b   : > { %v3246_v9 = vpop.f32.mrf.mxu1  ;;  %v3836_v15 = vpop.f32.mrf.mxu0 }
 0x44c   : > { %v3397_v40 = vcombine.low %v3333_v38, %v3334_v60  ;;  %v3398_v16 = vcombine.high %v3333_v38, %v3334_v60  ;;  %v3987_v23 = vcombine.low %v3923_v2, %v3924_v14  ;;  %v3988_v27 = vcombine.high %v3923_v2, %v3924_v14 }
 0x44d   : > { %v3247_v57 = vadd.f32 %v3246_v9, %v7059_v1  ;;  %v3837_v10 = vadd.f32 %v3836_v15, %v7061_v34  ;;  %v3250_v49 = vpop.f32.mrf.mxu1  ;;  %v3840_v56 = vpop.f32.mrf.mxu0  ;;  %v3335_v20 = vmax.f32 %v3245_v19, 0.0  ;;  %v3925_v22 = vmax.f32 %v3835_v63, 0.0 }
 0x44e   : > { %4454 = vst.sshfl [vmem:[%s7072_s26] sm:$0xff pattern:$0x75316420] %v3397_v40  ;;  %4455 = vst.sshfl [vmem:[%s7072_s26 + $0x8] sm:$0xff pattern:$0x75316420] %v3398_v16  ;;  %v3251_v61 = vadd.f32 %v3250_v49, %v7055_v7  ;;  %v3841_v6 = vadd.f32 %v3840_v56, %v7057_v46 }
 0x44f   : > { %4526 = vst.sshfl [vmem:[%s7072_s26 + $0x10] sm:$0xff pattern:$0x75316420] %v3987_v23  ;;  %4527 = vst.sshfl [vmem:[%s7072_s26 + $0x18] sm:$0xff pattern:$0x75316420] %v3988_v27  ;;  %v3252_v29 = vpop.f32.mrf.mxu1  ;;  %v3842_v17 = vpop.f32.mrf.mxu0 }
 0x450   : > { %v3336_v26 = vmax.f32 %v3247_v57, 0.0  ;;  %v3926_v41 = vmax.f32 %v3837_v10, 0.0  ;;  %v3253_v37 = vadd.f32 %v3252_v29, %v7059_v1  ;;  %v3843_v43 = vadd.f32 %v3842_v17, %v7061_v34 }
 0x451   : > { %v3256_v28 = vpop.f32.mrf.mxu1  ;;  %v3846_v47 = vpop.f32.mrf.mxu0  ;;  %v3337_v55 = vmax.f32 %v3251_v61, 0.0  ;;  %v3927_v62 = vmax.f32 %v3841_v6, 0.0 }
 0x452   : > { %v3399_v53 = vcombine.low %v3335_v20, %v3336_v26  ;;  %v3400_v25 = vcombine.high %v3335_v20, %v3336_v26  ;;  %v3989_v39 = vcombine.low %v3925_v22, %v3926_v41  ;;  %v3990_v54 = vcombine.high %v3925_v22, %v3926_v41 }
 0x453   : > { %v3338_v59 = vmax.f32 %v3253_v37, 0.0  ;;  %v3928_v35 = vmax.f32 %v3843_v43, 0.0  ;;  %v3257_v44 = vadd.f32 %v3256_v28, %v7055_v7  ;;  %v3847_v13 = vadd.f32 %v3846_v47, %v7057_v46  ;;  %v3258_v18 = vpop.f32.mrf.mxu1  ;;  %v3848_v5 = vpop.f32.mrf.mxu0 }
 0x454   : > { %4456 = vst.sshfl [vmem:[%s7072_s26 + $0x20] sm:$0xff pattern:$0x75316420] %v3399_v53  ;;  %4457 = vst.sshfl [vmem:[%s7072_s26 + $0x28] sm:$0xff pattern:$0x75316420] %v3400_v25  ;;  %v3259_v51 = vadd.f32 %v3258_v18, %v7059_v1  ;;  %v3849_v33 = vadd.f32 %v3848_v5, %v7061_v34 }
 0x455   : > { %4528 = vst.sshfl [vmem:[%s7072_s26 + $0x30] sm:$0xff pattern:$0x75316420] %v3989_v39  ;;  %4529 = vst.sshfl [vmem:[%s7072_s26 + $0x38] sm:$0xff pattern:$0x75316420] %v3990_v54  ;;  %v3401_v30 = vcombine.low %v3337_v55, %v3338_v59  ;;  %v3402_v8 = vcombine.high %v3337_v55, %v3338_v59  ;;  %v3991_v48 = vcombine.low %v3927_v62, %v3928_v35  ;;  %v3262_v11 = vpop.f32.mrf.mxu1  ;;  %v3852_v50 = vpop.f32.mrf.mxu0 }
 0x456   : > { %v3992_v42 = vcombine.high %v3927_v62, %v3928_v35  ;;  %v3263_v32 = vadd.f32 %v3262_v11, %v7055_v7  ;;  %v3853_v3 = vadd.f32 %v3852_v50, %v7057_v46  ;;  %v3339_v4 = vmax.f32 %v3257_v44, 0.0 }
 0x457   : > { %4458 = vst.sshfl [vmem:[%s7072_s26 + $0x40] sm:$0xff pattern:$0x75316420] %v3401_v30  ;;  %4459 = vst.sshfl [vmem:[%s7072_s26 + $0x48] sm:$0xff pattern:$0x75316420] %v3402_v8  ;;  %v3264_v0 = vpop.f32.mrf.mxu1  ;;  %v3854_v52 = vpop.f32.mrf.mxu0 }
 0x458   : > { %4530 = vst.sshfl [vmem:[%s7072_s26 + $0x50] sm:$0xff pattern:$0x75316420] %v3991_v48  ;;  %4531 = vst.sshfl [vmem:[%s7072_s26 + $0x58] sm:$0xff pattern:$0x75316420] %v3992_v42  ;;  %v3265_v58 = vadd.f32 %v3264_v0, %v7059_v1  ;;  %v3855_v31 = vadd.f32 %v3854_v52, %v7061_v34 }
 0x459   : > { %v3929_v21 = vmax.f32 %v3847_v13, 0.0  ;;  %v3340_v12 = vmax.f32 %v3259_v51, 0.0  ;;  %v3930_v24 = vmax.f32 %v3849_v33, 0.0  ;;  %v3268_v60 = vpop.f32.mrf.mxu1  ;;  %v3858_v14 = vpop.f32.mrf.mxu0  ;;  %v3341_v19 = vmax.f32 %v3263_v32, 0.0 }
 0x45a   : > { %v3931_v63 = vmax.f32 %v3853_v3, 0.0  ;;  %v3342_v9 = vmax.f32 %v3265_v58, 0.0  ;;  %v3932_v15 = vmax.f32 %v3855_v31, 0.0  ;;  %v3269_v40 = vadd.f32 %v3268_v60, %v7055_v7 }
 0x45b   : > { %v3403_v36 = vcombine.low %v3339_v4, %v3340_v12  ;;  %v3404_v45 = vcombine.high %v3339_v4, %v3340_v12  ;;  %v3993_v38 = vcombine.low %v3929_v21, %v3930_v24  ;;  %v3994_v2 = vcombine.high %v3929_v21, %v3930_v24  ;;  %v3270_v23 = vpop.f32.mrf.mxu1  ;;  %v3860_v27 = vpop.f32.mrf.mxu0 }
 0x45c   : > { %v3859_v16 = vadd.f32 %v3858_v14, %v7057_v46  ;;  %v3405_v57 = vcombine.low %v3341_v19, %v3342_v9  ;;  %v3406_v10 = vcombine.high %v3341_v19, %v3342_v9  ;;  %v3995_v49 = vcombine.low %v3931_v63, %v3932_v15 }
 0x45d   : > { %4460 = vst.sshfl [vmem:[%s7072_s26 + $0x60] sm:$0xff pattern:$0x75316420] %v3403_v36  ;;  %4461 = vst.sshfl [vmem:[%s7072_s26 + $0x68] sm:$0xff pattern:$0x75316420] %v3404_v45  ;;  %v3996_v56 = vcombine.high %v3931_v63, %v3932_v15  ;;  %v3271_v61 = vadd.f32 %v3270_v23, %v7059_v1  ;;  %v3861_v6 = vadd.f32 %v3860_v27, %v7061_v34  ;;  %v3274_v20 = vpop.f32.mrf.mxu1  ;;  %v3864_v22 = vpop.f32.mrf.mxu0 }
 0x45e   : > { %4532 = vst.sshfl [vmem:[%s7072_s26 + $0x70] sm:$0xff pattern:$0x75316420] %v3993_v38  ;;  %4533 = vst.sshfl [vmem:[%s7072_s26 + $0x78] sm:$0xff pattern:$0x75316420] %v3994_v2  ;;  %v3275_v26 = vadd.f32 %v3274_v20, %v7055_v7  ;;  %v3865_v41 = vadd.f32 %v3864_v22, %v7057_v46 }
 0x45f   : > { %4462 = vst.sshfl [vmem:[%s7072_s26 + $0x80] sm:$0xff pattern:$0x75316420] %v3405_v57  ;;  %4463 = vst.sshfl [vmem:[%s7072_s26 + $0x88] sm:$0xff pattern:$0x75316420] %v3406_v10  ;;  %v3276_v53 = vpop.f32.mrf.mxu1  ;;  %v3866_v25 = vpop.f32.mrf.mxu0 }
 0x460   : > { %4534 = vst.sshfl [vmem:[%s7072_s26 + $0x90] sm:$0xff pattern:$0x75316420] %v3995_v49  ;;  %4535 = vst.sshfl [vmem:[%s7072_s26 + $0x98] sm:$0xff pattern:$0x75316420] %v3996_v56  ;;  %v3277_v39 = vadd.f32 %v3276_v53, %v7059_v1  ;;  %v3867_v54 = vadd.f32 %v3866_v25, %v7061_v34 }
 0x461   : > { %v3343_v29 = vmax.f32 %v3269_v40, 0.0  ;;  %v3933_v17 = vmax.f32 %v3859_v16, 0.0  ;;  %v3344_v37 = vmax.f32 %v3271_v61, 0.0  ;;  %v3934_v43 = vmax.f32 %v3861_v6, 0.0  ;;  %v3280_v59 = vpop.f32.mrf.mxu1  ;;  %v3870_v35 = vpop.f32.mrf.mxu0 }
 0x462   : > { %v3345_v44 = vmax.f32 %v3275_v26, 0.0  ;;  %v3935_v13 = vmax.f32 %v3865_v41, 0.0  ;;  %v3346_v18 = vmax.f32 %v3277_v39, 0.0  ;;  %v3936_v5 = vmax.f32 %v3867_v54, 0.0 }
 0x463   : > { %v3407_v28 = vcombine.low %v3343_v29, %v3344_v37  ;;  %v3408_v47 = vcombine.high %v3343_v29, %v3344_v37  ;;  %v3997_v55 = vcombine.low %v3933_v17, %v3934_v43  ;;  %v3998_v62 = vcombine.high %v3933_v17, %v3934_v43  ;;  %v3282_v48 = vpop.f32.mrf.mxu1  ;;  %v3872_v42 = vpop.f32.mrf.mxu0 }
 0x464   : > { %v3281_v30 = vadd.f32 %v3280_v59, %v7055_v7  ;;  %v3871_v8 = vadd.f32 %v3870_v35, %v7057_v46  ;;  %v3409_v51 = vcombine.low %v3345_v44, %v3346_v18  ;;  %v3410_v33 = vcombine.high %v3345_v44, %v3346_v18 }
 0x465   : > { %4464 = vst.sshfl [vmem:[%s7072_s26 + $0xa0] sm:$0xff pattern:$0x75316420] %v3407_v28  ;;  %4465 = vst.sshfl [vmem:[%s7072_s26 + $0xa8] sm:$0xff pattern:$0x75316420] %v3408_v47  ;;  %v3999_v11 = vcombine.low %v3935_v13, %v3936_v5  ;;  %v4000_v50 = vcombine.high %v3935_v13, %v3936_v5  ;;  %v3283_v32 = vadd.f32 %v3282_v48, %v7059_v1 }
 0x466   : > { %4536 = vst.sshfl [vmem:[%s7072_s26 + $0xb0] sm:$0xff pattern:$0x75316420] %v3997_v55  ;;  %4537 = vst.sshfl [vmem:[%s7072_s26 + $0xb8] sm:$0xff pattern:$0x75316420] %v3998_v62  ;;  %v3873_v3 = vadd.f32 %v3872_v42, %v7061_v34 }
 0x467   : > { %4466 = vst.sshfl [vmem:[%s7072_s26 + $0xc0] sm:$0xff pattern:$0x75316420] %v3409_v51  ;;  %4467 = vst.sshfl [vmem:[%s7072_s26 + $0xc8] sm:$0xff pattern:$0x75316420] %v3410_v33 }
 0x468   : > { %4538 = vst.sshfl [vmem:[%s7072_s26 + $0xd0] sm:$0xff pattern:$0x75316420] %v3999_v11  ;;  %4539 = vst.sshfl [vmem:[%s7072_s26 + $0xd8] sm:$0xff pattern:$0x75316420] %v4000_v50  ;;  %v3286_v0 = vpop.f32.mrf.mxu1  ;;  %v3876_v52 = vpop.f32.mrf.mxu0 }
 0x469   : > { %v3347_v4 = vmax.f32 %v3281_v30, 0.0  ;;  %v3937_v21 = vmax.f32 %v3871_v8, 0.0  ;;  %v3348_v12 = vmax.f32 %v3283_v32, 0.0  ;;  %v3938_v24 = vmax.f32 %v3873_v3, 0.0 }
 0x46a   : > { %v3287_v58 = vadd.f32 %v3286_v0, %v7055_v7  ;;  %v3877_v31 = vadd.f32 %v3876_v52, %v7057_v46  ;;  %v3288_v60 = vpop.f32.mrf.mxu1  ;;  %v3878_v14 = vpop.f32.mrf.mxu0 }
 0x46b   : > { %v3411_v36 = vcombine.low %v3347_v4, %v3348_v12  ;;  %v3412_v45 = vcombine.high %v3347_v4, %v3348_v12  ;;  %v4001_v38 = vcombine.low %v3937_v21, %v3938_v24  ;;  %v4002_v2 = vcombine.high %v3937_v21, %v3938_v24 }
 0x46c   : > { %v3289_v19 = vadd.f32 %v3288_v60, %v7059_v1  ;;  %v3879_v63 = vadd.f32 %v3878_v14, %v7061_v34  ;;  %v3292_v9 = vpop.f32.mrf.mxu1  ;;  %v3882_v15 = vpop.f32.mrf.mxu0  ;;  %v3349_v40 = vmax.f32 %v3287_v58, 0.0  ;;  %v3939_v16 = vmax.f32 %v3877_v31, 0.0 }
 0x46d   : > { %4468 = vst.sshfl [vmem:[%s7072_s26 + $0xe0] sm:$0xff pattern:$0x75316420] %v3411_v36  ;;  %4469 = vst.sshfl [vmem:[%s7072_s26 + $0xe8] sm:$0xff pattern:$0x75316420] %v3412_v45  ;;  %v3293_v57 = vadd.f32 %v3292_v9, %v7055_v7  ;;  %v3883_v10 = vadd.f32 %v3882_v15, %v7057_v46 }
 0x46e   : > { %4540 = vst.sshfl [vmem:[%s7072_s26 + $0xf0] sm:$0xff pattern:$0x75316420] %v4001_v38  ;;  %4541 = vst.sshfl [vmem:[%s7072_s26 + $0xf8] sm:$0xff pattern:$0x75316420] %v4002_v2  ;;  %v3294_v49 = vpop.f32.mrf.mxu1  ;;  %v3884_v56 = vpop.f32.mrf.mxu0 }
 0x46f   : > { %v3350_v23 = vmax.f32 %v3289_v19, 0.0  ;;  %v3940_v27 = vmax.f32 %v3879_v63, 0.0  ;;  %v3295_v26 = vadd.f32 %v3294_v49, %v7059_v1  ;;  %v3885_v41 = vadd.f32 %v3884_v56, %v7061_v34 }
 0x470   : > { %v3298_v29 = vpop.f32.mrf.mxu1  ;;  %v3888_v17 = vpop.f32.mrf.mxu0  ;;  %v3351_v53 = vmax.f32 %v3293_v57, 0.0  ;;  %v3941_v25 = vmax.f32 %v3883_v10, 0.0 }
 0x471   : > { %v3413_v61 = vcombine.low %v3349_v40, %v3350_v23  ;;  %v3414_v6 = vcombine.high %v3349_v40, %v3350_v23  ;;  %v4003_v20 = vcombine.low %v3939_v16, %v3940_v27  ;;  %v4004_v22 = vcombine.high %v3939_v16, %v3940_v27 }
 0x472   : > { %v3299_v37 = vadd.f32 %v3298_v29, %v7055_v7  ;;  %v3889_v43 = vadd.f32 %v3888_v17, %v7057_v46  ;;  %v3352_v39 = vmax.f32 %v3295_v26, 0.0  ;;  %v3942_v54 = vmax.f32 %v3885_v41, 0.0  ;;  %v3300_v28 = vpop.f32.mrf.mxu1  ;;  %v3890_v47 = vpop.f32.mrf.mxu0 }
 0x473   : > { %4470 = vst.sshfl [vmem:[%s7072_s26 + $0x100] sm:$0xff pattern:$0x75316420] %v3413_v61  ;;  %4471 = vst.sshfl [vmem:[%s7072_s26 + $0x108] sm:$0xff pattern:$0x75316420] %v3414_v6  ;;  %v3301_v55 = vadd.f32 %v3300_v28, %v7059_v1  ;;  %v3891_v62 = vadd.f32 %v3890_v47, %v7061_v34 }
 0x474   : > { %4542 = vst.sshfl [vmem:[%s7072_s26 + $0x110] sm:$0xff pattern:$0x75316420] %v4003_v20  ;;  %4543 = vst.sshfl [vmem:[%s7072_s26 + $0x118] sm:$0xff pattern:$0x75316420] %v4004_v22  ;;  %v3415_v59 = vcombine.low %v3351_v53, %v3352_v39  ;;  %v3416_v35 = vcombine.high %v3351_v53, %v3352_v39  ;;  %v4005_v44 = vcombine.low %v3941_v25, %v3942_v54  ;;  %v3304_v18 = vpop.f32.mrf.mxu1  ;;  %v3894_v5 = vpop.f32.mrf.mxu0 }
 0x475   : > { %v4006_v13 = vcombine.high %v3941_v25, %v3942_v54  ;;  %v3353_v30 = vmax.f32 %v3299_v37, 0.0  ;;  %v3943_v8 = vmax.f32 %v3889_v43, 0.0  ;;  %v3354_v48 = vmax.f32 %v3301_v55, 0.0 }
 0x476   : > { %v3944_v42 = vmax.f32 %v3891_v62, 0.0  ;;  %4472 = vst.sshfl [vmem:[%s7072_s26 + $0x120] sm:$0xff pattern:$0x75316420] %v3415_v59  ;;  %v3305_v51 = vadd.f32 %v3304_v18, %v7055_v7  ;;  %v3895_v33 = vadd.f32 %v3894_v5, %v7057_v46  ;;  %v3306_v11 = vpop.f32.mrf.mxu1  ;;  %v3896_v50 = vpop.f32.mrf.mxu0 }
 0x477   : > { %4473 = vst.sshfl [vmem:[%s7072_s26 + $0x128] sm:$0xff pattern:$0x75316420] %v3416_v35  ;;  %4544 = vst.sshfl [vmem:[%s7072_s26 + $0x130] sm:$0xff pattern:$0x75316420] %v4005_v44  ;;  %v3417_v32 = vcombine.low %v3353_v30, %v3354_v48  ;;  %v3418_v3 = vcombine.high %v3353_v30, %v3354_v48  ;;  %v3307_v12 = vadd.f32 %v3306_v11, %v7059_v1 }
 0x478   : > { %4545 = vst.sshfl [vmem:[%s7072_s26 + $0x138] sm:$0xff pattern:$0x75316420] %v4006_v13  ;;  %v4007_v4 = vcombine.low %v3943_v8, %v3944_v42  ;;  %v4008_v21 = vcombine.high %v3943_v8, %v3944_v42  ;;  %v3897_v24 = vadd.f32 %v3896_v50, %v7061_v34  ;;  %v3310_v0 = vpop.f32.mrf.mxu1  ;;  %v3355_v58 = vmax.f32 %v3305_v51, 0.0 }
 0x479   : > { %4474 = vst.sshfl [vmem:[%s7072_s26 + $0x140] sm:$0xff pattern:$0x75316420] %v3417_v32  ;;  %4475 = vst.sshfl [vmem:[%s7072_s26 + $0x148] sm:$0xff pattern:$0x75316420] %v3418_v3  ;;  %v3311_v52 = vadd.f32 %v3310_v0, %v7055_v7 }
 0x47a   : > { %4546 = vst.sshfl [vmem:[%s7072_s26 + $0x150] sm:$0xff pattern:$0x75316420] %v4007_v4  ;;  %4547 = vst.sshfl [vmem:[%s7072_s26 + $0x158] sm:$0xff pattern:$0x75316420] %v4008_v21  ;;  %v3312_v38 = vpop.f32.mrf.mxu1 }
 0x47b   : > { %v3945_v31 = vmax.f32 %v3895_v33, 0.0  ;;  %v3356_v36 = vmax.f32 %v3307_v12, 0.0  ;;  %v3946_v45 = vmax.f32 %v3897_v24, 0.0  ;;  %v3313_v2 = vadd.f32 %v3312_v38, %v7059_v1 }
 0x47c   : > { %v3316_v9 = vpop.f32.mrf.mxu1  ;;  %v3357_v15 = vmax.f32 %v3311_v52, 0.0 }
 0x47d   : > { %v3419_v60 = vcombine.low %v3355_v58, %v3356_v36  ;;  %v3420_v14 = vcombine.high %v3355_v58, %v3356_v36  ;;  %v4009_v19 = vcombine.low %v3945_v31, %v3946_v45  ;;  %v4010_v63 = vcombine.high %v3945_v31, %v3946_v45 }
 0x47e   : > { %v3358_v40 = vmax.f32 %v3313_v2, 0.0  ;;  %v3317_v16 = vadd.f32 %v3316_v9, %v7055_v7  ;;  %v3318_v23 = vpop.f32.mrf.mxu1 }
 0x47f   : > { %4476 = vst.sshfl [vmem:[%s7072_s26 + $0x160] sm:$0xff pattern:$0x75316420] %v3419_v60  ;;  %4477 = vst.sshfl [vmem:[%s7072_s26 + $0x168] sm:$0xff pattern:$0x75316420] %v3420_v14  ;;  %v3319_v10 = vadd.f32 %v3318_v23, %v7059_v1 }
 0x480   : > { %4548 = vst.sshfl [vmem:[%s7072_s26 + $0x170] sm:$0xff pattern:$0x75316420] %v4009_v19  ;;  %4549 = vst.sshfl [vmem:[%s7072_s26 + $0x178] sm:$0xff pattern:$0x75316420] %v4010_v63  ;;  %v3421_v27 = vcombine.low %v3357_v15, %v3358_v40  ;;  %v3422_v57 = vcombine.high %v3357_v15, %v3358_v40  ;;  %v3322_v49 = vpop.f32.mrf.mxu1 }
 0x481   : > { %v3359_v56 = vmax.f32 %v3317_v16, 0.0  ;;  %v3360_v61 = vmax.f32 %v3319_v10, 0.0  ;;  %v3323_v6 = vadd.f32 %v3322_v49, %v7055_v7 }
 0x482   : > { %4478 = vst.sshfl [vmem:[%s7072_s26 + $0x180] sm:$0xff pattern:$0x75316420] %v3421_v27  ;;  %4479 = vst.sshfl [vmem:[%s7072_s26 + $0x188] sm:$0xff pattern:$0x75316420] %v3422_v57  ;;  %v3324_v20 = vpop.f32.mrf.mxu1 }
 0x483   : > { %v3423_v22 = vcombine.low %v3359_v56, %v3360_v61  ;;  %v3424_v26 = vcombine.high %v3359_v56, %v3360_v61  ;;  %v3325_v41 = vadd.f32 %v3324_v20, %v7059_v1  ;;  %v3361_v17 = vmax.f32 %v3323_v6, 0.0 }
 0x484   : > { %v3328_v29 = vpop.f32.mrf.mxu1 }
 0x485   : > { %4480 = vst.sshfl [vmem:[%s7072_s26 + $0x1a0] sm:$0xff pattern:$0x75316420] %v3423_v22  ;;  %4481 = vst.sshfl [vmem:[%s7072_s26 + $0x1a8] sm:$0xff pattern:$0x75316420] %v3424_v26  ;;  %v3329_v43 = vadd.f32 %v3328_v29, %v7055_v7 }
 0x486   : > { %v3362_v37 = vmax.f32 %v3325_v41, 0.0  ;;  %v3330_v53 = vpop.f32.mrf.mxu1 }
 0x487   : > { %v3331_v54 = vadd.f32 %v3330_v53, %v7059_v1  ;;  %v3363_v47 = vmax.f32 %v3329_v43, 0.0 }
 0x488   : > { %v3425_v25 = vcombine.low %v3361_v17, %v3362_v37  ;;  %v3426_v39 = vcombine.high %v3361_v17, %v3362_v37  ;;  %v3900_v28 = vpop.f32.mrf.mxu1 }
 0x489   : > { %v3364_v55 = vmax.f32 %v3331_v54, 0.0  ;;  %v3901_v62 = vadd.f32 %v3900_v28, %v7057_v46 }
 0x48a   : > { %4482 = vst.sshfl [vmem:[%s7072_s26 + $0x1c0] sm:$0xff pattern:$0x75316420] %v3425_v25  ;;  %4483 = vst.sshfl [vmem:[%s7072_s26 + $0x1c8] sm:$0xff pattern:$0x75316420] %v3426_v39  ;;  %v3902_v59 = vpop.f32.mrf.mxu1 }
 0x48b   : > { %v3427_v35 = vcombine.low %v3363_v47, %v3364_v55  ;;  %v3428_v44 = vcombine.high %v3363_v47, %v3364_v55  ;;  %v3903_v7 = vadd.f32 %v3902_v59, %v7061_v34  ;;  %v3947_v18 = vmax.f32 %v3901_v62, 0.0 }
 0x48c   : > { %v3906_v13 = vpop.f32.mrf.mxu1 }
 0x48d   : > { %4484 = vst.sshfl [vmem:[%s7072_s26 + $0x1e0] sm:$0xff pattern:$0x75316420] %v3427_v35  ;;  %4485 = vst.sshfl [vmem:[%s7072_s26 + $0x1e8] sm:$0xff pattern:$0x75316420] %v3428_v44  ;;  %v3907_v1 = vadd.f32 %v3906_v13, %v7057_v46 }
 0x48e   : > { %v3948_v5 = vmax.f32 %v3903_v7, 0.0  ;;  %v3908_v30 = vpop.f32.mrf.mxu1 }
 0x48f   : > { %v3909_v42 = vadd.f32 %v3908_v30, %v7061_v34  ;;  %v3949_v33 = vmax.f32 %v3907_v1, 0.0 }
 0x490   : > { %v4011_v8 = vcombine.low %v3947_v18, %v3948_v5  ;;  %v4012_v48 = vcombine.high %v3947_v18, %v3948_v5  ;;  %v3912_v51 = vpop.f32.mrf.mxu1 }
 0x491   : > { %v3950_v11 = vmax.f32 %v3909_v42, 0.0  ;;  %v3913_v50 = vadd.f32 %v3912_v51, %v7057_v46 }
 0x492   : > { %4550 = vst.sshfl [vmem:[%s7072_s26 + $0x190] sm:$0xff pattern:$0x75316420] %v4011_v8  ;;  %4551 = vst.sshfl [vmem:[%s7072_s26 + $0x198] sm:$0xff pattern:$0x75316420] %v4012_v48  ;;  %v3914_v32 = vpop.f32.mrf.mxu1 }
 0x493   : > { %v4013_v3 = vcombine.low %v3949_v33, %v3950_v11  ;;  %v4014_v4 = vcombine.high %v3949_v33, %v3950_v11  ;;  %v3915_v21 = vadd.f32 %v3914_v32, %v7061_v34  ;;  %v3951_v24 = vmax.f32 %v3913_v50, 0.0 }
 0x494   : > { %v3918_v12 = vpop.f32.mrf.mxu1 }
 0x495   : > { %4552 = vst.sshfl [vmem:[%s7072_s26 + $0x1b0] sm:$0xff pattern:$0x75316420] %v4013_v3  ;;  %4553 = vst.sshfl [vmem:[%s7072_s26 + $0x1b8] sm:$0xff pattern:$0x75316420] %v4014_v4  ;;  %v3919_v52 = vadd.f32 %v3918_v12, %v7057_v46 }
 0x496   : > { %v3952_v0 = vmax.f32 %v3915_v21, 0.0  ;;  %v3920_v58 = vpop.f32.mrf.mxu1 }
 0x497   : > { %v3921_v45 = vadd.f32 %v3920_v58, %v7061_v34  ;;  %v3953_v38 = vmax.f32 %v3919_v52, 0.0 }
 0x498   : > { %v4015_v31 = vcombine.low %v3951_v24, %v3952_v0  ;;  %v4016_v36 = vcombine.high %v3951_v24, %v3952_v0 }
 0x499   : > { %v3954_v2 = vmax.f32 %v3921_v45, 0.0 }
 0x49a   : > { %4554 = vst.sshfl [vmem:[%s7072_s26 + $0x1d0] sm:$0xff pattern:$0x75316420] %v4015_v31  ;;  %4555 = vst.sshfl [vmem:[%s7072_s26 + $0x1d8] sm:$0xff pattern:$0x75316420] %v4016_v36 }
 0x49b   : > { %v4017_v46 = vcombine.low %v3953_v38, %v3954_v2  ;;  %v4018_v60 = vcombine.high %v3953_v38, %v3954_v2 }
 0x49d   : > { %4556 = vst.sshfl [vmem:[%s7072_s26 + $0x1f0] sm:$0xff pattern:$0x75316420] %v4017_v46  ;;  %4557 = vst.sshfl [vmem:[%s7072_s26 + $0x1f8] sm:$0xff pattern:$0x75316420] %v4018_v60 }
 0x49e   : > { %5442 = shalt.err (!%p5439_p10)
}
 0x49f   : > { %s5443_s15 = scalar_lea.hbm %s7197_s13, 8192  ;;  %s5447_s30 = scalar_lea.hbm %s7249_s5, 16384 }
 0x4a0   : > { %p5444_p0 = scmp.ne.s32.totalorder %s7197_s13, %s5443_s15  ;;  %p5448_p9 = scmp.lt.s32.totalorder %s7197_s13, %s7249_s5 }
 0x4a1   : > { %p5449_p11 = scmp.lt.s32.totalorder %s5447_s30, %s5443_s15 }
 0x4a2   : > { %p5445_p4 = pnand %p5444_p0, %p7301_p2 }
 0x4a3   : > { %p5450_p5 = por %p5449_p11, %p5448_p9 }
 0x4a4   : > { %p5446_p8 = pneg %p5445_p4 }
 0x4a6   : > { %p5451_p1 = pnand %p5450_p5, %p5446_p8 }
 0x4a8   : > { %5454 = shalt.err (!%p5451_p1)
}
 0x4a9   : > { %s5515_s9 = smov 128   ;;  %s5516_s11 = smov 8  }
 0x4aa   : > { %5198 = dma.vmem_to_hbm [thread:$0]  (%p7301_p2), %s7199_s6, 8192, %s7197_s13, %s4309_s22, %s5515_s9, %s5515_s9, %s5516_s11  }
 0x4ab PF: > { %s4338_s12 = sand.u32 1, %s5489_s18   ;;  %p7302_p6 = scmp.ne.s32.totalorder %s7267_s25, 0 }
 0x4ac   : > { %p7303_p12 = scmp.ge.s32.totalorder %s5501_s21, 2  ;;  %s4339_s7 = scalar_lea.sflag [#allocation6], %s4338_s12 }
 0x4ae   : > { %p5218_p3 = pnand %p7303_p12, %p7302_p6 }
 0x4b0   : > { %p5219_p7 = pneg %p5218_p3 }
 0x4b2   : > { %5484 = dma.done.wait (%p5219_p7), %s4339_s7, 8192  }
 0x4b3   : > { %5486 = vsyncadd (%p5219_p7), %s4339_s7, 4294959104  ;;  %p20_p13 = scmp.ge.s32.totalorder %s5638_s14, 4   ;;  %s7304_s18 = smov %s5493_s19 }
 0x4b4   : > { %s7305_s19 = smov %s5497_s20  ;;  %s7306_s20 = smov %s5648_s16 }
 0x4b5   : > { %s7307_s21 = smov %s5638_s14  ;;  %22 = sbr.rel (!%p20_p13) target bundleno = 7 (0x7), region = 111 }
 0x4ba   :  { %4344 = vsyncpa [#allocation5], 1 }
 0x4bb   :  { %4346 = vsyncpa [#allocation5 + $0x1], 1 }
 0x4bc   :  { %4347 = vsyncpa [#allocation8], 1 }
 0x4bd   :  { %4348 = vsyncpa [#allocation11], 1 }
 0x4be   :  { %4349 = vsyncpa [#allocation6], 1 }
 0x4bf   :  { %4351 = vsyncpa [#allocation6 + $0x1], 1 }

</bundles_post_ra>
